<compile_context>
chip_gen: v7x
topology: tpu7x:2x2x1
jax: 0.10.0
libtpu: 0.0.40
codegen_flags: <defaults>
</compile_context>

<pallas_src>
import jax
import jax.numpy as jnp
from jax.experimental import pallas as pl
from jax.experimental.pallas import tpu as pltpu


POOL_L = 15      # s1_output_seq_size == s2_output_seq_size == 15 in the PyTorch module
_BN_EPS = 1e-5


def _full_spec(shape):
    # whole-array block, empty grid -> index_map takes no args
    return pl.BlockSpec(shape, lambda: (0,) * len(shape))


# ----------------------------------------------------------------------------
# fused forward (single pallas_call for the whole model)
# ----------------------------------------------------------------------------
def tempcnn_forward(s1, s2, kparams):
    B, T1, _ = s1.shape
    B2, T2, _ = s2.shape
    assert B == B2

    s1_convs = kparams["s1_convs"]            # [(w (K,Cin,Cout), scale (1,C), shift (1,C)), ...]
    s2_convs = kparams["s2_convs"]
    wd1, dsc1, dsh1 = kparams["s1_dense"]     # wd: (L, C, H), pre-permuted offline
    wd2, dsc2, dsh2 = kparams["s2_dense"]
    wf1, wf2, fsc, fsh = kparams["fused_dense"]   # fused weight pre-split into the 2 halves
    wl, lsc, lsh = kparams["fused_logit"]

    L = int(wd1.shape[0])
    n_classes = int(wl.shape[1])
    k1s = [int(w.shape[0]) for (w, _, _) in s1_convs]
    k2s = [int(w.shape[0]) for (w, _, _) in s2_convs]
    assert all(k % 2 == 1 for k in k1s + k2s), "same-length conv needs odd kernel size"

    tp_max = max([T1 + 2 * (k // 2) for k in k1s] + [T2 + 2 * (k // 2) for k in k2s])
    c_max = 1
    for (w, _, _) in s1_convs + s2_convs:
        c_max = max(c_max, int(w.shape[1]), int(w.shape[2]))

    flat_inputs = [s1, s2]
    for (w, sc, sh) in s1_convs + s2_convs:
        flat_inputs += [w, sc, sh]
    flat_inputs += [wd1, dsc1, dsh1, wd2, dsc2, dsh2, wf1, wf2, fsc, fsh, wl, lsc, lsh]
    n_in = len(flat_inputs)
    n1, n2 = len(s1_convs), len(s2_convs)

    def kernel(*refs):
        in_refs = refs[:n_in]
        o_ref = refs[n_in]
        pad_buf = refs[n_in + 1]      # (B*tp_max, c_max): zero-padded, batch-stacked layer input
        out_buf = refs[n_in + 2]      # (B*tp_max, c_max): stacked conv layer output
        pooled_buf = refs[n_in + 3]   # (L*B,  c_max): adaptive-max-pool rows, window-major

        s1_ref, s2_ref = in_refs[0], in_refs[1]
        idx = 2
        conv1 = [in_refs[idx + 3 * i: idx + 3 * i + 3] for i in range(n1)]
        idx += 3 * n1
        conv2 = [in_refs[idx + 3 * i: idx + 3 * i + 3] for i in range(n2)]
        idx += 3 * n2
        (wd1_r, dsc1_r, dsh1_r, wd2_r, dsc2_r, dsh2_r,
         wf1_r, wf2_r, fsc_r, fsh_r, wl_r, lsc_r, lsh_r) = in_refs[idx:idx + 13]

        def branch(x_ref, conv_refs, wd_r, dsc_r, dsh_r, T):
            prev_tp = None            # None -> layer input comes from x_ref
            cur_c = x_ref.shape[2]
            for (w_r, sc_r, sh_r) in conv_refs:
                K, cin, cout = w_r.shape
                pad = K // 2
                tp = T + 2 * pad
                span = (B - 1) * tp + T
                # zero the padded scratch once, then drop each sequence into its slot
                pad_buf[...] = jnp.zeros_like(pad_buf)
                for b in range(B):
                    if prev_tp is None:
                        xb = x_ref[b]                                          # (T, cin)
                    else:
                        xb = out_buf[b * prev_tp: b * prev_tp + T, :cin]       # (T, cin)
                    pad_buf[b * tp + pad: b * tp + pad + T, :cin] = xb
                # conv1d as K matmuls with the batch folded into M (one LHS for both samples)
                acc = jnp.zeros((span, cout), jnp.float32)
                for k in range(K):
                    acc = acc + jnp.dot(pad_buf[k:k + span, :cin], w_r[k],
                                        preferred_element_type=jnp.float32)
                y = jnp.maximum(acc * sc_r[...] + sh_r[...], 0.0)   # folded BN + ReLU
                out_buf[:span, :cout] = y
                prev_tp, cur_c = tp, cout

            # AdaptiveMaxPool1d (PyTorch window formula) -> pooled_buf rows
            C = cur_c
            for l in range(L):
                s = (l * T) // L
                e = ((l + 1) * T + L - 1) // L
                for b in range(B):
                    pooled_buf[l * B + b: l * B + b + 1, :C] = jnp.max(
                        out_buf[b * prev_tp + s: b * prev_tp + e, :C],
                        axis=0, keepdims=True)

            # Flatten + branch FC folded into one contraction with the (L, C, H) weight
            H = wd_r.shape[2]
            facc = jnp.zeros((B, H), jnp.float32)
            for l in range(L):
                facc = facc + jnp.dot(pooled_buf[l * B:(l + 1) * B, :C], wd_r[l],
                                      preferred_element_type=jnp.float32)
            return jnp.maximum(facc * dsc_r[...] + dsh_r[...], 0.0)

        f1 = branch(s1_ref, conv1, wd1_r, dsc1_r, dsh1_r, T1)
        f2 = branch(s2_ref, conv2, wd2_r, dsc2_r, dsh2_r, T2)

        # concat + fused_dense collapsed: cat([f1, f2]) @ Wf == f1 @ Wf_top + f2 @ Wf_bot
        fused = (jnp.dot(f1, wf1_r[...], preferred_element_type=jnp.float32)
                 + jnp.dot(f2, wf2_r[...], preferred_element_type=jnp.float32))
        fused = jnp.maximum(fused * fsc_r[...] + fsh_r[...], 0.0)
        logits = jnp.dot(fused, wl_r[...], preferred_element_type=jnp.float32)
        o_ref[...] = logits * lsc_r[...] + lsh_r[...]

    return pl.pallas_call(
        kernel,
        out_shape=jax.ShapeDtypeStruct((B, n_classes), jnp.float32),
        in_specs=[_full_spec(x.shape) for x in flat_inputs],
        out_specs=_full_spec((B, n_classes)),
        scratch_shapes=[pltpu.VMEM((B * tp_max, c_max), jnp.float32),
                        pltpu.VMEM((B * tp_max, c_max), jnp.float32),
                        pltpu.VMEM((L * B, c_max), jnp.float32)],
    )(*flat_inputs)


# ----------------------------------------------------------------------------
# parameter construction (synthetic, deterministic) + offline repacking
# ----------------------------------------------------------------------------
def make_conv_params(key, cin, cout, ksz):
    ks = jax.random.split(key, 6)
    w = jax.random.normal(ks[0], (ksz, cin, cout), jnp.float32) / jnp.sqrt(cin * ksz)
    b = jax.random.normal(ks[1], (cout,), jnp.float32) * 0.05
    gamma = jax.random.uniform(ks[2], (cout,), jnp.float32, minval=0.5, maxval=1.5)
    beta = jax.random.normal(ks[3], (cout,), jnp.float32) * 0.1
    mean = jax.random.normal(ks[4], (cout,), jnp.float32) * 0.1
    var = jax.random.uniform(ks[5], (cout,), jnp.float32, minval=0.5, maxval=1.5)
    scale = gamma / jnp.sqrt(var + _BN_EPS)
    shift = scale * (b - mean) + beta
    return w, scale.reshape(1, cout), shift.reshape(1, cout)


def make_fc_params(key, din, dout, with_bn=True):
    ks = jax.random.split(key, 6)
    w = jax.random.normal(ks[0], (din, dout), jnp.float32) / jnp.sqrt(din)
    b = jax.random.normal(ks[1], (dout,), jnp.float32) * 0.05
    if with_bn:
        gamma = jax.random.uniform(ks[2], (dout,), jnp.float32, minval=0.5, maxval=1.5)
        beta = jax.random.normal(ks[3], (dout,), jnp.float32) * 0.1
        mean = jax.random.normal(ks[4], (dout,), jnp.float32) * 0.1
        var = jax.random.uniform(ks[5], (dout,), jnp.float32, minval=0.5, maxval=1.5)
        scale = gamma / jnp.sqrt(var + _BN_EPS)
        shift = scale * (b - mean) + beta
    else:
        scale = jnp.ones((dout,), jnp.float32)
        shift = b
    return w, scale.reshape(1, dout), shift.reshape(1, dout)


def prepare_kernel_params(params, pool_l=POOL_L):
    """One-time offline repack of PyTorch-layout params for the fused kernel:
       * branch dense weight (C*L, H) (torch channel-major flatten order) -> (L, C, H)
       * fused_dense weight split into its s1 / s2 halves (removes the concat)."""
    kp = {"s1_convs": params["s1_convs"], "s2_convs": params["s2_convs"]}
    for dense_name, conv_name in (("s1_dense", "s1_convs"), ("s2_dense", "s2_convs")):
        w, sc, sh = params[dense_name]
        c = params[conv_name][-1][0].shape[2]      # channels of the last conv layer
        h = w.shape[1]
        wd = w.reshape(c, pool_l, h).transpose(1, 0, 2)   # (L, C, H); Wd[l,c,:] == W[c*L+l,:]
        kp[dense_name] = (wd, sc, sh)
    wf, fsc, fsh = params["fused_dense"]
    split = params["s1_dense"][0].shape[1]         # s1 branch feature width
    kp["fused_dense"] = (wf[:split], wf[split:], fsc, fsh)
    kp["fused_logit"] = params["fused_logit"]
    return kp


# ----------------------------------------------------------------------------
# pure-JAX reference (PyTorch-layout params) for the correctness check
# ----------------------------------------------------------------------------
def ref_forward(s1, s2, params):
    def conv_block(x, w, scale, shift):
        K = w.shape[0]
        y = jax.lax.conv_general_dilated(
            x, w, window_strides=(1,), padding=[(K // 2, K // 2)],
            dimension_numbers=("NWC", "WIO", "NWC"),
            precision=jax.lax.Precision.HIGHEST)
        return jnp.maximum(y * scale + shift, 0.0)

    def pool_flatten(x, L=POOL_L):
        B, T, C = x.shape
        cols = []
        for i in range(L):
            s = (i * T) // L
            e = ((i + 1) * T + L - 1) // L
            cols.append(jnp.max(x[:, s:e, :], axis=1))
        p = jnp.stack(cols, axis=1)                          # (B, L, C)
        return jnp.transpose(p, (0, 2, 1)).reshape(B, C * L)  # torch Flatten of (B, C, L)

    def fc(x, w, scale, shift, relu=True):
        y = jnp.dot(x, w, precision=jax.lax.Precision.HIGHEST) * scale + shift
        return jnp.maximum(y, 0.0) if relu else y

    def branch(x, convs, dense):
        for (w, sc, sh) in convs:
            x = conv_block(x, w, sc, sh)
        x = pool_flatten(x)
        w, sc, sh = dense
        return fc(x, w, sc, sh, relu=True)

    f1 = branch(s1, params["s1_convs"], params["s1_dense"])
    f2 = branch(s2, params["s2_convs"], params["s2_dense"])
    fused = jnp.concatenate([f1, f2], axis=1)
    wf, scf, shf = params["fused_dense"]
    fused = fc(fused, wf, scf, shf, relu=True)
    wl, scl, shl = params["fused_logit"]
    return fc(fused, wl, scl, shl, relu=False)


# ----------------------------------------------------------------------------
# main
# ----------------------------------------------------------------------------
if __name__ == "__main__":
    key = jax.random.PRNGKey(0)

    # module config (small, consistent with TempCNN.__init__)
    B = 2
    C1_IN, C2_IN = 4, 6                   # input_dims  = (4, 6)
    H1, H2 = [16, 32, 32], [16, 32, 32]   # hidden_dims
    K1, K2 = [5, 5, 5], [3, 3, 3]         # kernel_size
    N_CLASSES = 10
    T1, T2 = 30, 45                       # sequence lengths (>= 15 for the pool)

    keys = jax.random.split(key, 12)
    params = {
        "s1_convs": [
            make_conv_params(keys[0], C1_IN, H1[0], K1[0]),
            make_conv_params(keys[1], H1[0], H1[1], K1[1]),
            make_conv_params(keys[2], H1[1], H1[2], K1[2]),
        ],
        "s1_dense": make_fc_params(keys[3], H1[2] * POOL_L, H1[2]),
        "s2_convs": [
            make_conv_params(keys[4], C2_IN, H2[0], K2[0]),
            make_conv_params(keys[5], H2[0], H2[1], K2[1]),
            make_conv_params(keys[6], H2[1], H2[2], K2[2]),
        ],
        "s2_dense": make_fc_params(keys[7], H2[2] * POOL_L, H2[2]),
        "fused_dense": make_fc_params(keys[8], H1[2] + H2[2], (H1[2] + H2[2]) // 2),
        "fused_logit": make_fc_params(keys[9], (H1[2] + H2[2]) // 2, N_CLASSES,
                                      with_bn=False),
    }

    # inputs: PyTorch forward receives (B, T, C) and transposes internally;
    # we keep (B, T, C) throughout (the transpose is folded away).
    s1 = jax.random.normal(keys[10], (B, T1, C1_IN), jnp.float32)
    s2 = jax.random.normal(keys[11], (B, T2, C2_IN), jnp.float32)

    kparams = prepare_kernel_params(params)        # one-time offline weight repack
    fwd = jax.jit(tempcnn_forward)

    logits = jax.block_until_ready(fwd(s1, s2, kparams))
    ref = jax.block_until_ready(ref_forward(s1, s2, params))

    assert logits.shape == (B, N_CLASSES)
    max_err = float(jnp.max(jnp.abs(logits - ref)))
    assert jnp.allclose(logits, ref, rtol=1e-3, atol=1e-3), f"mismatch: {max_err}"
    print("KERNEL_OK")
</pallas_src>

<mosaic_0001>
module attributes {stable_mosaic.version = 11 : i64} {
  func.func @kernel(%arg0: memref<2x30x4xf32, #tpu.memory_space<vmem>>, %arg1: memref<2x45x6xf32, #tpu.memory_space<vmem>>, %arg2: memref<5x4x16xf32, #tpu.memory_space<vmem>>, %arg3: memref<1x16xf32, #tpu.memory_space<vmem>>, %arg4: memref<1x16xf32, #tpu.memory_space<vmem>>, %arg5: memref<5x16x32xf32, #tpu.memory_space<vmem>>, %arg6: memref<1x32xf32, #tpu.memory_space<vmem>>, %arg7: memref<1x32xf32, #tpu.memory_space<vmem>>, %arg8: memref<5x32x32xf32, #tpu.memory_space<vmem>>, %arg9: memref<1x32xf32, #tpu.memory_space<vmem>>, %arg10: memref<1x32xf32, #tpu.memory_space<vmem>>, %arg11: memref<3x6x16xf32, #tpu.memory_space<vmem>>, %arg12: memref<1x16xf32, #tpu.memory_space<vmem>>, %arg13: memref<1x16xf32, #tpu.memory_space<vmem>>, %arg14: memref<3x16x32xf32, #tpu.memory_space<vmem>>, %arg15: memref<1x32xf32, #tpu.memory_space<vmem>>, %arg16: memref<1x32xf32, #tpu.memory_space<vmem>>, %arg17: memref<3x32x32xf32, #tpu.memory_space<vmem>>, %arg18: memref<1x32xf32, #tpu.memory_space<vmem>>, %arg19: memref<1x32xf32, #tpu.memory_space<vmem>>, %arg20: memref<15x32x32xf32, #tpu.memory_space<vmem>>, %arg21: memref<1x32xf32, #tpu.memory_space<vmem>>, %arg22: memref<1x32xf32, #tpu.memory_space<vmem>>, %arg23: memref<15x32x32xf32, #tpu.memory_space<vmem>>, %arg24: memref<1x32xf32, #tpu.memory_space<vmem>>, %arg25: memref<1x32xf32, #tpu.memory_space<vmem>>, %arg26: memref<32x32xf32, #tpu.memory_space<vmem>>, %arg27: memref<32x32xf32, #tpu.memory_space<vmem>>, %arg28: memref<1x32xf32, #tpu.memory_space<vmem>>, %arg29: memref<1x32xf32, #tpu.memory_space<vmem>>, %arg30: memref<32x10xf32, #tpu.memory_space<vmem>>, %arg31: memref<1x10xf32, #tpu.memory_space<vmem>>, %arg32: memref<1x10xf32, #tpu.memory_space<vmem>>, %arg33: memref<2x10xf32, #tpu.memory_space<vmem>>, %arg34: memref<94x32xf32, #tpu.memory_space<vmem>>, %arg35: memref<94x32xf32, #tpu.memory_space<vmem>>, %arg36: memref<30x32xf32, #tpu.memory_space<vmem>>) attributes {dimension_semantics = [], scalar_prefetch = 0 : i64, scratch_operands = 3 : i64, tpu.core_type = #tpu.core_type<tc>} {
    %cst = arith.constant 0.000000e+00 : f32
    %0 = vector.broadcast %cst : f32 to vector<94x32xf32>
    %c0 = arith.constant 0 : index
    %c0_0 = arith.constant 0 : index
    %1 = vector.load %arg34[%c0, %c0_0] : memref<94x32xf32, #tpu.memory_space<vmem>>, vector<94x32xf32>
    tpu.vector_store %arg34[%c0, %c0_0], %0 {strides = array<i32>} : memref<94x32xf32, #tpu.memory_space<vmem>>, vector<94x32xf32>,
    %c0_1 = arith.constant 0 : index
    %c0_2 = arith.constant 0 : index
    %c0_3 = arith.constant 0 : index
    %2 = vector.load %arg0[%c0_1, %c0_2, %c0_3] : memref<2x30x4xf32, #tpu.memory_space<vmem>>, vector<1x30x4xf32>
    %3 = vector.shape_cast %2 : vector<1x30x4xf32> to vector<30x4xf32>
    %c2 = arith.constant 2 : index
    %c0_4 = arith.constant 0 : index
    %4 = vector.load %arg34[%c2, %c0_4] : memref<94x32xf32, #tpu.memory_space<vmem>>, vector<30x4xf32>
    tpu.vector_store %arg34[%c2, %c0_4], %3 {strides = array<i32>} : memref<94x32xf32, #tpu.memory_space<vmem>>, vector<30x4xf32>,
    %c1 = arith.constant 1 : index
    %c0_5 = arith.constant 0 : index
    %c0_6 = arith.constant 0 : index
    %5 = vector.load %arg0[%c1, %c0_5, %c0_6] : memref<2x30x4xf32, #tpu.memory_space<vmem>>, vector<1x30x4xf32>
    %6 = vector.shape_cast %5 : vector<1x30x4xf32> to vector<30x4xf32>
    %c36 = arith.constant 36 : index
    %c0_7 = arith.constant 0 : index
    %7 = vector.load %arg34[%c36, %c0_7] : memref<94x32xf32, #tpu.memory_space<vmem>>, vector<30x4xf32>
    tpu.vector_store %arg34[%c36, %c0_7], %6 {strides = array<i32>} : memref<94x32xf32, #tpu.memory_space<vmem>>, vector<30x4xf32>,
    %cst_8 = arith.constant 0.000000e+00 : f32
    %8 = vector.broadcast %cst_8 : f32 to vector<64x16xf32>
    %c0_9 = arith.constant 0 : index
    %c0_10 = arith.constant 0 : index
    %9 = vector.load %arg34[%c0_9, %c0_10] : memref<94x32xf32, #tpu.memory_space<vmem>>, vector<64x4xf32>
    %c0_11 = arith.constant 0 : index
    %c0_12 = arith.constant 0 : index
    %c0_13 = arith.constant 0 : index
    %10 = vector.load %arg2[%c0_11, %c0_12, %c0_13] : memref<5x4x16xf32, #tpu.memory_space<vmem>>, vector<1x4x16xf32>
    %11 = vector.shape_cast %10 : vector<1x4x16xf32> to vector<4x16xf32>
    %cst_14 = arith.constant dense<0.000000e+00> : vector<64x16xf32>
    %12 = tpu.matmul %9, %11, %cst_14 {dimension_numbers = #tpu.dot_dimension_numbers<[1], [0], [0], [1], [0, 0, 1, 1], [], []>} : vector<64x4xf32>, vector<4x16xf32>, vector<64x16xf32> -> vector<64x16xf32>
    %13 = arith.addf %8, %12 : vector<64x16xf32>
    %c1_15 = arith.constant 1 : index
    %c0_16 = arith.constant 0 : index
    %14 = vector.load %arg34[%c1_15, %c0_16] : memref<94x32xf32, #tpu.memory_space<vmem>>, vector<64x4xf32>
    %c1_17 = arith.constant 1 : index
    %c0_18 = arith.constant 0 : index
    %c0_19 = arith.constant 0 : index
    %15 = vector.load %arg2[%c1_17, %c0_18, %c0_19] : memref<5x4x16xf32, #tpu.memory_space<vmem>>, vector<1x4x16xf32>
    %16 = vector.shape_cast %15 : vector<1x4x16xf32> to vector<4x16xf32>
    %cst_20 = arith.constant dense<0.000000e+00> : vector<64x16xf32>
    %17 = tpu.matmul %14, %16, %cst_20 {dimension_numbers = #tpu.dot_dimension_numbers<[1], [0], [0], [1], [0, 0, 1, 1], [], []>} : vector<64x4xf32>, vector<4x16xf32>, vector<64x16xf32> -> vector<64x16xf32>
    %18 = arith.addf %13, %17 : vector<64x16xf32>
    %c2_21 = arith.constant 2 : index
    %c0_22 = arith.constant 0 : index
    %19 = vector.load %arg34[%c2_21, %c0_22] : memref<94x32xf32, #tpu.memory_space<vmem>>, vector<64x4xf32>
    %c2_23 = arith.constant 2 : index
    %c0_24 = arith.constant 0 : index
    %c0_25 = arith.constant 0 : index
    %20 = vector.load %arg2[%c2_23, %c0_24, %c0_25] : memref<5x4x16xf32, #tpu.memory_space<vmem>>, vector<1x4x16xf32>
    %21 = vector.shape_cast %20 : vector<1x4x16xf32> to vector<4x16xf32>
    %cst_26 = arith.constant dense<0.000000e+00> : vector<64x16xf32>
    %22 = tpu.matmul %19, %21, %cst_26 {dimension_numbers = #tpu.dot_dimension_numbers<[1], [0], [0], [1], [0, 0, 1, 1], [], []>} : vector<64x4xf32>, vector<4x16xf32>, vector<64x16xf32> -> vector<64x16xf32>
    %23 = arith.addf %18, %22 : vector<64x16xf32>
    %c3 = arith.constant 3 : index
    %c0_27 = arith.constant 0 : index
    %24 = vector.load %arg34[%c3, %c0_27] : memref<94x32xf32, #tpu.memory_space<vmem>>, vector<64x4xf32>
    %c3_28 = arith.constant 3 : index
    %c0_29 = arith.constant 0 : index
    %c0_30 = arith.constant 0 : index
    %25 = vector.load %arg2[%c3_28, %c0_29, %c0_30] : memref<5x4x16xf32, #tpu.memory_space<vmem>>, vector<1x4x16xf32>
    %26 = vector.shape_cast %25 : vector<1x4x16xf32> to vector<4x16xf32>
    %cst_31 = arith.constant dense<0.000000e+00> : vector<64x16xf32>
    %27 = tpu.matmul %24, %26, %cst_31 {dimension_numbers = #tpu.dot_dimension_numbers<[1], [0], [0], [1], [0, 0, 1, 1], [], []>} : vector<64x4xf32>, vector<4x16xf32>, vector<64x16xf32> -> vector<64x16xf32>
    %28 = arith.addf %23, %27 : vector<64x16xf32>
    %c4 = arith.constant 4 : index
    %c0_32 = arith.constant 0 : index
    %29 = vector.load %arg34[%c4, %c0_32] : memref<94x32xf32, #tpu.memory_space<vmem>>, vector<64x4xf32>
    %c4_33 = arith.constant 4 : index
    %c0_34 = arith.constant 0 : index
    %c0_35 = arith.constant 0 : index
    %30 = vector.load %arg2[%c4_33, %c0_34, %c0_35] : memref<5x4x16xf32, #tpu.memory_space<vmem>>, vector<1x4x16xf32>
    %31 = vector.shape_cast %30 : vector<1x4x16xf32> to vector<4x16xf32>
    %cst_36 = arith.constant dense<0.000000e+00> : vector<64x16xf32>
    %32 = tpu.matmul %29, %31, %cst_36 {dimension_numbers = #tpu.dot_dimension_numbers<[1], [0], [0], [1], [0, 0, 1, 1], [], []>} : vector<64x4xf32>, vector<4x16xf32>, vector<64x16xf32> -> vector<64x16xf32>
    %33 = arith.addf %28, %32 : vector<64x16xf32>
    %c0_37 = arith.constant 0 : index
    %c0_38 = arith.constant 0 : index
    %34 = vector.load %arg3[%c0_37, %c0_38] : memref<1x16xf32, #tpu.memory_space<vmem>>, vector<1x16xf32>
    %35 = vector.broadcast %34 : vector<1x16xf32> to vector<64x16xf32>
    %36 = arith.mulf %33, %35 : vector<64x16xf32>
    %c0_39 = arith.constant 0 : index
    %c0_40 = arith.constant 0 : index
    %37 = vector.load %arg4[%c0_39, %c0_40] : memref<1x16xf32, #tpu.memory_space<vmem>>, vector<1x16xf32>
    %38 = vector.broadcast %37 : vector<1x16xf32> to vector<64x16xf32>
    %39 = arith.addf %36, %38 : vector<64x16xf32>
    %cst_41 = arith.constant 0.000000e+00 : f32
    %40 = vector.broadcast %cst_41 : f32 to vector<64x16xf32>
    %41 = arith.maximumf %39, %40 : vector<64x16xf32>
    %c0_42 = arith.constant 0 : index
    %c0_43 = arith.constant 0 : index
    %42 = vector.load %arg35[%c0_42, %c0_43] : memref<94x32xf32, #tpu.memory_space<vmem>>, vector<64x16xf32>
    tpu.vector_store %arg35[%c0_42, %c0_43], %41 {strides = array<i32>} : memref<94x32xf32, #tpu.memory_space<vmem>>, vector<64x16xf32>,
    %cst_44 = arith.constant 0.000000e+00 : f32
    %43 = vector.broadcast %cst_44 : f32 to vector<94x32xf32>
    %c0_45 = arith.constant 0 : index
    %c0_46 = arith.constant 0 : index
    %44 = vector.load %arg34[%c0_45, %c0_46] : memref<94x32xf32, #tpu.memory_space<vmem>>, vector<94x32xf32>
    tpu.vector_store %arg34[%c0_45, %c0_46], %43 {strides = array<i32>} : memref<94x32xf32, #tpu.memory_space<vmem>>, vector<94x32xf32>,
    %c0_47 = arith.constant 0 : index
    %c0_48 = arith.constant 0 : index
    %45 = vector.load %arg35[%c0_47, %c0_48] : memref<94x32xf32, #tpu.memory_space<vmem>>, vector<30x16xf32>
    %c2_49 = arith.constant 2 : index
    %c0_50 = arith.constant 0 : index
    %46 = vector.load %arg34[%c2_49, %c0_50] : memref<94x32xf32, #tpu.memory_space<vmem>>, vector<30x16xf32>
    tpu.vector_store %arg34[%c2_49, %c0_50], %45 {strides = array<i32>} : memref<94x32xf32, #tpu.memory_space<vmem>>, vector<30x16xf32>,
    %c34 = arith.constant 34 : index
    %c0_51 = arith.constant 0 : index
    %47 = vector.load %arg35[%c34, %c0_51] : memref<94x32xf32, #tpu.memory_space<vmem>>, vector<30x16xf32>
    %c36_52 = arith.constant 36 : index
    %c0_53 = arith.constant 0 : index
    %48 = vector.load %arg34[%c36_52, %c0_53] : memref<94x32xf32, #tpu.memory_space<vmem>>, vector<30x16xf32>
    tpu.vector_store %arg34[%c36_52, %c0_53], %47 {strides = array<i32>} : memref<94x32xf32, #tpu.memory_space<vmem>>, vector<30x16xf32>,
    %cst_54 = arith.constant 0.000000e+00 : f32
    %49 = vector.broadcast %cst_54 : f32 to vector<64x32xf32>
    %c0_55 = arith.constant 0 : index
    %c0_56 = arith.constant 0 : index
    %50 = vector.load %arg34[%c0_55, %c0_56] : memref<94x32xf32, #tpu.memory_space<vmem>>, vector<64x16xf32>
    %c0_57 = arith.constant 0 : index
    %c0_58 = arith.constant 0 : index
    %c0_59 = arith.constant 0 : index
    %51 = vector.load %arg5[%c0_57, %c0_58, %c0_59] : memref<5x16x32xf32, #tpu.memory_space<vmem>>, vector<1x16x32xf32>
    %52 = vector.shape_cast %51 : vector<1x16x32xf32> to vector<16x32xf32>
    %cst_60 = arith.constant dense<0.000000e+00> : vector<64x32xf32>
    %53 = tpu.matmul %50, %52, %cst_60 {dimension_numbers = #tpu.dot_dimension_numbers<[1], [0], [0], [1], [0, 0, 1, 1], [], []>} : vector<64x16xf32>, vector<16x32xf32>, vector<64x32xf32> -> vector<64x32xf32>
    %54 = arith.addf %49, %53 : vector<64x32xf32>
    %c1_61 = arith.constant 1 : index
    %c0_62 = arith.constant 0 : index
    %55 = vector.load %arg34[%c1_61, %c0_62] : memref<94x32xf32, #tpu.memory_space<vmem>>, vector<64x16xf32>
    %c1_63 = arith.constant 1 : index
    %c0_64 = arith.constant 0 : index
    %c0_65 = arith.constant 0 : index
    %56 = vector.load %arg5[%c1_63, %c0_64, %c0_65] : memref<5x16x32xf32, #tpu.memory_space<vmem>>, vector<1x16x32xf32>
    %57 = vector.shape_cast %56 : vector<1x16x32xf32> to vector<16x32xf32>
    %cst_66 = arith.constant dense<0.000000e+00> : vector<64x32xf32>
    %58 = tpu.matmul %55, %57, %cst_66 {dimension_numbers = #tpu.dot_dimension_numbers<[1], [0], [0], [1], [0, 0, 1, 1], [], []>} : vector<64x16xf32>, vector<16x32xf32>, vector<64x32xf32> -> vector<64x32xf32>
    %59 = arith.addf %54, %58 : vector<64x32xf32>
    %c2_67 = arith.constant 2 : index
    %c0_68 = arith.constant 0 : index
    %60 = vector.load %arg34[%c2_67, %c0_68] : memref<94x32xf32, #tpu.memory_space<vmem>>, vector<64x16xf32>
    %c2_69 = arith.constant 2 : index
    %c0_70 = arith.constant 0 : index
    %c0_71 = arith.constant 0 : index
    %61 = vector.load %arg5[%c2_69, %c0_70, %c0_71] : memref<5x16x32xf32, #tpu.memory_space<vmem>>, vector<1x16x32xf32>
    %62 = vector.shape_cast %61 : vector<1x16x32xf32> to vector<16x32xf32>
    %cst_72 = arith.constant dense<0.000000e+00> : vector<64x32xf32>
    %63 = tpu.matmul %60, %62, %cst_72 {dimension_numbers = #tpu.dot_dimension_numbers<[1], [0], [0], [1], [0, 0, 1, 1], [], []>} : vector<64x16xf32>, vector<16x32xf32>, vector<64x32xf32> -> vector<64x32xf32>
    %64 = arith.addf %59, %63 : vector<64x32xf32>
    %c3_73 = arith.constant 3 : index
    %c0_74 = arith.constant 0 : index
    %65 = vector.load %arg34[%c3_73, %c0_74] : memref<94x32xf32, #tpu.memory_space<vmem>>, vector<64x16xf32>
    %c3_75 = arith.constant 3 : index
    %c0_76 = arith.constant 0 : index
    %c0_77 = arith.constant 0 : index
    %66 = vector.load %arg5[%c3_75, %c0_76, %c0_77] : memref<5x16x32xf32, #tpu.memory_space<vmem>>, vector<1x16x32xf32>
    %67 = vector.shape_cast %66 : vector<1x16x32xf32> to vector<16x32xf32>
    %cst_78 = arith.constant dense<0.000000e+00> : vector<64x32xf32>
    %68 = tpu.matmul %65, %67, %cst_78 {dimension_numbers = #tpu.dot_dimension_numbers<[1], [0], [0], [1], [0, 0, 1, 1], [], []>} : vector<64x16xf32>, vector<16x32xf32>, vector<64x32xf32> -> vector<64x32xf32>
    %69 = arith.addf %64, %68 : vector<64x32xf32>
    %c4_79 = arith.constant 4 : index
    %c0_80 = arith.constant 0 : index
    %70 = vector.load %arg34[%c4_79, %c0_80] : memref<94x32xf32, #tpu.memory_space<vmem>>, vector<64x16xf32>
    %c4_81 = arith.constant 4 : index
    %c0_82 = arith.constant 0 : index
    %c0_83 = arith.constant 0 : index
    %71 = vector.load %arg5[%c4_81, %c0_82, %c0_83] : memref<5x16x32xf32, #tpu.memory_space<vmem>>, vector<1x16x32xf32>
    %72 = vector.shape_cast %71 : vector<1x16x32xf32> to vector<16x32xf32>
    %cst_84 = arith.constant dense<0.000000e+00> : vector<64x32xf32>
    %73 = tpu.matmul %70, %72, %cst_84 {dimension_numbers = #tpu.dot_dimension_numbers<[1], [0], [0], [1], [0, 0, 1, 1], [], []>} : vector<64x16xf32>, vector<16x32xf32>, vector<64x32xf32> -> vector<64x32xf32>
    %74 = arith.addf %69, %73 : vector<64x32xf32>
    %c0_85 = arith.constant 0 : index
    %c0_86 = arith.constant 0 : index
    %75 = vector.load %arg6[%c0_85, %c0_86] : memref<1x32xf32, #tpu.memory_space<vmem>>, vector<1x32xf32>
    %76 = vector.broadcast %75 : vector<1x32xf32> to vector<64x32xf32>
    %77 = arith.mulf %74, %76 : vector<64x32xf32>
    %c0_87 = arith.constant 0 : index
    %c0_88 = arith.constant 0 : index
    %78 = vector.load %arg7[%c0_87, %c0_88] : memref<1x32xf32, #tpu.memory_space<vmem>>, vector<1x32xf32>
    %79 = vector.broadcast %78 : vector<1x32xf32> to vector<64x32xf32>
    %80 = arith.addf %77, %79 : vector<64x32xf32>
    %cst_89 = arith.constant 0.000000e+00 : f32
    %81 = vector.broadcast %cst_89 : f32 to vector<64x32xf32>
    %82 = arith.maximumf %80, %81 : vector<64x32xf32>
    %c0_90 = arith.constant 0 : index
    %c0_91 = arith.constant 0 : index
    %83 = vector.load %arg35[%c0_90, %c0_91] : memref<94x32xf32, #tpu.memory_space<vmem>>, vector<64x32xf32>
    tpu.vector_store %arg35[%c0_90, %c0_91], %82 {strides = array<i32>} : memref<94x32xf32, #tpu.memory_space<vmem>>, vector<64x32xf32>,
    %cst_92 = arith.constant 0.000000e+00 : f32
    %84 = vector.broadcast %cst_92 : f32 to vector<94x32xf32>
    %c0_93 = arith.constant 0 : index
    %c0_94 = arith.constant 0 : index
    %85 = vector.load %arg34[%c0_93, %c0_94] : memref<94x32xf32, #tpu.memory_space<vmem>>, vector<94x32xf32>
    tpu.vector_store %arg34[%c0_93, %c0_94], %84 {strides = array<i32>} : memref<94x32xf32, #tpu.memory_space<vmem>>, vector<94x32xf32>,
    %c0_95 = arith.constant 0 : index
    %c0_96 = arith.constant 0 : index
    %86 = vector.load %arg35[%c0_95, %c0_96] : memref<94x32xf32, #tpu.memory_space<vmem>>, vector<30x32xf32>
    %c2_97 = arith.constant 2 : index
    %c0_98 = arith.constant 0 : index
    %87 = vector.load %arg34[%c2_97, %c0_98] : memref<94x32xf32, #tpu.memory_space<vmem>>, vector<30x32xf32>
    tpu.vector_store %arg34[%c2_97, %c0_98], %86 {strides = array<i32>} : memref<94x32xf32, #tpu.memory_space<vmem>>, vector<30x32xf32>,
    %c34_99 = arith.constant 34 : index
    %c0_100 = arith.constant 0 : index
    %88 = vector.load %arg35[%c34_99, %c0_100] : memref<94x32xf32, #tpu.memory_space<vmem>>, vector<30x32xf32>
    %c36_101 = arith.constant 36 : index
    %c0_102 = arith.constant 0 : index
    %89 = vector.load %arg34[%c36_101, %c0_102] : memref<94x32xf32, #tpu.memory_space<vmem>>, vector<30x32xf32>
    tpu.vector_store %arg34[%c36_101, %c0_102], %88 {strides = array<i32>} : memref<94x32xf32, #tpu.memory_space<vmem>>, vector<30x32xf32>,
    %cst_103 = arith.constant 0.000000e+00 : f32
    %90 = vector.broadcast %cst_103 : f32 to vector<64x32xf32>
    %c0_104 = arith.constant 0 : index
    %c0_105 = arith.constant 0 : index
    %91 = vector.load %arg34[%c0_104, %c0_105] : memref<94x32xf32, #tpu.memory_space<vmem>>, vector<64x32xf32>
    %c0_106 = arith.constant 0 : index
    %c0_107 = arith.constant 0 : index
    %c0_108 = arith.constant 0 : index
    %92 = vector.load %arg8[%c0_106, %c0_107, %c0_108] : memref<5x32x32xf32, #tpu.memory_space<vmem>>, vector<1x32x32xf32>
    %93 = vector.shape_cast %92 : vector<1x32x32xf32> to vector<32x32xf32>
    %cst_109 = arith.constant dense<0.000000e+00> : vector<64x32xf32>
    %94 = tpu.matmul %91, %93, %cst_109 {dimension_numbers = #tpu.dot_dimension_numbers<[1], [0], [0], [1], [0, 0, 1, 1], [], []>} : vector<64x32xf32>, vector<32x32xf32>, vector<64x32xf32> -> vector<64x32xf32>
    %95 = arith.addf %90, %94 : vector<64x32xf32>
    %c1_110 = arith.constant 1 : index
    %c0_111 = arith.constant 0 : index
    %96 = vector.load %arg34[%c1_110, %c0_111] : memref<94x32xf32, #tpu.memory_space<vmem>>, vector<64x32xf32>
    %c1_112 = arith.constant 1 : index
    %c0_113 = arith.constant 0 : index
    %c0_114 = arith.constant 0 : index
    %97 = vector.load %arg8[%c1_112, %c0_113, %c0_114] : memref<5x32x32xf32, #tpu.memory_space<vmem>>, vector<1x32x32xf32>
    %98 = vector.shape_cast %97 : vector<1x32x32xf32> to vector<32x32xf32>
    %cst_115 = arith.constant dense<0.000000e+00> : vector<64x32xf32>
    %99 = tpu.matmul %96, %98, %cst_115 {dimension_numbers = #tpu.dot_dimension_numbers<[1], [0], [0], [1], [0, 0, 1, 1], [], []>} : vector<64x32xf32>, vector<32x32xf32>, vector<64x32xf32> -> vector<64x32xf32>
    %100 = arith.addf %95, %99 : vector<64x32xf32>
    %c2_116 = arith.constant 2 : index
    %c0_117 = arith.constant 0 : index
    %101 = vector.load %arg34[%c2_116, %c0_117] : memref<94x32xf32, #tpu.memory_space<vmem>>, vector<64x32xf32>
    %c2_118 = arith.constant 2 : index
    %c0_119 = arith.constant 0 : index
    %c0_120 = arith.constant 0 : index
    %102 = vector.load %arg8[%c2_118, %c0_119, %c0_120] : memref<5x32x32xf32, #tpu.memory_space<vmem>>, vector<1x32x32xf32>
    %103 = vector.shape_cast %102 : vector<1x32x32xf32> to vector<32x32xf32>
    %cst_121 = arith.constant dense<0.000000e+00> : vector<64x32xf32>
    %104 = tpu.matmul %101, %103, %cst_121 {dimension_numbers = #tpu.dot_dimension_numbers<[1], [0], [0], [1], [0, 0, 1, 1], [], []>} : vector<64x32xf32>, vector<32x32xf32>, vector<64x32xf32> -> vector<64x32xf32>
    %105 = arith.addf %100, %104 : vector<64x32xf32>
    %c3_122 = arith.constant 3 : index
    %c0_123 = arith.constant 0 : index
    %106 = vector.load %arg34[%c3_122, %c0_123] : memref<94x32xf32, #tpu.memory_space<vmem>>, vector<64x32xf32>
    %c3_124 = arith.constant 3 : index
    %c0_125 = arith.constant 0 : index
    %c0_126 = arith.constant 0 : index
    %107 = vector.load %arg8[%c3_124, %c0_125, %c0_126] : memref<5x32x32xf32, #tpu.memory_space<vmem>>, vector<1x32x32xf32>
    %108 = vector.shape_cast %107 : vector<1x32x32xf32> to vector<32x32xf32>
    %cst_127 = arith.constant dense<0.000000e+00> : vector<64x32xf32>
    %109 = tpu.matmul %106, %108, %cst_127 {dimension_numbers = #tpu.dot_dimension_numbers<[1], [0], [0], [1], [0, 0, 1, 1], [], []>} : vector<64x32xf32>, vector<32x32xf32>, vector<64x32xf32> -> vector<64x32xf32>
    %110 = arith.addf %105, %109 : vector<64x32xf32>
    %c4_128 = arith.constant 4 : index
    %c0_129 = arith.constant 0 : index
    %111 = vector.load %arg34[%c4_128, %c0_129] : memref<94x32xf32, #tpu.memory_space<vmem>>, vector<64x32xf32>
    %c4_130 = arith.constant 4 : index
    %c0_131 = arith.constant 0 : index
    %c0_132 = arith.constant 0 : index
    %112 = vector.load %arg8[%c4_130, %c0_131, %c0_132] : memref<5x32x32xf32, #tpu.memory_space<vmem>>, vector<1x32x32xf32>
    %113 = vector.shape_cast %112 : vector<1x32x32xf32> to vector<32x32xf32>
    %cst_133 = arith.constant dense<0.000000e+00> : vector<64x32xf32>
    %114 = tpu.matmul %111, %113, %cst_133 {dimension_numbers = #tpu.dot_dimension_numbers<[1], [0], [0], [1], [0, 0, 1, 1], [], []>} : vector<64x32xf32>, vector<32x32xf32>, vector<64x32xf32> -> vector<64x32xf32>
    %115 = arith.addf %110, %114 : vector<64x32xf32>
    %c0_134 = arith.constant 0 : index
    %c0_135 = arith.constant 0 : index
    %116 = vector.load %arg9[%c0_134, %c0_135] : memref<1x32xf32, #tpu.memory_space<vmem>>, vector<1x32xf32>
    %117 = vector.broadcast %116 : vector<1x32xf32> to vector<64x32xf32>
    %118 = arith.mulf %115, %117 : vector<64x32xf32>
    %c0_136 = arith.constant 0 : index
    %c0_137 = arith.constant 0 : index
    %119 = vector.load %arg10[%c0_136, %c0_137] : memref<1x32xf32, #tpu.memory_space<vmem>>, vector<1x32xf32>
    %120 = vector.broadcast %119 : vector<1x32xf32> to vector<64x32xf32>
    %121 = arith.addf %118, %120 : vector<64x32xf32>
    %cst_138 = arith.constant 0.000000e+00 : f32
    %122 = vector.broadcast %cst_138 : f32 to vector<64x32xf32>
    %123 = arith.maximumf %121, %122 : vector<64x32xf32>
    %c0_139 = arith.constant 0 : index
    %c0_140 = arith.constant 0 : index
    %124 = vector.load %arg35[%c0_139, %c0_140] : memref<94x32xf32, #tpu.memory_space<vmem>>, vector<64x32xf32>
    tpu.vector_store %arg35[%c0_139, %c0_140], %123 {strides = array<i32>} : memref<94x32xf32, #tpu.memory_space<vmem>>, vector<64x32xf32>,
    %c0_141 = arith.constant 0 : index
    %c0_142 = arith.constant 0 : index
    %125 = vector.load %arg35[%c0_141, %c0_142] : memref<94x32xf32, #tpu.memory_space<vmem>>, vector<2x32xf32>
    %cst_143 = arith.constant dense<0xFF800000> : vector<32xf32>
    %126 = vector.multi_reduction <maximumf>, %125, %cst_143 [0] : vector<2x32xf32> to vector<32xf32>
    %127 = vector.shape_cast %126 : vector<32xf32> to vector<1x32xf32>
    %c0_144 = arith.constant 0 : index
    %c0_145 = arith.constant 0 : index
    %128 = vector.load %arg36[%c0_144, %c0_145] : memref<30x32xf32, #tpu.memory_space<vmem>>, vector<1x32xf32>
    tpu.vector_store %arg36[%c0_144, %c0_145], %127 {strides = array<i32>} : memref<30x32xf32, #tpu.memory_space<vmem>>, vector<1x32xf32>,
    %c34_146 = arith.constant 34 : index
    %c0_147 = arith.constant 0 : index
    %129 = vector.load %arg35[%c34_146, %c0_147] : memref<94x32xf32, #tpu.memory_space<vmem>>, vector<2x32xf32>
    %cst_148 = arith.constant dense<0xFF800000> : vector<32xf32>
    %130 = vector.multi_reduction <maximumf>, %129, %cst_148 [0] : vector<2x32xf32> to vector<32xf32>
    %131 = vector.shape_cast %130 : vector<32xf32> to vector<1x32xf32>
    %c1_149 = arith.constant 1 : index
    %c0_150 = arith.constant 0 : index
    %132 = vector.load %arg36[%c1_149, %c0_150] : memref<30x32xf32, #tpu.memory_space<vmem>>, vector<1x32xf32>
    tpu.vector_store %arg36[%c1_149, %c0_150], %131 {strides = array<i32>} : memref<30x32xf32, #tpu.memory_space<vmem>>, vector<1x32xf32>,
    %c2_151 = arith.constant 2 : index
    %c0_152 = arith.constant 0 : index
    %133 = vector.load %arg35[%c2_151, %c0_152] : memref<94x32xf32, #tpu.memory_space<vmem>>, vector<2x32xf32>
    %cst_153 = arith.constant dense<0xFF800000> : vector<32xf32>
    %134 = vector.multi_reduction <maximumf>, %133, %cst_153 [0] : vector<2x32xf32> to vector<32xf32>
    %135 = vector.shape_cast %134 : vector<32xf32> to vector<1x32xf32>
    %c2_154 = arith.constant 2 : index
    %c0_155 = arith.constant 0 : index
    %136 = vector.load %arg36[%c2_154, %c0_155] : memref<30x32xf32, #tpu.memory_space<vmem>>, vector<1x32xf32>
    tpu.vector_store %arg36[%c2_154, %c0_155], %135 {strides = array<i32>} : memref<30x32xf32, #tpu.memory_space<vmem>>, vector<1x32xf32>,
    %c36_156 = arith.constant 36 : index
    %c0_157 = arith.constant 0 : index
    %137 = vector.load %arg35[%c36_156, %c0_157] : memref<94x32xf32, #tpu.memory_space<vmem>>, vector<2x32xf32>
    %cst_158 = arith.constant dense<0xFF800000> : vector<32xf32>
    %138 = vector.multi_reduction <maximumf>, %137, %cst_158 [0] : vector<2x32xf32> to vector<32xf32>
    %139 = vector.shape_cast %138 : vector<32xf32> to vector<1x32xf32>
    %c3_159 = arith.constant 3 : index
    %c0_160 = arith.constant 0 : index
    %140 = vector.load %arg36[%c3_159, %c0_160] : memref<30x32xf32, #tpu.memory_space<vmem>>, vector<1x32xf32>
    tpu.vector_store %arg36[%c3_159, %c0_160], %139 {strides = array<i32>} : memref<30x32xf32, #tpu.memory_space<vmem>>, vector<1x32xf32>,
    %c4_161 = arith.constant 4 : index
    %c0_162 = arith.constant 0 : index
    %141 = vector.load %arg35[%c4_161, %c0_162] : memref<94x32xf32, #tpu.memory_space<vmem>>, vector<2x32xf32>
    %cst_163 = arith.constant dense<0xFF800000> : vector<32xf32>
    %142 = vector.multi_reduction <maximumf>, %141, %cst_163 [0] : vector<2x32xf32> to vector<32xf32>
    %143 = vector.shape_cast %142 : vector<32xf32> to vector<1x32xf32>
    %c4_164 = arith.constant 4 : index
    %c0_165 = arith.constant 0 : index
    %144 = vector.load %arg36[%c4_164, %c0_165] : memref<30x32xf32, #tpu.memory_space<vmem>>, vector<1x32xf32>
    tpu.vector_store %arg36[%c4_164, %c0_165], %143 {strides = array<i32>} : memref<30x32xf32, #tpu.memory_space<vmem>>, vector<1x32xf32>,
    %c38 = arith.constant 38 : index
    %c0_166 = arith.constant 0 : index
    %145 = vector.load %arg35[%c38, %c0_166] : memref<94x32xf32, #tpu.memory_space<vmem>>, vector<2x32xf32>
    %cst_167 = arith.constant dense<0xFF800000> : vector<32xf32>
    %146 = vector.multi_reduction <maximumf>, %145, %cst_167 [0] : vector<2x32xf32> to vector<32xf32>
    %147 = vector.shape_cast %146 : vector<32xf32> to vector<1x32xf32>
    %c5 = arith.constant 5 : index
    %c0_168 = arith.constant 0 : index
    %148 = vector.load %arg36[%c5, %c0_168] : memref<30x32xf32, #tpu.memory_space<vmem>>, vector<1x32xf32>
    tpu.vector_store %arg36[%c5, %c0_168], %147 {strides = array<i32>} : memref<30x32xf32, #tpu.memory_space<vmem>>, vector<1x32xf32>,
    %c6 = arith.constant 6 : index
    %c0_169 = arith.constant 0 : index
    %149 = vector.load %arg35[%c6, %c0_169] : memref<94x32xf32, #tpu.memory_space<vmem>>, vector<2x32xf32>
    %cst_170 = arith.constant dense<0xFF800000> : vector<32xf32>
    %150 = vector.multi_reduction <maximumf>, %149, %cst_170 [0] : vector<2x32xf32> to vector<32xf32>
    %151 = vector.shape_cast %150 : vector<32xf32> to vector<1x32xf32>
    %c6_171 = arith.constant 6 : index
    %c0_172 = arith.constant 0 : index
    %152 = vector.load %arg36[%c6_171, %c0_172] : memref<30x32xf32, #tpu.memory_space<vmem>>, vector<1x32xf32>
    tpu.vector_store %arg36[%c6_171, %c0_172], %151 {strides = array<i32>} : memref<30x32xf32, #tpu.memory_space<vmem>>, vector<1x32xf32>,
    %c40 = arith.constant 40 : index
    %c0_173 = arith.constant 0 : index
    %153 = vector.load %arg35[%c40, %c0_173] : memref<94x32xf32, #tpu.memory_space<vmem>>, vector<2x32xf32>
    %cst_174 = arith.constant dense<0xFF800000> : vector<32xf32>
    %154 = vector.multi_reduction <maximumf>, %153, %cst_174 [0] : vector<2x32xf32> to vector<32xf32>
    %155 = vector.shape_cast %154 : vector<32xf32> to vector<1x32xf32>
    %c7 = arith.constant 7 : index
    %c0_175 = arith.constant 0 : index
    %156 = vector.load %arg36[%c7, %c0_175] : memref<30x32xf32, #tpu.memory_space<vmem>>, vector<1x32xf32>
    tpu.vector_store %arg36[%c7, %c0_175], %155 {strides = array<i32>} : memref<30x32xf32, #tpu.memory_space<vmem>>, vector<1x32xf32>,
    %c8 = arith.constant 8 : index
    %c0_176 = arith.constant 0 : index
    %157 = vector.load %arg35[%c8, %c0_176] : memref<94x32xf32, #tpu.memory_space<vmem>>, vector<2x32xf32>
    %cst_177 = arith.constant dense<0xFF800000> : vector<32xf32>
    %158 = vector.multi_reduction <maximumf>, %157, %cst_177 [0] : vector<2x32xf32> to vector<32xf32>
    %159 = vector.shape_cast %158 : vector<32xf32> to vector<1x32xf32>
    %c8_178 = arith.constant 8 : index
    %c0_179 = arith.constant 0 : index
    %160 = vector.load %arg36[%c8_178, %c0_179] : memref<30x32xf32, #tpu.memory_space<vmem>>, vector<1x32xf32>
    tpu.vector_store %arg36[%c8_178, %c0_179], %159 {strides = array<i32>} : memref<30x32xf32, #tpu.memory_space<vmem>>, vector<1x32xf32>,
    %c42 = arith.constant 42 : index
    %c0_180 = arith.constant 0 : index
    %161 = vector.load %arg35[%c42, %c0_180] : memref<94x32xf32, #tpu.memory_space<vmem>>, vector<2x32xf32>
    %cst_181 = arith.constant dense<0xFF800000> : vector<32xf32>
    %162 = vector.multi_reduction <maximumf>, %161, %cst_181 [0] : vector<2x32xf32> to vector<32xf32>
    %163 = vector.shape_cast %162 : vector<32xf32> to vector<1x32xf32>
    %c9 = arith.constant 9 : index
    %c0_182 = arith.constant 0 : index
    %164 = vector.load %arg36[%c9, %c0_182] : memref<30x32xf32, #tpu.memory_space<vmem>>, vector<1x32xf32>
    tpu.vector_store %arg36[%c9, %c0_182], %163 {strides = array<i32>} : memref<30x32xf32, #tpu.memory_space<vmem>>, vector<1x32xf32>,
    %c10 = arith.constant 10 : index
    %c0_183 = arith.constant 0 : index
    %165 = vector.load %arg35[%c10, %c0_183] : memref<94x32xf32, #tpu.memory_space<vmem>>, vector<2x32xf32>
    %cst_184 = arith.constant dense<0xFF800000> : vector<32xf32>
    %166 = vector.multi_reduction <maximumf>, %165, %cst_184 [0] : vector<2x32xf32> to vector<32xf32>
    %167 = vector.shape_cast %166 : vector<32xf32> to vector<1x32xf32>
    %c10_185 = arith.constant 10 : index
    %c0_186 = arith.constant 0 : index
    %168 = vector.load %arg36[%c10_185, %c0_186] : memref<30x32xf32, #tpu.memory_space<vmem>>, vector<1x32xf32>
    tpu.vector_store %arg36[%c10_185, %c0_186], %167 {strides = array<i32>} : memref<30x32xf32, #tpu.memory_space<vmem>>, vector<1x32xf32>,
    %c44 = arith.constant 44 : index
    %c0_187 = arith.constant 0 : index
    %169 = vector.load %arg35[%c44, %c0_187] : memref<94x32xf32, #tpu.memory_space<vmem>>, vector<2x32xf32>
    %cst_188 = arith.constant dense<0xFF800000> : vector<32xf32>
    %170 = vector.multi_reduction <maximumf>, %169, %cst_188 [0] : vector<2x32xf32> to vector<32xf32>
    %171 = vector.shape_cast %170 : vector<32xf32> to vector<1x32xf32>
    %c11 = arith.constant 11 : index
    %c0_189 = arith.constant 0 : index
    %172 = vector.load %arg36[%c11, %c0_189] : memref<30x32xf32, #tpu.memory_space<vmem>>, vector<1x32xf32>
    tpu.vector_store %arg36[%c11, %c0_189], %171 {strides = array<i32>} : memref<30x32xf32, #tpu.memory_space<vmem>>, vector<1x32xf32>,
    %c12 = arith.constant 12 : index
    %c0_190 = arith.constant 0 : index
    %173 = vector.load %arg35[%c12, %c0_190] : memref<94x32xf32, #tpu.memory_space<vmem>>, vector<2x32xf32>
    %cst_191 = arith.constant dense<0xFF800000> : vector<32xf32>
    %174 = vector.multi_reduction <maximumf>, %173, %cst_191 [0] : vector<2x32xf32> to vector<32xf32>
    %175 = vector.shape_cast %174 : vector<32xf32> to vector<1x32xf32>
    %c12_192 = arith.constant 12 : index
    %c0_193 = arith.constant 0 : index
    %176 = vector.load %arg36[%c12_192, %c0_193] : memref<30x32xf32, #tpu.memory_space<vmem>>, vector<1x32xf32>
    tpu.vector_store %arg36[%c12_192, %c0_193], %175 {strides = array<i32>} : memref<30x32xf32, #tpu.memory_space<vmem>>, vector<1x32xf32>,
    %c46 = arith.constant 46 : index
    %c0_194 = arith.constant 0 : index
    %177 = vector.load %arg35[%c46, %c0_194] : memref<94x32xf32, #tpu.memory_space<vmem>>, vector<2x32xf32>
    %cst_195 = arith.constant dense<0xFF800000> : vector<32xf32>
    %178 = vector.multi_reduction <maximumf>, %177, %cst_195 [0] : vector<2x32xf32> to vector<32xf32>
    %179 = vector.shape_cast %178 : vector<32xf32> to vector<1x32xf32>
    %c13 = arith.constant 13 : index
    %c0_196 = arith.constant 0 : index
    %180 = vector.load %arg36[%c13, %c0_196] : memref<30x32xf32, #tpu.memory_space<vmem>>, vector<1x32xf32>
    tpu.vector_store %arg36[%c13, %c0_196], %179 {strides = array<i32>} : memref<30x32xf32, #tpu.memory_space<vmem>>, vector<1x32xf32>,
    %c14 = arith.constant 14 : index
    %c0_197 = arith.constant 0 : index
    %181 = vector.load %arg35[%c14, %c0_197] : memref<94x32xf32, #tpu.memory_space<vmem>>, vector<2x32xf32>
    %cst_198 = arith.constant dense<0xFF800000> : vector<32xf32>
    %182 = vector.multi_reduction <maximumf>, %181, %cst_198 [0] : vector<2x32xf32> to vector<32xf32>
    %183 = vector.shape_cast %182 : vector<32xf32> to vector<1x32xf32>
    %c14_199 = arith.constant 14 : index
    %c0_200 = arith.constant 0 : index
    %184 = vector.load %arg36[%c14_199, %c0_200] : memref<30x32xf32, #tpu.memory_space<vmem>>, vector<1x32xf32>
    tpu.vector_store %arg36[%c14_199, %c0_200], %183 {strides = array<i32>} : memref<30x32xf32, #tpu.memory_space<vmem>>, vector<1x32xf32>,
    %c48 = arith.constant 48 : index
    %c0_201 = arith.constant 0 : index
    %185 = vector.load %arg35[%c48, %c0_201] : memref<94x32xf32, #tpu.memory_space<vmem>>, vector<2x32xf32>
    %cst_202 = arith.constant dense<0xFF800000> : vector<32xf32>
    %186 = vector.multi_reduction <maximumf>, %185, %cst_202 [0] : vector<2x32xf32> to vector<32xf32>
    %187 = vector.shape_cast %186 : vector<32xf32> to vector<1x32xf32>
    %c15 = arith.constant 15 : index
    %c0_203 = arith.constant 0 : index
    %188 = vector.load %arg36[%c15, %c0_203] : memref<30x32xf32, #tpu.memory_space<vmem>>, vector<1x32xf32>
    tpu.vector_store %arg36[%c15, %c0_203], %187 {strides = array<i32>} : memref<30x32xf32, #tpu.memory_space<vmem>>, vector<1x32xf32>,
    %c16 = arith.constant 16 : index
    %c0_204 = arith.constant 0 : index
    %189 = vector.load %arg35[%c16, %c0_204] : memref<94x32xf32, #tpu.memory_space<vmem>>, vector<2x32xf32>
    %cst_205 = arith.constant dense<0xFF800000> : vector<32xf32>
    %190 = vector.multi_reduction <maximumf>, %189, %cst_205 [0] : vector<2x32xf32> to vector<32xf32>
    %191 = vector.shape_cast %190 : vector<32xf32> to vector<1x32xf32>
    %c16_206 = arith.constant 16 : index
    %c0_207 = arith.constant 0 : index
    %192 = vector.load %arg36[%c16_206, %c0_207] : memref<30x32xf32, #tpu.memory_space<vmem>>, vector<1x32xf32>
    tpu.vector_store %arg36[%c16_206, %c0_207], %191 {strides = array<i32>} : memref<30x32xf32, #tpu.memory_space<vmem>>, vector<1x32xf32>,
    %c50 = arith.constant 50 : index
    %c0_208 = arith.constant 0 : index
    %193 = vector.load %arg35[%c50, %c0_208] : memref<94x32xf32, #tpu.memory_space<vmem>>, vector<2x32xf32>
    %cst_209 = arith.constant dense<0xFF800000> : vector<32xf32>
    %194 = vector.multi_reduction <maximumf>, %193, %cst_209 [0] : vector<2x32xf32> to vector<32xf32>
    %195 = vector.shape_cast %194 : vector<32xf32> to vector<1x32xf32>
    %c17 = arith.constant 17 : index
    %c0_210 = arith.constant 0 : index
    %196 = vector.load %arg36[%c17, %c0_210] : memref<30x32xf32, #tpu.memory_space<vmem>>, vector<1x32xf32>
    tpu.vector_store %arg36[%c17, %c0_210], %195 {strides = array<i32>} : memref<30x32xf32, #tpu.memory_space<vmem>>, vector<1x32xf32>,
    %c18 = arith.constant 18 : index
    %c0_211 = arith.constant 0 : index
    %197 = vector.load %arg35[%c18, %c0_211] : memref<94x32xf32, #tpu.memory_space<vmem>>, vector<2x32xf32>
    %cst_212 = arith.constant dense<0xFF800000> : vector<32xf32>
    %198 = vector.multi_reduction <maximumf>, %197, %cst_212 [0] : vector<2x32xf32> to vector<32xf32>
    %199 = vector.shape_cast %198 : vector<32xf32> to vector<1x32xf32>
    %c18_213 = arith.constant 18 : index
    %c0_214 = arith.constant 0 : index
    %200 = vector.load %arg36[%c18_213, %c0_214] : memref<30x32xf32, #tpu.memory_space<vmem>>, vector<1x32xf32>
    tpu.vector_store %arg36[%c18_213, %c0_214], %199 {strides = array<i32>} : memref<30x32xf32, #tpu.memory_space<vmem>>, vector<1x32xf32>,
    %c52 = arith.constant 52 : index
    %c0_215 = arith.constant 0 : index
    %201 = vector.load %arg35[%c52, %c0_215] : memref<94x32xf32, #tpu.memory_space<vmem>>, vector<2x32xf32>
    %cst_216 = arith.constant dense<0xFF800000> : vector<32xf32>
    %202 = vector.multi_reduction <maximumf>, %201, %cst_216 [0] : vector<2x32xf32> to vector<32xf32>
    %203 = vector.shape_cast %202 : vector<32xf32> to vector<1x32xf32>
    %c19 = arith.constant 19 : index
    %c0_217 = arith.constant 0 : index
    %204 = vector.load %arg36[%c19, %c0_217] : memref<30x32xf32, #tpu.memory_space<vmem>>, vector<1x32xf32>
    tpu.vector_store %arg36[%c19, %c0_217], %203 {strides = array<i32>} : memref<30x32xf32, #tpu.memory_space<vmem>>, vector<1x32xf32>,
    %c20 = arith.constant 20 : index
    %c0_218 = arith.constant 0 : index
    %205 = vector.load %arg35[%c20, %c0_218] : memref<94x32xf32, #tpu.memory_space<vmem>>, vector<2x32xf32>
    %cst_219 = arith.constant dense<0xFF800000> : vector<32xf32>
    %206 = vector.multi_reduction <maximumf>, %205, %cst_219 [0] : vector<2x32xf32> to vector<32xf32>
    %207 = vector.shape_cast %206 : vector<32xf32> to vector<1x32xf32>
    %c20_220 = arith.constant 20 : index
    %c0_221 = arith.constant 0 : index
    %208 = vector.load %arg36[%c20_220, %c0_221] : memref<30x32xf32, #tpu.memory_space<vmem>>, vector<1x32xf32>
    tpu.vector_store %arg36[%c20_220, %c0_221], %207 {strides = array<i32>} : memref<30x32xf32, #tpu.memory_space<vmem>>, vector<1x32xf32>,
    %c54 = arith.constant 54 : index
    %c0_222 = arith.constant 0 : index
    %209 = vector.load %arg35[%c54, %c0_222] : memref<94x32xf32, #tpu.memory_space<vmem>>, vector<2x32xf32>
    %cst_223 = arith.constant dense<0xFF800000> : vector<32xf32>
    %210 = vector.multi_reduction <maximumf>, %209, %cst_223 [0] : vector<2x32xf32> to vector<32xf32>
    %211 = vector.shape_cast %210 : vector<32xf32> to vector<1x32xf32>
    %c21 = arith.constant 21 : index
    %c0_224 = arith.constant 0 : index
    %212 = vector.load %arg36[%c21, %c0_224] : memref<30x32xf32, #tpu.memory_space<vmem>>, vector<1x32xf32>
    tpu.vector_store %arg36[%c21, %c0_224], %211 {strides = array<i32>} : memref<30x32xf32, #tpu.memory_space<vmem>>, vector<1x32xf32>,
    %c22 = arith.constant 22 : index
    %c0_225 = arith.constant 0 : index
    %213 = vector.load %arg35[%c22, %c0_225] : memref<94x32xf32, #tpu.memory_space<vmem>>, vector<2x32xf32>
    %cst_226 = arith.constant dense<0xFF800000> : vector<32xf32>
    %214 = vector.multi_reduction <maximumf>, %213, %cst_226 [0] : vector<2x32xf32> to vector<32xf32>
    %215 = vector.shape_cast %214 : vector<32xf32> to vector<1x32xf32>
    %c22_227 = arith.constant 22 : index
    %c0_228 = arith.constant 0 : index
    %216 = vector.load %arg36[%c22_227, %c0_228] : memref<30x32xf32, #tpu.memory_space<vmem>>, vector<1x32xf32>
    tpu.vector_store %arg36[%c22_227, %c0_228], %215 {strides = array<i32>} : memref<30x32xf32, #tpu.memory_space<vmem>>, vector<1x32xf32>,
    %c56 = arith.constant 56 : index
    %c0_229 = arith.constant 0 : index
    %217 = vector.load %arg35[%c56, %c0_229] : memref<94x32xf32, #tpu.memory_space<vmem>>, vector<2x32xf32>
    %cst_230 = arith.constant dense<0xFF800000> : vector<32xf32>
    %218 = vector.multi_reduction <maximumf>, %217, %cst_230 [0] : vector<2x32xf32> to vector<32xf32>
    %219 = vector.shape_cast %218 : vector<32xf32> to vector<1x32xf32>
    %c23 = arith.constant 23 : index
    %c0_231 = arith.constant 0 : index
    %220 = vector.load %arg36[%c23, %c0_231] : memref<30x32xf32, #tpu.memory_space<vmem>>, vector<1x32xf32>
    tpu.vector_store %arg36[%c23, %c0_231], %219 {strides = array<i32>} : memref<30x32xf32, #tpu.memory_space<vmem>>, vector<1x32xf32>,
    %c24 = arith.constant 24 : index
    %c0_232 = arith.constant 0 : index
    %221 = vector.load %arg35[%c24, %c0_232] : memref<94x32xf32, #tpu.memory_space<vmem>>, vector<2x32xf32>
    %cst_233 = arith.constant dense<0xFF800000> : vector<32xf32>
    %222 = vector.multi_reduction <maximumf>, %221, %cst_233 [0] : vector<2x32xf32> to vector<32xf32>
    %223 = vector.shape_cast %222 : vector<32xf32> to vector<1x32xf32>
    %c24_234 = arith.constant 24 : index
    %c0_235 = arith.constant 0 : index
    %224 = vector.load %arg36[%c24_234, %c0_235] : memref<30x32xf32, #tpu.memory_space<vmem>>, vector<1x32xf32>
    tpu.vector_store %arg36[%c24_234, %c0_235], %223 {strides = array<i32>} : memref<30x32xf32, #tpu.memory_space<vmem>>, vector<1x32xf32>,
    %c58 = arith.constant 58 : index
    %c0_236 = arith.constant 0 : index
    %225 = vector.load %arg35[%c58, %c0_236] : memref<94x32xf32, #tpu.memory_space<vmem>>, vector<2x32xf32>
    %cst_237 = arith.constant dense<0xFF800000> : vector<32xf32>
    %226 = vector.multi_reduction <maximumf>, %225, %cst_237 [0] : vector<2x32xf32> to vector<32xf32>
    %227 = vector.shape_cast %226 : vector<32xf32> to vector<1x32xf32>
    %c25 = arith.constant 25 : index
    %c0_238 = arith.constant 0 : index
    %228 = vector.load %arg36[%c25, %c0_238] : memref<30x32xf32, #tpu.memory_space<vmem>>, vector<1x32xf32>
    tpu.vector_store %arg36[%c25, %c0_238], %227 {strides = array<i32>} : memref<30x32xf32, #tpu.memory_space<vmem>>, vector<1x32xf32>,
    %c26 = arith.constant 26 : index
    %c0_239 = arith.constant 0 : index
    %229 = vector.load %arg35[%c26, %c0_239] : memref<94x32xf32, #tpu.memory_space<vmem>>, vector<2x32xf32>
    %cst_240 = arith.constant dense<0xFF800000> : vector<32xf32>
    %230 = vector.multi_reduction <maximumf>, %229, %cst_240 [0] : vector<2x32xf32> to vector<32xf32>
    %231 = vector.shape_cast %230 : vector<32xf32> to vector<1x32xf32>
    %c26_241 = arith.constant 26 : index
    %c0_242 = arith.constant 0 : index
    %232 = vector.load %arg36[%c26_241, %c0_242] : memref<30x32xf32, #tpu.memory_space<vmem>>, vector<1x32xf32>
    tpu.vector_store %arg36[%c26_241, %c0_242], %231 {strides = array<i32>} : memref<30x32xf32, #tpu.memory_space<vmem>>, vector<1x32xf32>,
    %c60 = arith.constant 60 : index
    %c0_243 = arith.constant 0 : index
    %233 = vector.load %arg35[%c60, %c0_243] : memref<94x32xf32, #tpu.memory_space<vmem>>, vector<2x32xf32>
    %cst_244 = arith.constant dense<0xFF800000> : vector<32xf32>
    %234 = vector.multi_reduction <maximumf>, %233, %cst_244 [0] : vector<2x32xf32> to vector<32xf32>
    %235 = vector.shape_cast %234 : vector<32xf32> to vector<1x32xf32>
    %c27 = arith.constant 27 : index
    %c0_245 = arith.constant 0 : index
    %236 = vector.load %arg36[%c27, %c0_245] : memref<30x32xf32, #tpu.memory_space<vmem>>, vector<1x32xf32>
    tpu.vector_store %arg36[%c27, %c0_245], %235 {strides = array<i32>} : memref<30x32xf32, #tpu.memory_space<vmem>>, vector<1x32xf32>,
    %c28 = arith.constant 28 : index
    %c0_246 = arith.constant 0 : index
    %237 = vector.load %arg35[%c28, %c0_246] : memref<94x32xf32, #tpu.memory_space<vmem>>, vector<2x32xf32>
    %cst_247 = arith.constant dense<0xFF800000> : vector<32xf32>
    %238 = vector.multi_reduction <maximumf>, %237, %cst_247 [0] : vector<2x32xf32> to vector<32xf32>
    %239 = vector.shape_cast %238 : vector<32xf32> to vector<1x32xf32>
    %c28_248 = arith.constant 28 : index
    %c0_249 = arith.constant 0 : index
    %240 = vector.load %arg36[%c28_248, %c0_249] : memref<30x32xf32, #tpu.memory_space<vmem>>, vector<1x32xf32>
    tpu.vector_store %arg36[%c28_248, %c0_249], %239 {strides = array<i32>} : memref<30x32xf32, #tpu.memory_space<vmem>>, vector<1x32xf32>,
    %c62 = arith.constant 62 : index
    %c0_250 = arith.constant 0 : index
    %241 = vector.load %arg35[%c62, %c0_250] : memref<94x32xf32, #tpu.memory_space<vmem>>, vector<2x32xf32>
    %cst_251 = arith.constant dense<0xFF800000> : vector<32xf32>
    %242 = vector.multi_reduction <maximumf>, %241, %cst_251 [0] : vector<2x32xf32> to vector<32xf32>
    %243 = vector.shape_cast %242 : vector<32xf32> to vector<1x32xf32>
    %c29 = arith.constant 29 : index
    %c0_252 = arith.constant 0 : index
    %244 = vector.load %arg36[%c29, %c0_252] : memref<30x32xf32, #tpu.memory_space<vmem>>, vector<1x32xf32>
    tpu.vector_store %arg36[%c29, %c0_252], %243 {strides = array<i32>} : memref<30x32xf32, #tpu.memory_space<vmem>>, vector<1x32xf32>,
    %cst_253 = arith.constant 0.000000e+00 : f32
    %245 = vector.broadcast %cst_253 : f32 to vector<2x32xf32>
    %c0_254 = arith.constant 0 : index
    %c0_255 = arith.constant 0 : index
    %246 = vector.load %arg36[%c0_254, %c0_255] : memref<30x32xf32, #tpu.memory_space<vmem>>, vector<2x32xf32>
    %c0_256 = arith.constant 0 : index
    %c0_257 = arith.constant 0 : index
    %c0_258 = arith.constant 0 : index
    %247 = vector.load %arg20[%c0_256, %c0_257, %c0_258] : memref<15x32x32xf32, #tpu.memory_space<vmem>>, vector<1x32x32xf32>
    %248 = vector.shape_cast %247 : vector<1x32x32xf32> to vector<32x32xf32>
    %cst_259 = arith.constant dense<0.000000e+00> : vector<2x32xf32>
    %249 = tpu.matmul %246, %248, %cst_259 {dimension_numbers = #tpu.dot_dimension_numbers<[1], [0], [0], [1], [0, 0, 1, 1], [], []>} : vector<2x32xf32>, vector<32x32xf32>, vector<2x32xf32> -> vector<2x32xf32>
    %250 = arith.addf %245, %249 : vector<2x32xf32>
    %c2_260 = arith.constant 2 : index
    %c0_261 = arith.constant 0 : index
    %251 = vector.load %arg36[%c2_260, %c0_261] : memref<30x32xf32, #tpu.memory_space<vmem>>, vector<2x32xf32>
    %c1_262 = arith.constant 1 : index
    %c0_263 = arith.constant 0 : index
    %c0_264 = arith.constant 0 : index
    %252 = vector.load %arg20[%c1_262, %c0_263, %c0_264] : memref<15x32x32xf32, #tpu.memory_space<vmem>>, vector<1x32x32xf32>
    %253 = vector.shape_cast %252 : vector<1x32x32xf32> to vector<32x32xf32>
    %cst_265 = arith.constant dense<0.000000e+00> : vector<2x32xf32>
    %254 = tpu.matmul %251, %253, %cst_265 {dimension_numbers = #tpu.dot_dimension_numbers<[1], [0], [0], [1], [0, 0, 1, 1], [], []>} : vector<2x32xf32>, vector<32x32xf32>, vector<2x32xf32> -> vector<2x32xf32>
    %255 = arith.addf %250, %254 : vector<2x32xf32>
    %c4_266 = arith.constant 4 : index
    %c0_267 = arith.constant 0 : index
    %256 = vector.load %arg36[%c4_266, %c0_267] : memref<30x32xf32, #tpu.memory_space<vmem>>, vector<2x32xf32>
    %c2_268 = arith.constant 2 : index
    %c0_269 = arith.constant 0 : index
    %c0_270 = arith.constant 0 : index
    %257 = vector.load %arg20[%c2_268, %c0_269, %c0_270] : memref<15x32x32xf32, #tpu.memory_space<vmem>>, vector<1x32x32xf32>
    %258 = vector.shape_cast %257 : vector<1x32x32xf32> to vector<32x32xf32>
    %cst_271 = arith.constant dense<0.000000e+00> : vector<2x32xf32>
    %259 = tpu.matmul %256, %258, %cst_271 {dimension_numbers = #tpu.dot_dimension_numbers<[1], [0], [0], [1], [0, 0, 1, 1], [], []>} : vector<2x32xf32>, vector<32x32xf32>, vector<2x32xf32> -> vector<2x32xf32>
    %260 = arith.addf %255, %259 : vector<2x32xf32>
    %c6_272 = arith.constant 6 : index
    %c0_273 = arith.constant 0 : index
    %261 = vector.load %arg36[%c6_272, %c0_273] : memref<30x32xf32, #tpu.memory_space<vmem>>, vector<2x32xf32>
    %c3_274 = arith.constant 3 : index
    %c0_275 = arith.constant 0 : index
    %c0_276 = arith.constant 0 : index
    %262 = vector.load %arg20[%c3_274, %c0_275, %c0_276] : memref<15x32x32xf32, #tpu.memory_space<vmem>>, vector<1x32x32xf32>
    %263 = vector.shape_cast %262 : vector<1x32x32xf32> to vector<32x32xf32>
    %cst_277 = arith.constant dense<0.000000e+00> : vector<2x32xf32>
    %264 = tpu.matmul %261, %263, %cst_277 {dimension_numbers = #tpu.dot_dimension_numbers<[1], [0], [0], [1], [0, 0, 1, 1], [], []>} : vector<2x32xf32>, vector<32x32xf32>, vector<2x32xf32> -> vector<2x32xf32>
    %265 = arith.addf %260, %264 : vector<2x32xf32>
    %c8_278 = arith.constant 8 : index
    %c0_279 = arith.constant 0 : index
    %266 = vector.load %arg36[%c8_278, %c0_279] : memref<30x32xf32, #tpu.memory_space<vmem>>, vector<2x32xf32>
    %c4_280 = arith.constant 4 : index
    %c0_281 = arith.constant 0 : index
    %c0_282 = arith.constant 0 : index
    %267 = vector.load %arg20[%c4_280, %c0_281, %c0_282] : memref<15x32x32xf32, #tpu.memory_space<vmem>>, vector<1x32x32xf32>
    %268 = vector.shape_cast %267 : vector<1x32x32xf32> to vector<32x32xf32>
    %cst_283 = arith.constant dense<0.000000e+00> : vector<2x32xf32>
    %269 = tpu.matmul %266, %268, %cst_283 {dimension_numbers = #tpu.dot_dimension_numbers<[1], [0], [0], [1], [0, 0, 1, 1], [], []>} : vector<2x32xf32>, vector<32x32xf32>, vector<2x32xf32> -> vector<2x32xf32>
    %270 = arith.addf %265, %269 : vector<2x32xf32>
    %c10_284 = arith.constant 10 : index
    %c0_285 = arith.constant 0 : index
    %271 = vector.load %arg36[%c10_284, %c0_285] : memref<30x32xf32, #tpu.memory_space<vmem>>, vector<2x32xf32>
    %c5_286 = arith.constant 5 : index
    %c0_287 = arith.constant 0 : index
    %c0_288 = arith.constant 0 : index
    %272 = vector.load %arg20[%c5_286, %c0_287, %c0_288] : memref<15x32x32xf32, #tpu.memory_space<vmem>>, vector<1x32x32xf32>
    %273 = vector.shape_cast %272 : vector<1x32x32xf32> to vector<32x32xf32>
    %cst_289 = arith.constant dense<0.000000e+00> : vector<2x32xf32>
    %274 = tpu.matmul %271, %273, %cst_289 {dimension_numbers = #tpu.dot_dimension_numbers<[1], [0], [0], [1], [0, 0, 1, 1], [], []>} : vector<2x32xf32>, vector<32x32xf32>, vector<2x32xf32> -> vector<2x32xf32>
    %275 = arith.addf %270, %274 : vector<2x32xf32>
    %c12_290 = arith.constant 12 : index
    %c0_291 = arith.constant 0 : index
    %276 = vector.load %arg36[%c12_290, %c0_291] : memref<30x32xf32, #tpu.memory_space<vmem>>, vector<2x32xf32>
    %c6_292 = arith.constant 6 : index
    %c0_293 = arith.constant 0 : index
    %c0_294 = arith.constant 0 : index
    %277 = vector.load %arg20[%c6_292, %c0_293, %c0_294] : memref<15x32x32xf32, #tpu.memory_space<vmem>>, vector<1x32x32xf32>
    %278 = vector.shape_cast %277 : vector<1x32x32xf32> to vector<32x32xf32>
    %cst_295 = arith.constant dense<0.000000e+00> : vector<2x32xf32>
    %279 = tpu.matmul %276, %278, %cst_295 {dimension_numbers = #tpu.dot_dimension_numbers<[1], [0], [0], [1], [0, 0, 1, 1], [], []>} : vector<2x32xf32>, vector<32x32xf32>, vector<2x32xf32> -> vector<2x32xf32>
    %280 = arith.addf %275, %279 : vector<2x32xf32>
    %c14_296 = arith.constant 14 : index
    %c0_297 = arith.constant 0 : index
    %281 = vector.load %arg36[%c14_296, %c0_297] : memref<30x32xf32, #tpu.memory_space<vmem>>, vector<2x32xf32>
    %c7_298 = arith.constant 7 : index
    %c0_299 = arith.constant 0 : index
    %c0_300 = arith.constant 0 : index
    %282 = vector.load %arg20[%c7_298, %c0_299, %c0_300] : memref<15x32x32xf32, #tpu.memory_space<vmem>>, vector<1x32x32xf32>
    %283 = vector.shape_cast %282 : vector<1x32x32xf32> to vector<32x32xf32>
    %cst_301 = arith.constant dense<0.000000e+00> : vector<2x32xf32>
    %284 = tpu.matmul %281, %283, %cst_301 {dimension_numbers = #tpu.dot_dimension_numbers<[1], [0], [0], [1], [0, 0, 1, 1], [], []>} : vector<2x32xf32>, vector<32x32xf32>, vector<2x32xf32> -> vector<2x32xf32>
    %285 = arith.addf %280, %284 : vector<2x32xf32>
    %c16_302 = arith.constant 16 : index
    %c0_303 = arith.constant 0 : index
    %286 = vector.load %arg36[%c16_302, %c0_303] : memref<30x32xf32, #tpu.memory_space<vmem>>, vector<2x32xf32>
    %c8_304 = arith.constant 8 : index
    %c0_305 = arith.constant 0 : index
    %c0_306 = arith.constant 0 : index
    %287 = vector.load %arg20[%c8_304, %c0_305, %c0_306] : memref<15x32x32xf32, #tpu.memory_space<vmem>>, vector<1x32x32xf32>
    %288 = vector.shape_cast %287 : vector<1x32x32xf32> to vector<32x32xf32>
    %cst_307 = arith.constant dense<0.000000e+00> : vector<2x32xf32>
    %289 = tpu.matmul %286, %288, %cst_307 {dimension_numbers = #tpu.dot_dimension_numbers<[1], [0], [0], [1], [0, 0, 1, 1], [], []>} : vector<2x32xf32>, vector<32x32xf32>, vector<2x32xf32> -> vector<2x32xf32>
    %290 = arith.addf %285, %289 : vector<2x32xf32>
    %c18_308 = arith.constant 18 : index
    %c0_309 = arith.constant 0 : index
    %291 = vector.load %arg36[%c18_308, %c0_309] : memref<30x32xf32, #tpu.memory_space<vmem>>, vector<2x32xf32>
    %c9_310 = arith.constant 9 : index
    %c0_311 = arith.constant 0 : index
    %c0_312 = arith.constant 0 : index
    %292 = vector.load %arg20[%c9_310, %c0_311, %c0_312] : memref<15x32x32xf32, #tpu.memory_space<vmem>>, vector<1x32x32xf32>
    %293 = vector.shape_cast %292 : vector<1x32x32xf32> to vector<32x32xf32>
    %cst_313 = arith.constant dense<0.000000e+00> : vector<2x32xf32>
    %294 = tpu.matmul %291, %293, %cst_313 {dimension_numbers = #tpu.dot_dimension_numbers<[1], [0], [0], [1], [0, 0, 1, 1], [], []>} : vector<2x32xf32>, vector<32x32xf32>, vector<2x32xf32> -> vector<2x32xf32>
    %295 = arith.addf %290, %294 : vector<2x32xf32>
    %c20_314 = arith.constant 20 : index
    %c0_315 = arith.constant 0 : index
    %296 = vector.load %arg36[%c20_314, %c0_315] : memref<30x32xf32, #tpu.memory_space<vmem>>, vector<2x32xf32>
    %c10_316 = arith.constant 10 : index
    %c0_317 = arith.constant 0 : index
    %c0_318 = arith.constant 0 : index
    %297 = vector.load %arg20[%c10_316, %c0_317, %c0_318] : memref<15x32x32xf32, #tpu.memory_space<vmem>>, vector<1x32x32xf32>
    %298 = vector.shape_cast %297 : vector<1x32x32xf32> to vector<32x32xf32>
    %cst_319 = arith.constant dense<0.000000e+00> : vector<2x32xf32>
    %299 = tpu.matmul %296, %298, %cst_319 {dimension_numbers = #tpu.dot_dimension_numbers<[1], [0], [0], [1], [0, 0, 1, 1], [], []>} : vector<2x32xf32>, vector<32x32xf32>, vector<2x32xf32> -> vector<2x32xf32>
    %300 = arith.addf %295, %299 : vector<2x32xf32>
    %c22_320 = arith.constant 22 : index
    %c0_321 = arith.constant 0 : index
    %301 = vector.load %arg36[%c22_320, %c0_321] : memref<30x32xf32, #tpu.memory_space<vmem>>, vector<2x32xf32>
    %c11_322 = arith.constant 11 : index
    %c0_323 = arith.constant 0 : index
    %c0_324 = arith.constant 0 : index
    %302 = vector.load %arg20[%c11_322, %c0_323, %c0_324] : memref<15x32x32xf32, #tpu.memory_space<vmem>>, vector<1x32x32xf32>
    %303 = vector.shape_cast %302 : vector<1x32x32xf32> to vector<32x32xf32>
    %cst_325 = arith.constant dense<0.000000e+00> : vector<2x32xf32>
    %304 = tpu.matmul %301, %303, %cst_325 {dimension_numbers = #tpu.dot_dimension_numbers<[1], [0], [0], [1], [0, 0, 1, 1], [], []>} : vector<2x32xf32>, vector<32x32xf32>, vector<2x32xf32> -> vector<2x32xf32>
    %305 = arith.addf %300, %304 : vector<2x32xf32>
    %c24_326 = arith.constant 24 : index
    %c0_327 = arith.constant 0 : index
    %306 = vector.load %arg36[%c24_326, %c0_327] : memref<30x32xf32, #tpu.memory_space<vmem>>, vector<2x32xf32>
    %c12_328 = arith.constant 12 : index
    %c0_329 = arith.constant 0 : index
    %c0_330 = arith.constant 0 : index
    %307 = vector.load %arg20[%c12_328, %c0_329, %c0_330] : memref<15x32x32xf32, #tpu.memory_space<vmem>>, vector<1x32x32xf32>
    %308 = vector.shape_cast %307 : vector<1x32x32xf32> to vector<32x32xf32>
    %cst_331 = arith.constant dense<0.000000e+00> : vector<2x32xf32>
    %309 = tpu.matmul %306, %308, %cst_331 {dimension_numbers = #tpu.dot_dimension_numbers<[1], [0], [0], [1], [0, 0, 1, 1], [], []>} : vector<2x32xf32>, vector<32x32xf32>, vector<2x32xf32> -> vector<2x32xf32>
    %310 = arith.addf %305, %309 : vector<2x32xf32>
    %c26_332 = arith.constant 26 : index
    %c0_333 = arith.constant 0 : index
    %311 = vector.load %arg36[%c26_332, %c0_333] : memref<30x32xf32, #tpu.memory_space<vmem>>, vector<2x32xf32>
    %c13_334 = arith.constant 13 : index
    %c0_335 = arith.constant 0 : index
    %c0_336 = arith.constant 0 : index
    %312 = vector.load %arg20[%c13_334, %c0_335, %c0_336] : memref<15x32x32xf32, #tpu.memory_space<vmem>>, vector<1x32x32xf32>
    %313 = vector.shape_cast %312 : vector<1x32x32xf32> to vector<32x32xf32>
    %cst_337 = arith.constant dense<0.000000e+00> : vector<2x32xf32>
    %314 = tpu.matmul %311, %313, %cst_337 {dimension_numbers = #tpu.dot_dimension_numbers<[1], [0], [0], [1], [0, 0, 1, 1], [], []>} : vector<2x32xf32>, vector<32x32xf32>, vector<2x32xf32> -> vector<2x32xf32>
    %315 = arith.addf %310, %314 : vector<2x32xf32>
    %c28_338 = arith.constant 28 : index
    %c0_339 = arith.constant 0 : index
    %316 = vector.load %arg36[%c28_338, %c0_339] : memref<30x32xf32, #tpu.memory_space<vmem>>, vector<2x32xf32>
    %c14_340 = arith.constant 14 : index
    %c0_341 = arith.constant 0 : index
    %c0_342 = arith.constant 0 : index
    %317 = vector.load %arg20[%c14_340, %c0_341, %c0_342] : memref<15x32x32xf32, #tpu.memory_space<vmem>>, vector<1x32x32xf32>
    %318 = vector.shape_cast %317 : vector<1x32x32xf32> to vector<32x32xf32>
    %cst_343 = arith.constant dense<0.000000e+00> : vector<2x32xf32>
    %319 = tpu.matmul %316, %318, %cst_343 {dimension_numbers = #tpu.dot_dimension_numbers<[1], [0], [0], [1], [0, 0, 1, 1], [], []>} : vector<2x32xf32>, vector<32x32xf32>, vector<2x32xf32> -> vector<2x32xf32>
    %320 = arith.addf %315, %319 : vector<2x32xf32>
    %c0_344 = arith.constant 0 : index
    %c0_345 = arith.constant 0 : index
    %321 = vector.load %arg21[%c0_344, %c0_345] : memref<1x32xf32, #tpu.memory_space<vmem>>, vector<1x32xf32>
    %322 = vector.broadcast %321 : vector<1x32xf32> to vector<2x32xf32>
    %323 = arith.mulf %320, %322 : vector<2x32xf32>
    %c0_346 = arith.constant 0 : index
    %c0_347 = arith.constant 0 : index
    %324 = vector.load %arg22[%c0_346, %c0_347] : memref<1x32xf32, #tpu.memory_space<vmem>>, vector<1x32xf32>
    %325 = vector.broadcast %324 : vector<1x32xf32> to vector<2x32xf32>
    %326 = arith.addf %323, %325 : vector<2x32xf32>
    %cst_348 = arith.constant 0.000000e+00 : f32
    %327 = vector.broadcast %cst_348 : f32 to vector<2x32xf32>
    %328 = arith.maximumf %326, %327 : vector<2x32xf32>
    %cst_349 = arith.constant 0.000000e+00 : f32
    %329 = vector.broadcast %cst_349 : f32 to vector<94x32xf32>
    %c0_350 = arith.constant 0 : index
    %c0_351 = arith.constant 0 : index
    %330 = vector.load %arg34[%c0_350, %c0_351] : memref<94x32xf32, #tpu.memory_space<vmem>>, vector<94x32xf32>
    tpu.vector_store %arg34[%c0_350, %c0_351], %329 {strides = array<i32>} : memref<94x32xf32, #tpu.memory_space<vmem>>, vector<94x32xf32>,
    %c0_352 = arith.constant 0 : index
    %c0_353 = arith.constant 0 : index
    %c0_354 = arith.constant 0 : index
    %331 = vector.load %arg1[%c0_352, %c0_353, %c0_354] : memref<2x45x6xf32, #tpu.memory_space<vmem>>, vector<1x45x6xf32>
    %332 = vector.shape_cast %331 : vector<1x45x6xf32> to vector<45x6xf32>
    %c1_355 = arith.constant 1 : index
    %c0_356 = arith.constant 0 : index
    %333 = vector.load %arg34[%c1_355, %c0_356] : memref<94x32xf32, #tpu.memory_space<vmem>>, vector<45x6xf32>
    tpu.vector_store %arg34[%c1_355, %c0_356], %332 {strides = array<i32>} : memref<94x32xf32, #tpu.memory_space<vmem>>, vector<45x6xf32>,
    %c1_357 = arith.constant 1 : index
    %c0_358 = arith.constant 0 : index
    %c0_359 = arith.constant 0 : index
    %334 = vector.load %arg1[%c1_357, %c0_358, %c0_359] : memref<2x45x6xf32, #tpu.memory_space<vmem>>, vector<1x45x6xf32>
    %335 = vector.shape_cast %334 : vector<1x45x6xf32> to vector<45x6xf32>
    %c48_360 = arith.constant 48 : index
    %c0_361 = arith.constant 0 : index
    %336 = vector.load %arg34[%c48_360, %c0_361] : memref<94x32xf32, #tpu.memory_space<vmem>>, vector<45x6xf32>
    tpu.vector_store %arg34[%c48_360, %c0_361], %335 {strides = array<i32>} : memref<94x32xf32, #tpu.memory_space<vmem>>, vector<45x6xf32>,
    %cst_362 = arith.constant 0.000000e+00 : f32
    %337 = vector.broadcast %cst_362 : f32 to vector<92x16xf32>
    %c0_363 = arith.constant 0 : index
    %c0_364 = arith.constant 0 : index
    %338 = vector.load %arg34[%c0_363, %c0_364] : memref<94x32xf32, #tpu.memory_space<vmem>>, vector<92x6xf32>
    %c0_365 = arith.constant 0 : index
    %c0_366 = arith.constant 0 : index
    %c0_367 = arith.constant 0 : index
    %339 = vector.load %arg11[%c0_365, %c0_366, %c0_367] : memref<3x6x16xf32, #tpu.memory_space<vmem>>, vector<1x6x16xf32>
    %340 = vector.shape_cast %339 : vector<1x6x16xf32> to vector<6x16xf32>
    %cst_368 = arith.constant dense<0.000000e+00> : vector<92x16xf32>
    %341 = tpu.matmul %338, %340, %cst_368 {dimension_numbers = #tpu.dot_dimension_numbers<[1], [0], [0], [1], [0, 0, 1, 1], [], []>} : vector<92x6xf32>, vector<6x16xf32>, vector<92x16xf32> -> vector<92x16xf32>
    %342 = arith.addf %337, %341 : vector<92x16xf32>
    %c1_369 = arith.constant 1 : index
    %c0_370 = arith.constant 0 : index
    %343 = vector.load %arg34[%c1_369, %c0_370] : memref<94x32xf32, #tpu.memory_space<vmem>>, vector<92x6xf32>
    %c1_371 = arith.constant 1 : index
    %c0_372 = arith.constant 0 : index
    %c0_373 = arith.constant 0 : index
    %344 = vector.load %arg11[%c1_371, %c0_372, %c0_373] : memref<3x6x16xf32, #tpu.memory_space<vmem>>, vector<1x6x16xf32>
    %345 = vector.shape_cast %344 : vector<1x6x16xf32> to vector<6x16xf32>
    %cst_374 = arith.constant dense<0.000000e+00> : vector<92x16xf32>
    %346 = tpu.matmul %343, %345, %cst_374 {dimension_numbers = #tpu.dot_dimension_numbers<[1], [0], [0], [1], [0, 0, 1, 1], [], []>} : vector<92x6xf32>, vector<6x16xf32>, vector<92x16xf32> -> vector<92x16xf32>
    %347 = arith.addf %342, %346 : vector<92x16xf32>
    %c2_375 = arith.constant 2 : index
    %c0_376 = arith.constant 0 : index
    %348 = vector.load %arg34[%c2_375, %c0_376] : memref<94x32xf32, #tpu.memory_space<vmem>>, vector<92x6xf32>
    %c2_377 = arith.constant 2 : index
    %c0_378 = arith.constant 0 : index
    %c0_379 = arith.constant 0 : index
    %349 = vector.load %arg11[%c2_377, %c0_378, %c0_379] : memref<3x6x16xf32, #tpu.memory_space<vmem>>, vector<1x6x16xf32>
    %350 = vector.shape_cast %349 : vector<1x6x16xf32> to vector<6x16xf32>
    %cst_380 = arith.constant dense<0.000000e+00> : vector<92x16xf32>
    %351 = tpu.matmul %348, %350, %cst_380 {dimension_numbers = #tpu.dot_dimension_numbers<[1], [0], [0], [1], [0, 0, 1, 1], [], []>} : vector<92x6xf32>, vector<6x16xf32>, vector<92x16xf32> -> vector<92x16xf32>
    %352 = arith.addf %347, %351 : vector<92x16xf32>
    %c0_381 = arith.constant 0 : index
    %c0_382 = arith.constant 0 : index
    %353 = vector.load %arg12[%c0_381, %c0_382] : memref<1x16xf32, #tpu.memory_space<vmem>>, vector<1x16xf32>
    %354 = vector.broadcast %353 : vector<1x16xf32> to vector<92x16xf32>
    %355 = arith.mulf %352, %354 : vector<92x16xf32>
    %c0_383 = arith.constant 0 : index
    %c0_384 = arith.constant 0 : index
    %356 = vector.load %arg13[%c0_383, %c0_384] : memref<1x16xf32, #tpu.memory_space<vmem>>, vector<1x16xf32>
    %357 = vector.broadcast %356 : vector<1x16xf32> to vector<92x16xf32>
    %358 = arith.addf %355, %357 : vector<92x16xf32>
    %cst_385 = arith.constant 0.000000e+00 : f32
    %359 = vector.broadcast %cst_385 : f32 to vector<92x16xf32>
    %360 = arith.maximumf %358, %359 : vector<92x16xf32>
    %c0_386 = arith.constant 0 : index
    %c0_387 = arith.constant 0 : index
    %361 = vector.load %arg35[%c0_386, %c0_387] : memref<94x32xf32, #tpu.memory_space<vmem>>, vector<92x16xf32>
    tpu.vector_store %arg35[%c0_386, %c0_387], %360 {strides = array<i32>} : memref<94x32xf32, #tpu.memory_space<vmem>>, vector<92x16xf32>,
    %cst_388 = arith.constant 0.000000e+00 : f32
    %362 = vector.broadcast %cst_388 : f32 to vector<94x32xf32>
    %c0_389 = arith.constant 0 : index
    %c0_390 = arith.constant 0 : index
    %363 = vector.load %arg34[%c0_389, %c0_390] : memref<94x32xf32, #tpu.memory_space<vmem>>, vector<94x32xf32>
    tpu.vector_store %arg34[%c0_389, %c0_390], %362 {strides = array<i32>} : memref<94x32xf32, #tpu.memory_space<vmem>>, vector<94x32xf32>,
    %c0_391 = arith.constant 0 : index
    %c0_392 = arith.constant 0 : index
    %364 = vector.load %arg35[%c0_391, %c0_392] : memref<94x32xf32, #tpu.memory_space<vmem>>, vector<45x16xf32>
    %c1_393 = arith.constant 1 : index
    %c0_394 = arith.constant 0 : index
    %365 = vector.load %arg34[%c1_393, %c0_394] : memref<94x32xf32, #tpu.memory_space<vmem>>, vector<45x16xf32>
    tpu.vector_store %arg34[%c1_393, %c0_394], %364 {strides = array<i32>} : memref<94x32xf32, #tpu.memory_space<vmem>>, vector<45x16xf32>,
    %c47 = arith.constant 47 : index
    %c0_395 = arith.constant 0 : index
    %366 = vector.load %arg35[%c47, %c0_395] : memref<94x32xf32, #tpu.memory_space<vmem>>, vector<45x16xf32>
    %c48_396 = arith.constant 48 : index
    %c0_397 = arith.constant 0 : index
    %367 = vector.load %arg34[%c48_396, %c0_397] : memref<94x32xf32, #tpu.memory_space<vmem>>, vector<45x16xf32>
    tpu.vector_store %arg34[%c48_396, %c0_397], %366 {strides = array<i32>} : memref<94x32xf32, #tpu.memory_space<vmem>>, vector<45x16xf32>,
    %cst_398 = arith.constant 0.000000e+00 : f32
    %368 = vector.broadcast %cst_398 : f32 to vector<92x32xf32>
    %c0_399 = arith.constant 0 : index
    %c0_400 = arith.constant 0 : index
    %369 = vector.load %arg34[%c0_399, %c0_400] : memref<94x32xf32, #tpu.memory_space<vmem>>, vector<92x16xf32>
    %c0_401 = arith.constant 0 : index
    %c0_402 = arith.constant 0 : index
    %c0_403 = arith.constant 0 : index
    %370 = vector.load %arg14[%c0_401, %c0_402, %c0_403] : memref<3x16x32xf32, #tpu.memory_space<vmem>>, vector<1x16x32xf32>
    %371 = vector.shape_cast %370 : vector<1x16x32xf32> to vector<16x32xf32>
    %cst_404 = arith.constant dense<0.000000e+00> : vector<92x32xf32>
    %372 = tpu.matmul %369, %371, %cst_404 {dimension_numbers = #tpu.dot_dimension_numbers<[1], [0], [0], [1], [0, 0, 1, 1], [], []>} : vector<92x16xf32>, vector<16x32xf32>, vector<92x32xf32> -> vector<92x32xf32>
    %373 = arith.addf %368, %372 : vector<92x32xf32>
    %c1_405 = arith.constant 1 : index
    %c0_406 = arith.constant 0 : index
    %374 = vector.load %arg34[%c1_405, %c0_406] : memref<94x32xf32, #tpu.memory_space<vmem>>, vector<92x16xf32>
    %c1_407 = arith.constant 1 : index
    %c0_408 = arith.constant 0 : index
    %c0_409 = arith.constant 0 : index
    %375 = vector.load %arg14[%c1_407, %c0_408, %c0_409] : memref<3x16x32xf32, #tpu.memory_space<vmem>>, vector<1x16x32xf32>
    %376 = vector.shape_cast %375 : vector<1x16x32xf32> to vector<16x32xf32>
    %cst_410 = arith.constant dense<0.000000e+00> : vector<92x32xf32>
    %377 = tpu.matmul %374, %376, %cst_410 {dimension_numbers = #tpu.dot_dimension_numbers<[1], [0], [0], [1], [0, 0, 1, 1], [], []>} : vector<92x16xf32>, vector<16x32xf32>, vector<92x32xf32> -> vector<92x32xf32>
    %378 = arith.addf %373, %377 : vector<92x32xf32>
    %c2_411 = arith.constant 2 : index
    %c0_412 = arith.constant 0 : index
    %379 = vector.load %arg34[%c2_411, %c0_412] : memref<94x32xf32, #tpu.memory_space<vmem>>, vector<92x16xf32>
    %c2_413 = arith.constant 2 : index
    %c0_414 = arith.constant 0 : index
    %c0_415 = arith.constant 0 : index
    %380 = vector.load %arg14[%c2_413, %c0_414, %c0_415] : memref<3x16x32xf32, #tpu.memory_space<vmem>>, vector<1x16x32xf32>
    %381 = vector.shape_cast %380 : vector<1x16x32xf32> to vector<16x32xf32>
    %cst_416 = arith.constant dense<0.000000e+00> : vector<92x32xf32>
    %382 = tpu.matmul %379, %381, %cst_416 {dimension_numbers = #tpu.dot_dimension_numbers<[1], [0], [0], [1], [0, 0, 1, 1], [], []>} : vector<92x16xf32>, vector<16x32xf32>, vector<92x32xf32> -> vector<92x32xf32>
    %383 = arith.addf %378, %382 : vector<92x32xf32>
    %c0_417 = arith.constant 0 : index
    %c0_418 = arith.constant 0 : index
    %384 = vector.load %arg15[%c0_417, %c0_418] : memref<1x32xf32, #tpu.memory_space<vmem>>, vector<1x32xf32>
    %385 = vector.broadcast %384 : vector<1x32xf32> to vector<92x32xf32>
    %386 = arith.mulf %383, %385 : vector<92x32xf32>
    %c0_419 = arith.constant 0 : index
    %c0_420 = arith.constant 0 : index
    %387 = vector.load %arg16[%c0_419, %c0_420] : memref<1x32xf32, #tpu.memory_space<vmem>>, vector<1x32xf32>
    %388 = vector.broadcast %387 : vector<1x32xf32> to vector<92x32xf32>
    %389 = arith.addf %386, %388 : vector<92x32xf32>
    %cst_421 = arith.constant 0.000000e+00 : f32
    %390 = vector.broadcast %cst_421 : f32 to vector<92x32xf32>
    %391 = arith.maximumf %389, %390 : vector<92x32xf32>
    %c0_422 = arith.constant 0 : index
    %c0_423 = arith.constant 0 : index
    %392 = vector.load %arg35[%c0_422, %c0_423] : memref<94x32xf32, #tpu.memory_space<vmem>>, vector<92x32xf32>
    tpu.vector_store %arg35[%c0_422, %c0_423], %391 {strides = array<i32>} : memref<94x32xf32, #tpu.memory_space<vmem>>, vector<92x32xf32>,
    %cst_424 = arith.constant 0.000000e+00 : f32
    %393 = vector.broadcast %cst_424 : f32 to vector<94x32xf32>
    %c0_425 = arith.constant 0 : index
    %c0_426 = arith.constant 0 : index
    %394 = vector.load %arg34[%c0_425, %c0_426] : memref<94x32xf32, #tpu.memory_space<vmem>>, vector<94x32xf32>
    tpu.vector_store %arg34[%c0_425, %c0_426], %393 {strides = array<i32>} : memref<94x32xf32, #tpu.memory_space<vmem>>, vector<94x32xf32>,
    %c0_427 = arith.constant 0 : index
    %c0_428 = arith.constant 0 : index
    %395 = vector.load %arg35[%c0_427, %c0_428] : memref<94x32xf32, #tpu.memory_space<vmem>>, vector<45x32xf32>
    %c1_429 = arith.constant 1 : index
    %c0_430 = arith.constant 0 : index
    %396 = vector.load %arg34[%c1_429, %c0_430] : memref<94x32xf32, #tpu.memory_space<vmem>>, vector<45x32xf32>
    tpu.vector_store %arg34[%c1_429, %c0_430], %395 {strides = array<i32>} : memref<94x32xf32, #tpu.memory_space<vmem>>, vector<45x32xf32>,
    %c47_431 = arith.constant 47 : index
    %c0_432 = arith.constant 0 : index
    %397 = vector.load %arg35[%c47_431, %c0_432] : memref<94x32xf32, #tpu.memory_space<vmem>>, vector<45x32xf32>
    %c48_433 = arith.constant 48 : index
    %c0_434 = arith.constant 0 : index
    %398 = vector.load %arg34[%c48_433, %c0_434] : memref<94x32xf32, #tpu.memory_space<vmem>>, vector<45x32xf32>
    tpu.vector_store %arg34[%c48_433, %c0_434], %397 {strides = array<i32>} : memref<94x32xf32, #tpu.memory_space<vmem>>, vector<45x32xf32>,
    %cst_435 = arith.constant 0.000000e+00 : f32
    %399 = vector.broadcast %cst_435 : f32 to vector<92x32xf32>
    %c0_436 = arith.constant 0 : index
    %c0_437 = arith.constant 0 : index
    %400 = vector.load %arg34[%c0_436, %c0_437] : memref<94x32xf32, #tpu.memory_space<vmem>>, vector<92x32xf32>
    %c0_438 = arith.constant 0 : index
    %c0_439 = arith.constant 0 : index
    %c0_440 = arith.constant 0 : index
    %401 = vector.load %arg17[%c0_438, %c0_439, %c0_440] : memref<3x32x32xf32, #tpu.memory_space<vmem>>, vector<1x32x32xf32>
    %402 = vector.shape_cast %401 : vector<1x32x32xf32> to vector<32x32xf32>
    %cst_441 = arith.constant dense<0.000000e+00> : vector<92x32xf32>
    %403 = tpu.matmul %400, %402, %cst_441 {dimension_numbers = #tpu.dot_dimension_numbers<[1], [0], [0], [1], [0, 0, 1, 1], [], []>} : vector<92x32xf32>, vector<32x32xf32>, vector<92x32xf32> -> vector<92x32xf32>
    %404 = arith.addf %399, %403 : vector<92x32xf32>
    %c1_442 = arith.constant 1 : index
    %c0_443 = arith.constant 0 : index
    %405 = vector.load %arg34[%c1_442, %c0_443] : memref<94x32xf32, #tpu.memory_space<vmem>>, vector<92x32xf32>
    %c1_444 = arith.constant 1 : index
    %c0_445 = arith.constant 0 : index
    %c0_446 = arith.constant 0 : index
    %406 = vector.load %arg17[%c1_444, %c0_445, %c0_446] : memref<3x32x32xf32, #tpu.memory_space<vmem>>, vector<1x32x32xf32>
    %407 = vector.shape_cast %406 : vector<1x32x32xf32> to vector<32x32xf32>
    %cst_447 = arith.constant dense<0.000000e+00> : vector<92x32xf32>
    %408 = tpu.matmul %405, %407, %cst_447 {dimension_numbers = #tpu.dot_dimension_numbers<[1], [0], [0], [1], [0, 0, 1, 1], [], []>} : vector<92x32xf32>, vector<32x32xf32>, vector<92x32xf32> -> vector<92x32xf32>
    %409 = arith.addf %404, %408 : vector<92x32xf32>
    %c2_448 = arith.constant 2 : index
    %c0_449 = arith.constant 0 : index
    %410 = vector.load %arg34[%c2_448, %c0_449] : memref<94x32xf32, #tpu.memory_space<vmem>>, vector<92x32xf32>
    %c2_450 = arith.constant 2 : index
    %c0_451 = arith.constant 0 : index
    %c0_452 = arith.constant 0 : index
    %411 = vector.load %arg17[%c2_450, %c0_451, %c0_452] : memref<3x32x32xf32, #tpu.memory_space<vmem>>, vector<1x32x32xf32>
    %412 = vector.shape_cast %411 : vector<1x32x32xf32> to vector<32x32xf32>
    %cst_453 = arith.constant dense<0.000000e+00> : vector<92x32xf32>
    %413 = tpu.matmul %410, %412, %cst_453 {dimension_numbers = #tpu.dot_dimension_numbers<[1], [0], [0], [1], [0, 0, 1, 1], [], []>} : vector<92x32xf32>, vector<32x32xf32>, vector<92x32xf32> -> vector<92x32xf32>
    %414 = arith.addf %409, %413 : vector<92x32xf32>
    %c0_454 = arith.constant 0 : index
    %c0_455 = arith.constant 0 : index
    %415 = vector.load %arg18[%c0_454, %c0_455] : memref<1x32xf32, #tpu.memory_space<vmem>>, vector<1x32xf32>
    %416 = vector.broadcast %415 : vector<1x32xf32> to vector<92x32xf32>
    %417 = arith.mulf %414, %416 : vector<92x32xf32>
    %c0_456 = arith.constant 0 : index
    %c0_457 = arith.constant 0 : index
    %418 = vector.load %arg19[%c0_456, %c0_457] : memref<1x32xf32, #tpu.memory_space<vmem>>, vector<1x32xf32>
    %419 = vector.broadcast %418 : vector<1x32xf32> to vector<92x32xf32>
    %420 = arith.addf %417, %419 : vector<92x32xf32>
    %cst_458 = arith.constant 0.000000e+00 : f32
    %421 = vector.broadcast %cst_458 : f32 to vector<92x32xf32>
    %422 = arith.maximumf %420, %421 : vector<92x32xf32>
    %c0_459 = arith.constant 0 : index
    %c0_460 = arith.constant 0 : index
    %423 = vector.load %arg35[%c0_459, %c0_460] : memref<94x32xf32, #tpu.memory_space<vmem>>, vector<92x32xf32>
    tpu.vector_store %arg35[%c0_459, %c0_460], %422 {strides = array<i32>} : memref<94x32xf32, #tpu.memory_space<vmem>>, vector<92x32xf32>,
    %c0_461 = arith.constant 0 : index
    %c0_462 = arith.constant 0 : index
    %424 = vector.load %arg35[%c0_461, %c0_462] : memref<94x32xf32, #tpu.memory_space<vmem>>, vector<3x32xf32>
    %cst_463 = arith.constant dense<0xFF800000> : vector<32xf32>
    %425 = vector.multi_reduction <maximumf>, %424, %cst_463 [0] : vector<3x32xf32> to vector<32xf32>
    %426 = vector.shape_cast %425 : vector<32xf32> to vector<1x32xf32>
    %c0_464 = arith.constant 0 : index
    %c0_465 = arith.constant 0 : index
    %427 = vector.load %arg36[%c0_464, %c0_465] : memref<30x32xf32, #tpu.memory_space<vmem>>, vector<1x32xf32>
    tpu.vector_store %arg36[%c0_464, %c0_465], %426 {strides = array<i32>} : memref<30x32xf32, #tpu.memory_space<vmem>>, vector<1x32xf32>,
    %c47_466 = arith.constant 47 : index
    %c0_467 = arith.constant 0 : index
    %428 = vector.load %arg35[%c47_466, %c0_467] : memref<94x32xf32, #tpu.memory_space<vmem>>, vector<3x32xf32>
    %cst_468 = arith.constant dense<0xFF800000> : vector<32xf32>
    %429 = vector.multi_reduction <maximumf>, %428, %cst_468 [0] : vector<3x32xf32> to vector<32xf32>
    %430 = vector.shape_cast %429 : vector<32xf32> to vector<1x32xf32>
    %c1_469 = arith.constant 1 : index
    %c0_470 = arith.constant 0 : index
    %431 = vector.load %arg36[%c1_469, %c0_470] : memref<30x32xf32, #tpu.memory_space<vmem>>, vector<1x32xf32>
    tpu.vector_store %arg36[%c1_469, %c0_470], %430 {strides = array<i32>} : memref<30x32xf32, #tpu.memory_space<vmem>>, vector<1x32xf32>,
    %c3_471 = arith.constant 3 : index
    %c0_472 = arith.constant 0 : index
    %432 = vector.load %arg35[%c3_471, %c0_472] : memref<94x32xf32, #tpu.memory_space<vmem>>, vector<3x32xf32>
    %cst_473 = arith.constant dense<0xFF800000> : vector<32xf32>
    %433 = vector.multi_reduction <maximumf>, %432, %cst_473 [0] : vector<3x32xf32> to vector<32xf32>
    %434 = vector.shape_cast %433 : vector<32xf32> to vector<1x32xf32>
    %c2_474 = arith.constant 2 : index
    %c0_475 = arith.constant 0 : index
    %435 = vector.load %arg36[%c2_474, %c0_475] : memref<30x32xf32, #tpu.memory_space<vmem>>, vector<1x32xf32>
    tpu.vector_store %arg36[%c2_474, %c0_475], %434 {strides = array<i32>} : memref<30x32xf32, #tpu.memory_space<vmem>>, vector<1x32xf32>,
    %c50_476 = arith.constant 50 : index
    %c0_477 = arith.constant 0 : index
    %436 = vector.load %arg35[%c50_476, %c0_477] : memref<94x32xf32, #tpu.memory_space<vmem>>, vector<3x32xf32>
    %cst_478 = arith.constant dense<0xFF800000> : vector<32xf32>
    %437 = vector.multi_reduction <maximumf>, %436, %cst_478 [0] : vector<3x32xf32> to vector<32xf32>
    %438 = vector.shape_cast %437 : vector<32xf32> to vector<1x32xf32>
    %c3_479 = arith.constant 3 : index
    %c0_480 = arith.constant 0 : index
    %439 = vector.load %arg36[%c3_479, %c0_480] : memref<30x32xf32, #tpu.memory_space<vmem>>, vector<1x32xf32>
    tpu.vector_store %arg36[%c3_479, %c0_480], %438 {strides = array<i32>} : memref<30x32xf32, #tpu.memory_space<vmem>>, vector<1x32xf32>,
    %c6_481 = arith.constant 6 : index
    %c0_482 = arith.constant 0 : index
    %440 = vector.load %arg35[%c6_481, %c0_482] : memref<94x32xf32, #tpu.memory_space<vmem>>, vector<3x32xf32>
    %cst_483 = arith.constant dense<0xFF800000> : vector<32xf32>
    %441 = vector.multi_reduction <maximumf>, %440, %cst_483 [0] : vector<3x32xf32> to vector<32xf32>
    %442 = vector.shape_cast %441 : vector<32xf32> to vector<1x32xf32>
    %c4_484 = arith.constant 4 : index
    %c0_485 = arith.constant 0 : index
    %443 = vector.load %arg36[%c4_484, %c0_485] : memref<30x32xf32, #tpu.memory_space<vmem>>, vector<1x32xf32>
    tpu.vector_store %arg36[%c4_484, %c0_485], %442 {strides = array<i32>} : memref<30x32xf32, #tpu.memory_space<vmem>>, vector<1x32xf32>,
    %c53 = arith.constant 53 : index
    %c0_486 = arith.constant 0 : index
    %444 = vector.load %arg35[%c53, %c0_486] : memref<94x32xf32, #tpu.memory_space<vmem>>, vector<3x32xf32>
    %cst_487 = arith.constant dense<0xFF800000> : vector<32xf32>
    %445 = vector.multi_reduction <maximumf>, %444, %cst_487 [0] : vector<3x32xf32> to vector<32xf32>
    %446 = vector.shape_cast %445 : vector<32xf32> to vector<1x32xf32>
    %c5_488 = arith.constant 5 : index
    %c0_489 = arith.constant 0 : index
    %447 = vector.load %arg36[%c5_488, %c0_489] : memref<30x32xf32, #tpu.memory_space<vmem>>, vector<1x32xf32>
    tpu.vector_store %arg36[%c5_488, %c0_489], %446 {strides = array<i32>} : memref<30x32xf32, #tpu.memory_space<vmem>>, vector<1x32xf32>,
    %c9_490 = arith.constant 9 : index
    %c0_491 = arith.constant 0 : index
    %448 = vector.load %arg35[%c9_490, %c0_491] : memref<94x32xf32, #tpu.memory_space<vmem>>, vector<3x32xf32>
    %cst_492 = arith.constant dense<0xFF800000> : vector<32xf32>
    %449 = vector.multi_reduction <maximumf>, %448, %cst_492 [0] : vector<3x32xf32> to vector<32xf32>
    %450 = vector.shape_cast %449 : vector<32xf32> to vector<1x32xf32>
    %c6_493 = arith.constant 6 : index
    %c0_494 = arith.constant 0 : index
    %451 = vector.load %arg36[%c6_493, %c0_494] : memref<30x32xf32, #tpu.memory_space<vmem>>, vector<1x32xf32>
    tpu.vector_store %arg36[%c6_493, %c0_494], %450 {strides = array<i32>} : memref<30x32xf32, #tpu.memory_space<vmem>>, vector<1x32xf32>,
    %c56_495 = arith.constant 56 : index
    %c0_496 = arith.constant 0 : index
    %452 = vector.load %arg35[%c56_495, %c0_496] : memref<94x32xf32, #tpu.memory_space<vmem>>, vector<3x32xf32>
    %cst_497 = arith.constant dense<0xFF800000> : vector<32xf32>
    %453 = vector.multi_reduction <maximumf>, %452, %cst_497 [0] : vector<3x32xf32> to vector<32xf32>
    %454 = vector.shape_cast %453 : vector<32xf32> to vector<1x32xf32>
    %c7_498 = arith.constant 7 : index
    %c0_499 = arith.constant 0 : index
    %455 = vector.load %arg36[%c7_498, %c0_499] : memref<30x32xf32, #tpu.memory_space<vmem>>, vector<1x32xf32>
    tpu.vector_store %arg36[%c7_498, %c0_499], %454 {strides = array<i32>} : memref<30x32xf32, #tpu.memory_space<vmem>>, vector<1x32xf32>,
    %c12_500 = arith.constant 12 : index
    %c0_501 = arith.constant 0 : index
    %456 = vector.load %arg35[%c12_500, %c0_501] : memref<94x32xf32, #tpu.memory_space<vmem>>, vector<3x32xf32>
    %cst_502 = arith.constant dense<0xFF800000> : vector<32xf32>
    %457 = vector.multi_reduction <maximumf>, %456, %cst_502 [0] : vector<3x32xf32> to vector<32xf32>
    %458 = vector.shape_cast %457 : vector<32xf32> to vector<1x32xf32>
    %c8_503 = arith.constant 8 : index
    %c0_504 = arith.constant 0 : index
    %459 = vector.load %arg36[%c8_503, %c0_504] : memref<30x32xf32, #tpu.memory_space<vmem>>, vector<1x32xf32>
    tpu.vector_store %arg36[%c8_503, %c0_504], %458 {strides = array<i32>} : memref<30x32xf32, #tpu.memory_space<vmem>>, vector<1x32xf32>,
    %c59 = arith.constant 59 : index
    %c0_505 = arith.constant 0 : index
    %460 = vector.load %arg35[%c59, %c0_505] : memref<94x32xf32, #tpu.memory_space<vmem>>, vector<3x32xf32>
    %cst_506 = arith.constant dense<0xFF800000> : vector<32xf32>
    %461 = vector.multi_reduction <maximumf>, %460, %cst_506 [0] : vector<3x32xf32> to vector<32xf32>
    %462 = vector.shape_cast %461 : vector<32xf32> to vector<1x32xf32>
    %c9_507 = arith.constant 9 : index
    %c0_508 = arith.constant 0 : index
    %463 = vector.load %arg36[%c9_507, %c0_508] : memref<30x32xf32, #tpu.memory_space<vmem>>, vector<1x32xf32>
    tpu.vector_store %arg36[%c9_507, %c0_508], %462 {strides = array<i32>} : memref<30x32xf32, #tpu.memory_space<vmem>>, vector<1x32xf32>,
    %c15_509 = arith.constant 15 : index
    %c0_510 = arith.constant 0 : index
    %464 = vector.load %arg35[%c15_509, %c0_510] : memref<94x32xf32, #tpu.memory_space<vmem>>, vector<3x32xf32>
    %cst_511 = arith.constant dense<0xFF800000> : vector<32xf32>
    %465 = vector.multi_reduction <maximumf>, %464, %cst_511 [0] : vector<3x32xf32> to vector<32xf32>
    %466 = vector.shape_cast %465 : vector<32xf32> to vector<1x32xf32>
    %c10_512 = arith.constant 10 : index
    %c0_513 = arith.constant 0 : index
    %467 = vector.load %arg36[%c10_512, %c0_513] : memref<30x32xf32, #tpu.memory_space<vmem>>, vector<1x32xf32>
    tpu.vector_store %arg36[%c10_512, %c0_513], %466 {strides = array<i32>} : memref<30x32xf32, #tpu.memory_space<vmem>>, vector<1x32xf32>,
    %c62_514 = arith.constant 62 : index
    %c0_515 = arith.constant 0 : index
    %468 = vector.load %arg35[%c62_514, %c0_515] : memref<94x32xf32, #tpu.memory_space<vmem>>, vector<3x32xf32>
    %cst_516 = arith.constant dense<0xFF800000> : vector<32xf32>
    %469 = vector.multi_reduction <maximumf>, %468, %cst_516 [0] : vector<3x32xf32> to vector<32xf32>
    %470 = vector.shape_cast %469 : vector<32xf32> to vector<1x32xf32>
    %c11_517 = arith.constant 11 : index
    %c0_518 = arith.constant 0 : index
    %471 = vector.load %arg36[%c11_517, %c0_518] : memref<30x32xf32, #tpu.memory_space<vmem>>, vector<1x32xf32>
    tpu.vector_store %arg36[%c11_517, %c0_518], %470 {strides = array<i32>} : memref<30x32xf32, #tpu.memory_space<vmem>>, vector<1x32xf32>,
    %c18_519 = arith.constant 18 : index
    %c0_520 = arith.constant 0 : index
    %472 = vector.load %arg35[%c18_519, %c0_520] : memref<94x32xf32, #tpu.memory_space<vmem>>, vector<3x32xf32>
    %cst_521 = arith.constant dense<0xFF800000> : vector<32xf32>
    %473 = vector.multi_reduction <maximumf>, %472, %cst_521 [0] : vector<3x32xf32> to vector<32xf32>
    %474 = vector.shape_cast %473 : vector<32xf32> to vector<1x32xf32>
    %c12_522 = arith.constant 12 : index
    %c0_523 = arith.constant 0 : index
    %475 = vector.load %arg36[%c12_522, %c0_523] : memref<30x32xf32, #tpu.memory_space<vmem>>, vector<1x32xf32>
    tpu.vector_store %arg36[%c12_522, %c0_523], %474 {strides = array<i32>} : memref<30x32xf32, #tpu.memory_space<vmem>>, vector<1x32xf32>,
    %c65 = arith.constant 65 : index
    %c0_524 = arith.constant 0 : index
    %476 = vector.load %arg35[%c65, %c0_524] : memref<94x32xf32, #tpu.memory_space<vmem>>, vector<3x32xf32>
    %cst_525 = arith.constant dense<0xFF800000> : vector<32xf32>
    %477 = vector.multi_reduction <maximumf>, %476, %cst_525 [0] : vector<3x32xf32> to vector<32xf32>
    %478 = vector.shape_cast %477 : vector<32xf32> to vector<1x32xf32>
    %c13_526 = arith.constant 13 : index
    %c0_527 = arith.constant 0 : index
    %479 = vector.load %arg36[%c13_526, %c0_527] : memref<30x32xf32, #tpu.memory_space<vmem>>, vector<1x32xf32>
    tpu.vector_store %arg36[%c13_526, %c0_527], %478 {strides = array<i32>} : memref<30x32xf32, #tpu.memory_space<vmem>>, vector<1x32xf32>,
    %c21_528 = arith.constant 21 : index
    %c0_529 = arith.constant 0 : index
    %480 = vector.load %arg35[%c21_528, %c0_529] : memref<94x32xf32, #tpu.memory_space<vmem>>, vector<3x32xf32>
    %cst_530 = arith.constant dense<0xFF800000> : vector<32xf32>
    %481 = vector.multi_reduction <maximumf>, %480, %cst_530 [0] : vector<3x32xf32> to vector<32xf32>
    %482 = vector.shape_cast %481 : vector<32xf32> to vector<1x32xf32>
    %c14_531 = arith.constant 14 : index
    %c0_532 = arith.constant 0 : index
    %483 = vector.load %arg36[%c14_531, %c0_532] : memref<30x32xf32, #tpu.memory_space<vmem>>, vector<1x32xf32>
    tpu.vector_store %arg36[%c14_531, %c0_532], %482 {strides = array<i32>} : memref<30x32xf32, #tpu.memory_space<vmem>>, vector<1x32xf32>,
    %c68 = arith.constant 68 : index
    %c0_533 = arith.constant 0 : index
    %484 = vector.load %arg35[%c68, %c0_533] : memref<94x32xf32, #tpu.memory_space<vmem>>, vector<3x32xf32>
    %cst_534 = arith.constant dense<0xFF800000> : vector<32xf32>
    %485 = vector.multi_reduction <maximumf>, %484, %cst_534 [0] : vector<3x32xf32> to vector<32xf32>
    %486 = vector.shape_cast %485 : vector<32xf32> to vector<1x32xf32>
    %c15_535 = arith.constant 15 : index
    %c0_536 = arith.constant 0 : index
    %487 = vector.load %arg36[%c15_535, %c0_536] : memref<30x32xf32, #tpu.memory_space<vmem>>, vector<1x32xf32>
    tpu.vector_store %arg36[%c15_535, %c0_536], %486 {strides = array<i32>} : memref<30x32xf32, #tpu.memory_space<vmem>>, vector<1x32xf32>,
    %c24_537 = arith.constant 24 : index
    %c0_538 = arith.constant 0 : index
    %488 = vector.load %arg35[%c24_537, %c0_538] : memref<94x32xf32, #tpu.memory_space<vmem>>, vector<3x32xf32>
    %cst_539 = arith.constant dense<0xFF800000> : vector<32xf32>
    %489 = vector.multi_reduction <maximumf>, %488, %cst_539 [0] : vector<3x32xf32> to vector<32xf32>
    %490 = vector.shape_cast %489 : vector<32xf32> to vector<1x32xf32>
    %c16_540 = arith.constant 16 : index
    %c0_541 = arith.constant 0 : index
    %491 = vector.load %arg36[%c16_540, %c0_541] : memref<30x32xf32, #tpu.memory_space<vmem>>, vector<1x32xf32>
    tpu.vector_store %arg36[%c16_540, %c0_541], %490 {strides = array<i32>} : memref<30x32xf32, #tpu.memory_space<vmem>>, vector<1x32xf32>,
    %c71 = arith.constant 71 : index
    %c0_542 = arith.constant 0 : index
    %492 = vector.load %arg35[%c71, %c0_542] : memref<94x32xf32, #tpu.memory_space<vmem>>, vector<3x32xf32>
    %cst_543 = arith.constant dense<0xFF800000> : vector<32xf32>
    %493 = vector.multi_reduction <maximumf>, %492, %cst_543 [0] : vector<3x32xf32> to vector<32xf32>
    %494 = vector.shape_cast %493 : vector<32xf32> to vector<1x32xf32>
    %c17_544 = arith.constant 17 : index
    %c0_545 = arith.constant 0 : index
    %495 = vector.load %arg36[%c17_544, %c0_545] : memref<30x32xf32, #tpu.memory_space<vmem>>, vector<1x32xf32>
    tpu.vector_store %arg36[%c17_544, %c0_545], %494 {strides = array<i32>} : memref<30x32xf32, #tpu.memory_space<vmem>>, vector<1x32xf32>,
    %c27_546 = arith.constant 27 : index
    %c0_547 = arith.constant 0 : index
    %496 = vector.load %arg35[%c27_546, %c0_547] : memref<94x32xf32, #tpu.memory_space<vmem>>, vector<3x32xf32>
    %cst_548 = arith.constant dense<0xFF800000> : vector<32xf32>
    %497 = vector.multi_reduction <maximumf>, %496, %cst_548 [0] : vector<3x32xf32> to vector<32xf32>
    %498 = vector.shape_cast %497 : vector<32xf32> to vector<1x32xf32>
    %c18_549 = arith.constant 18 : index
    %c0_550 = arith.constant 0 : index
    %499 = vector.load %arg36[%c18_549, %c0_550] : memref<30x32xf32, #tpu.memory_space<vmem>>, vector<1x32xf32>
    tpu.vector_store %arg36[%c18_549, %c0_550], %498 {strides = array<i32>} : memref<30x32xf32, #tpu.memory_space<vmem>>, vector<1x32xf32>,
    %c74 = arith.constant 74 : index
    %c0_551 = arith.constant 0 : index
    %500 = vector.load %arg35[%c74, %c0_551] : memref<94x32xf32, #tpu.memory_space<vmem>>, vector<3x32xf32>
    %cst_552 = arith.constant dense<0xFF800000> : vector<32xf32>
    %501 = vector.multi_reduction <maximumf>, %500, %cst_552 [0] : vector<3x32xf32> to vector<32xf32>
    %502 = vector.shape_cast %501 : vector<32xf32> to vector<1x32xf32>
    %c19_553 = arith.constant 19 : index
    %c0_554 = arith.constant 0 : index
    %503 = vector.load %arg36[%c19_553, %c0_554] : memref<30x32xf32, #tpu.memory_space<vmem>>, vector<1x32xf32>
    tpu.vector_store %arg36[%c19_553, %c0_554], %502 {strides = array<i32>} : memref<30x32xf32, #tpu.memory_space<vmem>>, vector<1x32xf32>,
    %c30 = arith.constant 30 : index
    %c0_555 = arith.constant 0 : index
    %504 = vector.load %arg35[%c30, %c0_555] : memref<94x32xf32, #tpu.memory_space<vmem>>, vector<3x32xf32>
    %cst_556 = arith.constant dense<0xFF800000> : vector<32xf32>
    %505 = vector.multi_reduction <maximumf>, %504, %cst_556 [0] : vector<3x32xf32> to vector<32xf32>
    %506 = vector.shape_cast %505 : vector<32xf32> to vector<1x32xf32>
    %c20_557 = arith.constant 20 : index
    %c0_558 = arith.constant 0 : index
    %507 = vector.load %arg36[%c20_557, %c0_558] : memref<30x32xf32, #tpu.memory_space<vmem>>, vector<1x32xf32>
    tpu.vector_store %arg36[%c20_557, %c0_558], %506 {strides = array<i32>} : memref<30x32xf32, #tpu.memory_space<vmem>>, vector<1x32xf32>,
    %c77 = arith.constant 77 : index
    %c0_559 = arith.constant 0 : index
    %508 = vector.load %arg35[%c77, %c0_559] : memref<94x32xf32, #tpu.memory_space<vmem>>, vector<3x32xf32>
    %cst_560 = arith.constant dense<0xFF800000> : vector<32xf32>
    %509 = vector.multi_reduction <maximumf>, %508, %cst_560 [0] : vector<3x32xf32> to vector<32xf32>
    %510 = vector.shape_cast %509 : vector<32xf32> to vector<1x32xf32>
    %c21_561 = arith.constant 21 : index
    %c0_562 = arith.constant 0 : index
    %511 = vector.load %arg36[%c21_561, %c0_562] : memref<30x32xf32, #tpu.memory_space<vmem>>, vector<1x32xf32>
    tpu.vector_store %arg36[%c21_561, %c0_562], %510 {strides = array<i32>} : memref<30x32xf32, #tpu.memory_space<vmem>>, vector<1x32xf32>,
    %c33 = arith.constant 33 : index
    %c0_563 = arith.constant 0 : index
    %512 = vector.load %arg35[%c33, %c0_563] : memref<94x32xf32, #tpu.memory_space<vmem>>, vector<3x32xf32>
    %cst_564 = arith.constant dense<0xFF800000> : vector<32xf32>
    %513 = vector.multi_reduction <maximumf>, %512, %cst_564 [0] : vector<3x32xf32> to vector<32xf32>
    %514 = vector.shape_cast %513 : vector<32xf32> to vector<1x32xf32>
    %c22_565 = arith.constant 22 : index
    %c0_566 = arith.constant 0 : index
    %515 = vector.load %arg36[%c22_565, %c0_566] : memref<30x32xf32, #tpu.memory_space<vmem>>, vector<1x32xf32>
    tpu.vector_store %arg36[%c22_565, %c0_566], %514 {strides = array<i32>} : memref<30x32xf32, #tpu.memory_space<vmem>>, vector<1x32xf32>,
    %c80 = arith.constant 80 : index
    %c0_567 = arith.constant 0 : index
    %516 = vector.load %arg35[%c80, %c0_567] : memref<94x32xf32, #tpu.memory_space<vmem>>, vector<3x32xf32>
    %cst_568 = arith.constant dense<0xFF800000> : vector<32xf32>
    %517 = vector.multi_reduction <maximumf>, %516, %cst_568 [0] : vector<3x32xf32> to vector<32xf32>
    %518 = vector.shape_cast %517 : vector<32xf32> to vector<1x32xf32>
    %c23_569 = arith.constant 23 : index
    %c0_570 = arith.constant 0 : index
    %519 = vector.load %arg36[%c23_569, %c0_570] : memref<30x32xf32, #tpu.memory_space<vmem>>, vector<1x32xf32>
    tpu.vector_store %arg36[%c23_569, %c0_570], %518 {strides = array<i32>} : memref<30x32xf32, #tpu.memory_space<vmem>>, vector<1x32xf32>,
    %c36_571 = arith.constant 36 : index
    %c0_572 = arith.constant 0 : index
    %520 = vector.load %arg35[%c36_571, %c0_572] : memref<94x32xf32, #tpu.memory_space<vmem>>, vector<3x32xf32>
    %cst_573 = arith.constant dense<0xFF800000> : vector<32xf32>
    %521 = vector.multi_reduction <maximumf>, %520, %cst_573 [0] : vector<3x32xf32> to vector<32xf32>
    %522 = vector.shape_cast %521 : vector<32xf32> to vector<1x32xf32>
    %c24_574 = arith.constant 24 : index
    %c0_575 = arith.constant 0 : index
    %523 = vector.load %arg36[%c24_574, %c0_575] : memref<30x32xf32, #tpu.memory_space<vmem>>, vector<1x32xf32>
    tpu.vector_store %arg36[%c24_574, %c0_575], %522 {strides = array<i32>} : memref<30x32xf32, #tpu.memory_space<vmem>>, vector<1x32xf32>,
    %c83 = arith.constant 83 : index
    %c0_576 = arith.constant 0 : index
    %524 = vector.load %arg35[%c83, %c0_576] : memref<94x32xf32, #tpu.memory_space<vmem>>, vector<3x32xf32>
    %cst_577 = arith.constant dense<0xFF800000> : vector<32xf32>
    %525 = vector.multi_reduction <maximumf>, %524, %cst_577 [0] : vector<3x32xf32> to vector<32xf32>
    %526 = vector.shape_cast %525 : vector<32xf32> to vector<1x32xf32>
    %c25_578 = arith.constant 25 : index
    %c0_579 = arith.constant 0 : index
    %527 = vector.load %arg36[%c25_578, %c0_579] : memref<30x32xf32, #tpu.memory_space<vmem>>, vector<1x32xf32>
    tpu.vector_store %arg36[%c25_578, %c0_579], %526 {strides = array<i32>} : memref<30x32xf32, #tpu.memory_space<vmem>>, vector<1x32xf32>,
    %c39 = arith.constant 39 : index
    %c0_580 = arith.constant 0 : index
    %528 = vector.load %arg35[%c39, %c0_580] : memref<94x32xf32, #tpu.memory_space<vmem>>, vector<3x32xf32>
    %cst_581 = arith.constant dense<0xFF800000> : vector<32xf32>
    %529 = vector.multi_reduction <maximumf>, %528, %cst_581 [0] : vector<3x32xf32> to vector<32xf32>
    %530 = vector.shape_cast %529 : vector<32xf32> to vector<1x32xf32>
    %c26_582 = arith.constant 26 : index
    %c0_583 = arith.constant 0 : index
    %531 = vector.load %arg36[%c26_582, %c0_583] : memref<30x32xf32, #tpu.memory_space<vmem>>, vector<1x32xf32>
    tpu.vector_store %arg36[%c26_582, %c0_583], %530 {strides = array<i32>} : memref<30x32xf32, #tpu.memory_space<vmem>>, vector<1x32xf32>,
    %c86 = arith.constant 86 : index
    %c0_584 = arith.constant 0 : index
    %532 = vector.load %arg35[%c86, %c0_584] : memref<94x32xf32, #tpu.memory_space<vmem>>, vector<3x32xf32>
    %cst_585 = arith.constant dense<0xFF800000> : vector<32xf32>
    %533 = vector.multi_reduction <maximumf>, %532, %cst_585 [0] : vector<3x32xf32> to vector<32xf32>
    %534 = vector.shape_cast %533 : vector<32xf32> to vector<1x32xf32>
    %c27_586 = arith.constant 27 : index
    %c0_587 = arith.constant 0 : index
    %535 = vector.load %arg36[%c27_586, %c0_587] : memref<30x32xf32, #tpu.memory_space<vmem>>, vector<1x32xf32>
    tpu.vector_store %arg36[%c27_586, %c0_587], %534 {strides = array<i32>} : memref<30x32xf32, #tpu.memory_space<vmem>>, vector<1x32xf32>,
    %c42_588 = arith.constant 42 : index
    %c0_589 = arith.constant 0 : index
    %536 = vector.load %arg35[%c42_588, %c0_589] : memref<94x32xf32, #tpu.memory_space<vmem>>, vector<3x32xf32>
    %cst_590 = arith.constant dense<0xFF800000> : vector<32xf32>
    %537 = vector.multi_reduction <maximumf>, %536, %cst_590 [0] : vector<3x32xf32> to vector<32xf32>
    %538 = vector.shape_cast %537 : vector<32xf32> to vector<1x32xf32>
    %c28_591 = arith.constant 28 : index
    %c0_592 = arith.constant 0 : index
    %539 = vector.load %arg36[%c28_591, %c0_592] : memref<30x32xf32, #tpu.memory_space<vmem>>, vector<1x32xf32>
    tpu.vector_store %arg36[%c28_591, %c0_592], %538 {strides = array<i32>} : memref<30x32xf32, #tpu.memory_space<vmem>>, vector<1x32xf32>,
    %c89 = arith.constant 89 : index
    %c0_593 = arith.constant 0 : index
    %540 = vector.load %arg35[%c89, %c0_593] : memref<94x32xf32, #tpu.memory_space<vmem>>, vector<3x32xf32>
    %cst_594 = arith.constant dense<0xFF800000> : vector<32xf32>
    %541 = vector.multi_reduction <maximumf>, %540, %cst_594 [0] : vector<3x32xf32> to vector<32xf32>
    %542 = vector.shape_cast %541 : vector<32xf32> to vector<1x32xf32>
    %c29_595 = arith.constant 29 : index
    %c0_596 = arith.constant 0 : index
    %543 = vector.load %arg36[%c29_595, %c0_596] : memref<30x32xf32, #tpu.memory_space<vmem>>, vector<1x32xf32>
    tpu.vector_store %arg36[%c29_595, %c0_596], %542 {strides = array<i32>} : memref<30x32xf32, #tpu.memory_space<vmem>>, vector<1x32xf32>,
    %cst_597 = arith.constant 0.000000e+00 : f32
    %544 = vector.broadcast %cst_597 : f32 to vector<2x32xf32>
    %c0_598 = arith.constant 0 : index
    %c0_599 = arith.constant 0 : index
    %545 = vector.load %arg36[%c0_598, %c0_599] : memref<30x32xf32, #tpu.memory_space<vmem>>, vector<2x32xf32>
    %c0_600 = arith.constant 0 : index
    %c0_601 = arith.constant 0 : index
    %c0_602 = arith.constant 0 : index
    %546 = vector.load %arg23[%c0_600, %c0_601, %c0_602] : memref<15x32x32xf32, #tpu.memory_space<vmem>>, vector<1x32x32xf32>
    %547 = vector.shape_cast %546 : vector<1x32x32xf32> to vector<32x32xf32>
    %cst_603 = arith.constant dense<0.000000e+00> : vector<2x32xf32>
    %548 = tpu.matmul %545, %547, %cst_603 {dimension_numbers = #tpu.dot_dimension_numbers<[1], [0], [0], [1], [0, 0, 1, 1], [], []>} : vector<2x32xf32>, vector<32x32xf32>, vector<2x32xf32> -> vector<2x32xf32>
    %549 = arith.addf %544, %548 : vector<2x32xf32>
    %c2_604 = arith.constant 2 : index
    %c0_605 = arith.constant 0 : index
    %550 = vector.load %arg36[%c2_604, %c0_605] : memref<30x32xf32, #tpu.memory_space<vmem>>, vector<2x32xf32>
    %c1_606 = arith.constant 1 : index
    %c0_607 = arith.constant 0 : index
    %c0_608 = arith.constant 0 : index
    %551 = vector.load %arg23[%c1_606, %c0_607, %c0_608] : memref<15x32x32xf32, #tpu.memory_space<vmem>>, vector<1x32x32xf32>
    %552 = vector.shape_cast %551 : vector<1x32x32xf32> to vector<32x32xf32>
    %cst_609 = arith.constant dense<0.000000e+00> : vector<2x32xf32>
    %553 = tpu.matmul %550, %552, %cst_609 {dimension_numbers = #tpu.dot_dimension_numbers<[1], [0], [0], [1], [0, 0, 1, 1], [], []>} : vector<2x32xf32>, vector<32x32xf32>, vector<2x32xf32> -> vector<2x32xf32>
    %554 = arith.addf %549, %553 : vector<2x32xf32>
    %c4_610 = arith.constant 4 : index
    %c0_611 = arith.constant 0 : index
    %555 = vector.load %arg36[%c4_610, %c0_611] : memref<30x32xf32, #tpu.memory_space<vmem>>, vector<2x32xf32>
    %c2_612 = arith.constant 2 : index
    %c0_613 = arith.constant 0 : index
    %c0_614 = arith.constant 0 : index
    %556 = vector.load %arg23[%c2_612, %c0_613, %c0_614] : memref<15x32x32xf32, #tpu.memory_space<vmem>>, vector<1x32x32xf32>
    %557 = vector.shape_cast %556 : vector<1x32x32xf32> to vector<32x32xf32>
    %cst_615 = arith.constant dense<0.000000e+00> : vector<2x32xf32>
    %558 = tpu.matmul %555, %557, %cst_615 {dimension_numbers = #tpu.dot_dimension_numbers<[1], [0], [0], [1], [0, 0, 1, 1], [], []>} : vector<2x32xf32>, vector<32x32xf32>, vector<2x32xf32> -> vector<2x32xf32>
    %559 = arith.addf %554, %558 : vector<2x32xf32>
    %c6_616 = arith.constant 6 : index
    %c0_617 = arith.constant 0 : index
    %560 = vector.load %arg36[%c6_616, %c0_617] : memref<30x32xf32, #tpu.memory_space<vmem>>, vector<2x32xf32>
    %c3_618 = arith.constant 3 : index
    %c0_619 = arith.constant 0 : index
    %c0_620 = arith.constant 0 : index
    %561 = vector.load %arg23[%c3_618, %c0_619, %c0_620] : memref<15x32x32xf32, #tpu.memory_space<vmem>>, vector<1x32x32xf32>
    %562 = vector.shape_cast %561 : vector<1x32x32xf32> to vector<32x32xf32>
    %cst_621 = arith.constant dense<0.000000e+00> : vector<2x32xf32>
    %563 = tpu.matmul %560, %562, %cst_621 {dimension_numbers = #tpu.dot_dimension_numbers<[1], [0], [0], [1], [0, 0, 1, 1], [], []>} : vector<2x32xf32>, vector<32x32xf32>, vector<2x32xf32> -> vector<2x32xf32>
    %564 = arith.addf %559, %563 : vector<2x32xf32>
    %c8_622 = arith.constant 8 : index
    %c0_623 = arith.constant 0 : index
    %565 = vector.load %arg36[%c8_622, %c0_623] : memref<30x32xf32, #tpu.memory_space<vmem>>, vector<2x32xf32>
    %c4_624 = arith.constant 4 : index
    %c0_625 = arith.constant 0 : index
    %c0_626 = arith.constant 0 : index
    %566 = vector.load %arg23[%c4_624, %c0_625, %c0_626] : memref<15x32x32xf32, #tpu.memory_space<vmem>>, vector<1x32x32xf32>
    %567 = vector.shape_cast %566 : vector<1x32x32xf32> to vector<32x32xf32>
    %cst_627 = arith.constant dense<0.000000e+00> : vector<2x32xf32>
    %568 = tpu.matmul %565, %567, %cst_627 {dimension_numbers = #tpu.dot_dimension_numbers<[1], [0], [0], [1], [0, 0, 1, 1], [], []>} : vector<2x32xf32>, vector<32x32xf32>, vector<2x32xf32> -> vector<2x32xf32>
    %569 = arith.addf %564, %568 : vector<2x32xf32>
    %c10_628 = arith.constant 10 : index
    %c0_629 = arith.constant 0 : index
    %570 = vector.load %arg36[%c10_628, %c0_629] : memref<30x32xf32, #tpu.memory_space<vmem>>, vector<2x32xf32>
    %c5_630 = arith.constant 5 : index
    %c0_631 = arith.constant 0 : index
    %c0_632 = arith.constant 0 : index
    %571 = vector.load %arg23[%c5_630, %c0_631, %c0_632] : memref<15x32x32xf32, #tpu.memory_space<vmem>>, vector<1x32x32xf32>
    %572 = vector.shape_cast %571 : vector<1x32x32xf32> to vector<32x32xf32>
    %cst_633 = arith.constant dense<0.000000e+00> : vector<2x32xf32>
    %573 = tpu.matmul %570, %572, %cst_633 {dimension_numbers = #tpu.dot_dimension_numbers<[1], [0], [0], [1], [0, 0, 1, 1], [], []>} : vector<2x32xf32>, vector<32x32xf32>, vector<2x32xf32> -> vector<2x32xf32>
    %574 = arith.addf %569, %573 : vector<2x32xf32>
    %c12_634 = arith.constant 12 : index
    %c0_635 = arith.constant 0 : index
    %575 = vector.load %arg36[%c12_634, %c0_635] : memref<30x32xf32, #tpu.memory_space<vmem>>, vector<2x32xf32>
    %c6_636 = arith.constant 6 : index
    %c0_637 = arith.constant 0 : index
    %c0_638 = arith.constant 0 : index
    %576 = vector.load %arg23[%c6_636, %c0_637, %c0_638] : memref<15x32x32xf32, #tpu.memory_space<vmem>>, vector<1x32x32xf32>
    %577 = vector.shape_cast %576 : vector<1x32x32xf32> to vector<32x32xf32>
    %cst_639 = arith.constant dense<0.000000e+00> : vector<2x32xf32>
    %578 = tpu.matmul %575, %577, %cst_639 {dimension_numbers = #tpu.dot_dimension_numbers<[1], [0], [0], [1], [0, 0, 1, 1], [], []>} : vector<2x32xf32>, vector<32x32xf32>, vector<2x32xf32> -> vector<2x32xf32>
    %579 = arith.addf %574, %578 : vector<2x32xf32>
    %c14_640 = arith.constant 14 : index
    %c0_641 = arith.constant 0 : index
    %580 = vector.load %arg36[%c14_640, %c0_641] : memref<30x32xf32, #tpu.memory_space<vmem>>, vector<2x32xf32>
    %c7_642 = arith.constant 7 : index
    %c0_643 = arith.constant 0 : index
    %c0_644 = arith.constant 0 : index
    %581 = vector.load %arg23[%c7_642, %c0_643, %c0_644] : memref<15x32x32xf32, #tpu.memory_space<vmem>>, vector<1x32x32xf32>
    %582 = vector.shape_cast %581 : vector<1x32x32xf32> to vector<32x32xf32>
    %cst_645 = arith.constant dense<0.000000e+00> : vector<2x32xf32>
    %583 = tpu.matmul %580, %582, %cst_645 {dimension_numbers = #tpu.dot_dimension_numbers<[1], [0], [0], [1], [0, 0, 1, 1], [], []>} : vector<2x32xf32>, vector<32x32xf32>, vector<2x32xf32> -> vector<2x32xf32>
    %584 = arith.addf %579, %583 : vector<2x32xf32>
    %c16_646 = arith.constant 16 : index
    %c0_647 = arith.constant 0 : index
    %585 = vector.load %arg36[%c16_646, %c0_647] : memref<30x32xf32, #tpu.memory_space<vmem>>, vector<2x32xf32>
    %c8_648 = arith.constant 8 : index
    %c0_649 = arith.constant 0 : index
    %c0_650 = arith.constant 0 : index
    %586 = vector.load %arg23[%c8_648, %c0_649, %c0_650] : memref<15x32x32xf32, #tpu.memory_space<vmem>>, vector<1x32x32xf32>
    %587 = vector.shape_cast %586 : vector<1x32x32xf32> to vector<32x32xf32>
    %cst_651 = arith.constant dense<0.000000e+00> : vector<2x32xf32>
    %588 = tpu.matmul %585, %587, %cst_651 {dimension_numbers = #tpu.dot_dimension_numbers<[1], [0], [0], [1], [0, 0, 1, 1], [], []>} : vector<2x32xf32>, vector<32x32xf32>, vector<2x32xf32> -> vector<2x32xf32>
    %589 = arith.addf %584, %588 : vector<2x32xf32>
    %c18_652 = arith.constant 18 : index
    %c0_653 = arith.constant 0 : index
    %590 = vector.load %arg36[%c18_652, %c0_653] : memref<30x32xf32, #tpu.memory_space<vmem>>, vector<2x32xf32>
    %c9_654 = arith.constant 9 : index
    %c0_655 = arith.constant 0 : index
    %c0_656 = arith.constant 0 : index
    %591 = vector.load %arg23[%c9_654, %c0_655, %c0_656] : memref<15x32x32xf32, #tpu.memory_space<vmem>>, vector<1x32x32xf32>
    %592 = vector.shape_cast %591 : vector<1x32x32xf32> to vector<32x32xf32>
    %cst_657 = arith.constant dense<0.000000e+00> : vector<2x32xf32>
    %593 = tpu.matmul %590, %592, %cst_657 {dimension_numbers = #tpu.dot_dimension_numbers<[1], [0], [0], [1], [0, 0, 1, 1], [], []>} : vector<2x32xf32>, vector<32x32xf32>, vector<2x32xf32> -> vector<2x32xf32>
    %594 = arith.addf %589, %593 : vector<2x32xf32>
    %c20_658 = arith.constant 20 : index
    %c0_659 = arith.constant 0 : index
    %595 = vector.load %arg36[%c20_658, %c0_659] : memref<30x32xf32, #tpu.memory_space<vmem>>, vector<2x32xf32>
    %c10_660 = arith.constant 10 : index
    %c0_661 = arith.constant 0 : index
    %c0_662 = arith.constant 0 : index
    %596 = vector.load %arg23[%c10_660, %c0_661, %c0_662] : memref<15x32x32xf32, #tpu.memory_space<vmem>>, vector<1x32x32xf32>
    %597 = vector.shape_cast %596 : vector<1x32x32xf32> to vector<32x32xf32>
    %cst_663 = arith.constant dense<0.000000e+00> : vector<2x32xf32>
    %598 = tpu.matmul %595, %597, %cst_663 {dimension_numbers = #tpu.dot_dimension_numbers<[1], [0], [0], [1], [0, 0, 1, 1], [], []>} : vector<2x32xf32>, vector<32x32xf32>, vector<2x32xf32> -> vector<2x32xf32>
    %599 = arith.addf %594, %598 : vector<2x32xf32>
    %c22_664 = arith.constant 22 : index
    %c0_665 = arith.constant 0 : index
    %600 = vector.load %arg36[%c22_664, %c0_665] : memref<30x32xf32, #tpu.memory_space<vmem>>, vector<2x32xf32>
    %c11_666 = arith.constant 11 : index
    %c0_667 = arith.constant 0 : index
    %c0_668 = arith.constant 0 : index
    %601 = vector.load %arg23[%c11_666, %c0_667, %c0_668] : memref<15x32x32xf32, #tpu.memory_space<vmem>>, vector<1x32x32xf32>
    %602 = vector.shape_cast %601 : vector<1x32x32xf32> to vector<32x32xf32>
    %cst_669 = arith.constant dense<0.000000e+00> : vector<2x32xf32>
    %603 = tpu.matmul %600, %602, %cst_669 {dimension_numbers = #tpu.dot_dimension_numbers<[1], [0], [0], [1], [0, 0, 1, 1], [], []>} : vector<2x32xf32>, vector<32x32xf32>, vector<2x32xf32> -> vector<2x32xf32>
    %604 = arith.addf %599, %603 : vector<2x32xf32>
    %c24_670 = arith.constant 24 : index
    %c0_671 = arith.constant 0 : index
    %605 = vector.load %arg36[%c24_670, %c0_671] : memref<30x32xf32, #tpu.memory_space<vmem>>, vector<2x32xf32>
    %c12_672 = arith.constant 12 : index
    %c0_673 = arith.constant 0 : index
    %c0_674 = arith.constant 0 : index
    %606 = vector.load %arg23[%c12_672, %c0_673, %c0_674] : memref<15x32x32xf32, #tpu.memory_space<vmem>>, vector<1x32x32xf32>
    %607 = vector.shape_cast %606 : vector<1x32x32xf32> to vector<32x32xf32>
    %cst_675 = arith.constant dense<0.000000e+00> : vector<2x32xf32>
    %608 = tpu.matmul %605, %607, %cst_675 {dimension_numbers = #tpu.dot_dimension_numbers<[1], [0], [0], [1], [0, 0, 1, 1], [], []>} : vector<2x32xf32>, vector<32x32xf32>, vector<2x32xf32> -> vector<2x32xf32>
    %609 = arith.addf %604, %608 : vector<2x32xf32>
    %c26_676 = arith.constant 26 : index
    %c0_677 = arith.constant 0 : index
    %610 = vector.load %arg36[%c26_676, %c0_677] : memref<30x32xf32, #tpu.memory_space<vmem>>, vector<2x32xf32>
    %c13_678 = arith.constant 13 : index
    %c0_679 = arith.constant 0 : index
    %c0_680 = arith.constant 0 : index
    %611 = vector.load %arg23[%c13_678, %c0_679, %c0_680] : memref<15x32x32xf32, #tpu.memory_space<vmem>>, vector<1x32x32xf32>
    %612 = vector.shape_cast %611 : vector<1x32x32xf32> to vector<32x32xf32>
    %cst_681 = arith.constant dense<0.000000e+00> : vector<2x32xf32>
    %613 = tpu.matmul %610, %612, %cst_681 {dimension_numbers = #tpu.dot_dimension_numbers<[1], [0], [0], [1], [0, 0, 1, 1], [], []>} : vector<2x32xf32>, vector<32x32xf32>, vector<2x32xf32> -> vector<2x32xf32>
    %614 = arith.addf %609, %613 : vector<2x32xf32>
    %c28_682 = arith.constant 28 : index
    %c0_683 = arith.constant 0 : index
    %615 = vector.load %arg36[%c28_682, %c0_683] : memref<30x32xf32, #tpu.memory_space<vmem>>, vector<2x32xf32>
    %c14_684 = arith.constant 14 : index
    %c0_685 = arith.constant 0 : index
    %c0_686 = arith.constant 0 : index
    %616 = vector.load %arg23[%c14_684, %c0_685, %c0_686] : memref<15x32x32xf32, #tpu.memory_space<vmem>>, vector<1x32x32xf32>
    %617 = vector.shape_cast %616 : vector<1x32x32xf32> to vector<32x32xf32>
    %cst_687 = arith.constant dense<0.000000e+00> : vector<2x32xf32>
    %618 = tpu.matmul %615, %617, %cst_687 {dimension_numbers = #tpu.dot_dimension_numbers<[1], [0], [0], [1], [0, 0, 1, 1], [], []>} : vector<2x32xf32>, vector<32x32xf32>, vector<2x32xf32> -> vector<2x32xf32>
    %619 = arith.addf %614, %618 : vector<2x32xf32>
    %c0_688 = arith.constant 0 : index
    %c0_689 = arith.constant 0 : index
    %620 = vector.load %arg24[%c0_688, %c0_689] : memref<1x32xf32, #tpu.memory_space<vmem>>, vector<1x32xf32>
    %621 = vector.broadcast %620 : vector<1x32xf32> to vector<2x32xf32>
    %622 = arith.mulf %619, %621 : vector<2x32xf32>
    %c0_690 = arith.constant 0 : index
    %c0_691 = arith.constant 0 : index
    %623 = vector.load %arg25[%c0_690, %c0_691] : memref<1x32xf32, #tpu.memory_space<vmem>>, vector<1x32xf32>
    %624 = vector.broadcast %623 : vector<1x32xf32> to vector<2x32xf32>
    %625 = arith.addf %622, %624 : vector<2x32xf32>
    %cst_692 = arith.constant 0.000000e+00 : f32
    %626 = vector.broadcast %cst_692 : f32 to vector<2x32xf32>
    %627 = arith.maximumf %625, %626 : vector<2x32xf32>
    %c0_693 = arith.constant 0 : index
    %c0_694 = arith.constant 0 : index
    %628 = vector.load %arg26[%c0_693, %c0_694] : memref<32x32xf32, #tpu.memory_space<vmem>>, vector<32x32xf32>
    %cst_695 = arith.constant dense<0.000000e+00> : vector<2x32xf32>
    %629 = tpu.matmul %328, %628, %cst_695 {dimension_numbers = #tpu.dot_dimension_numbers<[1], [0], [0], [1], [0, 0, 1, 1], [], []>} : vector<2x32xf32>, vector<32x32xf32>, vector<2x32xf32> -> vector<2x32xf32>
    %c0_696 = arith.constant 0 : index
    %c0_697 = arith.constant 0 : index
    %630 = vector.load %arg27[%c0_696, %c0_697] : memref<32x32xf32, #tpu.memory_space<vmem>>, vector<32x32xf32>
    %cst_698 = arith.constant dense<0.000000e+00> : vector<2x32xf32>
    %631 = tpu.matmul %627, %630, %cst_698 {dimension_numbers = #tpu.dot_dimension_numbers<[1], [0], [0], [1], [0, 0, 1, 1], [], []>} : vector<2x32xf32>, vector<32x32xf32>, vector<2x32xf32> -> vector<2x32xf32>
    %632 = arith.addf %629, %631 : vector<2x32xf32>
    %c0_699 = arith.constant 0 : index
    %c0_700 = arith.constant 0 : index
    %633 = vector.load %arg28[%c0_699, %c0_700] : memref<1x32xf32, #tpu.memory_space<vmem>>, vector<1x32xf32>
    %634 = vector.broadcast %633 : vector<1x32xf32> to vector<2x32xf32>
    %635 = arith.mulf %632, %634 : vector<2x32xf32>
    %c0_701 = arith.constant 0 : index
    %c0_702 = arith.constant 0 : index
    %636 = vector.load %arg29[%c0_701, %c0_702] : memref<1x32xf32, #tpu.memory_space<vmem>>, vector<1x32xf32>
    %637 = vector.broadcast %636 : vector<1x32xf32> to vector<2x32xf32>
    %638 = arith.addf %635, %637 : vector<2x32xf32>
    %cst_703 = arith.constant 0.000000e+00 : f32
    %639 = vector.broadcast %cst_703 : f32 to vector<2x32xf32>
    %640 = arith.maximumf %638, %639 : vector<2x32xf32>
    %c0_704 = arith.constant 0 : index
    %c0_705 = arith.constant 0 : index
    %641 = vector.load %arg30[%c0_704, %c0_705] : memref<32x10xf32, #tpu.memory_space<vmem>>, vector<32x10xf32>
    %cst_706 = arith.constant dense<0.000000e+00> : vector<2x10xf32>
    %642 = tpu.matmul %640, %641, %cst_706 {dimension_numbers = #tpu.dot_dimension_numbers<[1], [0], [0], [1], [0, 0, 1, 1], [], []>} : vector<2x32xf32>, vector<32x10xf32>, vector<2x10xf32> -> vector<2x10xf32>
    %c0_707 = arith.constant 0 : index
    %c0_708 = arith.constant 0 : index
    %643 = vector.load %arg31[%c0_707, %c0_708] : memref<1x10xf32, #tpu.memory_space<vmem>>, vector<1x10xf32>
    %644 = vector.broadcast %643 : vector<1x10xf32> to vector<2x10xf32>
    %645 = arith.mulf %642, %644 : vector<2x10xf32>
    %c0_709 = arith.constant 0 : index
    %c0_710 = arith.constant 0 : index
    %646 = vector.load %arg32[%c0_709, %c0_710] : memref<1x10xf32, #tpu.memory_space<vmem>>, vector<1x10xf32>
    %647 = vector.broadcast %646 : vector<1x10xf32> to vector<2x10xf32>
    %648 = arith.addf %645, %647 : vector<2x10xf32>
    %c0_711 = arith.constant 0 : index
    %c0_712 = arith.constant 0 : index
    %649 = vector.load %arg33[%c0_711, %c0_712] : memref<2x10xf32, #tpu.memory_space<vmem>>, vector<2x10xf32>
    tpu.vector_store %arg33[%c0_711, %c0_712], %648 {strides = array<i32>} : memref<2x10xf32, #tpu.memory_space<vmem>>, vector<2x10xf32>,
    return
  }
}

</mosaic_0001>

<bundles_post_ra>
// kernel: tempcnn_forward.1
= control target key start
LH: loop header
LB: loop body
LE: loop exit
PB: predicated region body
PF: predicated region fallthrough
CT: control target
= control target key end

     0   :  { %s10544_s6 = smov 1   ;;  %s10545_s10 = smov 2   ;;  %s12190_s0 = inlined_call_operand.smem [shape: u32[34], index: -1, kind: input, shape index: {}] }
   0x1   :  { %s10609_s5 = sld [smem:[%s12190_s0]]   ;;  %s10546_s14 = smov 3  }
   0x2   :  { %s10614_s9 = sld [smem:[%s12190_s0 + %s10544_s6]]   ;;  %s10547_s18 = smov 4  }
   0x3   :  { %s10619_s13 = sld [smem:[%s12190_s0 + %s10545_s10]]   ;;  %s10548_s22 = smov 5  }
   0x4   :  { %s10624_s17 = sld [smem:[%s12190_s0 + %s10546_s14]]   ;;  %s10549_s26 = smov 6  }
   0x5   :  { %s10629_s21 = sld [smem:[%s12190_s0 + %s10547_s18]]   ;;  %s10550_s30 = smov 7  }
   0x6   :  { %s10634_s25 = sld [smem:[%s12190_s0 + %s10548_s22]]   ;;  %s10551_s4 = smov 8  }
   0x7   :  { %12200 = sst [smem:[#allocation42_spill]] %s10609_s5  ;;  %s10552_s10 = smov 9  }
   0x8   :  { %12201 = sst [smem:[#allocation43_spill]] %s10614_s9  ;;  %s10553_s15 = smov 10  }
   0x9   :  { %s10639_s29 = sld [smem:[%s12190_s0 + %s10549_s26]]   ;;  %s10554_s20 = smov 11  }
   0xa   :  { %12202 = sst [smem:[#allocation44_spill]] %s10624_s17  ;;  %s10555_s26 = smov 12  }
   0xb   :  { %12203 = sst [smem:[#allocation45_spill]] %s10629_s21  ;;  %s10556_s1 = smov 13  }
   0xc   :  { %s10644_s3 = sld [smem:[%s12190_s0 + %s10550_s30]]   ;;  %s10557_s7 = smov 14  }
   0xd   :  { %s10649_s8 = sld [smem:[%s12190_s0 + %s10551_s4]]   ;;  %s10559_s22 = smov 16  }
   0xe   :  { %s10654_s14 = sld [smem:[%s12190_s0 + %s10552_s10]]   ;;  %s10560_s28 = smov 17  }
   0xf   :  { %12204 = sst [smem:[#allocation46_spill]] %s10639_s29 }
  0x10   :  { %s10659_s19 = sld [smem:[%s12190_s0 + %s10553_s15]]   ;;  %s10558_s15 = smov 15  }
  0x11   :  { %s10664_s24 = sld [smem:[%s12190_s0 + %s10554_s20]]  }
  0x12   :  { %s10669_s30 = sld [smem:[%s12190_s0 + %s10555_s26]]  }
  0x13   :  { %12205 = sst [smem:[#allocation47_spill]] %s10649_s8 }
  0x14   :  { %s10674_s6 = sld [smem:[%s12190_s0 + %s10556_s1]]  }
  0x15   :  { %s10679_s12 = sld [smem:[%s12190_s0 + %s10557_s7]]   ;;  %s10561_s7 = smov 18  }
  0x16   :  { %s10684_s20 = sld [smem:[%s12190_s0 + %s10558_s15]]   ;;  %s10562_s15 = smov 19  }
  0x17   :  { %s10689_s27 = sld [smem:[%s12190_s0 + %s10559_s22]]   ;;  %s10563_s22 = smov 20  }
  0x18   :  { %12206 = sst [smem:[#allocation48_spill]] %s10669_s30 }
  0x19   :  { %s10694_s4 = sld [smem:[%s12190_s0 + %s10560_s28]]   ;;  %s10564_s28 = smov 21  }
  0x1a   :  { %12207 = sst [smem:[#allocation49_spill]] %s10674_s6 }
  0x1b   :  { %12208 = sst [smem:[#allocation50_spill]] %s10679_s12 }
  0x1c   :  { %12209 = sst [smem:[#allocation51_spill]] %s10684_s20 }
  0x1d   :  { %12210 = sst [smem:[#allocation52_spill]] %s10689_s27 }
  0x1e   :  { %s10699_s6 = sld [smem:[%s12190_s0 + %s10561_s7]]   ;;  %s10565_s7 = smov 22  }
  0x1f   :  { %12211 = sst [smem:[#allocation53_spill]] %s10694_s4 }
  0x20   :  { %s10704_s20 = sld [smem:[%s12190_s0 + %s10562_s15]]   ;;  %s10566_s15 = smov 23  }
  0x21   :  { %s10709_s27 = sld [smem:[%s12190_s0 + %s10563_s22]]   ;;  %s10567_s22 = smov 24  }
  0x22   :  { %s10714_s4 = sld [smem:[%s12190_s0 + %s10564_s28]]   ;;  %s10568_s28 = smov 25  }
  0x23   :  { %s10729_s30 = sld [smem:[%s12190_s0 + %s10567_s22]]   ;;  %s10571_s22 = smov 28  }
  0x24   :  { %12212 = sst [smem:[#allocation54_spill]] %s10699_s6 }
  0x25   :  { %s10719_s6 = sld [smem:[%s12190_s0 + %s10565_s7]]   ;;  %s10569_s7 = smov 26  }
  0x26   :  { %12213 = sst [smem:[#allocation55_spill]] %s10704_s20 }
  0x27   :  { %s10724_s20 = sld [smem:[%s12190_s0 + %s10566_s15]]   ;;  %s10570_s15 = smov 27  }
  0x28   :  { %s10734_s12 = sld [smem:[%s12190_s0 + %s10568_s28]]   ;;  %s10572_s28 = smov 29  }
  0x29   :  { %12214 = sst [smem:[#allocation56_spill]] %s10729_s30 }
  0x2a   :  { %s10739_s9 = sld [smem:[%s12190_s0 + %s10569_s7]]   ;;  %s10573_s7 = smov 30  }
  0x2b   :  { %s10744_s29 = sld [smem:[%s12190_s0 + %s10570_s15]]   ;;  %s10574_s15 = smov 31  }
  0x2c   :  { %s10749_s30 = sld [smem:[%s12190_s0 + %s10571_s22]]   ;;  %s10575_s22 = smov 32  }
  0x2d   :  { %s10759_s8 = sld [smem:[%s12190_s0 + %s10573_s7]]  }
  0x2e   :  { %12215 = sst [smem:[#allocation57_spill]] %s10734_s12 }
  0x2f   :  { %s10754_s12 = sld [smem:[%s12190_s0 + %s10572_s28]]   ;;  %s10576_s28 = smov 33  }
  0x30   :  { %s10764_s21 = sld [smem:[%s12190_s0 + %s10574_s15]]  }
  0x31   :  { %s10769_s17 = sld [smem:[%s12190_s0 + %s10575_s22]]  }
  0x32   :  { %s10774_s5 = sld [smem:[%s12190_s0 + %s10576_s28]]  }
  0x33   :  { %72 = vsyncpa [#allocation6], 0 }
  0x34   :  { %73 = vsyncpa [#allocation9], 0 }
  0x35   :  { %74 = vsyncpa [#allocation12], 0 }
  0x36   :  { %75 = vsyncpa [#allocation15], 0 }
  0x37   :  { %76 = vsyncpa [#allocation18], 0 }
  0x38   :  { %77 = vsyncpa [#allocation21], 0 }
  0x39   :  { %78 = vsyncpa [#allocation24], 0 }
  0x3a   :  { %79 = vsyncpa [#allocation27], 0 }
  0x3b   :  { %80 = vsyncpa [#allocation30], 0 }
  0x3c   :  { %81 = vsyncpa [#allocation7], 0  ;;  %s10577_s7 = smov [#allocation8]   ;;  %s10150_s11 = scalar_lea.hbm %s10634_s25, 1280 }
  0x3d   :  { %s107_s10 = sshll.u32 %s10577_s7, 4  ;;  %p10151_p0 = scmp.ne.s32.totalorder %s10634_s25, %s10150_s11  ;;  %s108_s10 = int_to_ptr.vmem [resolvable:$true] %s107_s10 }
  0x3e   :  { %p10154_p1 = scmp.lt.u32.totalorder %s10150_s11, %s10634_s25 }
  0x40   :  { %p10156_p2 = pnand %p10154_p1, %p10151_p0 }
  0x42   :  { %10159 = shalt.err (!%p10156_p2)
}
  0x43   :  { %s10160_s0 = scalar_lea.vmem %s108_s10, 1280  ;;  %p10165_p4 = scmp.lt.s32.totalorder %s108_s10, %s108_s10 }
  0x44   :  { %p10161_p3 = scmp.ne.s32.totalorder %s108_s10, %s10160_s0  ;;  %p10166_p5 = scmp.lt.s32.totalorder %s10160_s0, %s10160_s0 }
  0x46   :  { %p10167_p6 = por %p10166_p5, %p10165_p4 }
  0x48   :  { %p10168_p7 = pnand %p10167_p6, %p10161_p3 }
  0x4a   :  { %10171 = shalt.err (!%p10168_p7)
}
  0x4b   :  { %s10578_s15 = smov 128   ;;  %s10579_s16 = smov 8  }
  0x4c   :  { %113 = dma.hbm_to_vmem [thread:$0]  %s10634_s25, 1280, %s108_s10, [#allocation9], %s10578_s15, %s10578_s15, %s10579_s16  }
  0x4d   :  { %s10580_s18 = smov [#allocation11]   ;;  %s10581_s23 = smov [#allocation14]  }
  0x4e   :  { %s134_s22 = sshll.u32 %s10580_s18, 4  ;;  %s153_s26 = sshll.u32 %s10581_s23, 4  ;;  %s135_s22 = int_to_ptr.vmem [resolvable:$true] %s134_s22  ;;  %s154_s26 = int_to_ptr.vmem [resolvable:$true] %s153_s26 }
  0x4f   :  { %s10172_s28 = scalar_lea.hbm %s10654_s14, 16 }
  0x50   :  { %p10173_p8 = scmp.ne.s32.totalorder %s10654_s14, %s10172_s28  ;;  %p10176_p9 = scmp.lt.u32.totalorder %s10172_s28, %s10654_s14 }
  0x52   :  { %p10178_p10 = pnand %p10176_p9, %p10173_p8 }
  0x54   :  { %10181 = shalt.err (!%p10178_p10)
}
  0x55   :  { %s10182_s1 = scalar_lea.vmem %s135_s22, 16  ;;  %s10186_s2 = scalar_lea.vmem %s135_s22, 32 }
  0x56   :  { %p10183_p11 = scmp.ne.s32.totalorder %s135_s22, %s10182_s1  ;;  %p10187_p12 = scmp.lt.s32.totalorder %s135_s22, %s135_s22 }
  0x57   :  { %p10188_p13 = scmp.lt.s32.totalorder %s10186_s2, %s10182_s1 }
  0x59   :  { %p10189_p0 = por %p10188_p13, %p10187_p12 }
  0x5b   :  { %p10190_p1 = pnand %p10189_p0, %p10183_p11 }
  0x5d   :  { %10193 = shalt.err (!%p10190_p1)
}
  0x5e   :  { %137 = dma.hbm_to_vmem [thread:$0]  %s10654_s14, 16, %s135_s22, [#allocation12]  }
  0x5f   :  { %s10194_s25 = scalar_lea.hbm %s10664_s24, 384 }
  0x60   :  { %p10195_p2 = scmp.ne.s32.totalorder %s10664_s24, %s10194_s25  ;;  %p10198_p3 = scmp.lt.u32.totalorder %s10194_s25, %s10664_s24 }
  0x62   :  { %p10200_p4 = pnand %p10198_p3, %p10195_p2 }
  0x64   :  { %10203 = shalt.err (!%p10200_p4)
}
  0x65   :  { %s10204_s7 = scalar_lea.vmem %s154_s26, 384  ;;  %p10209_p6 = scmp.lt.s32.totalorder %s154_s26, %s154_s26 }
  0x66   :  { %p10205_p5 = scmp.ne.s32.totalorder %s154_s26, %s10204_s7  ;;  %p10210_p7 = scmp.lt.s32.totalorder %s10204_s7, %s10204_s7 }
  0x68   :  { %p10211_p8 = por %p10210_p7, %p10209_p6 }
  0x6a   :  { %p10212_p9 = pnand %p10211_p8, %p10205_p5 }
  0x6c   :  { %10215 = shalt.err (!%p10212_p9)
}
  0x6d   :  { %159 = dma.hbm_to_vmem [thread:$0]  %s10664_s24, 384, %s154_s26, [#allocation15], %s10578_s15, %s10578_s15, %s10579_s16  }
  0x6e   :  { %s10582_s14 = smov [#allocation17]   ;;  %s10583_s11 = smov [#allocation20]  }
  0x6f   :  { %s194_s10 = sshll.u32 %s10582_s14, 4  ;;  %s213_s0 = sshll.u32 %s10583_s11, 4  ;;  %s195_s10 = int_to_ptr.vmem [resolvable:$true] %s194_s10  ;;  %s214_s0 = int_to_ptr.vmem [resolvable:$true] %s213_s0 }
  0x70   :  { %s10216_s18 = scalar_lea.hbm %s10714_s4, 16 }
  0x71   :  { %p10217_p10 = scmp.ne.s32.totalorder %s10714_s4, %s10216_s18  ;;  %p10220_p11 = scmp.lt.u32.totalorder %s10216_s18, %s10714_s4 }
  0x73   :  { %p10222_p12 = pnand %p10220_p11, %p10217_p10 }
  0x75   :  { %10225 = shalt.err (!%p10222_p12)
}
  0x76   :  { %s10226_s22 = scalar_lea.vmem %s195_s10, 16  ;;  %s10230_s23 = scalar_lea.vmem %s195_s10, 32 }
  0x77   :  { %p10227_p13 = scmp.ne.s32.totalorder %s195_s10, %s10226_s22  ;;  %p10231_p0 = scmp.lt.s32.totalorder %s195_s10, %s195_s10 }
  0x78   :  { %p10232_p1 = scmp.lt.s32.totalorder %s10230_s23, %s10226_s22 }
  0x7a   :  { %p10233_p2 = por %p10232_p1, %p10231_p0 }
  0x7c   :  { %p10234_p3 = pnand %p10233_p2, %p10227_p13 }
  0x7e   :  { %10237 = shalt.err (!%p10234_p3)
}
  0x7f   :  { %197 = dma.hbm_to_vmem [thread:$0]  %s10714_s4, 16, %s195_s10, [#allocation18]  }
  0x80   :  { %s10238_s24 = scalar_lea.hbm %s10724_s20, 7680 }
  0x81   :  { %p10239_p4 = scmp.ne.s32.totalorder %s10724_s20, %s10238_s24  ;;  %p10242_p5 = scmp.lt.u32.totalorder %s10238_s24, %s10724_s20 }
  0x83   :  { %p10244_p6 = pnand %p10242_p5, %p10239_p4 }
  0x85   :  { %10247 = shalt.err (!%p10244_p6)
}
  0x86   :  { %s10248_s26 = scalar_lea.vmem %s214_s0, 7680  ;;  %p10253_p8 = scmp.lt.s32.totalorder %s214_s0, %s214_s0 }
  0x87   :  { %p10249_p7 = scmp.ne.s32.totalorder %s214_s0, %s10248_s26  ;;  %p10254_p9 = scmp.lt.s32.totalorder %s10248_s26, %s10248_s26 }
  0x89   :  { %p10255_p10 = por %p10254_p9, %p10253_p8 }
  0x8b   :  { %p10256_p11 = pnand %p10255_p10, %p10249_p7 }
  0x8d   :  { %10259 = shalt.err (!%p10256_p11)
}
  0x8e   :  { %219 = dma.hbm_to_vmem [thread:$0]  %s10724_s20, 7680, %s214_s0, [#allocation21], %s10578_s15, %s10578_s15, %s10579_s16  }
  0x8f   :  { %s10584_s4 = smov [#allocation23]   ;;  %s10585_s1 = smov [#allocation26]  }
  0x90   :  { %s241_s28 = sshll.u32 %s10584_s4, 4  ;;  %s264_s2 = sshll.u32 %s10585_s1, 4  ;;  %s242_s28 = int_to_ptr.vmem [resolvable:$true] %s241_s28  ;;  %s265_s2 = int_to_ptr.vmem [resolvable:$true] %s264_s2 }
  0x91   :  { %s10260_s25 = scalar_lea.hbm %s10744_s29, 512 }
  0x92   :  { %p10261_p12 = scmp.ne.s32.totalorder %s10744_s29, %s10260_s25  ;;  %p10264_p13 = scmp.lt.u32.totalorder %s10260_s25, %s10744_s29 }
  0x94   :  { %p10266_p0 = pnand %p10264_p13, %p10261_p12 }
  0x96   :  { %10269 = shalt.err (!%p10266_p0)
}
  0x97   :  { %s10270_s7 = scalar_lea.vmem %s242_s28, 512  ;;  %p10275_p2 = scmp.lt.s32.totalorder %s242_s28, %s242_s28 }
  0x98   :  { %p10271_p1 = scmp.ne.s32.totalorder %s242_s28, %s10270_s7  ;;  %p10276_p3 = scmp.lt.s32.totalorder %s10270_s7, %s10270_s7 }
  0x9a   :  { %p10277_p4 = por %p10276_p3, %p10275_p2 }
  0x9c   :  { %p10278_p5 = pnand %p10277_p4, %p10271_p1 }
  0x9e   :  { %10281 = shalt.err (!%p10278_p5)
}
  0x9f   :  { %247 = dma.hbm_to_vmem [thread:$0]  %s10744_s29, 512, %s242_s28, [#allocation24], %s10578_s15, %s10578_s15, %s10579_s16  }
  0xa0   :  { %s10282_s20 = scalar_lea.hbm %s10754_s12, 16 }
  0xa1   :  { %p10283_p6 = scmp.ne.s32.totalorder %s10754_s12, %s10282_s20  ;;  %p10286_p7 = scmp.lt.u32.totalorder %s10282_s20, %s10754_s12 }
  0xa3   :  { %p10288_p8 = pnand %p10286_p7, %p10283_p6 }
  0xa5   :  { %10291 = shalt.err (!%p10288_p8)
}
  0xa6   :  { %s10292_s14 = scalar_lea.vmem %s265_s2, 16  ;;  %s10296_s10 = scalar_lea.vmem %s265_s2, 32 }
  0xa7   :  { %p10293_p9 = scmp.ne.s32.totalorder %s265_s2, %s10292_s14  ;;  %p10297_p10 = scmp.lt.s32.totalorder %s265_s2, %s265_s2 }
  0xa8   :  { %p10298_p11 = scmp.lt.s32.totalorder %s10296_s10, %s10292_s14 }
  0xaa   :  { %p10299_p12 = por %p10298_p11, %p10297_p10 }
  0xac   :  { %p10300_p13 = pnand %p10299_p12, %p10293_p9 }
  0xae   :  { %10303 = shalt.err (!%p10300_p13)
}
  0xaf   :  { %267 = dma.hbm_to_vmem [thread:$0]  %s10754_s12, 16, %s265_s2, [#allocation27]  }
  0xb0   :  { %s10586_s29 = smov [#allocation5]   ;;  %s10304_s0 = scalar_lea.hbm %s10619_s13, 320 }
  0xb1   :  { %s91_s11 = sshll.u32 %s10586_s29, 4  ;;  %p10305_p0 = scmp.ne.s32.totalorder %s10619_s13, %s10304_s0  ;;  %s92_s11 = int_to_ptr.vmem [resolvable:$true] %s91_s11 }
  0xb2   :  { %p10308_p1 = scmp.lt.u32.totalorder %s10304_s0, %s10619_s13 }
  0xb4   :  { %p10310_p2 = pnand %p10308_p1, %p10305_p0 }
  0xb6   :  { %10313 = shalt.err (!%p10310_p2)
}
  0xb7   :  { %s10314_s18 = scalar_lea.vmem %s92_s11, 320  ;;  %p10319_p4 = scmp.lt.s32.totalorder %s92_s11, %s92_s11 }
  0xb8   :  { %p10315_p3 = scmp.ne.s32.totalorder %s92_s11, %s10314_s18  ;;  %p10320_p5 = scmp.lt.s32.totalorder %s10314_s18, %s10314_s18 }
  0xba   :  { %p10321_p6 = por %p10320_p5, %p10319_p4 }
  0xbc   :  { %p10322_p7 = pnand %p10321_p6, %p10315_p3 }
  0xbe   :  { %10325 = shalt.err (!%p10322_p7)
}
  0xbf   :  { %s10587_s22 = smov 64   ;;  %s10588_s12 = smov 4  }
  0xc0   :  { %97 = dma.hbm_to_vmem [thread:$0]  %s10619_s13, 320, %s92_s11, [#allocation6], %s10587_s22, %s10587_s22, %s10588_s12  }
  0xc1   :  { %s10589_s23 = smov [#allocation10]   ;;  %s10590_s26 = smov [#allocation13]  }
  0xc2   :  { %s122_s24 = sshll.u32 %s10589_s23, 4  ;;  %s144_s4 = sshll.u32 %s10590_s26, 4  ;;  %s123_s24 = int_to_ptr.vmem [resolvable:$true] %s122_s24  ;;  %s145_s4 = int_to_ptr.vmem [resolvable:$true] %s144_s4 }
  0xc3   :  { %s10326_s28 = scalar_lea.hbm %s10644_s3, 16 }
  0xc4   :  { %p10327_p8 = scmp.ne.s32.totalorder %s10644_s3, %s10326_s28  ;;  %p10330_p9 = scmp.lt.u32.totalorder %s10326_s28, %s10644_s3 }
  0xc6   :  { %p10332_p10 = pnand %p10330_p9, %p10327_p8 }
  0xc8   :  { %10335 = shalt.err (!%p10332_p10)
}
  0xc9   :  { %s10336_s1 = scalar_lea.vmem %s123_s24, 16  ;;  %s10340_s2 = scalar_lea.vmem %s123_s24, 32 }
  0xca   :  { %p10337_p11 = scmp.ne.s32.totalorder %s123_s24, %s10336_s1  ;;  %p10341_p12 = scmp.lt.s32.totalorder %s123_s24, %s123_s24 }
  0xcb   :  { %p10342_p13 = scmp.lt.s32.totalorder %s10340_s2, %s10336_s1 }
  0xcd   :  { %p10343_p0 = por %p10342_p13, %p10341_p12 }
  0xcf   :  { %p10344_p1 = pnand %p10343_p0, %p10337_p11 }
  0xd1   :  { %10347 = shalt.err (!%p10344_p1)
}
  0xd2   :  { %125 = dma.hbm_to_vmem [thread:$0]  %s10644_s3, 16, %s123_s24, [#allocation9]  }
  0xd3   :  { %s10348_s13 = scalar_lea.hbm %s10659_s19, 16 }
  0xd4   :  { %p10349_p2 = scmp.ne.s32.totalorder %s10659_s19, %s10348_s13  ;;  %p10352_p3 = scmp.lt.u32.totalorder %s10348_s13, %s10659_s19 }
  0xd6   :  { %p10354_p4 = pnand %p10352_p3, %p10349_p2 }
  0xd8   :  { %10357 = shalt.err (!%p10354_p4)
}
  0xd9   :  { %s10358_s25 = scalar_lea.vmem %s145_s4, 16  ;;  %s10362_s7 = scalar_lea.vmem %s145_s4, 32 }
  0xda   :  { %p10359_p5 = scmp.ne.s32.totalorder %s145_s4, %s10358_s25  ;;  %p10363_p6 = scmp.lt.s32.totalorder %s145_s4, %s145_s4 }
  0xdb   :  { %p10364_p7 = scmp.lt.s32.totalorder %s10362_s7, %s10358_s25 }
  0xdd   :  { %p10365_p8 = por %p10364_p7, %p10363_p6 }
  0xdf   :  { %p10366_p9 = pnand %p10365_p8, %p10359_p5 }
  0xe1   :  { %10369 = shalt.err (!%p10366_p9)
}
  0xe2   :  { %147 = dma.hbm_to_vmem [thread:$0]  %s10659_s19, 16, %s145_s4, [#allocation12]  }
  0xe3   :  { %s10591_s20 = smov [#allocation16]   ;;  %s10592_s14 = smov [#allocation19]  }
  0xe4   :  { %s181_s3 = sshll.u32 %s10591_s20, 4  ;;  %s204_s10 = sshll.u32 %s10592_s14, 4  ;;  %s182_s3 = int_to_ptr.vmem [resolvable:$true] %s181_s3  ;;  %s205_s10 = int_to_ptr.vmem [resolvable:$true] %s204_s10 }
  0xe5   :  { %s10370_s29 = scalar_lea.hbm %s10709_s27, 7680 }
  0xe6   :  { %p10371_p10 = scmp.ne.s32.totalorder %s10709_s27, %s10370_s29  ;;  %p10374_p11 = scmp.lt.u32.totalorder %s10370_s29, %s10709_s27 }
  0xe8   :  { %p10376_p12 = pnand %p10374_p11, %p10371_p10 }
  0xea   :  { %10379 = shalt.err (!%p10376_p12)
}
  0xeb   :  { %s10380_s11 = scalar_lea.vmem %s182_s3, 7680  ;;  %p10385_p0 = scmp.lt.s32.totalorder %s182_s3, %s182_s3 }
  0xec   :  { %p10381_p13 = scmp.ne.s32.totalorder %s182_s3, %s10380_s11  ;;  %p10386_p1 = scmp.lt.s32.totalorder %s10380_s11, %s10380_s11 }
  0xee   :  { %p10387_p2 = por %p10386_p1, %p10385_p0 }
  0xf0   :  { %p10388_p3 = pnand %p10387_p2, %p10381_p13 }
  0xf2   :  { %10391 = shalt.err (!%p10388_p3)
}
  0xf3   :  { %187 = dma.hbm_to_vmem [thread:$0]  %s10709_s27, 7680, %s182_s3, [#allocation15], %s10578_s15, %s10578_s15, %s10579_s16  }
  0xf4   :  { %s10392_s19 = scalar_lea.hbm %s10719_s6, 16 }
  0xf5   :  { %p10393_p4 = scmp.ne.s32.totalorder %s10719_s6, %s10392_s19  ;;  %p10396_p5 = scmp.lt.u32.totalorder %s10392_s19, %s10719_s6 }
  0xf7   :  { %p10398_p6 = pnand %p10396_p5, %p10393_p4 }
  0xf9   :  { %10401 = shalt.err (!%p10398_p6)
}
  0xfa   :  { %s10402_s0 = scalar_lea.vmem %s205_s10, 16  ;;  %s10406_s18 = scalar_lea.vmem %s205_s10, 32 }
  0xfb   :  { %p10403_p7 = scmp.ne.s32.totalorder %s205_s10, %s10402_s0  ;;  %p10407_p8 = scmp.lt.s32.totalorder %s205_s10, %s205_s10 }
  0xfc   :  { %p10408_p9 = scmp.lt.s32.totalorder %s10406_s18, %s10402_s0 }
  0xfe   :  { %p10409_p10 = por %p10408_p9, %p10407_p8 }
 0x100   :  { %p10410_p11 = pnand %p10409_p10, %p10403_p7 }
 0x102   :  { %10413 = shalt.err (!%p10410_p11)
}
 0x103   :  { %207 = dma.hbm_to_vmem [thread:$0]  %s10719_s6, 16, %s205_s10, [#allocation18]  }
 0x104   :  { %s10593_s22 = smov [#allocation22]   ;;  %s10594_s12 = smov [#allocation25]  }
 0x105   :  { %s229_s27 = sshll.u32 %s10593_s22, 4  ;;  %s254_s23 = sshll.u32 %s10594_s12, 4  ;;  %s230_s27 = int_to_ptr.vmem [resolvable:$true] %s229_s27  ;;  %s255_s23 = int_to_ptr.vmem [resolvable:$true] %s254_s23 }
 0x106   :  { %s10414_s24 = scalar_lea.hbm %s10739_s9, 512 }
 0x107   :  { %p10415_p12 = scmp.ne.s32.totalorder %s10739_s9, %s10414_s24  ;;  %p10418_p13 = scmp.lt.u32.totalorder %s10414_s24, %s10739_s9 }
 0x109   :  { %p10420_p0 = pnand %p10418_p13, %p10415_p12 }
 0x10b   :  { %10423 = shalt.err (!%p10420_p0)
}
 0x10c   :  { %s10424_s26 = scalar_lea.vmem %s230_s27, 512  ;;  %p10429_p2 = scmp.lt.s32.totalorder %s230_s27, %s230_s27 }
 0x10d   :  { %p10425_p1 = scmp.ne.s32.totalorder %s230_s27, %s10424_s26  ;;  %p10430_p3 = scmp.lt.s32.totalorder %s10424_s26, %s10424_s26 }
 0x10f   :  { %p10431_p4 = por %p10430_p3, %p10429_p2 }
 0x111   :  { %p10432_p5 = pnand %p10431_p4, %p10425_p1 }
 0x113   :  { %10435 = shalt.err (!%p10432_p5)
}
 0x114   :  { %235 = dma.hbm_to_vmem [thread:$0]  %s10739_s9, 512, %s230_s27, [#allocation21], %s10578_s15, %s10578_s15, %s10579_s16  }
 0x115   :  { %s10436_s6 = scalar_lea.hbm %s10749_s30, 16 }
 0x116   :  { %p10437_p6 = scmp.ne.s32.totalorder %s10749_s30, %s10436_s6  ;;  %p10440_p7 = scmp.lt.u32.totalorder %s10436_s6, %s10749_s30 }
 0x118   :  { %p10442_p8 = pnand %p10440_p7, %p10437_p6 }
 0x11a   :  { %10445 = shalt.err (!%p10442_p8)
}
 0x11b   :  { %s10446_s4 = scalar_lea.vmem %s255_s23, 16  ;;  %s10450_s28 = scalar_lea.vmem %s255_s23, 32 }
 0x11c   :  { %p10447_p9 = scmp.ne.s32.totalorder %s255_s23, %s10446_s4  ;;  %p10451_p10 = scmp.lt.s32.totalorder %s255_s23, %s255_s23 }
 0x11d   :  { %p10452_p11 = scmp.lt.s32.totalorder %s10450_s28, %s10446_s4 }
 0x11f   :  { %p10453_p12 = por %p10452_p11, %p10451_p10 }
 0x121   :  { %p10454_p13 = pnand %p10453_p12, %p10447_p9 }
 0x123   :  { %10457 = shalt.err (!%p10454_p13)
}
 0x124   :  { %257 = dma.hbm_to_vmem [thread:$0]  %s10749_s30, 16, %s255_s23, [#allocation24]  }
 0x125   :  { %s10595_s1 = smov [#allocation28]   ;;  %s10596_s15 = smov [#allocation29]  }
 0x126   :  { %s276_s9 = sshll.u32 %s10595_s1, 4  ;;  %s286_s16 = sshll.u32 %s10596_s15, 4  ;;  %s277_s9 = int_to_ptr.vmem [resolvable:$true] %s276_s9  ;;  %s287_s16 = int_to_ptr.vmem [resolvable:$true] %s286_s16 }
 0x127   :  { %s10458_s2 = scalar_lea.hbm %s10764_s21, 16 }
 0x128   :  { %p10459_p0 = scmp.ne.s32.totalorder %s10764_s21, %s10458_s2  ;;  %p10462_p1 = scmp.lt.u32.totalorder %s10458_s2, %s10764_s21 }
 0x12a   :  { %p10464_p2 = pnand %p10462_p1, %p10459_p0 }
 0x12c   :  { %10467 = shalt.err (!%p10464_p2)
}
 0x12d   :  { %s10468_s13 = scalar_lea.vmem %s277_s9, 16  ;;  %s10472_s25 = scalar_lea.vmem %s277_s9, 32 }
 0x12e   :  { %p10469_p3 = scmp.ne.s32.totalorder %s277_s9, %s10468_s13  ;;  %p10473_p4 = scmp.lt.s32.totalorder %s277_s9, %s277_s9 }
 0x12f   :  { %p10474_p5 = scmp.lt.s32.totalorder %s10472_s25, %s10468_s13 }
 0x131   :  { %p10475_p6 = por %p10474_p5, %p10473_p4 }
 0x133   :  { %p10476_p7 = pnand %p10475_p6, %p10469_p3 }
 0x135   :  { %10479 = shalt.err (!%p10476_p7)
}
 0x136   :  { %279 = dma.hbm_to_vmem [thread:$0]  %s10764_s21, 16, %s277_s9, [#allocation27]  }
 0x137   :  { %s10480_s30 = scalar_lea.hbm %s10769_s17, 16 }
 0x138   :  { %p10481_p8 = scmp.ne.s32.totalorder %s10769_s17, %s10480_s30  ;;  %p10484_p9 = scmp.lt.u32.totalorder %s10480_s30, %s10769_s17 }
 0x13a   :  { %p10486_p10 = pnand %p10484_p9, %p10481_p8 }
 0x13c   :  { %10489 = shalt.err (!%p10486_p10)
}
 0x13d   :  { %s10490_s7 = scalar_lea.vmem %s287_s16, 16  ;;  %s10494_s20 = scalar_lea.vmem %s287_s16, 32 }
 0x13e   :  { %p10491_p11 = scmp.ne.s32.totalorder %s287_s16, %s10490_s7  ;;  %p10495_p12 = scmp.lt.s32.totalorder %s287_s16, %s287_s16 }
 0x13f   :  { %p10496_p13 = scmp.lt.s32.totalorder %s10494_s20, %s10490_s7 }
 0x141   :  { %p10497_p0 = por %p10496_p13, %p10495_p12 }
 0x143   :  { %p10498_p1 = pnand %p10497_p0, %p10491_p11 }
 0x145   :  { %10501 = shalt.err (!%p10498_p1)
}
 0x146   :  { %289 = dma.hbm_to_vmem [thread:$0]  %s10769_s17, 16, %s287_s16, [#allocation30]  }
 0x147   :  { %10524 = dma.done.wait [#allocation6], 320  }
 0x148   :  { %10525 = vsyncadd [#allocation6], 4294966976 }
 0x149   :  { %10526 = dma.done.wait [#allocation9], 1296  }
 0x14a   :  { %10527 = vsyncadd [#allocation9], 4294966000 }
 0x14b   :  { %10528 = dma.done.wait [#allocation12], 32  }
 0x14c   :  { %10529 = vsyncadd [#allocation12], 4294967264 }
 0x14d   :  { %10530 = dma.done.wait [#allocation15], 8064  }
 0x14e   :  { %10531 = vsyncadd [#allocation15], 4294959232 }
 0x14f   :  { %10532 = dma.done.wait [#allocation18], 32  }
 0x150   :  { %10533 = vsyncadd [#allocation18], 4294967264 }
 0x151   :  { %10534 = dma.done.wait [#allocation21], 8192  }
 0x152   :  { %10535 = vsyncadd [#allocation21], 4294959104 }
 0x153   :  { %10536 = dma.done.wait [#allocation24], 528  }
 0x154   :  { %10537 = vsyncadd [#allocation24], 4294966768 }
 0x155   :  { %10538 = dma.done.wait [#allocation27], 32  }
 0x156   :  { %10539 = vsyncadd [#allocation27], 4294967264 }
 0x157   :  { %10540 = dma.done.wait [#allocation30], 16  }
 0x158   :  { %10541 = vsyncadd [#allocation30], 4294967280  ;;  %vm338_vm0 = vcmask 261120   ;;  %v12196_v0 = vmov 0.0   ;;  %s12216_s17 = sld [smem:[#allocation42_spill]]  ;;  %vm414_vm1 = vcmask 1043456  }
 0x159   :  { %339 = vst.msk [vmem:[#allocation2] sm:$0xff] %vm338_vm0, %v12196_v0  ;;  %340 = vst.msk [vmem:[#allocation2 + $0x8] sm:$0xff] %vm338_vm0, %v12196_v0  ;;  %vm356_vm2 = vcmask 31744   ;;  %vm360_vm3 = vcmask 29696   ;;  %v389_v1 = vld [vmem:[#allocation5 + $0x4] sm:$0xf] }
 0x15a   :  { %341 = vst.msk [vmem:[#allocation2 + $0x10] sm:$0xff] %vm338_vm0, %v12196_v0  ;;  %342 = vst.msk [vmem:[#allocation2 + $0x18] sm:$0xff] %vm338_vm0, %v12196_v0  ;;  %v379_v3 = vld [vmem:[#allocation5] sm:$0xf]  ;;  %8757 = vmatprep.subr.msk.mxu0 %vm414_vm1, %v389_v1  ;;  %v10911_v11 = vld [vmem:[#allocation5 + $0x8] sm:$0xf] }
 0x15b   :  { %343 = vst.msk [vmem:[#allocation2 + $0x20] sm:$0xff] %vm338_vm0, %v12196_v0  ;;  %344 = vst.msk [vmem:[#allocation2 + $0x28] sm:$0xff] %vm338_vm0, %v12196_v0  ;;  %8758 = vmatpush3.msk.msra.mxu0 %vm414_vm1, %v389_v1  ;;  %v814_v52 = vld [vmem:[#allocation5 + $0xc] sm:$0xf]  ;;  %v964_v53 = vld [vmem:[#allocation5 + $0x10] sm:$0xf] }
 0x15c   :  { %345 = vst.msk [vmem:[#allocation2 + $0x30] sm:$0xff] %vm338_vm0, %v12196_v0  ;;  %346 = vst.msk [vmem:[#allocation2 + $0x38] sm:$0xff] %vm338_vm0, %v12196_v0  ;;  %8771 = vmatprep.subr.msk.mxu0 %vm414_vm1, %v379_v3  ;;  %s12217_s21 = sld [smem:[#allocation44_spill]]  ;;  %s12218_s3 = sld [smem:[#allocation45_spill]]  ;;  %v1200_v54 = vld [vmem:[#allocation8 + $0x10] sm:$0xff]  ;;  %v1201_v55 = vld [vmem:[#allocation8 + $0x18] sm:$0xff] }
 0x15d   :  { %347 = vst.msk [vmem:[#allocation2 + $0x40] sm:$0xff] %vm338_vm0, %v12196_v0  ;;  %348 = vst.msk [vmem:[#allocation2 + $0x48] sm:$0xff] %vm338_vm0, %v12196_v0  ;;  %v9574_v56 = vpack.c.bf16 %v1201_v55, %v1200_v54  ;;  %v1189_v57 = vld [vmem:[#allocation8] sm:$0xff]  ;;  %v1190_v58 = vld [vmem:[#allocation8 + $0x8] sm:$0xff]  ;;  %vm1143_vm4 = vcmask 130048   ;;  %vm1171_vm5 = vcmask 128000  }
 0x15e   :  { %349 = vst.msk [vmem:[#allocation2 + $0x50] sm:$0xff] %vm338_vm0, %v12196_v0  ;;  %1161 = vst.msk [vmem:[#allocation2 + $0x48] sm:$0xff] %vm338_vm0, %v12196_v0  ;;  %v352_v2 = vld [vmem:[%s12216_s17] sm:$0xff]  ;;  %v353_v4 = vld [vmem:[%s12216_s17 + $0x8] sm:$0xff]  ;;  %v11004_v59 = vpack.c.bf16 %v1190_v58, %v1189_v57  ;;  %s12219_s14 = sld [smem:[#allocation47_spill]]  ;;  %s12220_s10 = sld [smem:[#allocation46_spill]] }
 0x15f   :  { %1162 = vst.msk [vmem:[#allocation2 + $0x50] sm:$0xff] %vm338_vm0, %v12196_v0  ;;  %1959 = vst.msk [vmem:[#allocation2 + $0x48] sm:$0xff] %vm338_vm0, %v12196_v0  ;;  %v354_v5 = vld [vmem:[%s12216_s17 + $0x10] sm:$0xff]  ;;  %v355_v6 = vld [vmem:[%s12216_s17 + $0x18] sm:$0x3f]  ;;  %9575 = vmatprep.subr.bf16.mxu1 %v9574_v56  ;;  %vm350_vm6 = vcmask 259072  }
 0x160   :  { %1960 = vst.msk [vmem:[#allocation2 + $0x50] sm:$0xff] %vm338_vm0, %v12196_v0  ;;  %4252 = vst.msk [vmem:[#allocation2 + $0x48] sm:$0xff] %vm338_vm0, %v12196_v0  ;;  %v7984_v7 = vld [vmem:[%s12216_s17 + $0x38] sm:$0x3f]  ;;  %v7981_v8 = vld [vmem:[%s12216_s17 + $0x20] sm:$0xff]  ;;  %9577 = vmatpush3.bf16.msra.mxu1 %v9574_v56  ;;  %s12221_s29 = sld [smem:[#allocation43_spill]] }
 0x161   :  { %4253 = vst.msk [vmem:[#allocation2 + $0x50] sm:$0xff] %vm338_vm0, %v12196_v0  ;;  %v7982_v9 = vld [vmem:[%s12216_s17 + $0x28] sm:$0xff]  ;;  %v7983_v10 = vld [vmem:[%s12216_s17 + $0x30] sm:$0xff]  ;;  %9579 = vmatprep.subr.bf16.mxu1 %v11004_v59  ;;  %vm10599_vm7 = vmmov 0   ;;  %vm4345_vm8 = vcmask 1045504   ;;  %vm4261_vm9 = vcmask 48128  }
 0x162   :  { %357 = vst.msk [vmem:[#allocation2 + $0x2] sm:$0xff] %vm356_vm2, %v352_v2  ;;  %358 = vst.msk [vmem:[#allocation2 + $0xa] sm:$0xff] %vm356_vm2, %v353_v4  ;;  %v8030_v60 = vld [vmem:[%s12217_s21] ss:$0 sm:$0xff]  ;;  %vm4267_vm10 = vcmask 45056   ;;  %vm2758_vm11 = vcmask 254976  }
 0x163   :  { %359 = vst.msk [vmem:[#allocation2 + $0x12] sm:$0xff] %vm356_vm2, %v354_v5  ;;  %367 = vst.msk [vmem:[#allocation2 + $0x24] sm:$0xff] %vm356_vm2, %v7981_v8  ;;  %v8031_v62 = vld [vmem:[%s12218_s3] ss:$0 sm:$0xff]  ;;  %vm2766_vm12 = vcmask 253952   ;;  %s12261_s11 = sld [smem:[#allocation50_spill]] }
 0x164   :  { %361 = vst.msk [vmem:[#allocation2 + $0x1a] sm:$0x3f] %vm360_vm3, %v355_v6  ;;  %370 = vst.msk [vmem:[#allocation2 + $0x3c] sm:$0x3f] %vm360_vm3, %v7984_v7  ;;  %s12262_s19 = sld [smem:[#allocation48_spill]]  ;;  %s12263_s0 = sld [smem:[#allocation49_spill]] }
 0x165   :  { %368 = vst.msk [vmem:[#allocation2 + $0x2c] sm:$0xff] %vm356_vm2, %v7982_v9  ;;  %369 = vst.msk [vmem:[#allocation2 + $0x34] sm:$0xff] %vm356_vm2, %v7983_v10  ;;  %vm4914_vm13 = vcmask 126976   ;;  %vm4889_vm14 = vcmask 125952   ;;  %s12264_s18 = sld [smem:[#allocation53_spill]]  ;;  %s12265_s22 = sld [smem:[#allocation51_spill]] }
 0x166   :  { %351 = vst.msk [vmem:[#allocation2 + $0x58] sm:$0x3f] %vm350_vm6, %v12196_v0  ;;  %s12266_s27 = sld [smem:[#allocation52_spill]]  ;;  %vm5553_vm15 = vcmask 258048   ;;  %s12267_s12 = sld [smem:[#allocation54_spill]]  ;;  %vm7923_vm3 = vcmask 74752  }
 0x167   :  { %1163 = vst.msk [vmem:[#allocation2 + $0x58] sm:$0x3f] %vm350_vm6, %v12196_v0  ;;  %s12268_s23 = sld [smem:[#allocation55_spill]]  ;;  %s12269_s24 = sld [smem:[#allocation56_spill]] }
 0x168   :  { %1961 = vst.msk [vmem:[#allocation2 + $0x58] sm:$0x3f] %vm350_vm6, %v12196_v0  ;;  %s12270_s26 = sld [smem:[#allocation57_spill]]  ;;  %s10600_s6 = smov [#allocation31]  }
 0x169   :  { %v380_v12 = vld [vmem:[#allocation2 + $0x1] sm:$0xff]  ;;  %v381_v15 = vld [vmem:[#allocation2 + $0x9] sm:$0xff]  ;;  %4254 = vst.msk [vmem:[#allocation2 + $0x58] sm:$0x3f] %vm350_vm6, %v12196_v0  ;;  %s7931_s4 = sshll.u32 %s10600_s6, 4  ;;  %s7932_s4 = int_to_ptr.vmem [resolvable:$true] %s7931_s4 }
 0x16a   :  { %v371_v13 = vld [vmem:[#allocation2] sm:$0xff]  ;;  %8759 = vmatprep.mubr.msk.f32.mxu0 %vm356_vm2, %v380_v12  ;;  %v382_v18 = vld [vmem:[#allocation2 + $0x11] sm:$0xff]  ;;  %v372_v31 = vld [vmem:[#allocation2 + $0x8] sm:$0xff]  ;;  %p10507_p3 = scmp.lt.s32.totalorder %s7932_s4, %s7932_s4 }
 0x16b   :  { %v10913_v14 = vld [vmem:[#allocation2 + $0x2] sm:$0xff]  ;;  %8760 = vmatmul.mubr.msk.f32.vlgmr.msra.gmra.mrb[0].mxu0 %vm356_vm2, %v381_v15  ;;  %v383_v19 = vld [vmem:[#allocation2 + $0x19] sm:$0xff]  ;;  %v10929_v23 = vld [vmem:[#allocation2 + $0xb] sm:$0xff] }
 0x16c   :  { %v10916_v16 = vld [vmem:[#allocation2 + $0x3] sm:$0xff]  ;;  %8772 = vmatpush3.msk.msra.mxu0 %vm414_vm1, %v379_v3  ;;  %8762 = vmatprep.mubr.msk.f32.mxu0 %vm356_vm2, %v382_v18  ;;  %v386_v22 = vld [vmem:[#allocation2 + $0x31] sm:$0xff]  ;;  %v658_v25 = vld [vmem:[#allocation2 + $0x1a] sm:$0xff] }
 0x16d   :  { %v10918_v17 = vld [vmem:[#allocation2 + $0x4] sm:$0xff]  ;;  %8785 = vmatprep.subr.msk.mxu0 %vm414_vm1, %v10911_v11  ;;  %v10931_v24 = vld [vmem:[#allocation2 + $0xc] sm:$0xff]  ;;  %v808_v27 = vld [vmem:[#allocation2 + $0x1b] sm:$0xff] }
 0x16e   :  { %1152 = vst.msk [vmem:[#allocation2] sm:$0xff] %vm338_vm0, %v12196_v0  ;;  %v384_v20 = vld [vmem:[#allocation2 + $0x21] sm:$0xff]  ;;  %v385_v21 = vld [vmem:[#allocation2 + $0x29] sm:$0xff]  ;;  %v807_v26 = vld [vmem:[#allocation2 + $0x13] sm:$0xff] }
 0x16f   :  { %8763 = vmatmul.mubr.msk.f32.gmra.mrb[2].mxu0 %vm356_vm2, %v383_v19  ;;  %v10933_v28 = vld [vmem:[#allocation2 + $0x14] sm:$0xff]  ;;  %v10935_v29 = vld [vmem:[#allocation2 + $0x1c] sm:$0xff]  ;;  %v660_v35 = vld [vmem:[#allocation2 + $0x2a] sm:$0xff] }
 0x170   :  { %8765 = vmatprep.mubr.msk.f32.mxu0 %vm356_vm2, %v384_v20  ;;  %v387_v30 = vld [vmem:[#allocation2 + $0x39] sm:$0xff]  ;;  %v373_v32 = vld [vmem:[#allocation2 + $0x10] sm:$0xff]  ;;  %v659_v34 = vld [vmem:[#allocation2 + $0x22] sm:$0xff] }
 0x171   :  { %v10937_v33 = vld [vmem:[#allocation2 + $0x3c] sm:$0xff]  ;;  %v810_v37 = vld [vmem:[#allocation2 + $0x2b] sm:$0xff]  ;;  %v811_v42 = vld [vmem:[#allocation2 + $0x33] sm:$0xff] }
 0x172   :  { %v809_v36 = vld [vmem:[#allocation2 + $0x23] sm:$0xff]  ;;  %v374_v38 = vld [vmem:[#allocation2 + $0x18] sm:$0xff]  ;;  %v960_v48 = vld [vmem:[#allocation2 + $0x2c] sm:$0xff] }
 0x173   :  { %8766 = vmatmul.mubr.msk.f32.gmra.mrb[4].mxu0 %vm356_vm2, %v385_v21  ;;  %v375_v39 = vld [vmem:[#allocation2 + $0x20] sm:$0xff]  ;;  %v376_v40 = vld [vmem:[#allocation2 + $0x28] sm:$0xff]  ;;  %v661_v41 = vld [vmem:[#allocation2 + $0x32] sm:$0xff] }
 0x174   :  { %8768 = vmatprep.mubr.msk.f32.mxu0 %vm356_vm2, %v386_v22  ;;  %v656_v43 = vld [vmem:[#allocation2 + $0xa] sm:$0xff]  ;;  %v657_v44 = vld [vmem:[#allocation2 + $0x12] sm:$0xff]  ;;  %v662_v45 = vld [vmem:[#allocation2 + $0x3a] sm:$0xff] }
 0x175   :  { %1153 = vst.msk [vmem:[#allocation2 + $0x8] sm:$0xff] %vm338_vm0, %v12196_v0  ;;  %1154 = vst.msk [vmem:[#allocation2 + $0x10] sm:$0xff] %vm338_vm0, %v12196_v0  ;;  %v812_v46 = vld [vmem:[#allocation2 + $0x3b] sm:$0xff]  ;;  %v959_v47 = vld [vmem:[#allocation2 + $0x24] sm:$0xff] }
 0x176   :  { %1155 = vst.msk [vmem:[#allocation2 + $0x18] sm:$0xff] %vm338_vm0, %v12196_v0  ;;  %v377_v49 = vld [vmem:[#allocation2 + $0x30] sm:$0xff]  ;;  %v378_v50 = vld [vmem:[#allocation2 + $0x38] sm:$0xff]  ;;  %1160 = vst.msk [vmem:[#allocation2 + $0x40] sm:$0xff] %vm338_vm0, %v12196_v0 }
 0x177   :  { %1156 = vst.msk [vmem:[#allocation2 + $0x20] sm:$0xff] %vm338_vm0, %v12196_v0  ;;  %1157 = vst.msk [vmem:[#allocation2 + $0x28] sm:$0xff] %vm338_vm0, %v12196_v0  ;;  %v961_v51 = vld [vmem:[#allocation2 + $0x34] sm:$0xff]  ;;  %8769 = vmatmul.mubr.msk.f32.gmra.mrb[6].mxu0 %vm356_vm2, %v387_v30 }
 0x178   :  { %1158 = vst.msk [vmem:[#allocation2 + $0x30] sm:$0xff] %vm338_vm0, %v12196_v0  ;;  %1159 = vst.msk [vmem:[#allocation2 + $0x38] sm:$0xff] %vm338_vm0, %v12196_v0  ;;  %8773 = vmatprep.mubr.msk.f32.mxu0 %vm356_vm2, %v371_v13 }
 0x17b   :  { %8774 = vmatmul.mubr.msk.f32.vlgmr.msra.gmra.mrb[0].mxu0 %vm356_vm2, %v372_v31 }
 0x17c   :  { %8786 = vmatpush3.msk.msra.mxu0 %vm414_vm1, %v10911_v11  ;;  %8776 = vmatprep.mubr.msk.f32.mxu0 %vm356_vm2, %v373_v32 }
 0x17d   :  { %8799 = vmatprep.subr.msk.mxu0 %vm414_vm1, %v814_v52 }
 0x17f   :  { %8777 = vmatmul.mubr.msk.f32.gmra.mrb[2].mxu0 %vm356_vm2, %v374_v38 }
 0x180   :  { %8779 = vmatprep.mubr.msk.f32.mxu0 %vm356_vm2, %v375_v39 }
 0x183   :  { %8780 = vmatmul.mubr.msk.f32.gmra.mrb[4].mxu0 %vm356_vm2, %v376_v40 }
 0x184   :  { %8782 = vmatprep.mubr.msk.f32.mxu0 %vm356_vm2, %v377_v49 }
 0x187   :  { %8783 = vmatmul.mubr.msk.f32.gmra.mrb[6].mxu0 %vm356_vm2, %v378_v50 }
 0x188   :  { %8787 = vmatprep.mubr.msk.f32.mxu0 %vm356_vm2, %v10913_v14 }
 0x18b   :  { %8788 = vmatmul.mubr.msk.f32.vlgmr.msra.gmra.mrb[0].mxu0 %vm356_vm2, %v656_v43 }
 0x18c   :  { %8800 = vmatpush3.msk.msra.mxu0 %vm414_vm1, %v814_v52  ;;  %8790 = vmatprep.mubr.msk.f32.mxu0 %vm356_vm2, %v657_v44 }
 0x18d   :  { %8813 = vmatprep.subr.msk.mxu0 %vm414_vm1, %v964_v53 }
 0x18f   :  { %8791 = vmatmul.mubr.msk.f32.gmra.mrb[2].mxu0 %vm356_vm2, %v658_v25 }
 0x190   :  { %8793 = vmatprep.mubr.msk.f32.mxu0 %vm356_vm2, %v659_v34 }
 0x193   :  { %8794 = vmatmul.mubr.msk.f32.gmra.mrb[4].mxu0 %vm356_vm2, %v660_v35  ;;  %v1469_v35 = vld [vmem:[#allocation8 + $0x20] sm:$0xff] }
 0x194   :  { %8796 = vmatprep.mubr.msk.f32.mxu0 %vm356_vm2, %v661_v41 }
 0x197   :  { %8797 = vmatmul.mubr.msk.f32.gmra.mrb[6].mxu0 %vm356_vm2, %v662_v45 }
 0x198   :  { %8801 = vmatprep.mubr.msk.f32.mxu0 %vm356_vm2, %v10916_v16 }
 0x19b   :  { %8802 = vmatmul.mubr.msk.f32.vlgmr.msra.gmra.mrb[0].mxu0 %vm356_vm2, %v10929_v23 }
 0x19c   :  { %8814 = vmatpush3.msk.msra.mxu0 %vm414_vm1, %v964_v53  ;;  %8804 = vmatprep.mubr.msk.f32.mxu0 %vm356_vm2, %v807_v26  ;;  %vm5528_vm1 = vcmask 257024  }
 0x19f   :  { %8805 = vmatmul.mubr.msk.f32.gmra.mrb[2].mxu0 %vm356_vm2, %v808_v27 }
 0x1a0   :  { %8807 = vmatprep.mubr.msk.f32.mxu0 %vm356_vm2, %v809_v36  ;;  %v1470_v36 = vld [vmem:[#allocation8 + $0x28] sm:$0xff] }
 0x1a1   :  { %v11021_v40 = vpack.c.bf16 %v1470_v36, %v1469_v35  ;;  %v8073_v36 = vld [vmem:[#allocation10] ss:$0 sm:$0xff] }
 0x1a3   :  { %8808 = vmatmul.mubr.msk.f32.gmra.mrb[4].mxu0 %vm356_vm2, %v810_v37 }
 0x1a4   :  { %8810 = vmatprep.mubr.msk.f32.mxu0 %vm356_vm2, %v811_v42 }
 0x1a7   :  { %8811 = vmatmul.mubr.msk.f32.gmra.mrb[6].mxu0 %vm356_vm2, %v812_v46 }
 0x1a8   :  { %8815 = vmatprep.mubr.msk.f32.mxu0 %vm356_vm2, %v10918_v17 }
 0x1ab   :  { %8816 = vmatmul.mubr.msk.f32.vlgmr.msra.gmra.mrb[0].mxu0 %vm356_vm2, %v10931_v24 }
 0x1ac   :  { %8818 = vmatprep.mubr.msk.f32.mxu0 %vm356_vm2, %v10933_v28 }
 0x1af   :  { %8819 = vmatmul.mubr.msk.f32.gmra.mrb[2].mxu0 %vm356_vm2, %v10935_v29 }
 0x1b0   :  { %8821 = vmatprep.mubr.msk.f32.mxu0 %vm356_vm2, %v959_v47 }
 0x1b3   :  { %8822 = vmatmul.mubr.msk.f32.gmra.mrb[4].mxu0 %vm356_vm2, %v960_v48 }
 0x1b4   :  { %8824 = vmatprep.mubr.msk.f32.mxu0 %vm356_vm2, %v961_v51 }
 0x1b7   :  { %8825 = vmatmul.mubr.msk.f32.gmra.mrb[6].mxu0 %vm356_vm2, %v10937_v33  ;;  %vm6175_vm2 = vcmask 256000  }
 0x27e   :  { %v8817_v61 = vpop.f32.mrb[0].mxu0 }
 0x27f   :  { %v1113_v63 = vmul.f32 %v8817_v61, %v8030_v60  ;;  %v1058_v1 = vpop.f32.mrb[1].mxu0 }
 0x280   :  { %v1112_v2 = vmul.f32 %v8030_v60, %v1058_v1 }
 0x281   :  { %v1128_v3 = vadd.f32 %v8031_v62, %v1113_v63 }
 0x282   :  { %v1127_v4 = vadd.f32 %v8031_v62, %v1112_v2  ;;  %v8820_v5 = vpop.f32.mrb[2].mxu0 }
 0x283   :  { %v1136_v6 = vmax.f32 %v1128_v3, 0.0  ;;  %v1115_v7 = vmul.f32 %v8820_v5, %v8030_v60  ;;  %v1068_v8 = vpop.f32.mrb[3].mxu0 }
 0x284   :  { %v1135_v9 = vmax.f32 %v1127_v4, 0.0  ;;  %v1114_v10 = vmul.f32 %v8030_v60, %v1068_v8 }
 0x285   :  { %1145 = vst.msk [vmem:[#allocation3 + $0x8] sm:$0xff] %vm1143_vm4, %v1136_v6  ;;  %v1130_v11 = vadd.f32 %v8031_v62, %v1115_v7 }
 0x286   :  { %1144 = vst.msk [vmem:[#allocation3] sm:$0xff] %vm1143_vm4, %v1135_v9  ;;  %v1129_v12 = vadd.f32 %v8031_v62, %v1114_v10  ;;  %v8823_v13 = vpop.f32.mrb[4].mxu0 }
 0x287   :  { %v1138_v14 = vmax.f32 %v1130_v11, 0.0  ;;  %v1117_v15 = vmul.f32 %v8823_v13, %v8030_v60  ;;  %v1078_v16 = vpop.f32.mrb[5].mxu0  ;;  %v1617_v11 = vld [vmem:[#allocation8 + $0x30] sm:$0xff] }
 0x288   :  { %v1137_v17 = vmax.f32 %v1129_v12, 0.0  ;;  %v1116_v18 = vmul.f32 %v8030_v60, %v1078_v16  ;;  %v1618_v12 = vld [vmem:[#allocation8 + $0x38] sm:$0xff] }
 0x289   :  { %1147 = vst.msk [vmem:[#allocation3 + $0x18] sm:$0xff] %vm1143_vm4, %v1138_v14  ;;  %v1132_v19 = vadd.f32 %v8031_v62, %v1117_v15 }
 0x28a   :  { %1146 = vst.msk [vmem:[#allocation3 + $0x10] sm:$0xff] %vm1143_vm4, %v1137_v17  ;;  %v1131_v20 = vadd.f32 %v8031_v62, %v1116_v18  ;;  %v8826_v21 = vpop.f32.mrb[6].mxu0 }
 0x28b   :  { %v1140_v22 = vmax.f32 %v1132_v19, 0.0  ;;  %v1119_v23 = vmul.f32 %v8826_v21, %v8030_v60  ;;  %v1088_v24 = vpop.f32.mrb[7].mxu0  ;;  %v9586_v21 = vpack.c.bf16 %v1618_v12, %v1617_v11 }
 0x28c   :  { %v1165_v25 = vld [vmem:[#allocation3 + $0x8] sm:$0xff]  ;;  %v1139_v26 = vmax.f32 %v1131_v20, 0.0  ;;  %v1118_v27 = vmul.f32 %v8030_v60, %v1088_v24 }
 0x28d   :  { %1169 = vst.msk [vmem:[#allocation2 + $0xa] sm:$0xff] %vm1143_vm4, %v1165_v25  ;;  %v1164_v28 = vld [vmem:[#allocation3] sm:$0xff]  ;;  %1149 = vst.msk [vmem:[#allocation3 + $0x28] sm:$0xff] %vm1143_vm4, %v1140_v22  ;;  %v1134_v29 = vadd.f32 %v8031_v62, %v1119_v23  ;;  %v1765_v22 = vld [vmem:[#allocation8 + $0x40] sm:$0xff] }
 0x28e   :  { %1168 = vst.msk [vmem:[#allocation2 + $0x2] sm:$0xff] %vm1143_vm4, %v1164_v28  ;;  %1148 = vst.msk [vmem:[#allocation3 + $0x20] sm:$0xff] %vm1143_vm4, %v1139_v26  ;;  %v1133_v30 = vadd.f32 %v8031_v62, %v1118_v27  ;;  %v1766_v23 = vld [vmem:[#allocation8 + $0x48] sm:$0xff]  ;;  %v8075_v26 = vld [vmem:[%s12219_s14 + $0x28] sm:$0xff] }
 0x28f   :  { %v1142_v31 = vmax.f32 %v1134_v29, 0.0  ;;  %v9590_v24 = vpack.c.bf16 %v1766_v23, %v1765_v22  ;;  %v8074_v25 = vld [vmem:[%s12219_s14 + $0x20] sm:$0xff]  ;;  %v8076_v28 = vld [vmem:[%s12219_s14 + $0x30] sm:$0xff]  ;;  %v8077_v29 = vld [vmem:[%s12219_s14 + $0x38] sm:$0xff] }
 0x290   :  { %v1167_v32 = vld [vmem:[#allocation3 + $0x18] sm:$0x3f]  ;;  %v1141_v33 = vmax.f32 %v1133_v30, 0.0  ;;  %v9594_v27 = vpack.c.bf16 %v8075_v26, %v8074_v25  ;;  %v9598_v30 = vpack.c.bf16 %v8077_v29, %v8076_v28 }
 0x291   :  { %v1166_v34 = vld [vmem:[#allocation3 + $0x10] sm:$0xff]  ;;  %1151 = vst.msk [vmem:[#allocation3 + $0x38] sm:$0xff] %vm1143_vm4, %v1142_v31  ;;  %v1986_v31 = vld [vmem:[%s12219_s14] sm:$0xff] }
 0x292   :  { %1172 = vst.msk [vmem:[#allocation2 + $0x1a] sm:$0x3f] %vm1171_vm5, %v1167_v32  ;;  %9595 = vmatprep.subr.bf16.mxu0 %v9594_v27  ;;  %v1987_v32 = vld [vmem:[%s12219_s14 + $0x8] sm:$0xff] }
 0x293   :  { %1170 = vst.msk [vmem:[#allocation2 + $0x12] sm:$0xff] %vm1143_vm4, %v1166_v34  ;;  %1150 = vst.msk [vmem:[#allocation3 + $0x30] sm:$0xff] %vm1143_vm4, %v1141_v33  ;;  %9597 = vmatpush3.bf16.msra.mxu0 %v9594_v27  ;;  %v11135_v33 = vpack.c.bf16 %v1987_v32, %v1986_v31  ;;  %v8072_v34 = vld [vmem:[%s12220_s10] ss:$0 sm:$0xff] }
 0x294   :  { %v1461_v53 = vld [vmem:[#allocation2 + $0xa] sm:$0xff]  ;;  %9599 = vmatprep.subr.bf16.mxu0 %v9598_v30 }
 0x295   :  { %v1173_v37 = vld [vmem:[#allocation3 + $0x22] sm:$0xff] }
 0x296   :  { %v1191_v38 = vld [vmem:[#allocation2 + $0x1] sm:$0xff]  ;;  %v1192_v39 = vld [vmem:[#allocation2 + $0x9] sm:$0xff]  ;;  %1177 = vst.msk [vmem:[#allocation2 + $0x24] sm:$0xff] %vm1143_vm4, %v1173_v37 }
 0x297   :  { %8831 = vmatprep.mubr.msk.f32.mxu1 %vm1143_vm4, %v1191_v38  ;;  %v11025_v41 = vld [vmem:[#allocation2] sm:$0xff]  ;;  %v1182_v50 = vld [vmem:[#allocation2 + $0x8] sm:$0xff]  ;;  %9601 = vmatpush3.bf16.msra.mxu0 %v9598_v30 }
 0x298   :  { %8832 = vmatmul.mubr.msk.f32.vlgmr.msra.gmra.mrb[0].mxu1 %vm1143_vm4, %v1192_v39  ;;  %v11028_v42 = vld [vmem:[#allocation2 + $0x2] sm:$0xff]  ;;  %v1176_v45 = vld [vmem:[#allocation3 + $0x3a] sm:$0x3f]  ;;  %9603 = vmatprep.subr.bf16.mxu0 %v11135_v33 }
 0x299   :  { %v11030_v43 = vld [vmem:[#allocation2 + $0x3] sm:$0xff]  ;;  %9581 = vmatpush3.bf16.msra.mxu1 %v11004_v59  ;;  %1180 = vst.msk [vmem:[#allocation2 + $0x3c] sm:$0x3f] %vm1171_vm5, %v1176_v45  ;;  %v1463_v54 = vld [vmem:[#allocation2 + $0x1a] sm:$0xff] }
 0x29a   :  { %v11032_v44 = vld [vmem:[#allocation2 + $0x4] sm:$0xff]  ;;  %v1175_v47 = vld [vmem:[#allocation3 + $0x32] sm:$0xff]  ;;  %9583 = vmatprep.subr.bf16.mxu1 %v11021_v40  ;;  %v11042_v55 = vld [vmem:[#allocation2 + $0x1b] sm:$0xff] }
 0x29b   :  { %1950 = vst.msk [vmem:[#allocation2] sm:$0xff] %vm338_vm0, %v12196_v0  ;;  %v1174_v46 = vld [vmem:[#allocation3 + $0x2a] sm:$0xff]  ;;  %v1194_v49 = vld [vmem:[#allocation2 + $0x19] sm:$0xff] }
 0x29c   :  { %v1193_v48 = vld [vmem:[#allocation2 + $0x11] sm:$0xff]  ;;  %1178 = vst.msk [vmem:[#allocation2 + $0x2c] sm:$0xff] %vm1143_vm4, %v1174_v46  ;;  %1179 = vst.msk [vmem:[#allocation2 + $0x34] sm:$0xff] %vm1143_vm4, %v1175_v47  ;;  %v11053_v61 = vld [vmem:[#allocation2 + $0x1c] sm:$0xff] }
 0x29d   :  { %8834 = vmatprep.mubr.msk.f32.mxu1 %vm1143_vm4, %v1193_v48  ;;  %v1183_v51 = vld [vmem:[#allocation2 + $0x10] sm:$0xff]  ;;  %v1184_v52 = vld [vmem:[#allocation2 + $0x18] sm:$0xff]  ;;  %v1195_v62 = vld [vmem:[#allocation2 + $0x21] sm:$0xff] }
 0x29e   :  { %8835 = vmatmul.mubr.msk.f32.gmra.mrb[2].mxu1 %vm1143_vm4, %v1194_v49  ;;  %v1462_v56 = vld [vmem:[#allocation2 + $0x12] sm:$0xff]  ;;  %v1185_v63 = vld [vmem:[#allocation2 + $0x20] sm:$0xff] }
 0x29f   :  { %v11045_v57 = vld [vmem:[#allocation2 + $0xb] sm:$0xff]  ;;  %v11047_v58 = vld [vmem:[#allocation2 + $0x13] sm:$0xff]  ;;  %8837 = vmatprep.mubr.msk.f32.mxu1 %vm1143_vm4, %v1195_v62  ;;  %v1464_v1 = vld [vmem:[#allocation2 + $0x22] sm:$0xff] }
 0x2a0   :  { %v11049_v59 = vld [vmem:[#allocation2 + $0xc] sm:$0xff]  ;;  %v11051_v60 = vld [vmem:[#allocation2 + $0x14] sm:$0xff]  ;;  %v1612_v2 = vld [vmem:[#allocation2 + $0x23] sm:$0xff] }
 0x2a1   :  { %1951 = vst.msk [vmem:[#allocation2 + $0x8] sm:$0xff] %vm338_vm0, %v12196_v0  ;;  %1952 = vst.msk [vmem:[#allocation2 + $0x10] sm:$0xff] %vm338_vm0, %v12196_v0  ;;  %v11062_v3 = vld [vmem:[#allocation2 + $0x24] sm:$0xff]  ;;  %v1763_v7 = vld [vmem:[#allocation2 + $0x3c] sm:$0xff] }
 0x2a2   :  { %1953 = vst.msk [vmem:[#allocation2 + $0x18] sm:$0xff] %vm338_vm0, %v12196_v0  ;;  %1954 = vst.msk [vmem:[#allocation2 + $0x20] sm:$0xff] %vm338_vm0, %v12196_v0 }
 0x2a3   :  { %v1196_v4 = vld [vmem:[#allocation2 + $0x29] sm:$0xff]  ;;  %v1197_v5 = vld [vmem:[#allocation2 + $0x31] sm:$0xff]  ;;  %v1198_v6 = vld [vmem:[#allocation2 + $0x39] sm:$0xff] }
 0x2a4   :  { %8838 = vmatmul.mubr.msk.f32.gmra.mrb[4].mxu1 %vm1143_vm4, %v1196_v4  ;;  %v1186_v8 = vld [vmem:[#allocation2 + $0x28] sm:$0xff]  ;;  %v1187_v9 = vld [vmem:[#allocation2 + $0x30] sm:$0xff]  ;;  %v1188_v10 = vld [vmem:[#allocation2 + $0x38] sm:$0xff] }
 0x2a5   :  { %8840 = vmatprep.mubr.msk.f32.mxu1 %vm1143_vm4, %v1197_v5  ;;  %v1465_v13 = vld [vmem:[#allocation2 + $0x2a] sm:$0xff]  ;;  %v1466_v14 = vld [vmem:[#allocation2 + $0x32] sm:$0xff]  ;;  %v1467_v15 = vld [vmem:[#allocation2 + $0x3a] sm:$0xff] }
 0x2a6   :  { %v1613_v16 = vld [vmem:[#allocation2 + $0x2b] sm:$0xff]  ;;  %v1615_v17 = vld [vmem:[#allocation2 + $0x3b] sm:$0xff]  ;;  %v1614_v18 = vld [vmem:[#allocation2 + $0x33] sm:$0xff] }
 0x2a7   :  { %v1761_v19 = vld [vmem:[#allocation2 + $0x2c] sm:$0xff]  ;;  %v1762_v20 = vld [vmem:[#allocation2 + $0x34] sm:$0xff]  ;;  %1958 = vst.msk [vmem:[#allocation2 + $0x40] sm:$0xff] %vm338_vm0, %v12196_v0 }
 0x2a8   :  { %8841 = vmatmul.mubr.msk.f32.gmra.mrb[6].mxu1 %vm1143_vm4, %v1198_v6  ;;  %1955 = vst.msk [vmem:[#allocation2 + $0x28] sm:$0xff] %vm338_vm0, %v12196_v0  ;;  %1956 = vst.msk [vmem:[#allocation2 + $0x30] sm:$0xff] %vm338_vm0, %v12196_v0 }
 0x2a9   :  { %1957 = vst.msk [vmem:[#allocation2 + $0x38] sm:$0xff] %vm338_vm0, %v12196_v0  ;;  %8847 = vmatprep.mubr.msk.f32.mxu1 %vm1143_vm4, %v11025_v41 }
 0x2ac   :  { %8848 = vmatmul.mubr.msk.f32.vlgmr.msra.gmra.mrb[0].mxu1 %vm1143_vm4, %v1182_v50 }
 0x2ad   :  { %9585 = vmatpush3.bf16.msra.mxu1 %v11021_v40  ;;  %8850 = vmatprep.mubr.msk.f32.mxu1 %vm1143_vm4, %v1183_v51 }
 0x2ae   :  { %9587 = vmatprep.subr.bf16.mxu1 %v9586_v21 }
 0x2b0   :  { %8851 = vmatmul.mubr.msk.f32.gmra.mrb[2].mxu1 %vm1143_vm4, %v1184_v52 }
 0x2b1   :  { %8853 = vmatprep.mubr.msk.f32.mxu1 %vm1143_vm4, %v1185_v63 }
 0x2b4   :  { %8854 = vmatmul.mubr.msk.f32.gmra.mrb[4].mxu1 %vm1143_vm4, %v1186_v8 }
 0x2b5   :  { %8856 = vmatprep.mubr.msk.f32.mxu1 %vm1143_vm4, %v1187_v9  ;;  %v1988_v9 = vld [vmem:[%s12219_s14 + $0x10] sm:$0xff] }
 0x2b8   :  { %8857 = vmatmul.mubr.msk.f32.gmra.mrb[6].mxu1 %vm1143_vm4, %v1188_v10  ;;  %v1989_v10 = vld [vmem:[%s12219_s14 + $0x18] sm:$0xff] }
 0x2b9   :  { %8863 = vmatprep.mubr.msk.f32.mxu1 %vm1143_vm4, %v11028_v42 }
 0x2bc   :  { %8864 = vmatmul.mubr.msk.f32.vlgmr.msra.gmra.mrb[0].mxu1 %vm1143_vm4, %v1461_v53 }
 0x2bd   :  { %9589 = vmatpush3.bf16.msra.mxu1 %v9586_v21  ;;  %8866 = vmatprep.mubr.msk.f32.mxu1 %vm1143_vm4, %v1462_v56 }
 0x2be   :  { %9591 = vmatprep.subr.bf16.mxu1 %v9590_v24 }
 0x2c0   :  { %8867 = vmatmul.mubr.msk.f32.gmra.mrb[2].mxu1 %vm1143_vm4, %v1463_v54 }
 0x2c1   :  { %8869 = vmatprep.mubr.msk.f32.mxu1 %vm1143_vm4, %v1464_v1 }
 0x2c4   :  { %8870 = vmatmul.mubr.msk.f32.gmra.mrb[4].mxu1 %vm1143_vm4, %v1465_v13 }
 0x2c5   :  { %8872 = vmatprep.mubr.msk.f32.mxu1 %vm1143_vm4, %v1466_v14  ;;  %v9606_v14 = vpack.c.bf16 %v1989_v10, %v1988_v9  ;;  %v8121_v9 = vld [vmem:[%s12219_s14 + $0x98] sm:$0xff] }
 0x2c8   :  { %8873 = vmatmul.mubr.msk.f32.gmra.mrb[6].mxu1 %vm1143_vm4, %v1467_v15 }
 0x2c9   :  { %8879 = vmatprep.mubr.msk.f32.mxu1 %vm1143_vm4, %v11030_v43 }
 0x2cc   :  { %8880 = vmatmul.mubr.msk.f32.vlgmr.msra.gmra.mrb[0].mxu1 %vm1143_vm4, %v11045_v57 }
 0x2cd   :  { %9593 = vmatpush3.bf16.msra.mxu1 %v9590_v24  ;;  %8882 = vmatprep.mubr.msk.f32.mxu1 %vm1143_vm4, %v11047_v58 }
 0x2d0   :  { %8883 = vmatmul.mubr.msk.f32.gmra.mrb[2].mxu1 %vm1143_vm4, %v11042_v55 }
 0x2d1   :  { %8885 = vmatprep.mubr.msk.f32.mxu1 %vm1143_vm4, %v1612_v2 }
 0x2d4   :  { %8886 = vmatmul.mubr.msk.f32.gmra.mrb[4].mxu1 %vm1143_vm4, %v1613_v16  ;;  %v8094_v16 = vld [vmem:[%s12219_s14 + $0x40] sm:$0xff] }
 0x2d5   :  { %8888 = vmatprep.mubr.msk.f32.mxu1 %vm1143_vm4, %v1614_v18 }
 0x2d8   :  { %8889 = vmatmul.mubr.msk.f32.gmra.mrb[6].mxu1 %vm1143_vm4, %v1615_v17  ;;  %v8095_v17 = vld [vmem:[%s12219_s14 + $0x48] sm:$0xff] }
 0x2d9   :  { %8895 = vmatprep.mubr.msk.f32.mxu1 %vm1143_vm4, %v11032_v44  ;;  %v9610_v25 = vpack.c.bf16 %v8095_v17, %v8094_v16  ;;  %v3039_v16 = vld [vmem:[#allocation16 + $0x38] sm:$0xff]  ;;  %v3030_v17 = vld [vmem:[#allocation16] sm:$0xff] }
 0x2dc   :  { %8896 = vmatmul.mubr.msk.f32.vlgmr.msra.gmra.mrb[0].mxu1 %vm1143_vm4, %v11049_v59 }
 0x2dd   :  { %8898 = vmatprep.mubr.msk.f32.mxu1 %vm1143_vm4, %v11051_v60 }
 0x2e0   :  { %8899 = vmatmul.mubr.msk.f32.gmra.mrb[2].mxu1 %vm1143_vm4, %v11053_v61 }
 0x2e1   :  { %8901 = vmatprep.mubr.msk.f32.mxu1 %vm1143_vm4, %v11062_v3 }
 0x2e4   :  { %8902 = vmatmul.mubr.msk.f32.gmra.mrb[4].mxu1 %vm1143_vm4, %v1761_v19 }
 0x2e5   :  { %8904 = vmatprep.mubr.msk.f32.mxu1 %vm1143_vm4, %v1762_v20 }
 0x2e8   :  { %8905 = vmatmul.mubr.msk.f32.gmra.mrb[6].mxu1 %vm1143_vm4, %v1763_v7 }
 0x2e9   :  { %9026 = vmatprep.mubr.msk.f32.mxu1 %vm10599_vm7, %v12196_v0 }
 0x3af   :  { %v8897_v35 = vpop.f32.mrb[0].mxu1 }
 0x3b0   :  { %v1912_v37 = vmul.f32 %v8897_v35, %v8072_v34  ;;  %v1857_v38 = vpop.f32.mrb[1].mxu1 }
 0x3b1   :  { %v1911_v39 = vmul.f32 %v8072_v34, %v1857_v38 }
 0x3b2   :  { %v1927_v40 = vadd.f32 %v8073_v36, %v1912_v37 }
 0x3b3   :  { %v1926_v41 = vadd.f32 %v8073_v36, %v1911_v39  ;;  %v8900_v42 = vpop.f32.mrb[2].mxu1 }
 0x3b4   :  { %v1935_v43 = vmax.f32 %v1927_v40, 0.0  ;;  %v1914_v44 = vmul.f32 %v8900_v42, %v8072_v34  ;;  %v1867_v45 = vpop.f32.mrb[3].mxu1 }
 0x3b5   :  { %v1934_v46 = vmax.f32 %v1926_v41, 0.0  ;;  %v1913_v47 = vmul.f32 %v8072_v34, %v1867_v45 }
 0x3b6   :  { %1943 = vst.msk [vmem:[#allocation3 + $0x8] sm:$0xff] %vm338_vm0, %v1935_v43  ;;  %v1929_v48 = vadd.f32 %v8073_v36, %v1914_v44 }
 0x3b7   :  { %1942 = vst.msk [vmem:[#allocation3] sm:$0xff] %vm338_vm0, %v1934_v46  ;;  %v1928_v49 = vadd.f32 %v8073_v36, %v1913_v47  ;;  %v8903_v50 = vpop.f32.mrb[4].mxu1 }
 0x3b8   :  { %v1937_v51 = vmax.f32 %v1929_v48, 0.0  ;;  %v1916_v52 = vmul.f32 %v8903_v50, %v8072_v34  ;;  %v1877_v53 = vpop.f32.mrb[5].mxu1  ;;  %v8096_v48 = vld [vmem:[%s12219_s14 + $0x50] sm:$0xff] }
 0x3b9   :  { %v1936_v54 = vmax.f32 %v1928_v49, 0.0  ;;  %v1915_v55 = vmul.f32 %v8072_v34, %v1877_v53  ;;  %v8097_v49 = vld [vmem:[%s12219_s14 + $0x58] sm:$0xff] }
 0x3ba   :  { %1945 = vst.msk [vmem:[#allocation3 + $0x18] sm:$0xff] %vm338_vm0, %v1937_v51  ;;  %v1931_v56 = vadd.f32 %v8073_v36, %v1916_v52 }
 0x3bb   :  { %1944 = vst.msk [vmem:[#allocation3 + $0x10] sm:$0xff] %vm338_vm0, %v1936_v54  ;;  %v1930_v57 = vadd.f32 %v8073_v36, %v1915_v55  ;;  %v8906_v58 = vpop.f32.mrb[6].mxu1 }
 0x3bc   :  { %v1939_v59 = vmax.f32 %v1931_v56, 0.0  ;;  %v1918_v60 = vmul.f32 %v8906_v58, %v8072_v34  ;;  %v1887_v61 = vpop.f32.mrb[7].mxu1 }
 0x3bd   :  { %v1963_v62 = vld [vmem:[#allocation3 + $0x8] sm:$0xff]  ;;  %v1938_v63 = vmax.f32 %v1930_v57, 0.0  ;;  %v1917_v1 = vmul.f32 %v8072_v34, %v1887_v61  ;;  %v9614_v61 = vpack.c.bf16 %v8097_v49, %v8096_v48 }
 0x3be   :  { %1967 = vst.msk [vmem:[#allocation2 + $0xa] sm:$0xff] %vm338_vm0, %v1963_v62  ;;  %v1962_v2 = vld [vmem:[#allocation3] sm:$0xff]  ;;  %1947 = vst.msk [vmem:[#allocation3 + $0x28] sm:$0xff] %vm338_vm0, %v1939_v59  ;;  %v1933_v3 = vadd.f32 %v8073_v36, %v1918_v60 }
 0x3bf   :  { %1966 = vst.msk [vmem:[#allocation2 + $0x2] sm:$0xff] %vm338_vm0, %v1962_v2  ;;  %1946 = vst.msk [vmem:[#allocation3 + $0x20] sm:$0xff] %vm338_vm0, %v1938_v63  ;;  %v1932_v4 = vadd.f32 %v8073_v36, %v1917_v1  ;;  %v8106_v62 = vld [vmem:[%s12219_s14 + $0x60] sm:$0xff]  ;;  %v8107_v63 = vld [vmem:[%s12219_s14 + $0x68] sm:$0xff] }
 0x3c0   :  { %v1941_v5 = vmax.f32 %v1933_v3, 0.0  ;;  %v9618_v1 = vpack.c.bf16 %v8107_v63, %v8106_v62  ;;  %v8108_v2 = vld [vmem:[%s12219_s14 + $0x70] sm:$0xff]  ;;  %v8109_v3 = vld [vmem:[%s12219_s14 + $0x78] sm:$0xff] }
 0x3c1   :  { %v1965_v6 = vld [vmem:[#allocation3 + $0x18] sm:$0x3f]  ;;  %v1940_v7 = vmax.f32 %v1932_v4, 0.0  ;;  %v9622_v4 = vpack.c.bf16 %v8109_v3, %v8108_v2 }
 0x3c2   :  { %v1964_v8 = vld [vmem:[#allocation3 + $0x10] sm:$0xff]  ;;  %1949 = vst.msk [vmem:[#allocation3 + $0x38] sm:$0xff] %vm338_vm0, %v1941_v5  ;;  %v8118_v5 = vld [vmem:[%s12219_s14 + $0x80] sm:$0xff] }
 0x3c3   :  { %1969 = vst.msk [vmem:[#allocation2 + $0x1a] sm:$0x3f] %vm350_vm6, %v1965_v6  ;;  %v8119_v6 = vld [vmem:[%s12219_s14 + $0x88] sm:$0xff] }
 0x3c4   :  { %1968 = vst.msk [vmem:[#allocation2 + $0x12] sm:$0xff] %vm338_vm0, %v1964_v8  ;;  %1948 = vst.msk [vmem:[#allocation3 + $0x30] sm:$0xff] %vm338_vm0, %v1940_v7  ;;  %v9626_v7 = vpack.c.bf16 %v8119_v6, %v8118_v5  ;;  %v8120_v8 = vld [vmem:[%s12219_s14 + $0x90] sm:$0xff] }
 0x3c5   :  { %v11173_v30 = vld [vmem:[#allocation2 + $0xa] sm:$0xff]  ;;  %v9630_v10 = vpack.c.bf16 %v8121_v9, %v8120_v8 }
 0x3c6   :  { %v1970_v11 = vld [vmem:[#allocation3 + $0x22] sm:$0xff] }
 0x3c7   :  { %v1990_v12 = vld [vmem:[#allocation2 + $0x1] sm:$0xff]  ;;  %v1991_v13 = vld [vmem:[#allocation2 + $0x9] sm:$0xff]  ;;  %1974 = vst.msk [vmem:[#allocation2 + $0x24] sm:$0xff] %vm338_vm0, %v1970_v11 }
 0x3c8   :  { %8915 = vmatprep.mubr.msk.f32.mxu0 %vm338_vm0, %v1990_v12  ;;  %v11155_v15 = vld [vmem:[#allocation2] sm:$0xff]  ;;  %v1979_v27 = vld [vmem:[#allocation2 + $0x8] sm:$0xff] }
 0x3c9   :  { %8916 = vmatmul.mubr.msk.f32.vlgmr.msra.gmra.mrb[8].mxu0 %vm338_vm0, %v1991_v13  ;;  %v11160_v18 = vld [vmem:[#allocation2 + $0x2] sm:$0xff]  ;;  %v1973_v21 = vld [vmem:[#allocation3 + $0x3a] sm:$0x3f]  ;;  %v3037_v12 = vld [vmem:[#allocation16 + $0x28] sm:$0xff] }
 0x3ca   :  { %v11162_v19 = vld [vmem:[#allocation2 + $0x3] sm:$0xff]  ;;  %9605 = vmatpush3.bf16.msra.mxu0 %v11135_v33  ;;  %1977 = vst.msk [vmem:[#allocation2 + $0x3c] sm:$0x3f] %vm350_vm6, %v1973_v21  ;;  %v11175_v31 = vld [vmem:[#allocation2 + $0x1a] sm:$0xff]  ;;  %v3038_v13 = vld [vmem:[#allocation16 + $0x30] sm:$0xff] }
 0x3cb   :  { %v11164_v20 = vld [vmem:[#allocation2 + $0x4] sm:$0xff]  ;;  %v1972_v23 = vld [vmem:[#allocation3 + $0x32] sm:$0xff]  ;;  %9607 = vmatprep.subr.bf16.mxu0 %v9606_v14  ;;  %v11177_v32 = vld [vmem:[#allocation2 + $0x1b] sm:$0xff] }
 0x3cc   :  { %4243 = vst.msk [vmem:[#allocation2] sm:$0xff] %vm338_vm0, %v12196_v0  ;;  %v1971_v22 = vld [vmem:[#allocation3 + $0x2a] sm:$0xff]  ;;  %1976 = vst.msk [vmem:[#allocation2 + $0x34] sm:$0xff] %vm338_vm0, %v1972_v23  ;;  %v1993_v26 = vld [vmem:[#allocation2 + $0x19] sm:$0xff] }
 0x3cd   :  { %v1992_v24 = vld [vmem:[#allocation2 + $0x11] sm:$0xff]  ;;  %1975 = vst.msk [vmem:[#allocation2 + $0x2c] sm:$0xff] %vm338_vm0, %v1971_v22  ;;  %v11190_v38 = vld [vmem:[#allocation2 + $0x1c] sm:$0xff]  ;;  %v9638_v22 = vpack.c.bf16 %v3039_v16, %v3038_v13 }
 0x3ce   :  { %8918 = vmatprep.mubr.msk.f32.mxu0 %vm338_vm0, %v1992_v24  ;;  %v1980_v28 = vld [vmem:[#allocation2 + $0x10] sm:$0xff]  ;;  %v1981_v29 = vld [vmem:[#allocation2 + $0x18] sm:$0xff]  ;;  %9609 = vmatpush3.bf16.msra.mxu0 %v9606_v14  ;;  %v1994_v39 = vld [vmem:[#allocation2 + $0x21] sm:$0xff]  ;;  %v12198_v14 = vmov 0.0|0.0  }
 0x3cf   :  { %8919 = vmatmul.mubr.msk.f32.gmra.mrb[10].mxu0 %vm338_vm0, %v1993_v26  ;;  %v11180_v33 = vld [vmem:[#allocation2 + $0x12] sm:$0xff]  ;;  %9611 = vmatprep.subr.bf16.mxu0 %v9610_v25  ;;  %v1982_v40 = vld [vmem:[#allocation2 + $0x20] sm:$0xff]  ;;  %v4256_v26 = vld [vmem:[%s12221_s29 + $0x8] sm:$0xff] }
 0x3d0   :  { %v11182_v34 = vld [vmem:[#allocation2 + $0xb] sm:$0xff]  ;;  %v11184_v35 = vld [vmem:[#allocation2 + $0x13] sm:$0xff]  ;;  %8921 = vmatprep.mubr.msk.f32.mxu0 %vm338_vm0, %v1994_v39  ;;  %v2265_v41 = vld [vmem:[#allocation2 + $0x22] sm:$0xff]  ;;  %9640 = vmatprep.subr.bf16.mxu1 %v12198_v14 }
 0x3d1   :  { %v11186_v36 = vld [vmem:[#allocation2 + $0xc] sm:$0xff]  ;;  %v11188_v37 = vld [vmem:[#allocation2 + $0x14] sm:$0xff]  ;;  %v11199_v42 = vld [vmem:[#allocation2 + $0x23] sm:$0xff] }
 0x3d2   :  { %4244 = vst.msk [vmem:[#allocation2 + $0x8] sm:$0xff] %vm338_vm0, %v12196_v0  ;;  %4245 = vst.msk [vmem:[#allocation2 + $0x10] sm:$0xff] %vm338_vm0, %v12196_v0  ;;  %v11201_v43 = vld [vmem:[#allocation2 + $0x24] sm:$0xff]  ;;  %v11206_v47 = vld [vmem:[#allocation2 + $0x3c] sm:$0xff] }
 0x3d3   :  { %4246 = vst.msk [vmem:[#allocation2 + $0x18] sm:$0xff] %vm338_vm0, %v12196_v0  ;;  %4247 = vst.msk [vmem:[#allocation2 + $0x20] sm:$0xff] %vm338_vm0, %v12196_v0  ;;  %v1997_v46 = vld [vmem:[#allocation2 + $0x39] sm:$0xff]  ;;  %v3036_v11 = vld [vmem:[#allocation16 + $0x20] sm:$0xff] }
 0x3d4   :  { %v1995_v44 = vld [vmem:[#allocation2 + $0x29] sm:$0xff]  ;;  %v1996_v45 = vld [vmem:[#allocation2 + $0x31] sm:$0xff]  ;;  %v2268_v55 = vld [vmem:[#allocation2 + $0x3a] sm:$0xff]  ;;  %4263 = vst.msk [vmem:[#allocation2 + $0x9] sm:$0xff] %vm4261_vm9, %v4256_v26 }
 0x3d5   :  { %8922 = vmatmul.mubr.msk.f32.gmra.mrb[12].mxu0 %vm338_vm0, %v1995_v44  ;;  %v1983_v50 = vld [vmem:[#allocation2 + $0x28] sm:$0xff]  ;;  %v1984_v51 = vld [vmem:[#allocation2 + $0x30] sm:$0xff]  ;;  %v1985_v52 = vld [vmem:[#allocation2 + $0x38] sm:$0xff] }
 0x3d6   :  { %8924 = vmatprep.mubr.msk.f32.mxu0 %vm338_vm0, %v1996_v45  ;;  %v2266_v53 = vld [vmem:[#allocation2 + $0x2a] sm:$0xff]  ;;  %v2267_v54 = vld [vmem:[#allocation2 + $0x32] sm:$0xff]  ;;  %v2418_v57 = vld [vmem:[#allocation2 + $0x3b] sm:$0xff] }
 0x3d7   :  { %v2416_v56 = vld [vmem:[#allocation2 + $0x2b] sm:$0xff]  ;;  %v2417_v58 = vld [vmem:[#allocation2 + $0x33] sm:$0xff]  ;;  %4251 = vst.msk [vmem:[#allocation2 + $0x40] sm:$0xff] %vm338_vm0, %v12196_v0 }
 0x3d8   :  { %v2566_v59 = vld [vmem:[#allocation2 + $0x2c] sm:$0xff]  ;;  %v2567_v60 = vld [vmem:[#allocation2 + $0x34] sm:$0xff] }
 0x3d9   :  { %8925 = vmatmul.mubr.msk.f32.gmra.mrb[14].mxu0 %vm338_vm0, %v1997_v46  ;;  %4248 = vst.msk [vmem:[#allocation2 + $0x28] sm:$0xff] %vm338_vm0, %v12196_v0  ;;  %4249 = vst.msk [vmem:[#allocation2 + $0x30] sm:$0xff] %vm338_vm0, %v12196_v0  ;;  %v3033_v21 = vld [vmem:[#allocation16 + $0x18] sm:$0xff]  ;;  %v11284_v24 = vld [vmem:[#allocation14 + $0x8] sm:$0x3f] }
 0x3da   :  { %4250 = vst.msk [vmem:[#allocation2 + $0x38] sm:$0xff] %vm338_vm0, %v12196_v0  ;;  %8935 = vmatprep.mubr.msk.f32.mxu0 %vm338_vm0, %v11155_v15  ;;  %v9635_v15 = vpack.c.bf16 %v3037_v12, %v3036_v11  ;;  %v8131_v12 = vld [vmem:[#allocation13] ss:$0 sm:$0xff] }
 0x3dd   :  { %8936 = vmatmul.mubr.msk.f32.vlgmr.msra.gmra.mrb[8].mxu0 %vm338_vm0, %v1979_v27  ;;  %v4257_v27 = vld [vmem:[%s12221_s29 + $0x10] sm:$0xff] }
 0x3de   :  { %9613 = vmatpush3.bf16.msra.mxu0 %v9610_v25  ;;  %8938 = vmatprep.mubr.msk.f32.mxu0 %vm338_vm0, %v1980_v28  ;;  %v4255_v25 = vld [vmem:[%s12221_s29] sm:$0xff]  ;;  %4264 = vst.msk [vmem:[#allocation2 + $0x11] sm:$0xff] %vm4261_vm9, %v4257_v27  ;;  %v4258_v28 = vld [vmem:[%s12221_s29 + $0x18] sm:$0xff] }
 0x3df   :  { %9615 = vmatprep.subr.bf16.mxu0 %v9614_v61  ;;  %4262 = vst.msk [vmem:[#allocation2 + $0x1] sm:$0xff] %vm4261_vm9, %v4255_v25  ;;  %4265 = vst.msk [vmem:[#allocation2 + $0x19] sm:$0xff] %vm4261_vm9, %v4258_v28 }
 0x3e1   :  { %8939 = vmatmul.mubr.msk.f32.gmra.mrb[10].mxu0 %vm338_vm0, %v1981_v29  ;;  %v4259_v29 = vld [vmem:[%s12221_s29 + $0x20] sm:$0xff] }
 0x3e2   :  { %8941 = vmatprep.mubr.msk.f32.mxu0 %vm338_vm0, %v1982_v40  ;;  %9617 = vmatpush3.bf16.msra.mxu0 %v9614_v61  ;;  %4266 = vst.msk [vmem:[#allocation2 + $0x21] sm:$0xff] %vm4261_vm9, %v4259_v29  ;;  %v11317_v40 = vld [vmem:[#allocation2 + $0x9] sm:$0xff] }
 0x3e3   :  { %9619 = vmatprep.subr.bf16.mxu0 %v9618_v1 }
 0x3e5   :  { %8942 = vmatmul.mubr.msk.f32.gmra.mrb[12].mxu0 %vm338_vm0, %v1983_v50  ;;  %v11329_v44 = vld [vmem:[#allocation2 + $0x10] sm:$0xff] }
 0x3e6   :  { %8944 = vmatprep.mubr.msk.f32.mxu0 %vm338_vm0, %v1984_v51  ;;  %v11315_v39 = vld [vmem:[#allocation2 + $0x2] sm:$0xff]  ;;  %v11331_v45 = vld [vmem:[#allocation2 + $0x12] sm:$0xff] }
 0x3e7   :  { %12222 = vst [vmem:[#allocation58_spill] sm:$0xff] %v11315_v39  ;;  %12224 = vst [vmem:[#allocation60_spill] sm:$0xff] %v11331_v45  ;;  %v11335_v46 = vld [vmem:[#allocation2 + $0x19] sm:$0xff] }
 0x3e9   :  { %8945 = vmatmul.mubr.msk.f32.gmra.mrb[14].mxu0 %vm338_vm0, %v1985_v52  ;;  %v11339_v48 = vld [vmem:[#allocation2 + $0x1a] sm:$0xff] }
 0x3ea   :  { %8955 = vmatprep.mubr.msk.f32.mxu0 %vm338_vm0, %v11160_v18  ;;  %v3031_v18 = vld [vmem:[#allocation16 + $0x8] sm:$0xff]  ;;  %12225 = vst [vmem:[#allocation61_spill] sm:$0xff] %v11339_v48  ;;  %v11341_v49 = vld [vmem:[#allocation2 + $0x21] sm:$0xff] }
 0x3eb   :  { %v11343_v50 = vld [vmem:[#allocation2 + $0x20] sm:$0xff] }
 0x3ed   :  { %8956 = vmatmul.mubr.msk.f32.vlgmr.msra.gmra.mrb[8].mxu0 %vm338_vm0, %v11173_v30  ;;  %v4260_v30 = vld [vmem:[%s12221_s29 + $0x28] sm:$0x1f] }
 0x3ee   :  { %9621 = vmatpush3.bf16.msra.mxu0 %v9618_v1  ;;  %8958 = vmatprep.mubr.msk.f32.mxu0 %vm338_vm0, %v11180_v33  ;;  %4268 = vst.msk [vmem:[#allocation2 + $0x29] sm:$0x1f] %vm4267_vm10, %v4260_v30  ;;  %v8151_v33 = vld [vmem:[%s12221_s29 + $0x40] sm:$0xff] }
 0x3ef   :  { %9623 = vmatprep.subr.bf16.mxu0 %v9622_v4  ;;  %4278 = vst.msk [vmem:[#allocation2 + $0x40] sm:$0xff] %vm4261_vm9, %v8151_v33 }
 0x3f1   :  { %8959 = vmatmul.mubr.msk.f32.gmra.mrb[10].mxu0 %vm338_vm0, %v11175_v31  ;;  %v8149_v31 = vld [vmem:[%s12221_s29 + $0x30] sm:$0xff] }
 0x3f2   :  { %8961 = vmatprep.mubr.msk.f32.mxu0 %vm338_vm0, %v2265_v41  ;;  %9625 = vmatpush3.bf16.msra.mxu0 %v9622_v4  ;;  %4276 = vst.msk [vmem:[#allocation2 + $0x30] sm:$0xff] %vm4261_vm9, %v8149_v31  ;;  %v11319_v41 = vld [vmem:[#allocation2 + $0x8] sm:$0xff] }
 0x3f3   :  { %9627 = vmatprep.subr.bf16.mxu0 %v9626_v7 }
 0x3f5   :  { %8962 = vmatmul.mubr.msk.f32.gmra.mrb[12].mxu0 %vm338_vm0, %v2266_v53  ;;  %v11347_v51 = vld [vmem:[#allocation2 + $0x22] sm:$0xff] }
 0x3f6   :  { %8964 = vmatprep.mubr.msk.f32.mxu0 %vm338_vm0, %v2267_v54  ;;  %12226 = vst [vmem:[#allocation62_spill] sm:$0xff] %v11347_v51  ;;  %v11351_v53 = vld [vmem:[#allocation2 + $0x28] sm:$0xff]  ;;  %4895 = vst.msk [vmem:[#allocation2 + $0x20] sm:$0xff] %vm338_vm0, %v12196_v0  ;;  %v11375_v62 = vld [vmem:[#allocation2 + $0x40] sm:$0xff] }
 0x3f7   :  { %12230 = vst [vmem:[#allocation66_spill] sm:$0xff] %v11375_v62 }
 0x3f9   :  { %8965 = vmatmul.mubr.msk.f32.gmra.mrb[14].mxu0 %vm338_vm0, %v2268_v55  ;;  %v11349_v52 = vld [vmem:[#allocation2 + $0x29] sm:$0xff] }
 0x3fa   :  { %8975 = vmatprep.mubr.msk.f32.mxu0 %vm338_vm0, %v11162_v19  ;;  %v9641_v19 = vpack.c.bf16 %v3031_v18, %v3030_v17  ;;  %v11355_v54 = vld [vmem:[#allocation2 + $0x2a] sm:$0xff] }
 0x3fb   :  { %12227 = vst [vmem:[#allocation63_spill] sm:$0xff] %v11355_v54  ;;  %4896 = vst.msk [vmem:[#allocation2 + $0x28] sm:$0xff] %vm338_vm0, %v12196_v0 }
 0x3fc   :  { %9642 = vmatpush3.bf16.msra.mxu1 %v9641_v19 }
 0x3fd   :  { %8976 = vmatmul.mubr.msk.f32.vlgmr.msra.gmra.mrb[8].mxu0 %vm338_vm0, %v11182_v34  ;;  %9643 = vmatprep.subr.bf16.mxu1 %v12198_v14  ;;  %v8152_v34 = vld [vmem:[%s12221_s29 + $0x48] sm:$0xff] }
 0x3fe   :  { %9629 = vmatpush3.bf16.msra.mxu0 %v9626_v7  ;;  %8978 = vmatprep.mubr.msk.f32.mxu0 %vm338_vm0, %v11184_v35  ;;  %4279 = vst.msk [vmem:[#allocation2 + $0x48] sm:$0xff] %vm4261_vm9, %v8152_v34  ;;  %v8153_v35 = vld [vmem:[%s12221_s29 + $0x50] sm:$0xff] }
 0x3ff   :  { %9631 = vmatprep.subr.bf16.mxu0 %v9630_v10  ;;  %4280 = vst.msk [vmem:[#allocation2 + $0x50] sm:$0xff] %vm4261_vm9, %v8153_v35 }
 0x401   :  { %8979 = vmatmul.mubr.msk.f32.gmra.mrb[10].mxu0 %vm338_vm0, %v11177_v32  ;;  %v8150_v32 = vld [vmem:[%s12221_s29 + $0x38] sm:$0xff] }
 0x402   :  { %8981 = vmatprep.mubr.msk.f32.mxu0 %vm338_vm0, %v11199_v42  ;;  %9633 = vmatpush3.bf16.msra.mxu0 %v9630_v10  ;;  %4277 = vst.msk [vmem:[#allocation2 + $0x38] sm:$0xff] %vm4261_vm9, %v8150_v32  ;;  %v11323_v42 = vld [vmem:[#allocation2 + $0xa] sm:$0xff]  ;;  %v8130_v10 = vld [vmem:[#allocation11] ss:$0 sm:$0xff] }
 0x403   :  { %9634 = vmatprep.subr.bf16.mxu0 %v12198_v14  ;;  %12223 = vst [vmem:[#allocation59_spill] sm:$0xff] %v11323_v42 }
 0x405   :  { %8982 = vmatmul.mubr.msk.f32.gmra.mrb[12].mxu0 %vm338_vm0, %v2416_v56  ;;  %v11361_v56 = vld [vmem:[#allocation2 + $0x30] sm:$0xff]  ;;  %v11373_v61 = vld [vmem:[#allocation2 + $0x41] sm:$0xff] }
 0x406   :  { %8984 = vmatprep.mubr.msk.f32.mxu0 %vm338_vm0, %v2417_v58  ;;  %v11379_v63 = vld [vmem:[#allocation2 + $0x42] sm:$0xff]  ;;  %v11387_v3 = vld [vmem:[#allocation2 + $0x4a] sm:$0xff] }
 0x407   :  { %12231 = vst [vmem:[#allocation67_spill] sm:$0xff] %v11379_v63  ;;  %v11381_v1 = vld [vmem:[#allocation2 + $0x49] sm:$0xff]  ;;  %12233 = vst [vmem:[#allocation69_spill] sm:$0xff] %v11387_v3 }
 0x408   :  { %v11383_v2 = vld [vmem:[#allocation2 + $0x48] sm:$0xff]  ;;  %v11393_v5 = vld [vmem:[#allocation2 + $0x50] sm:$0xff] }
 0x409   :  { %8985 = vmatmul.mubr.msk.f32.gmra.mrb[14].mxu0 %vm338_vm0, %v2418_v57  ;;  %v11359_v55 = vld [vmem:[#allocation2 + $0x31] sm:$0xff]  ;;  %v11367_v58 = vld [vmem:[#allocation2 + $0x39] sm:$0xff]  ;;  %12232 = vst [vmem:[#allocation68_spill] sm:$0xff] %v11383_v2  ;;  %4900 = vst.msk [vmem:[#allocation2 + $0x48] sm:$0xff] %vm338_vm0, %v12196_v0 }
 0x40a   :  { %8995 = vmatprep.mubr.msk.f32.mxu0 %vm338_vm0, %v11164_v20  ;;  %v3032_v20 = vld [vmem:[#allocation16 + $0x10] sm:$0xff]  ;;  %12234 = vst [vmem:[#allocation70_spill] sm:$0xff] %v11393_v5 }
 0x40b   :  { %v9644_v23 = vpack.c.bf16 %v3033_v21, %v3032_v20  ;;  %v11363_v57 = vld [vmem:[#allocation2 + $0x32] sm:$0xff] }
 0x40c   :  { %12228 = vst [vmem:[#allocation64_spill] sm:$0xff] %v11363_v57  ;;  %4897 = vst.msk [vmem:[#allocation2 + $0x30] sm:$0xff] %vm338_vm0, %v12196_v0 }
 0x40d   :  { %8996 = vmatmul.mubr.msk.f32.vlgmr.msra.gmra.mrb[8].mxu0 %vm338_vm0, %v11186_v36  ;;  %9645 = vmatpush3.bf16.msra.mxu1 %v9644_v23  ;;  %v8154_v36 = vld [vmem:[%s12221_s29 + $0x58] sm:$0x1f] }
 0x40e   :  { %8998 = vmatprep.mubr.msk.f32.mxu0 %vm338_vm0, %v11188_v37  ;;  %9636 = vmatpush3.bf16.msra.mxu0 %v9635_v15  ;;  %4281 = vst.msk [vmem:[#allocation2 + $0x58] sm:$0x1f] %vm4267_vm10, %v8154_v36  ;;  %v11311_v37 = vld [vmem:[#allocation2 + $0x1] sm:$0xff] }
 0x40f   :  { %9637 = vmatprep.subr.bf16.mxu0 %v12198_v14  ;;  %9646 = vmatprep.subr.bf16.mxu1 %v12198_v14  ;;  %4892 = vst.msk [vmem:[#allocation2 + $0x8] sm:$0xff] %vm338_vm0, %v12196_v0  ;;  %v11442_v14 = vld [vmem:[#allocation16 + $0x80] sm:$0xff] }
 0x411   :  { %8999 = vmatmul.mubr.msk.f32.gmra.mrb[10].mxu0 %vm338_vm0, %v11190_v38  ;;  %v11313_v38 = vld [vmem:[#allocation2] sm:$0xff] }
 0x412   :  { %9001 = vmatprep.mubr.msk.f32.mxu0 %vm338_vm0, %v11201_v43  ;;  %9639 = vmatpush3.bf16.msra.mxu0 %v9638_v22  ;;  %4891 = vst.msk [vmem:[#allocation2] sm:$0xff] %vm338_vm0, %v12196_v0  ;;  %v11327_v43 = vld [vmem:[#allocation2 + $0x11] sm:$0xff] }
 0x413   :  { %9172 = vmatprep.subr.msk.mxu0 %vm4345_vm8, %v11284_v24  ;;  %4893 = vst.msk [vmem:[#allocation2 + $0x10] sm:$0xff] %vm338_vm0, %v12196_v0 }
 0x415   :  { %9002 = vmatmul.mubr.msk.f32.gmra.mrb[12].mxu0 %vm338_vm0, %v2566_v59  ;;  %v11369_v59 = vld [vmem:[#allocation2 + $0x38] sm:$0xff] }
 0x416   :  { %9004 = vmatprep.mubr.msk.f32.mxu0 %vm338_vm0, %v2567_v60  ;;  %v11371_v60 = vld [vmem:[#allocation2 + $0x3a] sm:$0xff]  ;;  %v11391_v4 = vld [vmem:[#allocation2 + $0x51] sm:$0xff] }
 0x417   :  { %12229 = vst [vmem:[#allocation65_spill] sm:$0xff] %v11371_v60  ;;  %4898 = vst.msk [vmem:[#allocation2 + $0x38] sm:$0xff] %vm338_vm0, %v12196_v0  ;;  %v11395_v6 = vld [vmem:[#allocation2 + $0x52] sm:$0xff]  ;;  %v11403_v9 = vld [vmem:[#allocation2 + $0x5a] sm:$0xf] }
 0x418   :  { %4899 = vst.msk [vmem:[#allocation2 + $0x40] sm:$0xff] %vm338_vm0, %v12196_v0  ;;  %12235 = vst [vmem:[#allocation71_spill] sm:$0xff] %v11395_v6  ;;  %v11399_v7 = vld [vmem:[#allocation2 + $0x59] sm:$0xf] }
 0x419   :  { %9005 = vmatmul.mubr.msk.f32.gmra.mrb[14].mxu0 %vm338_vm0, %v11206_v47  ;;  %v11337_v47 = vld [vmem:[#allocation2 + $0x18] sm:$0xff]  ;;  %4901 = vst.msk [vmem:[#allocation2 + $0x50] sm:$0xff] %vm338_vm0, %v12196_v0  ;;  %12237 = vst [vmem:[#allocation73_spill] sm:$0xff] %v11403_v9 }
 0x41a   :  { %9015 = vmatprep.mubr.msk.f32.mxu0 %vm10599_vm7, %v12196_v0  ;;  %4894 = vst.msk [vmem:[#allocation2 + $0x18] sm:$0xff] %vm338_vm0, %v12196_v0  ;;  %v11401_v8 = vld [vmem:[#allocation2 + $0x58] sm:$0xf] }
 0x41b   :  { %12236 = vst [vmem:[#allocation72_spill] sm:$0xff] %v11401_v8  ;;  %4902 = vst.msk [vmem:[#allocation2 + $0x58] sm:$0x3f] %vm350_vm6, %v12196_v0 }
 0x4e0   :  { %v8997_v11 = vpop.f32.mrb[8].mxu0 }
 0x4e1   :  { %v2719_v13 = vmul.f32 %v8997_v11, %v8130_v10  ;;  %v2664_v15 = vpop.f32.mrb[9].mxu0 }
 0x4e2   :  { %v2718_v16 = vmul.f32 %v8130_v10, %v2664_v15 }
 0x4e3   :  { %v2734_v17 = vadd.f32 %v8131_v12, %v2719_v13 }
 0x4e4   :  { %v2733_v18 = vadd.f32 %v8131_v12, %v2718_v16  ;;  %v9000_v19 = vpop.f32.mrb[10].mxu0  ;;  %v11411_v16 = vld [vmem:[#allocation16 + $0x40] sm:$0xff] }
 0x4e5   :  { %v2742_v20 = vmax.f32 %v2734_v17, 0.0  ;;  %v2721_v21 = vmul.f32 %v9000_v19, %v8130_v10  ;;  %v2674_v22 = vpop.f32.mrb[11].mxu0  ;;  %v11413_v17 = vld [vmem:[#allocation16 + $0x48] sm:$0xff]  ;;  %v11415_v19 = vld [vmem:[#allocation16 + $0x50] sm:$0xff] }
 0x4e6   :  { %v2741_v23 = vmax.f32 %v2733_v18, 0.0  ;;  %v2720_v25 = vmul.f32 %v8130_v10, %v2674_v22 }
 0x4e7   :  { %2750 = vst.msk [vmem:[#allocation3 + $0x8] sm:$0xff] %vm338_vm0, %v2742_v20  ;;  %v2736_v26 = vadd.f32 %v8131_v12, %v2721_v21  ;;  %v11417_v20 = vld [vmem:[#allocation16 + $0x58] sm:$0xff]  ;;  %v11419_v21 = vld [vmem:[#allocation16 + $0x60] sm:$0xff] }
 0x4e8   :  { %2749 = vst.msk [vmem:[#allocation3] sm:$0xff] %vm338_vm0, %v2741_v23  ;;  %v2735_v27 = vadd.f32 %v8131_v12, %v2720_v25  ;;  %v9003_v28 = vpop.f32.mrb[12].mxu0 }
 0x4e9   :  { %v2744_v29 = vmax.f32 %v2736_v26, 0.0  ;;  %v2723_v30 = vmul.f32 %v9003_v28, %v8130_v10  ;;  %v2684_v31 = vpop.f32.mrb[13].mxu0  ;;  %v11422_v26 = vld [vmem:[#allocation16 + $0x68] sm:$0xff] }
 0x4ea   :  { %v2743_v32 = vmax.f32 %v2735_v27, 0.0  ;;  %v2722_v33 = vmul.f32 %v8130_v10, %v2684_v31  ;;  %v11425_v31 = vld [vmem:[#allocation16 + $0x70] sm:$0xff] }
 0x4eb   :  { %2752 = vst.msk [vmem:[#allocation3 + $0x18] sm:$0xff] %vm338_vm0, %v2744_v29  ;;  %v2738_v34 = vadd.f32 %v8131_v12, %v2723_v30 }
 0x4ec   :  { %2751 = vst.msk [vmem:[#allocation3 + $0x10] sm:$0xff] %vm338_vm0, %v2743_v32  ;;  %v2737_v35 = vadd.f32 %v8131_v12, %v2722_v33  ;;  %v9006_v36 = vpop.f32.mrb[14].mxu0 }
 0x4ed   :  { %v2746_v11 = vmax.f32 %v2738_v34, 0.0  ;;  %v2725_v13 = vmul.f32 %v9006_v36, %v8130_v10  ;;  %v2694_v15 = vpop.f32.mrb[15].mxu0 }
 0x4ee   :  { %v2724_v18 = vmul.f32 %v8130_v10, %v2694_v15  ;;  %v2745_v29 = vmax.f32 %v2737_v35, 0.0  ;;  %v11427_v10 = vld [vmem:[#allocation16 + $0x78] sm:$0xff]  ;;  %v11444_v35 = vld [vmem:[#allocation16 + $0x88] sm:$0xff] }
 0x4ef   :  { %v2757_v22 = vld [vmem:[#allocation3] sm:$0x3]  ;;  %v2777_v23 = vld [vmem:[#allocation3 + $0x2] sm:$0x3]  ;;  %2754 = vst.msk [vmem:[#allocation3 + $0x28] sm:$0xff] %vm338_vm0, %v2746_v11  ;;  %v2740_v25 = vadd.f32 %v8131_v12, %v2725_v13 }
 0x4f0   :  { %v2759_v27 = vsel %vm2758_vm11, %v2757_v22, -inf  ;;  %v2795_v28 = vld [vmem:[#allocation3 + $0x4] sm:$0x3]  ;;  %v2739_v30 = vadd.f32 %v8131_v12, %v2724_v18  ;;  %v2813_v33 = vld [vmem:[#allocation3 + $0x6] sm:$0x3]  ;;  %v2778_v36 = vsel %vm2758_vm11, %v2777_v23, -inf }
 0x4f1   :  { %v2760_v32 = vrot.slane %v2759_v27, 4  ;;  %v2748_v34 = vmax.f32 %v2740_v25, 0.0  ;;  %v2796_v15 = vsel %vm2758_vm11, %v2795_v28, -inf  ;;  %v2831_v11 = vld [vmem:[#allocation3 + $0x8] sm:$0x3]  ;;  %2753 = vst.msk [vmem:[#allocation3 + $0x20] sm:$0xff] %vm338_vm0, %v2745_v29 }
 0x4f2   :  { %v2849_v13 = vld [vmem:[#allocation3 + $0xa] sm:$0x3]  ;;  %v2747_v25 = vmax.f32 %v2739_v30, 0.0  ;;  %v2779_v28 = vrot.slane %v2778_v36, 4  ;;  %v2797_v0 = vrot.slane %v2796_v15, 4  ;;  %v2814_v29 = vsel %vm2758_vm11, %v2813_v33, -inf }
 0x4f3   :  { %2756 = vst.msk [vmem:[#allocation3 + $0x38] sm:$0xff] %vm338_vm0, %v2748_v34  ;;  %v2761_v12 = vmax.f32 %v2759_v27, %v2760_v32  ;;  %v2815_v27 = vrot.slane %v2814_v29, 4  ;;  %v2832_v32 = vsel %vm2758_vm11, %v2831_v11, -inf  ;;  %v2850_v18 = vsel %vm2758_vm11, %v2849_v13, -inf }
 0x4f4   :  { %2755 = vst.msk [vmem:[#allocation3 + $0x30] sm:$0xff] %vm338_vm0, %v2747_v25  ;;  %v2780_v22 = vmax.f32 %v2778_v36, %v2779_v28  ;;  %v2798_v9 = vmax.f32 %v2796_v15, %v2797_v0  ;;  %v2833_v30 = vrot.slane %v2832_v32, 4  ;;  %v2851_v3 = vrot.slane %v2850_v18, 4 }
 0x4f5   :  { %v2762_v34 = vrot.slane %v2761_v12, 2  ;;  %v2816_v33 = vmax.f32 %v2814_v29, %v2815_v27 }
 0x4f6   :  { %v2822_v23 = vld [vmem:[#allocation3 + $0x28] sm:$0x3]  ;;  %v2840_v6 = vld [vmem:[#allocation3 + $0x2a] sm:$0x3]  ;;  %v2781_v54 = vrot.slane %v2780_v22, 2  ;;  %v2799_v51 = vrot.slane %v2798_v9, 2  ;;  %v2834_v15 = vmax.f32 %v2832_v32, %v2833_v30  ;;  %v2852_v28 = vmax.f32 %v2850_v18, %v2851_v3 }
 0x4f7   :  { %v2763_v63 = vmax.f32 %v2761_v12, %v2762_v34  ;;  %v2823_v60 = vsel %vm2758_vm11, %v2822_v23, -inf  ;;  %v2841_v13 = vsel %vm2758_vm11, %v2840_v6, -inf  ;;  %v2817_v0 = vrot.slane %v2816_v33, 2 }
 0x4f8   :  { %v2824_v11 = vrot.slane %v2823_v60, 4  ;;  %v2768_v48 = vld [vmem:[#allocation3 + $0x22] sm:$0x3]  ;;  %v2786_v25 = vld [vmem:[#allocation3 + $0x24] sm:$0x3]  ;;  %v2782_v45 = vmax.f32 %v2780_v22, %v2781_v54  ;;  %v2800_v23 = vmax.f32 %v2798_v9, %v2799_v51  ;;  %v2835_v18 = vrot.slane %v2834_v15, 2 }
 0x4f9   :  { %v2764_v36 = vrot.slane %v2763_v63, 1  ;;  %v2787_v12 = vsel %vm2758_vm11, %v2786_v25, -inf  ;;  %v2769_v29 = vsel %vm2758_vm11, %v2768_v48, -inf  ;;  %v2804_v34 = vld [vmem:[#allocation3 + $0x26] sm:$0x3]  ;;  %v2818_v2 = vmax.f32 %v2816_v33, %v2817_v0 }
 0x4fa   :  { %v2788_v27 = vrot.slane %v2787_v12, 4  ;;  %v2770_v42 = vrot.slane %v2769_v29, 4  ;;  %v2805_v39 = vsel %vm2758_vm11, %v2804_v34, -inf  ;;  %v2783_v8 = vrot.slane %v2782_v45, 1 }
 0x4fb   :  { %v2765_v57 = vmax.f32 %v2763_v63, %v2764_v36  ;;  %v2801_v6 = vrot.slane %v2800_v23, 1  ;;  %v2806_v5 = vrot.slane %v2805_v39, 4  ;;  %v2825_v54 = vmax.f32 %v2823_v60, %v2824_v11  ;;  %v2858_v36 = vld [vmem:[#allocation3 + $0x2c] sm:$0x3] }
 0x4fc   :  { %v2789_v62 = vmax.f32 %v2787_v12, %v2788_v27  ;;  %v2771_v3 = vmax.f32 %v2769_v29, %v2770_v42  ;;  %v2784_v22 = vmax.f32 %v2782_v45, %v2783_v8  ;;  %v2819_v51 = vrot.slane %v2818_v2, 1  ;;  %v2867_v8 = vld [vmem:[#allocation3 + $0xc] sm:$0x3] }
 0x4fd   :  { %2767 = vst.msk [vmem:[#allocation4] sm:$0x1] %vm2766_vm12, %v2765_v57  ;;  %v2802_v32 = vmax.f32 %v2800_v23, %v2801_v6  ;;  %v2807_v48 = vmax.f32 %v2805_v39, %v2806_v5  ;;  %v2826_v63 = vrot.slane %v2825_v54, 2  ;;  %v2836_v25 = vmax.f32 %v2834_v15, %v2835_v18  ;;  %v2885_v39 = vld [vmem:[#allocation3 + $0xe] sm:$0x3] }
 0x4fe   :  { %v2790_v9 = vrot.slane %v2789_v62, 2  ;;  %v2772_v30 = vrot.slane %v2771_v3, 2  ;;  %2785 = vst.msk [vmem:[#allocation4 + $0x2] sm:$0x1] %vm2766_vm12, %v2784_v22  ;;  %v2820_v0 = vmax.f32 %v2818_v2, %v2819_v51  ;;  %v2842_v12 = vrot.slane %v2841_v13, 4 }
 0x4ff   :  { %2803 = vst.msk [vmem:[#allocation4 + $0x4] sm:$0x1] %vm2766_vm12, %v2802_v32  ;;  %v2808_v33 = vrot.slane %v2807_v48, 2  ;;  %v2853_v57 = vrot.slane %v2852_v28, 2  ;;  %v2827_v11 = vmax.f32 %v2825_v54, %v2826_v63  ;;  %v2837_v45 = vrot.slane %v2836_v25, 1 }
 0x500   :  { %v2791_v42 = vmax.f32 %v2789_v62, %v2790_v9  ;;  %v2773_v60 = vmax.f32 %v2771_v3, %v2772_v30  ;;  %2821 = vst.msk [vmem:[#allocation4 + $0x6] sm:$0x1] %vm2766_vm12, %v2820_v0  ;;  %v2843_v29 = vmax.f32 %v2841_v13, %v2842_v12  ;;  %v2859_v23 = vsel %vm2758_vm11, %v2858_v36, -inf  ;;  %v2876_v2 = vld [vmem:[#allocation3 + $0x2e] sm:$0x3] }
 0x501   :  { %v2809_v5 = vmax.f32 %v2807_v48, %v2808_v33  ;;  %v2854_v15 = vmax.f32 %v2852_v28, %v2853_v57  ;;  %v2828_v6 = vrot.slane %v2827_v11, 1  ;;  %v2838_v18 = vmax.f32 %v2836_v25, %v2837_v45  ;;  %v2894_v54 = vld [vmem:[#allocation3 + $0x30] sm:$0x3]  ;;  %v2912_v0 = vld [vmem:[#allocation3 + $0x32] sm:$0x3] }
 0x502   :  { %v2792_v34 = vrot.slane %v2791_v42, 1  ;;  %v2774_v27 = vrot.slane %v2773_v60, 1  ;;  %v2844_v32 = vrot.slane %v2843_v29, 2  ;;  %v2860_v3 = vrot.slane %v2859_v23, 4  ;;  %v2903_v28 = vld [vmem:[#allocation3 + $0x10] sm:$0x3] }
 0x503   :  { %v2810_v22 = vrot.slane %v2809_v5, 1  ;;  %v2855_v62 = vrot.slane %v2854_v15, 1  ;;  %v2829_v30 = vmax.f32 %v2827_v11, %v2828_v6  ;;  %2839 = vst.msk [vmem:[#allocation4 + $0x8] sm:$0x1] %vm2766_vm12, %v2838_v18  ;;  %v2868_v13 = vsel %vm2758_vm11, %v2867_v8, -inf }
 0x504   :  { %v2793_v51 = vmax.f32 %v2791_v42, %v2792_v34  ;;  %v2775_v9 = vmax.f32 %v2773_v60, %v2774_v27  ;;  %v2845_v63 = vmax.f32 %v2843_v29, %v2844_v32  ;;  %v2861_v33 = vmax.f32 %v2859_v23, %v2860_v3 }
 0x505   :  { %v2811_v48 = vmax.f32 %v2809_v5, %v2810_v22  ;;  %v2856_v36 = vmax.f32 %v2854_v15, %v2855_v62  ;;  %2830 = vst.msk [vmem:[#allocation4 + $0x7] sm:$0x1] %vm2766_vm12, %v2829_v30  ;;  %v2869_v25 = vrot.slane %v2868_v13, 4  ;;  %v2877_v12 = vsel %vm2758_vm11, %v2876_v2, -inf  ;;  %v2921_v5 = vld [vmem:[#allocation3 + $0x12] sm:$0x3] }
 0x506   :  { %2794 = vst.msk [vmem:[#allocation4 + $0x3] sm:$0x1] %vm2766_vm12, %v2793_v51  ;;  %2776 = vst.msk [vmem:[#allocation4 + $0x1] sm:$0x1] %vm2766_vm12, %v2775_v9  ;;  %v2886_v57 = vsel %vm2758_vm11, %v2885_v39, -inf  ;;  %v2895_v42 = vsel %vm2758_vm11, %v2894_v54, -inf }
 0x507   :  { %2812 = vst.msk [vmem:[#allocation4 + $0x5] sm:$0x1] %vm2766_vm12, %v2811_v48  ;;  %v2846_v60 = vrot.slane %v2845_v63, 1  ;;  %2857 = vst.msk [vmem:[#allocation4 + $0xa] sm:$0x1] %vm2766_vm12, %v2856_v36  ;;  %v2862_v11 = vrot.slane %v2861_v33, 2  ;;  %v2870_v29 = vmax.f32 %v2868_v13, %v2869_v25 }
 0x508   :  { %v2878_v45 = vrot.slane %v2877_v12, 4  ;;  %v2887_v8 = vrot.slane %v2886_v57, 4  ;;  %v2896_v15 = vrot.slane %v2895_v42, 4  ;;  %v2904_v23 = vsel %vm2758_vm11, %v2903_v28, -inf  ;;  %v11473_v2 = vld [vmem:[#allocation16 + $0x90] sm:$0xff]  ;;  %v11475_v22 = vld [vmem:[#allocation16 + $0x98] sm:$0xff] }
 0x509   :  { %v2913_v34 = vsel %vm2758_vm11, %v2912_v0, -inf  ;;  %v2847_v27 = vmax.f32 %v2845_v63, %v2846_v60  ;;  %v2863_v6 = vmax.f32 %v2861_v33, %v2862_v11  ;;  %v2871_v32 = vrot.slane %v2870_v29, 2  ;;  %v2930_v33 = vld [vmem:[#allocation3 + $0x34] sm:$0x3] }
 0x50a   :  { %v2879_v39 = vmax.f32 %v2877_v12, %v2878_v45  ;;  %v2888_v18 = vmax.f32 %v2886_v57, %v2887_v8  ;;  %v2897_v62 = vmax.f32 %v2895_v42, %v2896_v15  ;;  %v2905_v3 = vrot.slane %v2904_v23, 4  ;;  %v4294_v12 = vld [vmem:[#allocation14] sm:$0x3f]  ;;  %v2939_v15 = vld [vmem:[#allocation3 + $0x14] sm:$0x3] }
 0x50b   :  { %v2914_v54 = vrot.slane %v2913_v34, 4  ;;  %2848 = vst.msk [vmem:[#allocation4 + $0x9] sm:$0x1] %vm2766_vm12, %v2847_v27  ;;  %v2864_v51 = vrot.slane %v2863_v6, 1  ;;  %v2922_v13 = vsel %vm2758_vm11, %v2921_v5, -inf  ;;  %v2872_v28 = vmax.f32 %v2870_v29, %v2871_v32 }
 0x50c   :  { %v2880_v9 = vrot.slane %v2879_v39, 2  ;;  %v2889_v30 = vrot.slane %v2888_v18, 2  ;;  %v2898_v48 = vrot.slane %v2897_v62, 2  ;;  %v2906_v63 = vmax.f32 %v2904_v23, %v2905_v3 }
 0x50d   :  { %v2915_v36 = vmax.f32 %v2913_v34, %v2914_v54  ;;  %v3034_v0 = vld [vmem:[#allocation4 + $0x2] sm:$0x3]  ;;  %v3029_v25 = vld [vmem:[#allocation4] sm:$0x3]  ;;  %v9662_v57 = vpack.c.bf16 %v11475_v22, %v11473_v2  ;;  %v2865_v42 = vmax.f32 %v2863_v6, %v2864_v51  ;;  %v2873_v45 = vrot.slane %v2872_v28, 1 }
 0x50e   :  { %v2881_v60 = vmax.f32 %v2879_v39, %v2880_v9  ;;  %v2890_v11 = vmax.f32 %v2888_v18, %v2889_v30  ;;  %9016 = vmatmul.mubr.msk.f32.vlgmr.msra.gmra.mrb[16].mxu0 %vm338_vm0, %v3034_v0  ;;  %9027 = vmatmul.mubr.msk.f32.vlgmr.msra.gmra.mrb[8].mxu1 %vm338_vm0, %v3029_v25  ;;  %v2899_v8 = vmax.f32 %v2897_v62, %v2898_v48  ;;  %v2907_v5 = vrot.slane %v2906_v63, 2  ;;  %v11493_v18 = vld [vmem:[#allocation14 + $0x10] sm:$0x3f]  ;;  %v2957_v54 = vld [vmem:[#allocation3 + $0x16] sm:$0x3] }
 0x50f   :  { %v2916_v29 = vrot.slane %v2915_v36, 2  ;;  %9173 = vmatpush3.msk.msra.mxu0 %vm4345_vm8, %v11284_v24  ;;  %v12238_v23 = vpack.c.bf16 %v11413_v17, %v11411_v16  ;;  %2866 = vst.msk [vmem:[#allocation4 + $0xb] sm:$0x1] %vm2766_vm12, %v2865_v42  ;;  %v2923_v6 = vrot.slane %v2922_v13, 4  ;;  %v2931_v39 = vsel %vm2758_vm11, %v2930_v33, -inf  ;;  %9174 = vmatprep.mubr.msk.f32.mxu0 %vm4261_vm9, %v11311_v37 }
 0x510   :  { %v2882_v34 = vrot.slane %v2881_v60, 1  ;;  %v2891_v27 = vrot.slane %v2890_v11, 1  ;;  %9192 = vmatprep.subr.msk.mxu0 %vm4345_vm8, %v4294_v12  ;;  %v2874_v32 = vmax.f32 %v2872_v28, %v2873_v45  ;;  %v2900_v24 = vrot.slane %v2899_v8, 1  ;;  %v2948_v16 = vld [vmem:[#allocation3 + $0x36] sm:$0x3] }
 0x511   :  { %9648 = vmatpush3.bf16.msra.mxu1 %v12238_v23  ;;  %v2908_v62 = vmax.f32 %v2906_v63, %v2907_v5  ;;  %v2917_v3 = vmax.f32 %v2915_v36, %v2916_v29  ;;  %v2975_v17 = vld [vmem:[#allocation3 + $0x18] sm:$0x3]  ;;  %v12239_v51 = vmov 0.0|0.0   ;;  %v12240_v9 = vmov 0.0   ;;  %v2984_v45 = vld [vmem:[#allocation3 + $0x3a] sm:$0x3] }
 0x512   :  { %9649 = vmatprep.subr.bf16.mxu1 %v12239_v51  ;;  %9037 = vmatprep.mubr.msk.f32.mxu1 %vm10599_vm7, %v12240_v9  ;;  %v2883_v30 = vmax.f32 %v2881_v60, %v2882_v34  ;;  %v2892_v48 = vmax.f32 %v2890_v11, %v2891_v27  ;;  %v2924_v33 = vmax.f32 %v2922_v13, %v2923_v6  ;;  %v2932_v37 = vrot.slane %v2931_v39, 4  ;;  %v2966_v25 = vld [vmem:[#allocation3 + $0x38] sm:$0x3]  ;;  %v3186_v5 = vld [vmem:[#allocation4 + $0x4] sm:$0x3] }
 0x513   :  { %9175 = vmatmul.mubr.msk.f32.vlgmr.msra.gmra.mrb[18].mxu0 %vm4261_vm9, %v11317_v40  ;;  %2875 = vst.msk [vmem:[#allocation4 + $0xc] sm:$0x1] %vm2766_vm12, %v2874_v32  ;;  %v2901_v28 = vmax.f32 %v2899_v8, %v2900_v24  ;;  %v2909_v63 = vrot.slane %v2908_v62, 1  ;;  %v2918_v36 = vrot.slane %v2917_v3, 1  ;;  %v2940_v0 = vsel %vm2758_vm11, %v2939_v15, -inf }
 0x514   :  { %9193 = vmatpush3.msk.msra.mxu0 %vm4345_vm8, %v4294_v12  ;;  %v12241_v42 = vpack.c.bf16 %v11417_v20, %v11415_v19  ;;  %2884 = vst.msk [vmem:[#allocation4 + $0xd] sm:$0x1] %vm2766_vm12, %v2883_v30  ;;  %2893 = vst.msk [vmem:[#allocation4 + $0xe] sm:$0x1] %vm2766_vm12, %v2892_v48  ;;  %v2925_v13 = vrot.slane %v2924_v33, 2  ;;  %v2933_v40 = vmax.f32 %v2931_v39, %v2932_v37  ;;  %v2941_v60 = vrot.slane %v2940_v0, 4 }
 0x515   :  { %v2949_v11 = vsel %vm2758_vm11, %v2948_v16, -inf  ;;  %9177 = vmatprep.mubr.msk.f32.mxu0 %vm4261_vm9, %v11327_v43  ;;  %2902 = vst.msk [vmem:[#allocation4 + $0xf] sm:$0x1] %vm2766_vm12, %v2901_v28  ;;  %v2910_v12 = vmax.f32 %v2908_v62, %v2909_v63  ;;  %v2919_v19 = vmax.f32 %v2917_v3, %v2918_v36  ;;  %v2958_v8 = vsel %vm2758_vm11, %v2957_v54, -inf  ;;  %9212 = vmatprep.subr.msk.mxu0 %vm4345_vm8, %v11493_v18  ;;  %v2993_v16 = vld [vmem:[#allocation3 + $0x1a] sm:$0x3] }
 0x516   :  { %9651 = vmatpush3.bf16.msra.mxu1 %v12241_v42  ;;  %v2950_v20 = vrot.slane %v2949_v11, 4  ;;  %v2926_v29 = vmax.f32 %v2924_v33, %v2925_v13  ;;  %v2934_v15 = vrot.slane %v2933_v40, 2  ;;  %v2942_v23 = vmax.f32 %v2940_v0, %v2941_v60  ;;  %v3002_v0 = vld [vmem:[#allocation3 + $0x3c] sm:$0x3] }
 0x517   :  { %9652 = vmatprep.subr.bf16.mxu1 %v12239_v51  ;;  %v2959_v34 = vrot.slane %v2958_v8, 4  ;;  %9178 = vmatmul.mubr.msk.f32.gmra.mrb[20].mxu0 %vm4261_vm9, %v11335_v46  ;;  %2911 = vst.msk [vmem:[#allocation4 + $0x10] sm:$0x1] %vm2766_vm12, %v2910_v12  ;;  %2920 = vst.msk [vmem:[#allocation4 + $0x11] sm:$0x1] %vm2766_vm12, %v2919_v19  ;;  %v2967_v27 = vsel %vm2758_vm11, %v2966_v25, -inf  ;;  %v12242_v32 = vpack.c.bf16 %v11422_v26, %v11419_v21 }
 0x518   :  { %v2951_v43 = vmax.f32 %v2949_v11, %v2950_v20  ;;  %v2976_v6 = vsel %vm2758_vm11, %v2975_v17, -inf  ;;  %v2985_v39 = vsel %vm2758_vm11, %v2984_v45, -inf  ;;  %9180 = vmatprep.mubr.msk.f32.mxu0 %vm4261_vm9, %v11341_v49  ;;  %v2927_v24 = vrot.slane %v2926_v29, 1  ;;  %v3266_v20 = vld [vmem:[#allocation4 + $0x6] sm:$0x3] }
 0x519   :  { %9038 = vmatmul.mubr.msk.f32.vlgmr.msra.gmra.mrb[8].mxu1 %vm338_vm0, %v3186_v5  ;;  %v2935_v46 = vmax.f32 %v2933_v40, %v2934_v15  ;;  %v2943_v62 = vrot.slane %v2942_v23, 2  ;;  %v2960_v3 = vmax.f32 %v2958_v8, %v2959_v34  ;;  %v2968_v54 = vrot.slane %v2967_v27, 4  ;;  %v3020_v34 = vld [vmem:[#allocation3 + $0x3e] sm:$0x3] }
 0x51a   :  { %9654 = vmatpush3.bf16.msra.mxu1 %v12242_v32  ;;  %9048 = vmatprep.mubr.msk.f32.mxu1 %vm10599_vm7, %v12240_v9  ;;  %v2952_v17 = vrot.slane %v2951_v43, 2  ;;  %v2977_v30 = vrot.slane %v2976_v6, 4  ;;  %v2986_v48 = vrot.slane %v2985_v39, 4  ;;  %v2928_v33 = vmax.f32 %v2926_v29, %v2927_v24  ;;  %v3429_v24 = vld [vmem:[#allocation16 + $0xa8] sm:$0xff] }
 0x51b   :  { %9655 = vmatprep.subr.bf16.mxu1 %v12239_v51  ;;  %v2936_v21 = vrot.slane %v2935_v46, 1  ;;  %v2944_v26 = vmax.f32 %v2942_v23, %v2943_v62  ;;  %v2961_v37 = vrot.slane %v2960_v3, 2  ;;  %9181 = vmatmul.mubr.msk.f32.gmra.mrb[22].mxu0 %vm4261_vm9, %v11349_v52  ;;  %v2969_v28 = vmax.f32 %v2967_v27, %v2968_v54  ;;  %v3011_v52 = vld [vmem:[#allocation3 + $0x1c] sm:$0x3] }
 0x51c   :  { %v2953_v49 = vmax.f32 %v2951_v43, %v2952_v17  ;;  %v2978_v63 = vmax.f32 %v2976_v6, %v2977_v30  ;;  %v2987_v36 = vmax.f32 %v2985_v39, %v2986_v48  ;;  %v12243_v25 = vpack.c.bf16 %v11427_v10, %v11425_v31  ;;  %9183 = vmatprep.mubr.msk.f32.mxu0 %vm4261_vm9, %v11359_v55 }
 0x51d   :  { %2929 = vst.msk [vmem:[#allocation4 + $0x12] sm:$0x1] %vm2766_vm12, %v2928_v33  ;;  %v2937_v42 = vmax.f32 %v2935_v46, %v2936_v21  ;;  %v2945_v13 = vrot.slane %v2944_v26, 1  ;;  %v2962_v40 = vmax.f32 %v2960_v3, %v2961_v37  ;;  %v2994_v60 = vsel %vm2758_vm11, %v2993_v16, -inf }
 0x51e   :  { %9657 = vmatpush3.bf16.msra.mxu1 %v12243_v25  ;;  %v2954_v11 = vrot.slane %v2953_v49, 1  ;;  %v2970_v45 = vrot.slane %v2969_v28, 2  ;;  %v2979_v12 = vrot.slane %v2978_v63, 2  ;;  %v2988_v19 = vrot.slane %v2987_v36, 2 }
 0x51f   :  { %9658 = vmatprep.subr.bf16.mxu1 %v12239_v51  ;;  %2938 = vst.msk [vmem:[#allocation4 + $0x13] sm:$0x1] %vm2766_vm12, %v2937_v42  ;;  %v2946_v31 = vmax.f32 %v2944_v26, %v2945_v13  ;;  %v2963_v10 = vrot.slane %v2962_v40, 1  ;;  %v2995_v55 = vrot.slane %v2994_v60, 4  ;;  %v3003_v8 = vsel %vm2758_vm11, %v3002_v0, -inf  ;;  %9184 = vmatmul.mubr.msk.f32.gmra.mrb[24].mxu0 %vm4261_vm9, %v11367_v58  ;;  %v3428_v58 = vld [vmem:[#allocation16 + $0xa0] sm:$0xff] }
 0x520   :  { %v2955_v5 = vmax.f32 %v2953_v49, %v2954_v11  ;;  %v2971_v29 = vmax.f32 %v2969_v28, %v2970_v45  ;;  %v2980_v15 = vmax.f32 %v2978_v63, %v2979_v12  ;;  %v3004_v23 = vrot.slane %v3003_v8, 4  ;;  %9186 = vmatprep.mubr.msk.f32.mxu0 %vm4261_vm9, %v11373_v61  ;;  %v3430_v49 = vld [vmem:[#allocation16 + $0xb0] sm:$0xff]  ;;  %v3431_v28 = vld [vmem:[#allocation16 + $0xb8] sm:$0xff]  ;;  %v3508_v13 = vld [vmem:[#allocation16 + $0xc0] sm:$0xff] }
 0x521   :  { %9049 = vmatmul.mubr.msk.f32.vlgmr.msra.gmra.mrb[8].mxu1 %vm338_vm0, %v3266_v20  ;;  %v12244_v43 = vpack.c.bf16 %v11444_v35, %v11442_v14  ;;  %2947 = vst.msk [vmem:[#allocation4 + $0x14] sm:$0x1] %vm2766_vm12, %v2946_v31  ;;  %v2964_v27 = vmax.f32 %v2962_v40, %v2963_v10  ;;  %v2989_v6 = vmax.f32 %v2987_v36, %v2988_v19  ;;  %v3012_v32 = vsel %vm2758_vm11, %v3011_v52, -inf  ;;  %v3346_v36 = vld [vmem:[#allocation4 + $0x8] sm:$0x3]  ;;  %v3509_v40 = vld [vmem:[#allocation16 + $0xc8] sm:$0xff] }
 0x522   :  { %v2996_v39 = vmax.f32 %v2994_v60, %v2995_v55  ;;  %9059 = vmatprep.mubr.msk.f32.mxu1 %vm10599_vm7, %v12240_v9  ;;  %2956 = vst.msk [vmem:[#allocation4 + $0x15] sm:$0x1] %vm2766_vm12, %v2955_v5  ;;  %v2972_v14 = vrot.slane %v2971_v29, 1  ;;  %v2981_v35 = vrot.slane %v2980_v15, 1  ;;  %v3005_v46 = vmax.f32 %v3003_v8, %v3004_v23  ;;  %v3510_v12 = vld [vmem:[#allocation16 + $0xd0] sm:$0xff]  ;;  %v3511_v19 = vld [vmem:[#allocation16 + $0xd8] sm:$0xff] }
 0x523   :  { %9660 = vmatpush3.bf16.msra.mxu1 %v12244_v43  ;;  %v3013_v61 = vrot.slane %v3012_v32, 4  ;;  %2965 = vst.msk [vmem:[#allocation4 + $0x16] sm:$0x1] %vm2766_vm12, %v2964_v27  ;;  %v2990_v62 = vrot.slane %v2989_v6, 1  ;;  %v3021_v16 = vsel %vm2758_vm11, %v3020_v34, -inf  ;;  %9187 = vmatmul.mubr.msk.f32.gmra.mrb[26].mxu0 %vm4261_vm9, %v11381_v1  ;;  %v9665_v33 = vpack.c.bf16 %v3429_v24, %v3428_v58  ;;  %v3589_v31 = vld [vmem:[#allocation16 + $0xe8] sm:$0xff] }
 0x524   :  { %9661 = vmatprep.subr.bf16.mxu1 %v12239_v51  ;;  %v2997_v3 = vrot.slane %v2996_v39, 2  ;;  %v2973_v17 = vmax.f32 %v2971_v29, %v2972_v14  ;;  %v2982_v54 = vmax.f32 %v2980_v15, %v2981_v35  ;;  %v3006_v30 = vrot.slane %v3005_v46, 2  ;;  %9189 = vmatprep.mubr.msk.f32.mxu0 %vm4261_vm9, %v11391_v4  ;;  %v3426_v20 = vld [vmem:[#allocation4 + $0xa] sm:$0x3]  ;;  %v3591_v10 = vld [vmem:[#allocation16 + $0xf8] sm:$0xff]  ;;  %v12245_v8 = vld [vmem:[#allocation66_spill] sm:$0xff] }
 0x525   :  { %v3014_v48 = vmax.f32 %v3012_v32, %v3013_v61  ;;  %v2991_v21 = vmax.f32 %v2989_v6, %v2990_v62  ;;  %v3022_v37 = vrot.slane %v3021_v16, 4  ;;  %v9668_v0 = vpack.c.bf16 %v3431_v28, %v3430_v49  ;;  %v3506_v55 = vld [vmem:[#allocation4 + $0xc] sm:$0x3]  ;;  %v12246_v29 = vld [vmem:[#allocation68_spill] sm:$0xff]  ;;  %v12247_v15 = vld [vmem:[#allocation70_spill] sm:$0xff] }
 0x526   :  { %v2998_v26 = vmax.f32 %v2996_v39, %v2997_v3  ;;  %2974 = vst.msk [vmem:[#allocation4 + $0x17] sm:$0x1] %vm2766_vm12, %v2973_v17  ;;  %2983 = vst.msk [vmem:[#allocation4 + $0x18] sm:$0x1] %vm2766_vm12, %v2982_v54  ;;  %v3007_v1 = vmax.f32 %v3005_v46, %v3006_v30  ;;  %v9671_v11 = vpack.c.bf16 %v3509_v40, %v3508_v13  ;;  %v3669_v5 = vld [vmem:[#allocation16 + $0x108] sm:$0xff]  ;;  %v3670_v23 = vld [vmem:[#allocation16 + $0x110] sm:$0xff] }
 0x527   :  { %9663 = vmatpush3.bf16.msra.mxu1 %v9662_v57  ;;  %v3015_v63 = vrot.slane %v3014_v48, 2  ;;  %2992 = vst.msk [vmem:[#allocation4 + $0x19] sm:$0x1] %vm2766_vm12, %v2991_v21  ;;  %v3023_v22 = vmax.f32 %v3021_v16, %v3022_v37  ;;  %9190 = vmatmul.mubr.msk.f32.gmra.mrb[28].mxu0 %vm4261_vm9, %v11399_v7  ;;  %v3671_v34 = vld [vmem:[#allocation16 + $0x118] sm:$0xff]  ;;  %v3586_v43 = vld [vmem:[#allocation4 + $0xe] sm:$0x3] }
 0x528   :  { %9664 = vmatprep.subr.bf16.mxu1 %v12239_v51  ;;  %v2999_v2 = vrot.slane %v2998_v26, 1  ;;  %v3008_v4 = vrot.slane %v3007_v1, 1  ;;  %9194 = vmatprep.mubr.msk.f32.mxu0 %vm4261_vm9, %v11313_v38  ;;  %v12248_v27 = vld [vmem:[#allocation72_spill] sm:$0xff]  ;;  %v12249_v6 = vld [vmem:[#allocation58_spill] sm:$0xff]  ;;  %v9686_v39 = vpack.c.bf16 %v3671_v34, %v3670_v23  ;;  %v12250_v24 = vld [vmem:[#allocation59_spill] sm:$0xff] }
 0x529   :  { %v3016_v57 = vmax.f32 %v3014_v48, %v3015_v63  ;;  %v3024_v42 = vrot.slane %v3023_v22, 2  ;;  %v3748_v32 = vld [vmem:[#allocation16 + $0x120] sm:$0xff]  ;;  %v3749_v58 = vld [vmem:[#allocation16 + $0x128] sm:$0xff]  ;;  %v3750_v46 = vld [vmem:[#allocation16 + $0x130] sm:$0xff] }
 0x52a   :  { %9060 = vmatmul.mubr.msk.f32.vlgmr.msra.gmra.mrb[8].mxu1 %vm338_vm0, %v3346_v36  ;;  %v3000_v25 = vmax.f32 %v2998_v26, %v2999_v2  ;;  %v3009_v60 = vmax.f32 %v3007_v1, %v3008_v4  ;;  %v12251_v14 = vld [vmem:[#allocation60_spill] sm:$0xff]  ;;  %v9689_v35 = vpack.c.bf16 %v3749_v58, %v3748_v32  ;;  %v3666_v62 = vld [vmem:[#allocation4 + $0x10] sm:$0x3]  ;;  %v12252_v3 = vld [vmem:[#allocation61_spill] sm:$0xff] }
 0x52b   :  { %9666 = vmatpush3.bf16.msra.mxu1 %v9665_v33  ;;  %9070 = vmatprep.mubr.msk.f32.mxu1 %vm10599_vm7, %v12240_v9  ;;  %v3017_v52 = vrot.slane %v3016_v57, 1  ;;  %v3025_v7 = vmax.f32 %v3023_v22, %v3024_v42  ;;  %v3751_v61 = vld [vmem:[#allocation16 + $0x138] sm:$0xff]  ;;  %v12253_v16 = vld [vmem:[#allocation62_spill] sm:$0xff]  ;;  %v3828_v54 = vld [vmem:[#allocation16 + $0x140] sm:$0xff] }
 0x52c   :  { %9667 = vmatprep.subr.bf16.mxu1 %v12239_v51  ;;  %3001 = vst.msk [vmem:[#allocation4 + $0x1a] sm:$0x1] %vm2766_vm12, %v3000_v25  ;;  %9195 = vmatmul.mubr.msk.f32.vlgmr.msra.gmra.mrb[18].mxu0 %vm4261_vm9, %v11319_v41  ;;  %3010 = vst.msk [vmem:[#allocation4 + $0x1b] sm:$0x1] %vm2766_vm12, %v3009_v60  ;;  %v9692_v17 = vpack.c.bf16 %v3751_v61, %v3750_v46  ;;  %v3829_v30 = vld [vmem:[#allocation16 + $0x148] sm:$0xff]  ;;  %v12254_v48 = vld [vmem:[#allocation63_spill] sm:$0xff] }
 0x52d   :  { %v3018_v38 = vmax.f32 %v3016_v57, %v3017_v52  ;;  %9213 = vmatpush3.msk.msra.mxu0 %vm4345_vm8, %v11493_v18  ;;  %v3026_v45 = vrot.slane %v3025_v7, 1  ;;  %9197 = vmatprep.mubr.msk.f32.mxu0 %vm4261_vm9, %v11329_v44  ;;  %v9674_v18 = vpack.c.bf16 %v3511_v19, %v3510_v12  ;;  %v3588_v44 = vld [vmem:[#allocation16 + $0xe0] sm:$0xff]  ;;  %v9695_v21 = vpack.c.bf16 %v3829_v30, %v3828_v54  ;;  %v3830_v26 = vld [vmem:[#allocation16 + $0x150] sm:$0xff]  ;;  %v3831_v37 = vld [vmem:[#allocation16 + $0x158] sm:$0xff] }
 0x52e   :  { %v12255_v33 = vld [vmem:[#allocation64_spill] sm:$0xff]  ;;  %v3746_v49 = vld [vmem:[#allocation4 + $0x12] sm:$0x3]  ;;  %v12256_v28 = vld [vmem:[#allocation65_spill] sm:$0xff]  ;;  %v9698_v63 = vpack.c.bf16 %v3831_v37, %v3830_v26 }
 0x52f   :  { %9669 = vmatpush3.bf16.msra.mxu1 %v9668_v0  ;;  %3019 = vst.msk [vmem:[#allocation4 + $0x1c] sm:$0x1] %vm2766_vm12, %v3018_v38  ;;  %v3027_v41 = vmax.f32 %v3025_v7, %v3026_v45  ;;  %v12257_v1 = vld [vmem:[#allocation67_spill] sm:$0xff]  ;;  %v3908_v36 = vld [vmem:[#allocation16 + $0x160] sm:$0xff]  ;;  %v3909_v2 = vld [vmem:[#allocation16 + $0x168] sm:$0xff] }
 0x530   :  { %9670 = vmatprep.subr.bf16.mxu1 %v12239_v51  ;;  %9198 = vmatmul.mubr.msk.f32.gmra.mrb[20].mxu0 %vm4261_vm9, %v11337_v47  ;;  %v9677_v47 = vpack.c.bf16 %v3589_v31, %v3588_v44  ;;  %v12258_v22 = vld [vmem:[#allocation69_spill] sm:$0xff]  ;;  %v12259_v4 = vld [vmem:[#allocation71_spill] sm:$0xff]  ;;  %v9701_v57 = vpack.c.bf16 %v3909_v2, %v3908_v36  ;;  %v3826_v42 = vld [vmem:[#allocation4 + $0x14] sm:$0x3] }
 0x531   :  { %9200 = vmatprep.mubr.msk.f32.mxu0 %vm4261_vm9, %v11343_v50  ;;  %3028 = vst.msk [vmem:[#allocation4 + $0x1d] sm:$0x1] %vm2766_vm12, %v3027_v41  ;;  %v3590_v50 = vld [vmem:[#allocation16 + $0xf0] sm:$0xff]  ;;  %v3911_v25 = vld [vmem:[#allocation16 + $0x178] sm:$0xff]  ;;  %v12260_v13 = vld [vmem:[#allocation73_spill] sm:$0xff] }
 0x532   :  { %9071 = vmatmul.mubr.msk.f32.vlgmr.msra.gmra.mrb[8].mxu1 %vm338_vm0, %v3426_v20  ;;  %v3910_v0 = vld [vmem:[#allocation16 + $0x170] sm:$0xff]  ;;  %v3988_v60 = vld [vmem:[#allocation16 + $0x180] sm:$0xff]  ;;  %v3989_v52 = vld [vmem:[#allocation16 + $0x188] sm:$0xff] }
 0x533   :  { %9672 = vmatpush3.bf16.msra.mxu1 %v9671_v11  ;;  %9081 = vmatprep.mubr.msk.f32.mxu1 %vm10599_vm7, %v12240_v9  ;;  %v9704_v40 = vpack.c.bf16 %v3911_v25, %v3910_v0  ;;  %v9707_v7 = vpack.c.bf16 %v3989_v52, %v3988_v60  ;;  %v3990_v38 = vld [vmem:[#allocation16 + $0x190] sm:$0xff]  ;;  %v3991_v11 = vld [vmem:[#allocation16 + $0x198] sm:$0xff]  ;;  %v4068_v19 = vld [vmem:[#allocation16 + $0x1a0] sm:$0xff] }
 0x534   :  { %9673 = vmatprep.subr.bf16.mxu1 %v12239_v51  ;;  %9201 = vmatmul.mubr.msk.f32.gmra.mrb[22].mxu0 %vm4261_vm9, %v11351_v53  ;;  %v9680_v53 = vpack.c.bf16 %v3591_v10, %v3590_v50  ;;  %v3906_v45 = vld [vmem:[#allocation4 + $0x16] sm:$0x3]  ;;  %v9710_v12 = vpack.c.bf16 %v3991_v11, %v3990_v38  ;;  %v4069_v20 = vld [vmem:[#allocation16 + $0x1a8] sm:$0xff]  ;;  %v4071_v44 = vld [vmem:[#allocation16 + $0x1b8] sm:$0xff] }
 0x535   :  { %9203 = vmatprep.mubr.msk.f32.mxu0 %vm4261_vm9, %v11361_v56  ;;  %v3668_v56 = vld [vmem:[#allocation16 + $0x100] sm:$0xff]  ;;  %v9713_v41 = vpack.c.bf16 %v4069_v20, %v4068_v19  ;;  %v3986_v31 = vld [vmem:[#allocation4 + $0x18] sm:$0x3]  ;;  %v4149_v10 = vld [vmem:[#allocation16 + $0x1c8] sm:$0xff] }
 0x536   :  { %v4148_v50 = vld [vmem:[#allocation16 + $0x1c0] sm:$0xff]  ;;  %v8196_v34 = vld [vmem:[%s12261_s11 + $0x10] sm:$0xff]  ;;  %v11692_v46 = vld [vmem:[%s12263_s0] ss:$0 sm:$0xff] }
 0x537   :  { %9675 = vmatpush3.bf16.msra.mxu1 %v9674_v18  ;;  %v4070_v18 = vld [vmem:[#allocation16 + $0x1b0] sm:$0xff] }
 0x538   :  { %9676 = vmatprep.subr.bf16.mxu1 %v12239_v51  ;;  %9204 = vmatmul.mubr.msk.f32.gmra.mrb[24].mxu0 %vm4261_vm9, %v11369_v59  ;;  %v9683_v59 = vpack.c.bf16 %v3669_v5, %v3668_v56  ;;  %v4066_v56 = vld [vmem:[#allocation4 + $0x1a] sm:$0x3] }
 0x539   :  { %9206 = vmatprep.mubr.msk.f32.mxu0 %vm4261_vm9, %v12245_v8  ;;  %v4150_v8 = vld [vmem:[#allocation16 + $0x1d0] sm:$0xff] }
 0x53a   :  { %9082 = vmatmul.mubr.msk.f32.vlgmr.msra.gmra.mrb[8].mxu1 %vm338_vm0, %v3506_v55  ;;  %v9719_v55 = vpack.c.bf16 %v4149_v10, %v4148_v50 }
 0x53b   :  { %9678 = vmatpush3.bf16.msra.mxu1 %v9677_v47  ;;  %9092 = vmatprep.mubr.msk.f32.mxu1 %vm10599_vm7, %v12240_v9  ;;  %v9716_v47 = vpack.c.bf16 %v4071_v44, %v4070_v18 }
 0x53c   :  { %9679 = vmatprep.subr.bf16.mxu1 %v12239_v51  ;;  %9207 = vmatmul.mubr.msk.f32.gmra.mrb[26].mxu0 %vm4261_vm9, %v12246_v29  ;;  %v4146_v29 = vld [vmem:[#allocation4 + $0x1c] sm:$0x3] }
 0x53d   :  { %9209 = vmatprep.mubr.msk.f32.mxu0 %vm4261_vm9, %v12247_v15  ;;  %v4940_v15 = vld [vmem:[%s12261_s11] sm:$0xff] }
 0x53f   :  { %9681 = vmatpush3.bf16.msra.mxu1 %v9680_v53  ;;  %v4151_v53 = vld [vmem:[#allocation16 + $0x1d8] sm:$0xff] }
 0x540   :  { %9682 = vmatprep.subr.bf16.mxu1 %v12239_v51  ;;  %9210 = vmatmul.mubr.msk.f32.gmra.mrb[28].mxu0 %vm4261_vm9, %v12248_v27  ;;  %v9722_v5 = vpack.c.bf16 %v4151_v53, %v4150_v8  ;;  %v8222_v27 = vld [vmem:[%s12261_s11 + $0x20] sm:$0xff] }
 0x541   :  { %9214 = vmatprep.mubr.msk.f32.mxu0 %vm4261_vm9, %v12249_v6 }
 0x542   :  { %9093 = vmatmul.mubr.msk.f32.vlgmr.msra.gmra.mrb[8].mxu1 %vm338_vm0, %v3586_v43  ;;  %v8197_v43 = vld [vmem:[%s12261_s11 + $0x18] sm:$0xff] }
 0x543   :  { %9684 = vmatpush3.bf16.msra.mxu1 %v9683_v59  ;;  %9103 = vmatprep.mubr.msk.f32.mxu1 %vm10599_vm7, %v12240_v9  ;;  %v4941_v59 = vld [vmem:[%s12261_s11 + $0x8] sm:$0xff]  ;;  %v9724_v6 = vpack.c.bf16 %v8197_v43, %v8196_v34 }
 0x544   :  { %9685 = vmatprep.subr.bf16.mxu1 %v12239_v51  ;;  %9215 = vmatmul.mubr.msk.f32.vlgmr.msra.gmra.mrb[18].mxu0 %vm4261_vm9, %v12250_v24  ;;  %v9728_v23 = vpack.c.bf16 %v4941_v59, %v4940_v15 }
 0x545   :  { %9217 = vmatprep.mubr.msk.f32.mxu0 %vm4261_vm9, %v12251_v14  ;;  %9725 = vmatprep.subr.bf16.mxu0 %v9724_v6  ;;  %v11689_v14 = vld [vmem:[%s12262_s19] ss:$0 sm:$0xff] }
 0x546   :  { %9727 = vmatpush3.bf16.msra.mxu0 %v9724_v6 }
 0x547   :  { %9687 = vmatpush3.bf16.msra.mxu1 %v9686_v39  ;;  %v8223_v39 = vld [vmem:[%s12261_s11 + $0x28] sm:$0xff] }
 0x548   :  { %9688 = vmatprep.subr.bf16.mxu1 %v12239_v51  ;;  %9218 = vmatmul.mubr.msk.f32.gmra.mrb[20].mxu0 %vm4261_vm9, %v12252_v3  ;;  %v11683_v32 = vpack.c.bf16 %v8223_v39, %v8222_v27 }
 0x549   :  { %9220 = vmatprep.mubr.msk.f32.mxu0 %vm4261_vm9, %v12253_v16 }
 0x54a   :  { %9104 = vmatmul.mubr.msk.f32.vlgmr.msra.gmra.mrb[8].mxu1 %vm338_vm0, %v3666_v62 }
 0x54b   :  { %9690 = vmatpush3.bf16.msra.mxu1 %v9689_v35  ;;  %9114 = vmatprep.mubr.msk.f32.mxu1 %vm10599_vm7, %v12240_v9 }
 0x54c   :  { %9691 = vmatprep.subr.bf16.mxu1 %v12239_v51  ;;  %9221 = vmatmul.mubr.msk.f32.gmra.mrb[22].mxu0 %vm4261_vm9, %v12254_v48 }
 0x54d   :  { %9223 = vmatprep.mubr.msk.f32.mxu0 %vm4261_vm9, %v12255_v33 }
 0x54f   :  { %9693 = vmatpush3.bf16.msra.mxu1 %v9692_v17 }
 0x550   :  { %9694 = vmatprep.subr.bf16.mxu1 %v12239_v51  ;;  %9224 = vmatmul.mubr.msk.f32.gmra.mrb[24].mxu0 %vm4261_vm9, %v12256_v28 }
 0x551   :  { %9226 = vmatprep.mubr.msk.f32.mxu0 %vm4261_vm9, %v12257_v1 }
 0x552   :  { %9115 = vmatmul.mubr.msk.f32.vlgmr.msra.gmra.mrb[8].mxu1 %vm338_vm0, %v3746_v49 }
 0x553   :  { %9696 = vmatpush3.bf16.msra.mxu1 %v9695_v21  ;;  %9125 = vmatprep.mubr.msk.f32.mxu1 %vm10599_vm7, %v12240_v9 }
 0x554   :  { %9697 = vmatprep.subr.bf16.mxu1 %v12239_v51  ;;  %9227 = vmatmul.mubr.msk.f32.gmra.mrb[26].mxu0 %vm4261_vm9, %v12258_v22 }
 0x555   :  { %9229 = vmatprep.mubr.msk.f32.mxu0 %vm4261_vm9, %v12259_v4 }
 0x557   :  { %9699 = vmatpush3.bf16.msra.mxu1 %v9698_v63 }
 0x558   :  { %9700 = vmatprep.subr.bf16.mxu1 %v12239_v51  ;;  %9230 = vmatmul.mubr.msk.f32.gmra.mrb[28].mxu0 %vm4261_vm9, %v12260_v13 }
 0x55a   :  { %9126 = vmatmul.mubr.msk.f32.vlgmr.msra.gmra.mrb[8].mxu1 %vm338_vm0, %v3826_v42 }
 0x55b   :  { %9702 = vmatpush3.bf16.msra.mxu1 %v9701_v57  ;;  %9136 = vmatprep.mubr.msk.f32.mxu1 %vm10599_vm7, %v12240_v9 }
 0x55c   :  { %9703 = vmatprep.subr.bf16.mxu1 %v12239_v51 }
 0x55f   :  { %9705 = vmatpush3.bf16.msra.mxu1 %v9704_v40 }
 0x560   :  { %9706 = vmatprep.subr.bf16.mxu1 %v12239_v51 }
 0x562   :  { %9137 = vmatmul.mubr.msk.f32.vlgmr.msra.gmra.mrb[8].mxu1 %vm338_vm0, %v3906_v45 }
 0x563   :  { %9708 = vmatpush3.bf16.msra.mxu1 %v9707_v7  ;;  %9147 = vmatprep.mubr.msk.f32.mxu1 %vm10599_vm7, %v12240_v9 }
 0x564   :  { %9709 = vmatprep.subr.bf16.mxu1 %v12239_v51 }
 0x567   :  { %9711 = vmatpush3.bf16.msra.mxu1 %v9710_v12 }
 0x568   :  { %9712 = vmatprep.subr.bf16.mxu1 %v12239_v51 }
 0x56a   :  { %9148 = vmatmul.mubr.msk.f32.vlgmr.msra.gmra.mrb[8].mxu1 %vm338_vm0, %v3986_v31 }
 0x56b   :  { %9714 = vmatpush3.bf16.msra.mxu1 %v9713_v41  ;;  %9158 = vmatprep.mubr.msk.f32.mxu1 %vm10599_vm7, %v12240_v9 }
 0x56c   :  { %9715 = vmatprep.subr.bf16.mxu1 %v12239_v51 }
 0x56f   :  { %9717 = vmatpush3.bf16.msra.mxu1 %v9716_v47 }
 0x570   :  { %9718 = vmatprep.subr.bf16.mxu1 %v12239_v51 }
 0x572   :  { %9159 = vmatmul.mubr.msk.f32.vlgmr.msra.gmra.mrb[8].mxu1 %vm338_vm0, %v4066_v56 }
 0x573   :  { %9720 = vmatpush3.bf16.msra.mxu1 %v9719_v55  ;;  %9169 = vmatprep.mubr.msk.f32.mxu1 %vm10599_vm7, %v12240_v9 }
 0x574   :  { %9721 = vmatprep.subr.bf16.mxu1 %v12239_v51 }
 0x577   :  { %9723 = vmatpush3.bf16.msra.mxu1 %v9722_v5 }
 0x578   :  { %9729 = vmatprep.subr.bf16.mxu1 %v9728_v23 }
 0x57a   :  { %9170 = vmatmul.mubr.msk.f32.vlgmr.msra.gmra.mrb[8].mxu1 %vm338_vm0, %v4146_v29 }
 0x57b   :  { %9731 = vmatpush3.bf16.msra.mxu1 %v9728_v23 }
 0x57c   :  { %9733 = vmatprep.subr.bf16.mxu1 %v11683_v32 }
 0x5e1   :  { %v11686_v58 = vpop.f32.mrb[16].mxu0 }
 0x5e2   :  { %v9017_v24 = vpop.f32.mrb[17].mxu0 }
 0x617   :  { %v9216_v35 = vpop.f32.mrb[18].mxu0 }
 0x618   :  { %v4836_v61 = vmul.f32 %v9216_v35, %v11689_v14  ;;  %v4757_v62 = vpop.f32.mrb[19].mxu0 }
 0x619   :  { %v4835_v3 = vmul.f32 %v11689_v14, %v4757_v62 }
 0x61a   :  { %v4855_v16 = vadd.f32 %v11692_v46, %v4836_v61 }
 0x61b   :  { %v4854_v17 = vadd.f32 %v11692_v46, %v4835_v3  ;;  %v9219_v54 = vpop.f32.mrb[20].mxu0 }
 0x61c   :  { %v4867_v30 = vmax.f32 %v4855_v16, 0.0  ;;  %v4838_v48 = vmul.f32 %v9219_v54, %v11689_v14  ;;  %v4767_v33 = vpop.f32.mrb[21].mxu0 }
 0x61d   :  { %v4866_v21 = vmax.f32 %v4854_v17, 0.0  ;;  %v4837_v26 = vmul.f32 %v11689_v14, %v4767_v33 }
 0x61e   :  { %4879 = vst.msk [vmem:[#allocation3 + $0x8] sm:$0xff] %vm1143_vm4, %v4867_v30  ;;  %v4857_v37 = vadd.f32 %v11692_v46, %v4838_v48 }
 0x61f   :  { %4878 = vst.msk [vmem:[#allocation3] sm:$0xff] %vm1143_vm4, %v4866_v21  ;;  %v4856_v49 = vadd.f32 %v11692_v46, %v4837_v26  ;;  %v9222_v28 = vpop.f32.mrb[22].mxu0 }
 0x620   :  { %v4869_v1 = vmax.f32 %v4857_v37, 0.0  ;;  %v4840_v63 = vmul.f32 %v9222_v28, %v11689_v14  ;;  %v4777_v36 = vpop.f32.mrb[23].mxu0 }
 0x621   :  { %v4868_v2 = vmax.f32 %v4856_v49, 0.0  ;;  %v4839_v22 = vmul.f32 %v11689_v14, %v4777_v36 }
 0x622   :  { %4881 = vst.msk [vmem:[#allocation3 + $0x18] sm:$0xff] %vm1143_vm4, %v4869_v1  ;;  %v4859_v4 = vadd.f32 %v11692_v46, %v4840_v63 }
 0x623   :  { %4880 = vst.msk [vmem:[#allocation3 + $0x10] sm:$0xff] %vm1143_vm4, %v4868_v2  ;;  %v4858_v57 = vadd.f32 %v11692_v46, %v4839_v22  ;;  %v9225_v0 = vpop.f32.mrb[24].mxu0 }
 0x624   :  { %v4871_v25 = vmax.f32 %v4859_v4, 0.0  ;;  %v4842_v42 = vmul.f32 %v9225_v0, %v11689_v14  ;;  %v4787_v13 = vpop.f32.mrb[25].mxu0 }
 0x625   :  { %v4904_v40 = vld [vmem:[#allocation3 + $0x8] sm:$0xff]  ;;  %v4870_v60 = vmax.f32 %v4858_v57, 0.0  ;;  %v4841_v52 = vmul.f32 %v11689_v14, %v4787_v13 }
 0x626   :  { %4910 = vst.msk [vmem:[#allocation2 + $0x9] sm:$0xff] %vm1143_vm4, %v4904_v40  ;;  %v4903_v7 = vld [vmem:[#allocation3] sm:$0xff]  ;;  %4883 = vst.msk [vmem:[#allocation3 + $0x28] sm:$0xff] %vm1143_vm4, %v4871_v25  ;;  %v4861_v38 = vadd.f32 %v11692_v46, %v4842_v42 }
 0x627   :  { %4909 = vst.msk [vmem:[#allocation2 + $0x1] sm:$0xff] %vm1143_vm4, %v4903_v7  ;;  %4882 = vst.msk [vmem:[#allocation3 + $0x20] sm:$0xff] %vm1143_vm4, %v4870_v60  ;;  %v4860_v11 = vadd.f32 %v11692_v46, %v4841_v52  ;;  %v9228_v45 = vpop.f32.mrb[26].mxu0 }
 0x628   :  { %v4873_v12 = vmax.f32 %v4861_v38, 0.0  ;;  %v4844_v19 = vmul.f32 %v9228_v45, %v11689_v14  ;;  %v4797_v20 = vpop.f32.mrb[27].mxu0 }
 0x629   :  { %v4906_v41 = vld [vmem:[#allocation3 + $0x18] sm:$0xff]  ;;  %v4872_v18 = vmax.f32 %v4860_v11, 0.0  ;;  %v4843_v44 = vmul.f32 %v11689_v14, %v4797_v20 }
 0x62a   :  { %4912 = vst.msk [vmem:[#allocation2 + $0x19] sm:$0xff] %vm1143_vm4, %v4906_v41  ;;  %v4905_v31 = vld [vmem:[#allocation3 + $0x10] sm:$0xff]  ;;  %4885 = vst.msk [vmem:[#allocation3 + $0x38] sm:$0xff] %vm1143_vm4, %v4873_v12  ;;  %v4863_v47 = vadd.f32 %v11692_v46, %v4844_v19 }
 0x62b   :  { %4911 = vst.msk [vmem:[#allocation2 + $0x11] sm:$0xff] %vm1143_vm4, %v4905_v31  ;;  %4884 = vst.msk [vmem:[#allocation3 + $0x30] sm:$0xff] %vm1143_vm4, %v4872_v18  ;;  %v4862_v50 = vadd.f32 %v11692_v46, %v4843_v44  ;;  %v9231_v10 = vpop.f32.mrb[28].mxu0  ;;  %v8239_v44 = vld [vmem:[%s12264_s18 + $0x28] sm:$0xff] }
 0x62c   :  { %v4875_v55 = vmax.f32 %v4863_v47, 0.0  ;;  %v4846_v8 = vmul.f32 %v9231_v10, %v11689_v14  ;;  %v4807_v53 = vpop.f32.mrb[29].mxu0  ;;  %v8240_v47 = vld [vmem:[%s12264_s18 + $0x30] sm:$0xff] }
 0x62d   :  { %v4908_v56 = vld [vmem:[#allocation3 + $0x28] sm:$0x1f]  ;;  %v4874_v5 = vmax.f32 %v4862_v50, 0.0  ;;  %v4845_v29 = vmul.f32 %v11689_v14, %v4807_v53  ;;  %v8241_v50 = vld [vmem:[%s12264_s18 + $0x38] sm:$0xff] }
 0x62e   :  { %v4907_v15 = vld [vmem:[#allocation3 + $0x20] sm:$0xff]  ;;  %4887 = vst.msk [vmem:[#allocation3 + $0x48] sm:$0xff] %vm1143_vm4, %v4875_v55  ;;  %v4865_v59 = vadd.f32 %v11692_v46, %v4846_v8  ;;  %v4943_v27 = vld [vmem:[#allocation2 + $0x9] sm:$0xff]  ;;  %v9740_v10 = vpack.c.bf16 %v8241_v50, %v8240_v47 }
 0x62f   :  { %v4942_v23 = vld [vmem:[#allocation2 + $0x1] sm:$0xff]  ;;  %4915 = vst.msk [vmem:[#allocation2 + $0x29] sm:$0x1f] %vm4914_vm13, %v4908_v56  ;;  %v4864_v43 = vadd.f32 %v11692_v46, %v4845_v29 }
 0x630   :  { %v4928_v34 = vld [vmem:[#allocation2] sm:$0xff]  ;;  %4913 = vst.msk [vmem:[#allocation2 + $0x21] sm:$0xff] %vm1143_vm4, %v4907_v15  ;;  %4886 = vst.msk [vmem:[#allocation3 + $0x40] sm:$0xff] %vm1143_vm4, %v4874_v5  ;;  %9236 = vmatprep.mubr.msk.f32.mxu0 %vm1143_vm4, %v4942_v23  ;;  %v4929_v6 = vld [vmem:[#allocation2 + $0x8] sm:$0xff]  ;;  %v4877_v24 = vmax.f32 %v4865_v59, 0.0 }
 0x631   :  { %9258 = vmatprep.mubr.msk.f32.mxu1 %vm1143_vm4, %v4928_v34  ;;  %v11736_v39 = vld [vmem:[#allocation2 + $0x2] sm:$0xff]  ;;  %9237 = vmatmul.mubr.msk.f32.vlgmr.msra.gmra.mrb[30].mxu0 %vm1143_vm4, %v4943_v27  ;;  %v4876_v14 = vmax.f32 %v4864_v43, 0.0  ;;  %v4945_v35 = vld [vmem:[#allocation2 + $0x19] sm:$0xff] }
 0x632   :  { %9259 = vmatmul.mubr.msk.f32.vlgmr.msra.gmra.mrb[10].mxu1 %vm1143_vm4, %v4929_v6  ;;  %5530 = vst.msk [vmem:[#allocation2] sm:$0xff] %vm338_vm0, %v12240_v9  ;;  %v4916_v46 = vld [vmem:[#allocation3 + $0x2f] sm:$0xff]  ;;  %v4917_v61 = vld [vmem:[#allocation3 + $0x37] sm:$0xff]  ;;  %v5579_v55 = vld [vmem:[%s12264_s18] sm:$0xff] }
 0x633   :  { %9735 = vmatpush3.bf16.msra.mxu1 %v11683_v32  ;;  %4890 = vst.msk [vmem:[#allocation3 + $0x58] sm:$0xf] %vm4889_vm14, %v4877_v24  ;;  %v4944_v62 = vld [vmem:[#allocation2 + $0x11] sm:$0xff]  ;;  %v5580_v8 = vld [vmem:[%s12264_s18 + $0x8] sm:$0xff] }
 0x634   :  { %9760 = vmatprep.subr.bf16.mxu1 %v12239_v51  ;;  %4922 = vst.msk [vmem:[#allocation2 + $0x30] sm:$0xff] %vm1143_vm4, %v4916_v46  ;;  %4923 = vst.msk [vmem:[#allocation2 + $0x38] sm:$0xff] %vm1143_vm4, %v4917_v61  ;;  %9239 = vmatprep.mubr.msk.f32.mxu0 %vm1143_vm4, %v4944_v62  ;;  %v4930_v3 = vld [vmem:[#allocation2 + $0x10] sm:$0xff]  ;;  %v4931_v16 = vld [vmem:[#allocation2 + $0x18] sm:$0xff]  ;;  %v11824_v53 = vpack.c.bf16 %v5580_v8, %v5579_v55 }
 0x635   :  { %4888 = vst.msk [vmem:[#allocation3 + $0x50] sm:$0xff] %vm1143_vm4, %v4876_v14  ;;  %v11749_v17 = vld [vmem:[#allocation2 + $0xa] sm:$0xff]  ;;  %9261 = vmatprep.mubr.msk.f32.mxu1 %vm1143_vm4, %v4930_v3  ;;  %9240 = vmatmul.mubr.msk.f32.gmra.mrb[32].mxu0 %vm1143_vm4, %v4945_v35  ;;  %v11755_v32 = vld [vmem:[#allocation2 + $0x12] sm:$0xff]  ;;  %v11832_v35 = vld [vmem:[%s12265_s22] ss:$0 sm:$0xff] }
 0x636   :  { %5531 = vst.msk [vmem:[#allocation2 + $0x8] sm:$0xff] %vm338_vm0, %v12240_v9  ;;  %9262 = vmatmul.mubr.msk.f32.gmra.mrb[12].mxu1 %vm1143_vm4, %v4931_v16  ;;  %5532 = vst.msk [vmem:[#allocation2 + $0x10] sm:$0xff] %vm338_vm0, %v12240_v9  ;;  %v11835_v62 = vld [vmem:[%s12266_s27] ss:$0 sm:$0xff] }
 0x637   :  { %v4918_v54 = vld [vmem:[#allocation3 + $0x3f] sm:$0xff]  ;;  %v4919_v30 = vld [vmem:[#allocation3 + $0x47] sm:$0xff] }
 0x638   :  { %v4946_v48 = vld [vmem:[#allocation2 + $0x21] sm:$0xff]  ;;  %4924 = vst.msk [vmem:[#allocation2 + $0x40] sm:$0xff] %vm1143_vm4, %v4918_v54  ;;  %4925 = vst.msk [vmem:[#allocation2 + $0x48] sm:$0xff] %vm1143_vm4, %v4919_v30 }
 0x639   :  { %9242 = vmatprep.mubr.msk.f32.mxu0 %vm1143_vm4, %v4946_v48  ;;  %v4932_v33 = vld [vmem:[#allocation2 + $0x20] sm:$0xff]  ;;  %v4933_v21 = vld [vmem:[#allocation2 + $0x28] sm:$0xff] }
 0x63a   :  { %v5282_v26 = vld [vmem:[#allocation2 + $0x1a] sm:$0xff]  ;;  %9264 = vmatprep.mubr.msk.f32.mxu1 %vm1143_vm4, %v4932_v33  ;;  %v5283_v37 = vld [vmem:[#allocation2 + $0x22] sm:$0xff] }
 0x63b   :  { %5533 = vst.msk [vmem:[#allocation2 + $0x18] sm:$0xff] %vm338_vm0, %v12240_v9  ;;  %9265 = vmatmul.mubr.msk.f32.gmra.mrb[14].mxu1 %vm1143_vm4, %v4933_v21  ;;  %5534 = vst.msk [vmem:[#allocation2 + $0x20] sm:$0xff] %vm338_vm0, %v12240_v9  ;;  %v4947_v1 = vld [vmem:[#allocation2 + $0x29] sm:$0xff]  ;;  %v4948_v36 = vld [vmem:[#allocation2 + $0x31] sm:$0xff] }
 0x63c   :  { %v4920_v49 = vld [vmem:[#allocation3 + $0x4f] sm:$0xff]  ;;  %v4921_v28 = vld [vmem:[#allocation3 + $0x57] sm:$0x1f]  ;;  %9243 = vmatmul.mubr.msk.f32.gmra.mrb[34].mxu0 %vm1143_vm4, %v4947_v1 }
 0x63d   :  { %4926 = vst.msk [vmem:[#allocation2 + $0x50] sm:$0xff] %vm1143_vm4, %v4920_v49  ;;  %v4934_v63 = vld [vmem:[#allocation2 + $0x30] sm:$0xff]  ;;  %v4935_v2 = vld [vmem:[#allocation2 + $0x38] sm:$0xff]  ;;  %9245 = vmatprep.mubr.msk.f32.mxu0 %vm1143_vm4, %v4948_v36 }
 0x63e   :  { %4927 = vst.msk [vmem:[#allocation2 + $0x58] sm:$0x1f] %vm4914_vm13, %v4921_v28  ;;  %9267 = vmatprep.mubr.msk.f32.mxu1 %vm1143_vm4, %v4934_v63  ;;  %v5284_v22 = vld [vmem:[#allocation2 + $0x2a] sm:$0xff]  ;;  %v5285_v4 = vld [vmem:[#allocation2 + $0x32] sm:$0xff] }
 0x63f   :  { %9268 = vmatmul.mubr.msk.f32.gmra.mrb[16].mxu1 %vm1143_vm4, %v4935_v2  ;;  %5535 = vst.msk [vmem:[#allocation2 + $0x28] sm:$0xff] %vm338_vm0, %v12240_v9  ;;  %5536 = vst.msk [vmem:[#allocation2 + $0x30] sm:$0xff] %vm338_vm0, %v12240_v9  ;;  %v4949_v57 = vld [vmem:[#allocation2 + $0x39] sm:$0xff]  ;;  %v4950_v25 = vld [vmem:[#allocation2 + $0x41] sm:$0xff] }
 0x640   :  { %v4936_v0 = vld [vmem:[#allocation2 + $0x40] sm:$0xff]  ;;  %9246 = vmatmul.mubr.msk.f32.gmra.mrb[36].mxu0 %vm1143_vm4, %v4949_v57  ;;  %v4937_v42 = vld [vmem:[#allocation2 + $0x48] sm:$0xff] }
 0x641   :  { %9270 = vmatprep.mubr.msk.f32.mxu1 %vm1143_vm4, %v4936_v0  ;;  %v5286_v13 = vld [vmem:[#allocation2 + $0x3a] sm:$0xff]  ;;  %v5287_v40 = vld [vmem:[#allocation2 + $0x42] sm:$0xff]  ;;  %9248 = vmatprep.mubr.msk.f32.mxu0 %vm1143_vm4, %v4950_v25 }
 0x642   :  { %5537 = vst.msk [vmem:[#allocation2 + $0x38] sm:$0xff] %vm338_vm0, %v12240_v9  ;;  %5538 = vst.msk [vmem:[#allocation2 + $0x40] sm:$0xff] %vm338_vm0, %v12240_v9 }
 0x643   :  { %9271 = vmatmul.mubr.msk.f32.gmra.mrb[18].mxu1 %vm1143_vm4, %v4937_v42 }
 0x644   :  { %v4951_v60 = vld [vmem:[#allocation2 + $0x49] sm:$0xff] }
 0x645   :  { %v4938_v52 = vld [vmem:[#allocation2 + $0x50] sm:$0xff]  ;;  %9249 = vmatmul.mubr.msk.f32.gmra.mrb[38].mxu0 %vm1143_vm4, %v4951_v60  ;;  %v4939_v38 = vld [vmem:[#allocation2 + $0x58] sm:$0xf] }
 0x646   :  { %v4952_v7 = vld [vmem:[#allocation2 + $0x51] sm:$0xff]  ;;  %9273 = vmatprep.mubr.msk.f32.mxu1 %vm1143_vm4, %v4938_v52  ;;  %v4953_v45 = vld [vmem:[#allocation2 + $0x59] sm:$0xf] }
 0x647   :  { %v5288_v11 = vld [vmem:[#allocation2 + $0x4a] sm:$0xff]  ;;  %9251 = vmatprep.mubr.msk.f32.mxu0 %vm1143_vm4, %v4952_v7  ;;  %v5289_v12 = vld [vmem:[#allocation2 + $0x52] sm:$0xff]  ;;  %v5290_v19 = vld [vmem:[#allocation2 + $0x5a] sm:$0xf]  ;;  %9274 = vmatmul.mubr.msk.f32.gmra.mrb[20].mxu1 %vm1143_vm4, %v4939_v38 }
 0x648   :  { %5539 = vst.msk [vmem:[#allocation2 + $0x48] sm:$0xff] %vm338_vm0, %v12240_v9  ;;  %5540 = vst.msk [vmem:[#allocation2 + $0x50] sm:$0xff] %vm338_vm0, %v12240_v9  ;;  %9280 = vmatprep.mubr.msk.f32.mxu1 %vm1143_vm4, %v11736_v39 }
 0x649   :  { %5541 = vst.msk [vmem:[#allocation2 + $0x58] sm:$0x3f] %vm350_vm6, %v12240_v9  ;;  %9252 = vmatmul.mubr.msk.f32.gmra.mrb[40].mxu0 %vm1143_vm4, %v4953_v45 }
 0x64b   :  { %9281 = vmatmul.mubr.msk.f32.vlgmr.msra.gmra.mrb[10].mxu1 %vm1143_vm4, %v11749_v17 }
 0x64c   :  { %9283 = vmatprep.mubr.msk.f32.mxu1 %vm1143_vm4, %v11755_v32 }
 0x64d   :  { %v4221_v20 = vpop.f32.mrb[8].mxu1 }
 0x64e   :  { %v11805_v41 = vadd.f32 %v4221_v20, %v11686_v58  ;;  %v9171_v18 = vpop.f32.mrb[9].mxu1  ;;  %v8238_v58 = vld [vmem:[%s12264_s18 + $0x20] sm:$0xff] }
 0x64f   :  { %9284 = vmatmul.mubr.msk.f32.gmra.mrb[12].mxu1 %vm1143_vm4, %v5282_v26  ;;  %v9736_v31 = vpack.c.bf16 %v8239_v44, %v8238_v58 }
 0x650   :  { %9286 = vmatprep.mubr.msk.f32.mxu1 %vm1143_vm4, %v5283_v37 }
 0x651   :  { %9737 = vmatprep.subr.bf16.mxu0 %v9736_v31 }
 0x652   :  { %9739 = vmatpush3.bf16.msra.mxu0 %v9736_v31 }
 0x653   :  { %9287 = vmatmul.mubr.msk.f32.gmra.mrb[14].mxu1 %vm1143_vm4, %v5284_v22  ;;  %9741 = vmatprep.subr.bf16.mxu0 %v9740_v10 }
 0x654   :  { %9289 = vmatprep.mubr.msk.f32.mxu1 %vm1143_vm4, %v5285_v4 }
 0x656   :  { %9743 = vmatpush3.bf16.msra.mxu0 %v9740_v10 }
 0x657   :  { %9290 = vmatmul.mubr.msk.f32.gmra.mrb[16].mxu1 %vm1143_vm4, %v5286_v13  ;;  %9745 = vmatprep.subr.bf16.mxu0 %v11824_v53 }
 0x658   :  { %9292 = vmatprep.mubr.msk.f32.mxu1 %vm1143_vm4, %v5287_v40 }
 0x65b   :  { %9293 = vmatmul.mubr.msk.f32.gmra.mrb[18].mxu1 %vm1143_vm4, %v5288_v11 }
 0x65c   :  { %9295 = vmatprep.mubr.msk.f32.mxu1 %vm1143_vm4, %v5289_v12 }
 0x65f   :  { %9296 = vmatmul.mubr.msk.f32.gmra.mrb[20].mxu1 %vm1143_vm4, %v5290_v19 }
 0x660   :  { %9384 = vmatprep.mubr.msk.f32.mxu1 %vm10599_vm7, %v12240_v9 }
 0x704   :  { %v9238_v56 = vpop.f32.mrb[30].mxu0 }
 0x705   :  { %v5059_v5 = vpop.f32.mrb[31].mxu0 }
 0x708   :  { %v9241_v29 = vpop.f32.mrb[32].mxu0 }
 0x709   :  { %v5069_v15 = vpop.f32.mrb[33].mxu0 }
 0x70f   :  { %v9244_v59 = vpop.f32.mrb[34].mxu0 }
 0x710   :  { %v5079_v23 = vpop.f32.mrb[35].mxu0 }
 0x713   :  { %v9247_v34 = vpop.f32.mrb[36].mxu0 }
 0x714   :  { %v5089_v43 = vpop.f32.mrb[37].mxu0 }
 0x718   :  { %v9250_v27 = vpop.f32.mrb[38].mxu0 }
 0x719   :  { %v5099_v6 = vpop.f32.mrb[39].mxu0 }
 0x71c   :  { %v11827_v39 = vpop.f32.mrb[40].mxu0 }
 0x71d   :  { %v11829_v24 = vpop.f32.mrb[41].mxu0 }
 0x71e   :  { %v9282_v14 = vpop.f32.mrb[10].mxu1 }
 0x71f   :  { %v9869_v46 = vadd.f32 %v9282_v14, %v9238_v56  ;;  %v5396_v61 = vpop.f32.mrb[11].mxu1  ;;  %v5581_v14 = vld [vmem:[%s12264_s18 + $0x10] sm:$0xff] }
 0x720   :  { %v9870_v3 = vadd.f32 %v5396_v61, %v5059_v5 }
 0x721   :  { %v5475_v16 = vmul.f32 %v9869_v46, %v11832_v35  ;;  %v5582_v46 = vld [vmem:[%s12264_s18 + $0x18] sm:$0xff] }
 0x722   :  { %v5474_v17 = vmul.f32 %v9870_v3, %v11832_v35  ;;  %v9285_v32 = vpop.f32.mrb[12].mxu1 }
 0x723   :  { %v5494_v54 = vadd.f32 %v11835_v62, %v5475_v16  ;;  %v9871_v30 = vadd.f32 %v9285_v32, %v9241_v29  ;;  %v5406_v48 = vpop.f32.mrb[13].mxu1 }
 0x724   :  { %v5493_v33 = vadd.f32 %v11835_v62, %v5474_v17  ;;  %v9872_v21 = vadd.f32 %v5406_v48, %v5069_v15 }
 0x725   :  { %v5506_v26 = vmax.f32 %v5494_v54, 0.0  ;;  %v5477_v37 = vmul.f32 %v9871_v30, %v11832_v35 }
 0x726   :  { %v5505_v49 = vmax.f32 %v5493_v33, 0.0  ;;  %v5476_v28 = vmul.f32 %v9872_v21, %v11832_v35  ;;  %v9288_v1 = vpop.f32.mrb[14].mxu1  ;;  %v8267_v21 = vld [vmem:[%s12264_s18 + $0x48] sm:$0xff] }
 0x727   :  { %5518 = vst.msk [vmem:[#allocation3 + $0x8] sm:$0xff] %vm338_vm0, %v5506_v26  ;;  %v5496_v63 = vadd.f32 %v11835_v62, %v5477_v37  ;;  %v9873_v36 = vadd.f32 %v9288_v1, %v9244_v59  ;;  %v5416_v2 = vpop.f32.mrb[15].mxu1 }
 0x728   :  { %5517 = vst.msk [vmem:[#allocation3] sm:$0xff] %vm338_vm0, %v5505_v49  ;;  %v5495_v22 = vadd.f32 %v11835_v62, %v5476_v28  ;;  %v9874_v4 = vadd.f32 %v5416_v2, %v5079_v23 }
 0x729   :  { %v5508_v57 = vmax.f32 %v5496_v63, 0.0  ;;  %v5479_v0 = vmul.f32 %v9873_v36, %v11832_v35 }
 0x72a   :  { %v5507_v25 = vmax.f32 %v5495_v22, 0.0  ;;  %v5478_v42 = vmul.f32 %v9874_v4, %v11832_v35  ;;  %v9291_v13 = vpop.f32.mrb[16].mxu1 }
 0x72b   :  { %5520 = vst.msk [vmem:[#allocation3 + $0x18] sm:$0xff] %vm338_vm0, %v5508_v57  ;;  %v5498_v40 = vadd.f32 %v11835_v62, %v5479_v0  ;;  %v9875_v60 = vadd.f32 %v9291_v13, %v9247_v34  ;;  %v5426_v52 = vpop.f32.mrb[17].mxu1 }
 0x72c   :  { %5519 = vst.msk [vmem:[#allocation3 + $0x10] sm:$0xff] %vm338_vm0, %v5507_v25  ;;  %v5497_v7 = vadd.f32 %v11835_v62, %v5478_v42  ;;  %v9876_v38 = vadd.f32 %v5426_v52, %v5089_v43  ;;  %v8268_v52 = vld [vmem:[%s12264_s18 + $0x50] sm:$0xff] }
 0x72d   :  { %v5510_v11 = vmax.f32 %v5498_v40, 0.0  ;;  %v5481_v45 = vmul.f32 %v9875_v60, %v11832_v35 }
 0x72e   :  { %v5543_v12 = vld [vmem:[#allocation3 + $0x8] sm:$0xff]  ;;  %v5509_v19 = vmax.f32 %v5497_v7, 0.0  ;;  %v5480_v20 = vmul.f32 %v9876_v38, %v11832_v35  ;;  %v9294_v18 = vpop.f32.mrb[18].mxu1  ;;  %v8269_v7 = vld [vmem:[%s12264_s18 + $0x58] sm:$0xff] }
 0x72f   :  { %5549 = vst.msk [vmem:[#allocation2 + $0x9] sm:$0xff] %vm338_vm0, %v5543_v12  ;;  %v5542_v58 = vld [vmem:[#allocation3] sm:$0xff]  ;;  %5522 = vst.msk [vmem:[#allocation3 + $0x28] sm:$0xff] %vm338_vm0, %v5510_v11  ;;  %v5500_v44 = vadd.f32 %v11835_v62, %v5481_v45  ;;  %v9877_v31 = vadd.f32 %v9294_v18, %v9250_v27  ;;  %v5436_v47 = vpop.f32.mrb[19].mxu1  ;;  %v9756_v11 = vpack.c.bf16 %v8269_v7, %v8268_v52 }
 0x730   :  { %5548 = vst.msk [vmem:[#allocation2 + $0x1] sm:$0xff] %vm338_vm0, %v5542_v58  ;;  %5521 = vst.msk [vmem:[#allocation3 + $0x20] sm:$0xff] %vm338_vm0, %v5509_v19  ;;  %v5499_v50 = vadd.f32 %v11835_v62, %v5480_v20  ;;  %v9878_v10 = vadd.f32 %v5436_v47, %v5099_v6  ;;  %v11963_v52 = vld [vmem:[#allocation20 + $0x18] sm:$0xff] }
 0x731   :  { %v5512_v55 = vmax.f32 %v5500_v44, 0.0  ;;  %v5483_v8 = vmul.f32 %v9877_v31, %v11832_v35 }
 0x732   :  { %v5545_v56 = vld [vmem:[#allocation3 + $0x18] sm:$0xff]  ;;  %v5511_v5 = vmax.f32 %v5499_v50, 0.0  ;;  %v5482_v29 = vmul.f32 %v9878_v10, %v11832_v35  ;;  %v9297_v15 = vpop.f32.mrb[20].mxu1 }
 0x733   :  { %5551 = vst.msk [vmem:[#allocation2 + $0x19] sm:$0xff] %vm338_vm0, %v5545_v56  ;;  %v5544_v59 = vld [vmem:[#allocation3 + $0x10] sm:$0xff]  ;;  %5524 = vst.msk [vmem:[#allocation3 + $0x38] sm:$0xff] %vm338_vm0, %v5512_v55  ;;  %v5502_v23 = vadd.f32 %v11835_v62, %v5483_v8  ;;  %v9879_v34 = vadd.f32 %v9297_v15, %v11827_v39  ;;  %v5446_v43 = vpop.f32.mrb[21].mxu1 }
 0x734   :  { %5550 = vst.msk [vmem:[#allocation2 + $0x11] sm:$0xff] %vm338_vm0, %v5544_v59  ;;  %5523 = vst.msk [vmem:[#allocation3 + $0x30] sm:$0xff] %vm338_vm0, %v5511_v5  ;;  %v5501_v27 = vadd.f32 %v11835_v62, %v5482_v29  ;;  %v9880_v6 = vadd.f32 %v5446_v43, %v11829_v24  ;;  %v9748_v24 = vpack.c.bf16 %v5582_v46, %v5581_v14  ;;  %v6452_v14 = vld [vmem:[#allocation20 + $0x20] sm:$0xff]  ;;  %v6453_v46 = vld [vmem:[#allocation20 + $0x28] sm:$0xff] }
 0x735   :  { %v5514_v61 = vmax.f32 %v5502_v23, 0.0  ;;  %v5485_v3 = vmul.f32 %v9879_v34, %v11832_v35 }
 0x736   :  { %v5547_v16 = vld [vmem:[#allocation3 + $0x28] sm:$0x1f]  ;;  %v5513_v17 = vmax.f32 %v5501_v27, 0.0  ;;  %v5484_v39 = vmul.f32 %v9880_v6, %v11832_v35  ;;  %v8266_v35 = vld [vmem:[%s12264_s18 + $0x40] sm:$0xff] }
 0x737   :  { %v5546_v32 = vld [vmem:[#allocation3 + $0x20] sm:$0xff]  ;;  %5526 = vst.msk [vmem:[#allocation3 + $0x48] sm:$0xff] %vm338_vm0, %v5514_v61  ;;  %v5504_v54 = vadd.f32 %v11835_v62, %v5485_v3  ;;  %v5584_v33 = vld [vmem:[#allocation2 + $0x9] sm:$0xff]  ;;  %v9752_v63 = vpack.c.bf16 %v8267_v21, %v8266_v35  ;;  %v6454_v61 = vld [vmem:[#allocation20 + $0x30] sm:$0xff]  ;;  %v9761_v3 = vpack.c.bf16 %v6453_v46, %v6452_v14 }
 0x738   :  { %v5583_v30 = vld [vmem:[#allocation2 + $0x1] sm:$0xff]  ;;  %5554 = vst.msk [vmem:[#allocation2 + $0x29] sm:$0x1f] %vm5553_vm15, %v5547_v16  ;;  %v5503_v48 = vadd.f32 %v11835_v62, %v5484_v39  ;;  %v11936_v39 = vld [vmem:[%s12267_s12] ss:$0 sm:$0xff] }
 0x739   :  { %5552 = vst.msk [vmem:[#allocation2 + $0x21] sm:$0xff] %vm338_vm0, %v5546_v32  ;;  %5525 = vst.msk [vmem:[#allocation3 + $0x40] sm:$0xff] %vm338_vm0, %v5513_v17  ;;  %9306 = vmatprep.mubr.msk.f32.mxu0 %vm338_vm0, %v5583_v30  ;;  %v5516_v26 = vmax.f32 %v5504_v54, 0.0  ;;  %v5567_v38 = vld [vmem:[#allocation2] sm:$0xff]  ;;  %v5568_v45 = vld [vmem:[#allocation2 + $0x8] sm:$0xff]  ;;  %9762 = vmatpush3.bf16.msra.mxu1 %v9761_v3 }
 0x73a   :  { %9307 = vmatmul.mubr.msk.f32.vlgmr.msra.gmra.mrb[42].mxu0 %vm338_vm0, %v5584_v33  ;;  %v5515_v37 = vmax.f32 %v5503_v48, 0.0  ;;  %v5586_v62 = vld [vmem:[#allocation2 + $0x19] sm:$0xff]  ;;  %v5922_v55 = vld [vmem:[#allocation2 + $0x2] sm:$0xff]  ;;  %9763 = vmatprep.subr.bf16.mxu1 %v12239_v51 }
 0x73b   :  { %9747 = vmatpush3.bf16.msra.mxu0 %v11824_v53  ;;  %v5555_v49 = vld [vmem:[#allocation3 + $0x2f] sm:$0xff]  ;;  %v5556_v28 = vld [vmem:[#allocation3 + $0x37] sm:$0xff]  ;;  %5529 = vst.msk [vmem:[#allocation3 + $0x58] sm:$0xf] %vm5528_vm1, %v5516_v26  ;;  %v11939_v54 = vld [vmem:[%s12268_s23] ss:$0 sm:$0xff] }
 0x73c   :  { %v5585_v1 = vld [vmem:[#allocation2 + $0x11] sm:$0xff]  ;;  %9749 = vmatprep.subr.bf16.mxu0 %v9748_v24  ;;  %5561 = vst.msk [vmem:[#allocation2 + $0x30] sm:$0xff] %vm338_vm0, %v5555_v49  ;;  %5562 = vst.msk [vmem:[#allocation2 + $0x38] sm:$0xff] %vm338_vm0, %v5556_v28  ;;  %v6455_v16 = vld [vmem:[#allocation20 + $0x38] sm:$0xff] }
 0x73d   :  { %5527 = vst.msk [vmem:[#allocation3 + $0x50] sm:$0xff] %vm338_vm0, %v5515_v37  ;;  %9309 = vmatprep.mubr.msk.f32.mxu0 %vm338_vm0, %v5585_v1  ;;  %v5569_v12 = vld [vmem:[#allocation2 + $0x10] sm:$0xff]  ;;  %v5570_v19 = vld [vmem:[#allocation2 + $0x18] sm:$0xff]  ;;  %v9764_v17 = vpack.c.bf16 %v6455_v16, %v6454_v61 }
 0x73e   :  { %9310 = vmatmul.mubr.msk.f32.gmra.mrb[44].mxu0 %vm338_vm0, %v5586_v62  ;;  %v5923_v8 = vld [vmem:[#allocation2 + $0xa] sm:$0xff]  ;;  %v5924_v56 = vld [vmem:[#allocation2 + $0x12] sm:$0xff] }
 0x73f   :  { %9751 = vmatpush3.bf16.msra.mxu0 %v9748_v24  ;;  %9765 = vmatpush3.bf16.msra.mxu1 %v9764_v17 }
 0x740   :  { %v5557_v53 = vld [vmem:[#allocation3 + $0x3f] sm:$0xff]  ;;  %v5558_v36 = vld [vmem:[#allocation3 + $0x47] sm:$0xff]  ;;  %9753 = vmatprep.subr.bf16.mxu0 %v9752_v63  ;;  %9766 = vmatprep.subr.bf16.mxu1 %v12239_v51 }
 0x741   :  { %v5587_v2 = vld [vmem:[#allocation2 + $0x21] sm:$0xff]  ;;  %5563 = vst.msk [vmem:[#allocation2 + $0x40] sm:$0xff] %vm338_vm0, %v5557_v53  ;;  %5564 = vst.msk [vmem:[#allocation2 + $0x48] sm:$0xff] %vm338_vm0, %v5558_v36 }
 0x742   :  { %9312 = vmatprep.mubr.msk.f32.mxu0 %vm338_vm0, %v5587_v2  ;;  %v5571_v20 = vld [vmem:[#allocation2 + $0x20] sm:$0xff]  ;;  %v5572_v18 = vld [vmem:[#allocation2 + $0x28] sm:$0xff] }
 0x743   :  { %v5588_v57 = vld [vmem:[#allocation2 + $0x29] sm:$0xff]  ;;  %v5589_v0 = vld [vmem:[#allocation2 + $0x31] sm:$0xff]  ;;  %v5925_v5 = vld [vmem:[#allocation2 + $0x1a] sm:$0xff] }
 0x744   :  { %v5559_v22 = vld [vmem:[#allocation3 + $0x4f] sm:$0xff]  ;;  %v5560_v4 = vld [vmem:[#allocation3 + $0x57] sm:$0x1f]  ;;  %9313 = vmatmul.mubr.msk.f32.gmra.mrb[46].mxu0 %vm338_vm0, %v5588_v57  ;;  %v5926_v29 = vld [vmem:[#allocation2 + $0x22] sm:$0xff] }
 0x745   :  { %5565 = vst.msk [vmem:[#allocation2 + $0x50] sm:$0xff] %vm338_vm0, %v5559_v22  ;;  %9315 = vmatprep.mubr.msk.f32.mxu0 %vm338_vm0, %v5589_v0  ;;  %v5573_v58 = vld [vmem:[#allocation2 + $0x30] sm:$0xff]  ;;  %v5574_v44 = vld [vmem:[#allocation2 + $0x38] sm:$0xff] }
 0x746   :  { %5566 = vst.msk [vmem:[#allocation2 + $0x58] sm:$0x1f] %vm5553_vm15, %v5560_v4  ;;  %v5927_v15 = vld [vmem:[#allocation2 + $0x2a] sm:$0xff]  ;;  %v5928_v59 = vld [vmem:[#allocation2 + $0x32] sm:$0xff] }
 0x748   :  { %v5590_v25 = vld [vmem:[#allocation2 + $0x39] sm:$0xff]  ;;  %v5591_v42 = vld [vmem:[#allocation2 + $0x41] sm:$0xff] }
 0x749   :  { %9316 = vmatmul.mubr.msk.f32.gmra.mrb[48].mxu0 %vm338_vm0, %v5590_v25  ;;  %v5575_v31 = vld [vmem:[#allocation2 + $0x40] sm:$0xff]  ;;  %v5576_v47 = vld [vmem:[#allocation2 + $0x48] sm:$0xff] }
 0x74a   :  { %9318 = vmatprep.mubr.msk.f32.mxu0 %vm338_vm0, %v5591_v42  ;;  %v5929_v23 = vld [vmem:[#allocation2 + $0x3a] sm:$0xff]  ;;  %v5930_v34 = vld [vmem:[#allocation2 + $0x42] sm:$0xff] }
 0x74b   :  { %v11955_v25 = vld [vmem:[#allocation20] sm:$0xff] }
 0x74c   :  { %v5592_v13 = vld [vmem:[#allocation2 + $0x49] sm:$0xff] }
 0x74d   :  { %v5593_v40 = vld [vmem:[#allocation2 + $0x51] sm:$0xff]  ;;  %9319 = vmatmul.mubr.msk.f32.gmra.mrb[50].mxu0 %vm338_vm0, %v5592_v13  ;;  %v5594_v60 = vld [vmem:[#allocation2 + $0x59] sm:$0xf] }
 0x74e   :  { %9321 = vmatprep.mubr.msk.f32.mxu0 %vm338_vm0, %v5593_v40  ;;  %v5577_v50 = vld [vmem:[#allocation2 + $0x50] sm:$0xff]  ;;  %v5578_v10 = vld [vmem:[#allocation2 + $0x58] sm:$0xf] }
 0x74f   :  { %v5931_v43 = vld [vmem:[#allocation2 + $0x4a] sm:$0xff]  ;;  %v5932_v27 = vld [vmem:[#allocation2 + $0x52] sm:$0xff]  ;;  %v5933_v6 = vld [vmem:[#allocation2 + $0x5a] sm:$0xf] }
 0x750   :  { %v11959_v40 = vld [vmem:[#allocation20 + $0x8] sm:$0xff] }
 0x751   :  { %9322 = vmatmul.mubr.msk.f32.gmra.mrb[52].mxu0 %vm338_vm0, %v5594_v60  ;;  %v11961_v60 = vld [vmem:[#allocation20 + $0x10] sm:$0xff] }
 0x752   :  { %9332 = vmatprep.mubr.msk.f32.mxu0 %vm338_vm0, %v5567_v38 }
 0x755   :  { %9333 = vmatmul.mubr.msk.f32.vlgmr.msra.gmra.mrb[42].mxu0 %vm338_vm0, %v5568_v45 }
 0x756   :  { %9755 = vmatpush3.bf16.msra.mxu0 %v9752_v63  ;;  %9335 = vmatprep.mubr.msk.f32.mxu0 %vm338_vm0, %v5569_v12 }
 0x757   :  { %9757 = vmatprep.subr.bf16.mxu0 %v9756_v11 }
 0x759   :  { %9336 = vmatmul.mubr.msk.f32.gmra.mrb[44].mxu0 %vm338_vm0, %v5570_v19 }
 0x75a   :  { %9338 = vmatprep.mubr.msk.f32.mxu0 %vm338_vm0, %v5571_v20  ;;  %9759 = vmatpush3.bf16.msra.mxu0 %v9756_v11 }
 0x75b   :  { %9850 = vmatprep.subr.bf16.mxu0 %v12239_v51 }
 0x75d   :  { %9339 = vmatmul.mubr.msk.f32.gmra.mrb[46].mxu0 %vm338_vm0, %v5572_v18 }
 0x75e   :  { %9341 = vmatprep.mubr.msk.f32.mxu0 %vm338_vm0, %v5573_v58  ;;  %v9767_v58 = vpack.c.bf16 %v11959_v40, %v11955_v25 }
 0x761   :  { %9342 = vmatmul.mubr.msk.f32.gmra.mrb[48].mxu0 %vm338_vm0, %v5574_v44  ;;  %v9770_v44 = vpack.c.bf16 %v11963_v52, %v11961_v60 }
 0x762   :  { %9344 = vmatprep.mubr.msk.f32.mxu0 %vm338_vm0, %v5575_v31 }
 0x765   :  { %9345 = vmatmul.mubr.msk.f32.gmra.mrb[50].mxu0 %vm338_vm0, %v5576_v47 }
 0x766   :  { %9347 = vmatprep.mubr.msk.f32.mxu0 %vm338_vm0, %v5577_v50 }
 0x769   :  { %9348 = vmatmul.mubr.msk.f32.gmra.mrb[52].mxu0 %vm338_vm0, %v5578_v10 }
 0x76a   :  { %9358 = vmatprep.mubr.msk.f32.mxu0 %vm338_vm0, %v5922_v55 }
 0x76d   :  { %9359 = vmatmul.mubr.msk.f32.vlgmr.msra.gmra.mrb[42].mxu0 %vm338_vm0, %v5923_v8 }
 0x76e   :  { %9361 = vmatprep.mubr.msk.f32.mxu0 %vm338_vm0, %v5924_v56 }
 0x771   :  { %9362 = vmatmul.mubr.msk.f32.gmra.mrb[44].mxu0 %vm338_vm0, %v5925_v5 }
 0x772   :  { %9364 = vmatprep.mubr.msk.f32.mxu0 %vm338_vm0, %v5926_v29 }
 0x775   :  { %9365 = vmatmul.mubr.msk.f32.gmra.mrb[46].mxu0 %vm338_vm0, %v5927_v15 }
 0x776   :  { %9367 = vmatprep.mubr.msk.f32.mxu0 %vm338_vm0, %v5928_v59 }
 0x779   :  { %9368 = vmatmul.mubr.msk.f32.gmra.mrb[48].mxu0 %vm338_vm0, %v5929_v23 }
 0x77a   :  { %9370 = vmatprep.mubr.msk.f32.mxu0 %vm338_vm0, %v5930_v34 }
 0x77d   :  { %9371 = vmatmul.mubr.msk.f32.gmra.mrb[50].mxu0 %vm338_vm0, %v5931_v43 }
 0x77e   :  { %9373 = vmatprep.mubr.msk.f32.mxu0 %vm338_vm0, %v5932_v27 }
 0x781   :  { %9374 = vmatmul.mubr.msk.f32.gmra.mrb[52].mxu0 %vm338_vm0, %v5933_v6 }
 0x782   :  { %9549 = vmatprep.mubr.msk.f32.mxu0 %vm10599_vm7, %v12240_v9 }
 0x840   :  { %v9360_v32 = vpop.f32.mrb[42].mxu0 }
 0x841   :  { %v6120_v30 = vmul.f32 %v9360_v32, %v11936_v39  ;;  %v6041_v24 = vpop.f32.mrb[43].mxu0 }
 0x842   :  { %v6119_v48 = vmul.f32 %v11936_v39, %v6041_v24 }
 0x843   :  { %v6139_v33 = vadd.f32 %v11939_v54, %v6120_v30 }
 0x844   :  { %v6138_v35 = vadd.f32 %v11939_v54, %v6119_v48  ;;  %v9363_v21 = vpop.f32.mrb[44].mxu0 }
 0x845   :  { %v6151_v26 = vmax.f32 %v6139_v33, 0.0  ;;  %v6122_v37 = vmul.f32 %v9363_v21, %v11936_v39  ;;  %v6051_v49 = vpop.f32.mrb[45].mxu0 }
 0x846   :  { %v6150_v28 = vmax.f32 %v6138_v35, 0.0  ;;  %v6121_v1 = vmul.f32 %v11936_v39, %v6051_v49 }
 0x847   :  { %6163 = vst.msk [vmem:[#allocation3 + $0x8] sm:$0xff] %vm338_vm0, %v6151_v26  ;;  %v6141_v63 = vadd.f32 %v11939_v54, %v6122_v37 }
 0x848   :  { %6162 = vst.msk [vmem:[#allocation3] sm:$0xff] %vm338_vm0, %v6150_v28  ;;  %v6140_v62 = vadd.f32 %v11939_v54, %v6121_v1  ;;  %v9366_v53 = vpop.f32.mrb[46].mxu0 }
 0x849   :  { %v6153_v36 = vmax.f32 %v6141_v63, 0.0  ;;  %v6124_v2 = vmul.f32 %v9366_v53, %v11936_v39  ;;  %v6061_v22 = vpop.f32.mrb[47].mxu0 }
 0x84a   :  { %v6152_v4 = vmax.f32 %v6140_v62, 0.0  ;;  %v6123_v57 = vmul.f32 %v11936_v39, %v6061_v22  ;;  %v11991_v22 = vld [vmem:[#allocation20 + $0x40] sm:$0xff] }
 0x84b   :  { %6165 = vst.msk [vmem:[#allocation3 + $0x18] sm:$0xff] %vm338_vm0, %v6153_v36  ;;  %v6143_v0 = vadd.f32 %v11939_v54, %v6124_v2 }
 0x84c   :  { %6164 = vst.msk [vmem:[#allocation3 + $0x10] sm:$0xff] %vm338_vm0, %v6152_v4  ;;  %v6142_v42 = vadd.f32 %v11939_v54, %v6123_v57  ;;  %v9369_v13 = vpop.f32.mrb[48].mxu0 }
 0x84d   :  { %v6155_v7 = vmax.f32 %v6143_v0, 0.0  ;;  %v6126_v38 = vmul.f32 %v9369_v13, %v11936_v39  ;;  %v6071_v11 = vpop.f32.mrb[49].mxu0  ;;  %v11995_v0 = vld [vmem:[#allocation20 + $0x48] sm:$0xff] }
 0x84e   :  { %v6154_v45 = vmax.f32 %v6142_v42, 0.0  ;;  %v6125_v12 = vmul.f32 %v11936_v39, %v6071_v11  ;;  %v6229_v19 = vld [vmem:[#allocation3 + $0x9] sm:$0x7]  ;;  %v6247_v34 = vld [vmem:[#allocation3 + $0xc] sm:$0x7]  ;;  %v11997_v42 = vld [vmem:[#allocation20 + $0x50] sm:$0xff] }
 0x84f   :  { %6167 = vst.msk [vmem:[#allocation3 + $0x28] sm:$0xff] %vm338_vm0, %v6155_v7  ;;  %v6145_v20 = vadd.f32 %v11939_v54, %v6126_v38  ;;  %v6193_v18 = vld [vmem:[#allocation3 + $0x3] sm:$0x7]  ;;  %v6174_v31 = vld [vmem:[#allocation3] sm:$0x7]  ;;  %v6230_v14 = vsel %vm6175_vm2, %v6229_v19, -inf }
 0x850   :  { %v6211_v47 = vld [vmem:[#allocation3 + $0x6] sm:$0x7]  ;;  %6166 = vst.msk [vmem:[#allocation3 + $0x20] sm:$0xff] %vm338_vm0, %v6154_v45  ;;  %v6144_v50 = vadd.f32 %v11939_v54, %v6125_v12  ;;  %v9372_v10 = vpop.f32.mrb[50].mxu0  ;;  %v6194_v55 = vsel %vm6175_vm2, %v6193_v18, -inf  ;;  %v6176_v8 = vsel %vm6175_vm2, %v6174_v31, -inf }
 0x851   :  { %v6212_v56 = vsel %vm6175_vm2, %v6211_v47, -inf  ;;  %v6157_v5 = vmax.f32 %v6145_v20, 0.0  ;;  %v6128_v29 = vmul.f32 %v9372_v10, %v11936_v39  ;;  %v6081_v15 = vpop.f32.mrb[51].mxu0  ;;  %v6195_v59 = vrot.slane %v6194_v55, 4 }
 0x852   :  { %v6177_v23 = vrot.slane %v6176_v8, 4  ;;  %v6156_v43 = vmax.f32 %v6144_v50, 0.0  ;;  %v6127_v27 = vmul.f32 %v11936_v39, %v6081_v15  ;;  %v6213_v6 = vrot.slane %v6212_v56, 4 }
 0x853   :  { %6169 = vst.msk [vmem:[#allocation3 + $0x38] sm:$0xff] %vm338_vm0, %v6157_v5  ;;  %v6147_v46 = vadd.f32 %v11939_v54, %v6128_v29  ;;  %v6196_v61 = vmax.f32 %v6194_v55, %v6195_v59  ;;  %v6231_v16 = vrot.slane %v6230_v14, 4  ;;  %v6265_v17 = vld [vmem:[#allocation3 + $0xf] sm:$0x7]  ;;  %v6248_v48 = vsel %vm6175_vm2, %v6247_v34, -inf }
 0x854   :  { %v6178_v3 = vmax.f32 %v6176_v8, %v6177_v23  ;;  %6168 = vst.msk [vmem:[#allocation3 + $0x30] sm:$0xff] %vm338_vm0, %v6156_v43  ;;  %v6146_v32 = vadd.f32 %v11939_v54, %v6127_v27  ;;  %v9375_v30 = vpop.f32.mrb[52].mxu0  ;;  %v6214_v24 = vmax.f32 %v6212_v56, %v6213_v6  ;;  %v6266_v33 = vsel %vm6175_vm2, %v6265_v17, -inf }
 0x855   :  { %v6159_v35 = vmax.f32 %v6147_v46, 0.0  ;;  %v6130_v21 = vmul.f32 %v9375_v30, %v11936_v39  ;;  %v6091_v26 = vpop.f32.mrb[53].mxu0  ;;  %v6197_v37 = vrot.slane %v6196_v61, 2  ;;  %v6232_v62 = vmax.f32 %v6230_v14, %v6231_v16 }
 0x856   :  { %v6179_v49 = vrot.slane %v6178_v3, 2  ;;  %v6158_v28 = vmax.f32 %v6146_v32, 0.0  ;;  %v6129_v1 = vmul.f32 %v11936_v39, %v6091_v26  ;;  %v6215_v63 = vrot.slane %v6214_v24, 2  ;;  %v11999_v39 = vld [vmem:[#allocation20 + $0x58] sm:$0xff] }
 0x857   :  { %6171 = vst.msk [vmem:[#allocation3 + $0x48] sm:$0xff] %vm338_vm0, %v6159_v35  ;;  %v6149_v53 = vadd.f32 %v11939_v54, %v6130_v21  ;;  %v6198_v36 = vmax.f32 %v6196_v61, %v6197_v37  ;;  %v6249_v4 = vrot.slane %v6248_v48, 4  ;;  %v6233_v7 = vrot.slane %v6232_v62, 2  ;;  %v12013_v61 = vld [vmem:[#allocation20 + $0x60] sm:$0xff]  ;;  %v6373_v40 = vld [vmem:[#allocation3 + $0x21] sm:$0x7] }
 0x858   :  { %v6180_v2 = vmax.f32 %v6178_v3, %v6179_v49  ;;  %6170 = vst.msk [vmem:[#allocation3 + $0x40] sm:$0xff] %vm338_vm0, %v6158_v28  ;;  %v6148_v57 = vadd.f32 %v11939_v54, %v6129_v1  ;;  %v6216_v13 = vmax.f32 %v6214_v24, %v6215_v63  ;;  %v6267_v38 = vrot.slane %v6266_v33, 4  ;;  %v12015_v3 = vld [vmem:[#allocation20 + $0x68] sm:$0xff] }
 0x859   :  { %v6161_v11 = vmax.f32 %v6149_v53, 0.0  ;;  %v6199_v45 = vrot.slane %v6198_v36, 1  ;;  %v6250_v19 = vmax.f32 %v6248_v48, %v6249_v4  ;;  %v6234_v31 = vmax.f32 %v6232_v62, %v6233_v7 }
 0x85a   :  { %v6181_v12 = vrot.slane %v6180_v2, 1  ;;  %v6160_v20 = vmax.f32 %v6148_v57, 0.0  ;;  %v6217_v18 = vrot.slane %v6216_v13, 1  ;;  %v6238_v47 = vld [vmem:[#allocation3 + $0x38] sm:$0x7]  ;;  %v6268_v10 = vmax.f32 %v6266_v33, %v6267_v38 }
 0x85b   :  { %v6256_v50 = vld [vmem:[#allocation3 + $0x3b] sm:$0x7]  ;;  %6173 = vst.msk [vmem:[#allocation3 + $0x58] sm:$0xf] %vm5528_vm1, %v6161_v11  ;;  %v6200_v54 = vmax.f32 %v6198_v36, %v6199_v45  ;;  %v6202_v55 = vld [vmem:[#allocation3 + $0x32] sm:$0x7]  ;;  %v9773_v5 = vpack.c.bf16 %v11995_v0, %v11991_v22  ;;  %v9776_v29 = vpack.c.bf16 %v11999_v39, %v11997_v42  ;;  %v9779_v53 = vpack.c.bf16 %v12015_v3, %v12013_v61 }
 0x85c   :  { %v6182_v8 = vmax.f32 %v6180_v2, %v6181_v12  ;;  %v6184_v56 = vld [vmem:[#allocation3 + $0x2f] sm:$0x7]  ;;  %v6220_v15 = vld [vmem:[#allocation3 + $0x35] sm:$0x7]  ;;  %6172 = vst.msk [vmem:[#allocation3 + $0x50] sm:$0xff] %vm338_vm0, %v6160_v20  ;;  %v6203_v59 = vsel %vm6175_vm2, %v6202_v55, -inf  ;;  %v6218_v34 = vmax.f32 %v6216_v13, %v6217_v18 }
 0x85d   :  { %v6185_v23 = vsel %vm6175_vm2, %v6184_v56, -inf  ;;  %v6221_v43 = vsel %vm6175_vm2, %v6220_v15, -inf  ;;  %6201 = vst.msk [vmem:[#allocation4 + $0x2] sm:$0x1] %vm2766_vm12, %v6200_v54  ;;  %v6204_v27 = vrot.slane %v6203_v59, 4  ;;  %v6235_v46 = vrot.slane %v6234_v31, 1 }
 0x85e   :  { %6183 = vst.msk [vmem:[#allocation4] sm:$0x1] %vm2766_vm12, %v6182_v8  ;;  %v6186_v6 = vrot.slane %v6185_v23, 4  ;;  %v6222_v14 = vrot.slane %v6221_v43, 4  ;;  %6219 = vst.msk [vmem:[#allocation4 + $0x4] sm:$0x1] %vm2766_vm12, %v6218_v34 }
 0x85f   :  { %v6239_v16 = vsel %vm6175_vm2, %v6238_v47, -inf  ;;  %v6251_v17 = vrot.slane %v6250_v19, 2  ;;  %v6257_v32 = vsel %vm6175_vm2, %v6256_v50, -inf  ;;  %v6269_v30 = vrot.slane %v6268_v10, 2  ;;  %v6274_v28 = vld [vmem:[#allocation3 + $0x3e] sm:$0x7] }
 0x860   :  { %v6205_v24 = vmax.f32 %v6203_v59, %v6204_v27  ;;  %v6187_v48 = vmax.f32 %v6185_v23, %v6186_v6  ;;  %v6223_v33 = vmax.f32 %v6221_v43, %v6222_v14  ;;  %v6236_v35 = vmax.f32 %v6234_v31, %v6235_v46  ;;  %v6283_v12 = vld [vmem:[#allocation3 + $0x12] sm:$0x7]  ;;  %v6292_v55 = vld [vmem:[#allocation3 + $0x41] sm:$0x7]  ;;  %v6301_v23 = vld [vmem:[#allocation3 + $0x15] sm:$0x7] }
 0x861   :  { %v6240_v21 = vrot.slane %v6239_v16, 4  ;;  %v6252_v26 = vmax.f32 %v6250_v19, %v6251_v17  ;;  %v6258_v37 = vrot.slane %v6257_v32, 4  ;;  %v6270_v49 = vmax.f32 %v6268_v10, %v6269_v30  ;;  %v6310_v34 = vld [vmem:[#allocation3 + $0x44] sm:$0x7]  ;;  %v6319_v30 = vld [vmem:[#allocation3 + $0x18] sm:$0x7] }
 0x862   :  { %v6206_v1 = vrot.slane %v6205_v24, 2  ;;  %v6188_v63 = vrot.slane %v6187_v48, 2  ;;  %v6224_v62 = vrot.slane %v6223_v33, 2  ;;  %6237 = vst.msk [vmem:[#allocation4 + $0x6] sm:$0x1] %vm2766_vm12, %v6236_v35  ;;  %v6275_v45 = vsel %vm6175_vm2, %v6274_v28, -inf }
 0x863   :  { %v6436_v36 = vld [vmem:[#allocation3 + $0x59] sm:$0x7]  ;;  %v6241_v2 = vmax.f32 %v6239_v16, %v6240_v21  ;;  %v6253_v4 = vrot.slane %v6252_v26, 1  ;;  %v6259_v57 = vmax.f32 %v6257_v32, %v6258_v37  ;;  %v6271_v13 = vrot.slane %v6270_v49, 1  ;;  %v6328_v21 = vld [vmem:[#allocation3 + $0x47] sm:$0x7] }
 0x864   :  { %v6207_v7 = vmax.f32 %v6205_v24, %v6206_v1  ;;  %v6189_v38 = vmax.f32 %v6187_v48, %v6188_v63  ;;  %v6225_v11 = vmax.f32 %v6223_v33, %v6224_v62  ;;  %v12024_v19 = vsel %vm6175_vm2, %v6436_v36, -inf  ;;  %v6364_v25 = vld [vmem:[#allocation3 + $0x4d] sm:$0x7] }
 0x865   :  { %v6242_v20 = vrot.slane %v6241_v2, 2  ;;  %v6254_v18 = vmax.f32 %v6252_v26, %v6253_v4  ;;  %v6260_v31 = vrot.slane %v6259_v57, 2  ;;  %v6272_v54 = vmax.f32 %v6270_v49, %v6271_v13 }
 0x866   :  { %v6208_v47 = vrot.slane %v6207_v7, 1  ;;  %v6190_v50 = vrot.slane %v6189_v38, 1  ;;  %v6226_v10 = vrot.slane %v6225_v11, 1  ;;  %v6276_v15 = vrot.slane %v6275_v45, 4 }
 0x867   :  { %v6243_v8 = vmax.f32 %v6241_v2, %v6242_v20  ;;  %6255 = vst.msk [vmem:[#allocation4 + $0x8] sm:$0x1] %vm2766_vm12, %v6254_v18  ;;  %v6261_v56 = vmax.f32 %v6259_v57, %v6260_v31  ;;  %v6284_v59 = vsel %vm6175_vm2, %v6283_v12, -inf  ;;  %6273 = vst.msk [vmem:[#allocation4 + $0xa] sm:$0x1] %vm2766_vm12, %v6272_v54  ;;  %v6293_v32 = vsel %vm6175_vm2, %v6292_v55, -inf }
 0x868   :  { %v6209_v43 = vmax.f32 %v6207_v7, %v6208_v47  ;;  %v6191_v27 = vmax.f32 %v6189_v38, %v6190_v50  ;;  %v6227_v6 = vmax.f32 %v6225_v11, %v6226_v10  ;;  %v6285_v14 = vrot.slane %v6284_v59, 4  ;;  %v6337_v2 = vld [vmem:[#allocation3 + $0x1b] sm:$0x7]  ;;  %v12041_v11 = vld [vmem:[#allocation20 + $0x78] sm:$0xff] }
 0x869   :  { %v6244_v46 = vrot.slane %v6243_v8, 1  ;;  %v6262_v16 = vrot.slane %v6261_v56, 1  ;;  %v6277_v17 = vmax.f32 %v6275_v45, %v6276_v15  ;;  %v6294_v48 = vrot.slane %v6293_v32, 4  ;;  %v12039_v38 = vld [vmem:[#allocation20 + $0x70] sm:$0xff]  ;;  %v6346_v15 = vld [vmem:[#allocation3 + $0x4a] sm:$0x7] }
 0x86a   :  { %6210 = vst.msk [vmem:[#allocation4 + $0x3] sm:$0x1] %vm2766_vm12, %v6209_v43  ;;  %6192 = vst.msk [vmem:[#allocation4 + $0x1] sm:$0x1] %vm2766_vm12, %v6191_v27  ;;  %v6286_v24 = vmax.f32 %v6284_v59, %v6285_v14  ;;  %v6302_v33 = vsel %vm6175_vm2, %v6301_v23, -inf  ;;  %v6311_v35 = vsel %vm6175_vm2, %v6310_v34, -inf  ;;  %v9782_v34 = vpack.c.bf16 %v12041_v11, %v12039_v38 }
 0x86b   :  { %6228 = vst.msk [vmem:[#allocation4 + $0x5] sm:$0x1] %vm2766_vm12, %v6227_v6  ;;  %v6245_v26 = vmax.f32 %v6243_v8, %v6244_v46  ;;  %v6263_v37 = vmax.f32 %v6261_v56, %v6262_v16  ;;  %v6278_v49 = vrot.slane %v6277_v17, 2  ;;  %v6303_v28 = vrot.slane %v6302_v33, 4 }
 0x86c   :  { %v6287_v1 = vrot.slane %v6286_v24, 2  ;;  %v6295_v63 = vmax.f32 %v6293_v32, %v6294_v48  ;;  %v6312_v62 = vrot.slane %v6311_v35, 4  ;;  %v6320_v36 = vsel %vm6175_vm2, %v6319_v30, -inf }
 0x86d   :  { %6246 = vst.msk [vmem:[#allocation4 + $0x7] sm:$0x1] %vm2766_vm12, %v6245_v26  ;;  %6264 = vst.msk [vmem:[#allocation4 + $0x9] sm:$0x1] %vm2766_vm12, %v6263_v37  ;;  %v6279_v4 = vmax.f32 %v6277_v17, %v6278_v49  ;;  %v6304_v57 = vmax.f32 %v6302_v33, %v6303_v28  ;;  %v6321_v13 = vrot.slane %v6320_v36, 4  ;;  %v6329_v7 = vsel %vm6175_vm2, %v6328_v21, -inf }
 0x86e   :  { %v6288_v45 = vmax.f32 %v6286_v24, %v6287_v1  ;;  %v6296_v12 = vrot.slane %v6295_v63, 2  ;;  %v6313_v20 = vmax.f32 %v6311_v35, %v6312_v62  ;;  %v6330_v18 = vrot.slane %v6329_v7, 4  ;;  %v6355_v17 = vld [vmem:[#allocation3 + $0x1e] sm:$0x7] }
 0x86f   :  { %v6280_v31 = vrot.slane %v6279_v4, 1  ;;  %v6305_v47 = vrot.slane %v6304_v57, 2  ;;  %v6322_v50 = vmax.f32 %v6320_v36, %v6321_v13  ;;  %v6338_v10 = vsel %vm6175_vm2, %v6337_v2, -inf  ;;  %v6382_v2 = vld [vmem:[#allocation3 + $0x50] sm:$0x7] }
 0x870   :  { %v6289_v54 = vrot.slane %v6288_v45, 1  ;;  %v6297_v55 = vmax.f32 %v6295_v63, %v6296_v12  ;;  %v6314_v8 = vrot.slane %v6313_v20, 2  ;;  %v6331_v56 = vmax.f32 %v6329_v7, %v6330_v18 }
 0x871   :  { %v6438_v59 = vrot.slane %v12024_v19, 4  ;;  %v6450_v23 = vld [vmem:[#allocation4 + $0x2] sm:$0x3]  ;;  %v6281_v43 = vmax.f32 %v6279_v4, %v6280_v31  ;;  %v6306_v27 = vmax.f32 %v6304_v57, %v6305_v47  ;;  %v6323_v16 = vrot.slane %v6322_v50, 2  ;;  %v6391_v31 = vld [vmem:[#allocation3 + $0x24] sm:$0x7] }
 0x872   :  { %9385 = vmatmul.mubr.msk.f32.vlgmr.msra.gmra.mrb[22].mxu1 %vm338_vm0, %v6450_v23  ;;  %v6290_v6 = vmax.f32 %v6288_v45, %v6289_v54  ;;  %v6298_v14 = vrot.slane %v6297_v55, 1  ;;  %v6315_v46 = vmax.f32 %v6313_v20, %v6314_v8  ;;  %v6332_v30 = vrot.slane %v6331_v56, 2  ;;  %v6400_v47 = vld [vmem:[#allocation3 + $0x53] sm:$0x7]  ;;  %v6445_v60 = vld [vmem:[#allocation4] sm:$0x3] }
 0x873   :  { %9768 = vmatpush3.bf16.msra.mxu1 %v9767_v58  ;;  %9395 = vmatprep.mubr.msk.f32.mxu1 %vm10599_vm7, %v12240_v9  ;;  %6282 = vst.msk [vmem:[#allocation4 + $0xb] sm:$0x1] %vm2766_vm12, %v6281_v43  ;;  %v6307_v32 = vrot.slane %v6306_v27, 1  ;;  %v6339_v24 = vrot.slane %v6338_v10, 4  ;;  %v6347_v48 = vsel %vm6175_vm2, %v6346_v15, -inf  ;;  %v6324_v21 = vmax.f32 %v6322_v50, %v6323_v16 }
 0x874   :  { %9769 = vmatprep.subr.bf16.mxu1 %v12239_v51  ;;  %6291 = vst.msk [vmem:[#allocation4 + $0xc] sm:$0x1] %vm2766_vm12, %v6290_v6  ;;  %v6299_v33 = vmax.f32 %v6297_v55, %v6298_v14  ;;  %v6316_v35 = vrot.slane %v6315_v46, 1  ;;  %v6348_v26 = vrot.slane %v6347_v48, 4  ;;  %v6333_v37 = vmax.f32 %v6331_v56, %v6332_v30 }
 0x875   :  { %v6308_v58 = vmax.f32 %v6306_v27, %v6307_v32  ;;  %v6340_v49 = vmax.f32 %v6338_v10, %v6339_v24  ;;  %v6356_v28 = vsel %vm6175_vm2, %v6355_v17, -inf  ;;  %v6325_v63 = vrot.slane %v6324_v21, 1  ;;  %v6409_v17 = vld [vmem:[#allocation3 + $0x27] sm:$0x7] }
 0x876   :  { %6300 = vst.msk [vmem:[#allocation4 + $0xd] sm:$0x1] %vm2766_vm12, %v6299_v33  ;;  %v6317_v1 = vmax.f32 %v6315_v46, %v6316_v35  ;;  %v6349_v62 = vmax.f32 %v6347_v48, %v6348_v26  ;;  %v6357_v36 = vrot.slane %v6356_v28, 4  ;;  %v6334_v4 = vrot.slane %v6333_v37, 1  ;;  %v6418_v35 = vld [vmem:[#allocation3 + $0x56] sm:$0x7] }
 0x877   :  { %9771 = vmatpush3.bf16.msra.mxu1 %v9770_v44  ;;  %6309 = vst.msk [vmem:[#allocation4 + $0xe] sm:$0x1] %vm2766_vm12, %v6308_v58  ;;  %v6341_v57 = vrot.slane %v6340_v49, 2  ;;  %v6365_v13 = vsel %vm6175_vm2, %v6364_v25, -inf  ;;  %v6374_v7 = vsel %vm6175_vm2, %v6373_v40, -inf  ;;  %v6326_v45 = vmax.f32 %v6324_v21, %v6325_v63 }
 0x878   :  { %9772 = vmatprep.subr.bf16.mxu1 %v12239_v51  ;;  %6318 = vst.msk [vmem:[#allocation4 + $0xf] sm:$0x1] %vm2766_vm12, %v6317_v1  ;;  %v6350_v12 = vrot.slane %v6349_v62, 2  ;;  %v6358_v20 = vmax.f32 %v6356_v28, %v6357_v36  ;;  %v6366_v18 = vrot.slane %v6365_v13, 4  ;;  %v6335_v52 = vmax.f32 %v6333_v37, %v6334_v4  ;;  %v6427_v1 = vld [vmem:[#allocation3 + $0x2a] sm:$0x7] }
 0x879   :  { %v6342_v44 = vmax.f32 %v6340_v49, %v6341_v57  ;;  %v6375_v50 = vrot.slane %v6374_v7, 4  ;;  %v6383_v10 = vsel %vm6175_vm2, %v6382_v2, -inf  ;;  %6327 = vst.msk [vmem:[#allocation4 + $0x10] sm:$0x1] %vm2766_vm12, %v6326_v45  ;;  %v6392_v43 = vsel %vm6175_vm2, %v6391_v31, -inf  ;;  %v6764_v31 = vld [vmem:[#allocation20 + $0x80] sm:$0xff] }
 0x87a   :  { %9396 = vmatmul.mubr.msk.f32.vlgmr.msra.gmra.mrb[22].mxu1 %vm338_vm0, %v6445_v60  ;;  %v6351_v54 = vmax.f32 %v6349_v62, %v6350_v12  ;;  %v6359_v55 = vrot.slane %v6358_v20, 2  ;;  %v6367_v8 = vmax.f32 %v6365_v13, %v6366_v18  ;;  %v6384_v56 = vrot.slane %v6383_v10, 4  ;;  %6336 = vst.msk [vmem:[#allocation4 + $0x11] sm:$0x1] %vm2766_vm12, %v6335_v52  ;;  %v6602_v63 = vld [vmem:[#allocation4 + $0x4] sm:$0x3] }
 0x87b   :  { %9774 = vmatpush3.bf16.msra.mxu1 %v9773_v5  ;;  %9406 = vmatprep.mubr.msk.f32.mxu1 %vm10599_vm7, %v12240_v9  ;;  %v6343_v15 = vrot.slane %v6342_v44, 1  ;;  %v6376_v23 = vmax.f32 %v6374_v7, %v6375_v50  ;;  %v6401_v27 = vsel %vm6175_vm2, %v6400_v47, -inf  ;;  %v6393_v5 = vrot.slane %v6392_v43, 4  ;;  %v7663_v13 = vld [vmem:[#allocation23] sm:$0xff]  ;;  %v7664_v7 = vld [vmem:[#allocation23 + $0x8] sm:$0xff] }
 0x87c   :  { %9775 = vmatprep.subr.bf16.mxu1 %v12239_v51  ;;  %v6352_v6 = vrot.slane %v6351_v54, 1  ;;  %v6360_v14 = vmax.f32 %v6358_v20, %v6359_v55  ;;  %v6368_v46 = vrot.slane %v6367_v8, 2  ;;  %v6385_v16 = vmax.f32 %v6383_v10, %v6384_v56  ;;  %v6765_v47 = vld [vmem:[#allocation20 + $0x88] sm:$0xff]  ;;  %v7666_v55 = vld [vmem:[#allocation23 + $0x18] sm:$0xff] }
 0x87d   :  { %v6344_v22 = vmax.f32 %v6342_v44, %v6343_v15  ;;  %v6377_v0 = vrot.slane %v6376_v23, 2  ;;  %v6402_v32 = vrot.slane %v6401_v27, 4  ;;  %v6394_v26 = vmax.f32 %v6392_v43, %v6393_v5 }
 0x87e   :  { %v6353_v30 = vmax.f32 %v6351_v54, %v6352_v6  ;;  %v6361_v24 = vrot.slane %v6360_v14, 1  ;;  %v6369_v48 = vmax.f32 %v6367_v8, %v6368_v46  ;;  %v6386_v33 = vrot.slane %v6385_v16, 2  ;;  %v7665_v54 = vld [vmem:[#allocation23 + $0x10] sm:$0xff] }
 0x87f   :  { %9777 = vmatpush3.bf16.msra.mxu1 %v9776_v29  ;;  %6345 = vst.msk [vmem:[#allocation4 + $0x12] sm:$0x1] %vm2766_vm12, %v6344_v22  ;;  %v6378_v21 = vmax.f32 %v6376_v23, %v6377_v0  ;;  %v6403_v25 = vmax.f32 %v6401_v27, %v6402_v32  ;;  %v6410_v40 = vsel %vm6175_vm2, %v6409_v17, -inf  ;;  %v6395_v42 = vrot.slane %v6394_v26, 2  ;;  %v6682_v22 = vld [vmem:[#allocation4 + $0x6] sm:$0x3] }
 0x880   :  { %9778 = vmatprep.subr.bf16.mxu1 %v12239_v51  ;;  %6354 = vst.msk [vmem:[#allocation4 + $0x13] sm:$0x1] %vm2766_vm12, %v6353_v30  ;;  %v6362_v58 = vmax.f32 %v6360_v14, %v6361_v24  ;;  %v6370_v37 = vrot.slane %v6369_v48, 1  ;;  %v6387_v49 = vmax.f32 %v6385_v16, %v6386_v33  ;;  %v6411_v28 = vrot.slane %v6410_v40, 4  ;;  %v6844_v30 = vld [vmem:[#allocation20 + $0xa0] sm:$0xff]  ;;  %v6845_v24 = vld [vmem:[#allocation20 + $0xa8] sm:$0xff] }
 0x881   :  { %v6379_v62 = vrot.slane %v6378_v21, 1  ;;  %v6404_v39 = vrot.slane %v6403_v25, 2  ;;  %v6419_v29 = vsel %vm6175_vm2, %v6418_v35, -inf  ;;  %v6396_v12 = vmax.f32 %v6394_v26, %v6395_v42  ;;  %v6842_v42 = vld [vmem:[#allocation4 + $0xa] sm:$0x3] }
 0x882   :  { %9407 = vmatmul.mubr.msk.f32.vlgmr.msra.gmra.mrb[22].mxu1 %vm338_vm0, %v6602_v63  ;;  %6363 = vst.msk [vmem:[#allocation4 + $0x14] sm:$0x1] %vm2766_vm12, %v6362_v58  ;;  %v6371_v36 = vmax.f32 %v6369_v48, %v6370_v37  ;;  %v6388_v2 = vrot.slane %v6387_v49, 1  ;;  %v6412_v4 = vmax.f32 %v6410_v40, %v6411_v28  ;;  %v6420_v57 = vrot.slane %v6419_v29, 4  ;;  %v6847_v40 = vld [vmem:[#allocation20 + $0xb8] sm:$0xff]  ;;  %v6925_v28 = vld [vmem:[#allocation20 + $0xc8] sm:$0xff] }
 0x883   :  { %9780 = vmatpush3.bf16.msra.mxu1 %v9779_v53  ;;  %9417 = vmatprep.mubr.msk.f32.mxu1 %vm10599_vm7, %v12240_v9  ;;  %v6380_v45 = vmax.f32 %v6378_v21, %v6379_v62  ;;  %v6405_v20 = vmax.f32 %v6403_v25, %v6404_v39  ;;  %v6428_v18 = vsel %vm6175_vm2, %v6427_v1, -inf  ;;  %v6397_v61 = vrot.slane %v6396_v12, 1  ;;  %v6846_v25 = vld [vmem:[#allocation20 + $0xb0] sm:$0xff]  ;;  %v6762_v58 = vld [vmem:[#allocation4 + $0x8] sm:$0x3]  ;;  %v6927_v62 = vld [vmem:[#allocation20 + $0xd8] sm:$0xff] }
 0x884   :  { %9781 = vmatprep.subr.bf16.mxu1 %v12239_v51  ;;  %6372 = vst.msk [vmem:[#allocation4 + $0x15] sm:$0x1] %vm2766_vm12, %v6371_v36  ;;  %v6389_v60 = vmax.f32 %v6387_v49, %v6388_v2  ;;  %v6413_v52 = vrot.slane %v6412_v4, 2  ;;  %v6421_v44 = vmax.f32 %v6419_v29, %v6420_v57  ;;  %v6429_v50 = vrot.slane %v6428_v18, 4  ;;  %v6924_v49 = vld [vmem:[#allocation20 + $0xc0] sm:$0xff]  ;;  %v6926_v63 = vld [vmem:[#allocation20 + $0xd0] sm:$0xff] }
 0x885   :  { %6381 = vst.msk [vmem:[#allocation4 + $0x16] sm:$0x1] %vm2766_vm12, %v6380_v45  ;;  %v6406_v3 = vrot.slane %v6405_v20, 1  ;;  %v6439_v53 = vmax.f32 %v12024_v19, %v6438_v59  ;;  %v9851_v10 = vpack.c.bf16 %v7664_v7, %v7663_v13  ;;  %v9785_v23 = vpack.c.bf16 %v6765_v47, %v6764_v31  ;;  %v6766_v19 = vld [vmem:[#allocation20 + $0x90] sm:$0xff]  ;;  %v6767_v59 = vld [vmem:[#allocation20 + $0x98] sm:$0xff]  ;;  %v7004_v29 = vld [vmem:[#allocation20 + $0xe0] sm:$0xff] }
 0x886   :  { %6390 = vst.msk [vmem:[#allocation4 + $0x17] sm:$0x1] %vm2766_vm12, %v6389_v60  ;;  %v6414_v8 = vmax.f32 %v6412_v4, %v6413_v52  ;;  %v6422_v56 = vrot.slane %v6421_v44, 2  ;;  %v6430_v15 = vmax.f32 %v6428_v18, %v6429_v50  ;;  %v6398_v43 = vmax.f32 %v6396_v12, %v6397_v61  ;;  %v7005_v36 = vld [vmem:[#allocation20 + $0xe8] sm:$0xff]  ;;  %v7006_v4 = vld [vmem:[#allocation20 + $0xf0] sm:$0xff]  ;;  %v7007_v57 = vld [vmem:[#allocation20 + $0xf8] sm:$0xff] }
 0x887   :  { %9783 = vmatpush3.bf16.msra.mxu1 %v9782_v34  ;;  %v6407_v27 = vmax.f32 %v6405_v20, %v6406_v3  ;;  %v6440_v6 = vrot.slane %v6439_v53, 2  ;;  %9852 = vmatpush3.bf16.msra.mxu0 %v9851_v10  ;;  %v9854_v17 = vpack.c.bf16 %v7666_v55, %v7665_v54  ;;  %v9788_v5 = vpack.c.bf16 %v6767_v59, %v6766_v19  ;;  %v6922_v13 = vld [vmem:[#allocation4 + $0xc] sm:$0x3]  ;;  %v7085_v12 = vld [vmem:[#allocation20 + $0x108] sm:$0xff]  ;;  %v7086_v18 = vld [vmem:[#allocation20 + $0x110] sm:$0xff] }
 0x888   :  { %9784 = vmatprep.subr.bf16.mxu1 %v12239_v51  ;;  %v6415_v14 = vrot.slane %v6414_v8, 1  ;;  %v6423_v46 = vmax.f32 %v6421_v44, %v6422_v56  ;;  %v6431_v16 = vrot.slane %v6430_v15, 2  ;;  %9853 = vmatprep.subr.bf16.mxu0 %v12239_v51  ;;  %6399 = vst.msk [vmem:[#allocation4 + $0x18] sm:$0x1] %vm2766_vm12, %v6398_v43  ;;  %v9791_v26 = vpack.c.bf16 %v6845_v24, %v6844_v30  ;;  %v7084_v45 = vld [vmem:[#allocation20 + $0x100] sm:$0xff]  ;;  %v7087_v31 = vld [vmem:[#allocation20 + $0x118] sm:$0xff] }
 0x889   :  { %6408 = vst.msk [vmem:[#allocation4 + $0x19] sm:$0x1] %vm2766_vm12, %v6407_v27  ;;  %v6441_v38 = vmax.f32 %v6439_v53, %v6440_v6  ;;  %v9794_v37 = vpack.c.bf16 %v6847_v40, %v6846_v25  ;;  %v9797_v1 = vpack.c.bf16 %v6925_v28, %v6924_v49  ;;  %v9800_v39 = vpack.c.bf16 %v6927_v62, %v6926_v63  ;;  %v7002_v47 = vld [vmem:[#allocation4 + $0xe] sm:$0x3]  ;;  %v7164_v52 = vld [vmem:[#allocation20 + $0x120] sm:$0xff]  ;;  %v7166_v61 = vld [vmem:[#allocation20 + $0x130] sm:$0xff] }
 0x88a   :  { %9418 = vmatmul.mubr.msk.f32.vlgmr.msra.gmra.mrb[22].mxu1 %vm338_vm0, %v6682_v22  ;;  %v6416_v11 = vmax.f32 %v6414_v8, %v6415_v14  ;;  %v6424_v34 = vrot.slane %v6423_v46, 1  ;;  %v6432_v0 = vmax.f32 %v6430_v15, %v6431_v16  ;;  %v9803_v2 = vpack.c.bf16 %v7005_v36, %v7004_v29  ;;  %v7165_v44 = vld [vmem:[#allocation20 + $0x128] sm:$0xff]  ;;  %v7167_v3 = vld [vmem:[#allocation20 + $0x138] sm:$0xff]  ;;  %v7244_v54 = vld [vmem:[#allocation20 + $0x140] sm:$0xff] }
 0x88b   :  { %9786 = vmatpush3.bf16.msra.mxu1 %v9785_v23  ;;  %9428 = vmatprep.mubr.msk.f32.mxu1 %vm10599_vm7, %v12240_v9  ;;  %v6442_v32 = vrot.slane %v6441_v38, 1  ;;  %v9806_v7 = vpack.c.bf16 %v7007_v57, %v7006_v4  ;;  %v9809_v20 = vpack.c.bf16 %v7085_v12, %v7084_v45  ;;  %v9812_v60 = vpack.c.bf16 %v7087_v31, %v7086_v18  ;;  %v7082_v53 = vld [vmem:[#allocation4 + $0x10] sm:$0x3]  ;;  %v7246_v56 = vld [vmem:[#allocation20 + $0x150] sm:$0xff]  ;;  %v7247_v15 = vld [vmem:[#allocation20 + $0x158] sm:$0xff] }
 0x88c   :  { %9787 = vmatprep.subr.bf16.mxu1 %v12239_v51  ;;  %6417 = vst.msk [vmem:[#allocation4 + $0x1a] sm:$0x1] %vm2766_vm12, %v6416_v11  ;;  %v6425_v48 = vmax.f32 %v6423_v46, %v6424_v34  ;;  %v6433_v33 = vrot.slane %v6432_v0, 1  ;;  %9855 = vmatpush3.bf16.msra.mxu0 %v9854_v17  ;;  %v9815_v50 = vpack.c.bf16 %v7165_v44, %v7164_v52  ;;  %v7245_v55 = vld [vmem:[#allocation20 + $0x148] sm:$0xff]  ;;  %v7324_v27 = vld [vmem:[#allocation20 + $0x160] sm:$0xff]  ;;  %v7326_v59 = vld [vmem:[#allocation20 + $0x170] sm:$0xff] }
 0x88d   :  { %v6443_v35 = vmax.f32 %v6441_v38, %v6442_v32  ;;  %9856 = vmatprep.subr.bf16.mxu0 %v12239_v51  ;;  %v9818_v10 = vpack.c.bf16 %v7167_v3, %v7166_v61  ;;  %v9821_v8 = vpack.c.bf16 %v7245_v55, %v7244_v54  ;;  %v7162_v23 = vld [vmem:[#allocation4 + $0x12] sm:$0x3]  ;;  %v9824_v43 = vpack.c.bf16 %v7247_v15, %v7246_v56  ;;  %v7327_v14 = vld [vmem:[#allocation20 + $0x178] sm:$0xff]  ;;  %v7242_v46 = vld [vmem:[#allocation4 + $0x14] sm:$0x3] }
 0x88e   :  { %6426 = vst.msk [vmem:[#allocation4 + $0x1b] sm:$0x1] %vm2766_vm12, %v6425_v48  ;;  %v6434_v21 = vmax.f32 %v6432_v0, %v6433_v33  ;;  %v7325_v6 = vld [vmem:[#allocation20 + $0x168] sm:$0xff]  ;;  %v9830_v16 = vpack.c.bf16 %v7327_v14, %v7326_v59  ;;  %v7404_v17 = vld [vmem:[#allocation20 + $0x180] sm:$0xff]  ;;  %v7406_v11 = vld [vmem:[#allocation20 + $0x190] sm:$0xff] }
 0x88f   :  { %9789 = vmatpush3.bf16.msra.mxu1 %v9788_v5  ;;  %6444 = vst.msk [vmem:[#allocation4 + $0x1d] sm:$0x1] %vm2766_vm12, %v6443_v35  ;;  %v9827_v19 = vpack.c.bf16 %v7325_v6, %v7324_v27  ;;  %v7405_v22 = vld [vmem:[#allocation20 + $0x188] sm:$0xff]  ;;  %v7407_v34 = vld [vmem:[#allocation20 + $0x198] sm:$0xff]  ;;  %v7322_v0 = vld [vmem:[#allocation4 + $0x16] sm:$0x3] }
 0x890   :  { %9790 = vmatprep.subr.bf16.mxu1 %v12239_v51  ;;  %6435 = vst.msk [vmem:[#allocation4 + $0x1c] sm:$0x1] %vm2766_vm12, %v6434_v21  ;;  %v9833_v38 = vpack.c.bf16 %v7405_v22, %v7404_v17  ;;  %v9836_v5 = vpack.c.bf16 %v7407_v34, %v7406_v11  ;;  %v7484_v32 = vld [vmem:[#allocation20 + $0x1a0] sm:$0xff]  ;;  %v7485_v30 = vld [vmem:[#allocation20 + $0x1a8] sm:$0xff]  ;;  %v7486_v48 = vld [vmem:[#allocation20 + $0x1b0] sm:$0xff] }
 0x891   :  { %v9839_v24 = vpack.c.bf16 %v7485_v30, %v7484_v32  ;;  %v7487_v33 = vld [vmem:[#allocation20 + $0x1b8] sm:$0xff]  ;;  %v7402_v35 = vld [vmem:[#allocation4 + $0x18] sm:$0x3]  ;;  %v7565_v25 = vld [vmem:[#allocation20 + $0x1c8] sm:$0xff] }
 0x892   :  { %9429 = vmatmul.mubr.msk.f32.vlgmr.msra.gmra.mrb[22].mxu1 %vm338_vm0, %v6762_v58  ;;  %v9842_v21 = vpack.c.bf16 %v7487_v33, %v7486_v48  ;;  %v7566_v58 = vld [vmem:[#allocation20 + $0x1d0] sm:$0xff]  ;;  %v8299_v63 = vld [vmem:[%s12269_s24] ss:$0 sm:$0xff]  ;;  %v7659_v36 = vld [vmem:[#allocation22] sm:$0xff] }
 0x893   :  { %9792 = vmatpush3.bf16.msra.mxu1 %v9791_v26  ;;  %9439 = vmatprep.mubr.msk.f32.mxu1 %vm10599_vm7, %v12240_v9  ;;  %v7564_v26 = vld [vmem:[#allocation20 + $0x1c0] sm:$0xff]  ;;  %v8147_v4 = vld [vmem:[#allocation17] ss:$0 sm:$0xff]  ;;  %v7661_v12 = vld [vmem:[#allocation22 + $0x10] sm:$0xff] }
 0x894   :  { %9793 = vmatprep.subr.bf16.mxu1 %v12239_v51  ;;  %v9845_v40 = vpack.c.bf16 %v7565_v25, %v7564_v26  ;;  %v8148_v18 = vld [vmem:[#allocation19] ss:$0 sm:$0xff]  ;;  %v7831_v52 = vld [vmem:[%s10759_s8 + $0x8] sm:$0xff]  ;;  %v7832_v44 = vld [vmem:[%s10759_s8 + $0x10] sm:$0xff] }
 0x895   :  { %v7482_v49 = vld [vmem:[#allocation4 + $0x1a] sm:$0x3]  ;;  %v8304_v54 = vld [vmem:[#allocation26] ss:$0 sm:$0xff] }
 0x896   :  { %v7833_v61 = vld [vmem:[%s10759_s8 + $0x18] sm:$0xff] }
 0x897   :  { %9795 = vmatpush3.bf16.msra.mxu1 %v9794_v37  ;;  %v7567_v37 = vld [vmem:[#allocation20 + $0x1d8] sm:$0xff]  ;;  %v9866_v3 = vpack.c.bf16 %v7833_v61, %v7832_v44 }
 0x898   :  { %9796 = vmatprep.subr.bf16.mxu1 %v12239_v51  ;;  %v9848_v28 = vpack.c.bf16 %v7567_v37, %v7566_v58 }
 0x89a   :  { %9440 = vmatmul.mubr.msk.f32.vlgmr.msra.gmra.mrb[22].mxu1 %vm338_vm0, %v6842_v42  ;;  %v8300_v42 = vld [vmem:[%s12270_s26] ss:$0 sm:$0xff] }
 0x89b   :  { %9798 = vmatpush3.bf16.msra.mxu1 %v9797_v1  ;;  %9450 = vmatprep.mubr.msk.f32.mxu1 %vm10599_vm7, %v12240_v9  ;;  %v7562_v1 = vld [vmem:[#allocation4 + $0x1c] sm:$0x3] }
 0x89c   :  { %9799 = vmatprep.subr.bf16.mxu1 %v12239_v51 }
 0x89f   :  { %9801 = vmatpush3.bf16.msra.mxu1 %v9800_v39 }
 0x8a0   :  { %9802 = vmatprep.subr.bf16.mxu1 %v12239_v51 }
 0x8a2   :  { %9451 = vmatmul.mubr.msk.f32.vlgmr.msra.gmra.mrb[22].mxu1 %vm338_vm0, %v6922_v13 }
 0x8a3   :  { %9804 = vmatpush3.bf16.msra.mxu1 %v9803_v2  ;;  %9461 = vmatprep.mubr.msk.f32.mxu1 %vm10599_vm7, %v12240_v9  ;;  %v7660_v2 = vld [vmem:[#allocation22 + $0x8] sm:$0xff] }
 0x8a4   :  { %9805 = vmatprep.subr.bf16.mxu1 %v12239_v51  ;;  %v9857_v13 = vpack.c.bf16 %v7660_v2, %v7659_v36 }
 0x8a7   :  { %9807 = vmatpush3.bf16.msra.mxu1 %v9806_v7  ;;  %v4233_v7 = vmul.f32 %v11805_v41, %v8147_v4 }
 0x8a8   :  { %9808 = vmatprep.subr.bf16.mxu1 %v12239_v51 }
 0x8aa   :  { %9462 = vmatmul.mubr.msk.f32.vlgmr.msra.gmra.mrb[22].mxu1 %vm338_vm0, %v7002_v47  ;;  %v4241_v47 = vadd.f32 %v8148_v18, %v4233_v7 }
 0x8ab   :  { %9810 = vmatpush3.bf16.msra.mxu1 %v9809_v20  ;;  %9472 = vmatprep.mubr.msk.f32.mxu1 %vm10599_vm7, %v12240_v9  ;;  %v7662_v20 = vld [vmem:[#allocation22 + $0x18] sm:$0xff] }
 0x8ac   :  { %9811 = vmatprep.subr.bf16.mxu1 %v12239_v51  ;;  %v9860_v31 = vpack.c.bf16 %v7662_v20, %v7661_v12  ;;  %v4242_v41 = vmax.f32 %v4241_v47, 0.0 }
 0x8af   :  { %9813 = vmatpush3.bf16.msra.mxu1 %v9812_v60  ;;  %v7830_v60 = vld [vmem:[%s10759_s8] sm:$0xff]  ;;  %s10502_s8 = scalar_lea.vmem %s7932_s4, 32 }
 0x8b0   :  { %9814 = vmatprep.subr.bf16.mxu1 %v12239_v51  ;;  %p10503_p2 = scmp.ne.s32.totalorder %s7932_s4, %s10502_s8  ;;  %p10508_p4 = scmp.lt.s32.totalorder %s10502_s8, %s10502_s8 }
 0x8b2   :  { %9473 = vmatmul.mubr.msk.f32.vlgmr.msra.gmra.mrb[22].mxu1 %vm338_vm0, %v7082_v53  ;;  %v8303_v53 = vld [vmem:[#allocation25] ss:$0 sm:$0xff]  ;;  %p10509_p5 = por %p10508_p4, %p10507_p3 }
 0x8b3   :  { %9816 = vmatpush3.bf16.msra.mxu1 %v9815_v50  ;;  %9483 = vmatprep.mubr.msk.f32.mxu1 %vm10599_vm7, %v12240_v9  ;;  %v9863_v50 = vpack.c.bf16 %v7831_v52, %v7830_v60 }
 0x8b4   :  { %9817 = vmatprep.subr.bf16.mxu1 %v12239_v51  ;;  %p10510_p6 = pnand %p10509_p5, %p10503_p2 }
 0x8b7   :  { %9819 = vmatpush3.bf16.msra.mxu1 %v9818_v10 }
 0x8b8   :  { %9820 = vmatprep.subr.bf16.mxu1 %v12239_v51 }
 0x8ba   :  { %9484 = vmatmul.mubr.msk.f32.vlgmr.msra.gmra.mrb[22].mxu1 %vm338_vm0, %v7162_v23 }
 0x8bb   :  { %9822 = vmatpush3.bf16.msra.mxu1 %v9821_v8  ;;  %9494 = vmatprep.mubr.msk.f32.mxu1 %vm10599_vm7, %v12240_v9 }
 0x8bc   :  { %9823 = vmatprep.subr.bf16.mxu1 %v12239_v51 }
 0x8bf   :  { %9825 = vmatpush3.bf16.msra.mxu1 %v9824_v43  ;;  %v8307_v43 = vld [vmem:[#allocation29] ss:$0 sm:$0xff] }
 0x8c0   :  { %9826 = vmatprep.subr.bf16.mxu1 %v12239_v51 }
 0x8c2   :  { %9495 = vmatmul.mubr.msk.f32.vlgmr.msra.gmra.mrb[22].mxu1 %vm338_vm0, %v7242_v46 }
 0x8c3   :  { %9828 = vmatpush3.bf16.msra.mxu1 %v9827_v19  ;;  %9505 = vmatprep.mubr.msk.f32.mxu1 %vm10599_vm7, %v12240_v9 }
 0x8c4   :  { %9829 = vmatprep.subr.bf16.mxu1 %v12239_v51 }
 0x8c7   :  { %9831 = vmatpush3.bf16.msra.mxu1 %v9830_v16 }
 0x8c8   :  { %9832 = vmatprep.subr.bf16.mxu1 %v12239_v51 }
 0x8ca   :  { %9506 = vmatmul.mubr.msk.f32.vlgmr.msra.gmra.mrb[22].mxu1 %vm338_vm0, %v7322_v0 }
 0x8cb   :  { %9834 = vmatpush3.bf16.msra.mxu1 %v9833_v38  ;;  %9516 = vmatprep.mubr.msk.f32.mxu1 %vm10599_vm7, %v12240_v9 }
 0x8cc   :  { %9835 = vmatprep.subr.bf16.mxu1 %v12239_v51 }
 0x8cf   :  { %9837 = vmatpush3.bf16.msra.mxu1 %v9836_v5 }
 0x8d0   :  { %9838 = vmatprep.subr.bf16.mxu1 %v12239_v51 }
 0x8d2   :  { %9517 = vmatmul.mubr.msk.f32.vlgmr.msra.gmra.mrb[22].mxu1 %vm338_vm0, %v7402_v35 }
 0x8d3   :  { %9840 = vmatpush3.bf16.msra.mxu1 %v9839_v24  ;;  %9527 = vmatprep.mubr.msk.f32.mxu1 %vm10599_vm7, %v12240_v9 }
 0x8d4   :  { %9841 = vmatprep.subr.bf16.mxu1 %v12239_v51 }
 0x8d7   :  { %9843 = vmatpush3.bf16.msra.mxu1 %v9842_v21 }
 0x8d8   :  { %9844 = vmatprep.subr.bf16.mxu1 %v12239_v51 }
 0x8da   :  { %9528 = vmatmul.mubr.msk.f32.vlgmr.msra.gmra.mrb[22].mxu1 %vm338_vm0, %v7482_v49 }
 0x8db   :  { %9846 = vmatpush3.bf16.msra.mxu1 %v9845_v40  ;;  %9538 = vmatprep.mubr.msk.f32.mxu1 %vm10599_vm7, %v12240_v9 }
 0x8dc   :  { %9847 = vmatprep.subr.bf16.mxu1 %v12239_v51 }
 0x8df   :  { %9849 = vmatpush3.bf16.msra.mxu1 %v9848_v28 }
 0x8e2   :  { %9539 = vmatmul.mubr.msk.f32.vlgmr.msra.gmra.mrb[22].mxu1 %vm338_vm0, %v7562_v1 }
 0x9b5   :  { %v7637_v62 = vpop.f32.mrb[22].mxu1 }
 0x9b6   :  { %v7649_v39 = vmul.f32 %v8299_v63, %v7637_v62  ;;  %v9540_v29 = vpop.f32.mrb[23].mxu1 }
 0x9b8   :  { %v7657_v57 = vadd.f32 %v8300_v42, %v7649_v39 }
 0x9ba   :  { %v7658_v45 = vmax.f32 %v7657_v57, 0.0 }
 0x9bc   :  { %9550 = vmatmul.mubr.msk.f32.vlgmr.msra.gmra.mrb[54].mxu0 %vm338_vm0, %v7658_v45 }
 0x9bd   :  { %9858 = vmatpush3.bf16.msra.mxu0 %v9857_v13  ;;  %9560 = vmatprep.mubr.msk.f32.mxu0 %vm10599_vm7, %v12240_v9 }
 0x9be   :  { %9859 = vmatprep.subr.bf16.mxu0 %v12239_v51 }
 0x9c1   :  { %9861 = vmatpush3.bf16.msra.mxu0 %v9860_v31 }
 0x9c2   :  { %9862 = vmatprep.subr.bf16.mxu0 %v12239_v51 }
 0x9c4   :  { %9561 = vmatmul.mubr.msk.f32.vlgmr.msra.gmra.mrb[54].mxu0 %vm338_vm0, %v4242_v41 }
 0x9c5   :  { %9571 = vmatprep.mubr.msk.f32.mxu0 %vm10599_vm7, %v12240_v9  ;;  %9864 = vmatpush3.bf16.msra.mxu0 %v9863_v50  ;;  %v8306_v9 = vld [vmem:[#allocation28] ss:$0 sm:$0xff] }
 0x9c6   :  { %9865 = vmatprep.subr.bf16.mxu0 %v12239_v51 }
 0x9c9   :  { %9867 = vmatpush3.bf16.msra.mxu0 %v9866_v3 }
 0xa97   :  { %v7809_v10 = vpop.f32.mrb[54].mxu0 }
 0xa98   :  { %v7820_v55 = vmul.f32 %v8303_v53, %v7809_v10  ;;  %v9562_v8 = vpop.f32.mrb[55].mxu0 }
 0xa9a   :  { %v7828_v56 = vadd.f32 %v8304_v54, %v7820_v55 }
 0xa9c   :  { %v7829_v15 = vmax.f32 %v7828_v56, 0.0 }
 0xa9e   :  { %9572 = vmatmul.mubr.msk.f32.vlgmr.msra.gmra.mrb[56].mxu0 %vm338_vm0, %v7829_v15 }
 0xb71   :  { %v7903_v23 = vpop.f32.mrb[56].mxu0 }
 0xb72   :  { %v7914_v27 = vmul.f32 %v8306_v9, %v7903_v23  ;;  %v9573_v6 = vpop.f32.mrb[57].mxu0 }
 0xb74   :  { %v7922_v19 = vadd.f32 %v8307_v43, %v7914_v27 }
 0xb76   :  { %7924 = vst.msk [vmem:[#allocation31] sm:$0x3] %vm7923_vm3, %v7922_v19 }
 0xb77   :  { %10513 = shalt.err (!%p10510_p6)
}
 0xb78   :  { %s10514_s28 = scalar_lea.hbm %s10774_s5, 32 }
 0xb79   :  { %p10515_p7 = scmp.ne.s32.totalorder %s10774_s5, %s10514_s28  ;;  %p10518_p8 = scmp.lt.u32.totalorder %s10514_s28, %s10774_s5 }
 0xb7b   :  { %p10520_p9 = pnand %p10518_p8, %p10515_p7 }
 0xb7d   :  { %10523 = shalt.err (!%p10520_p9)
}
 0xb7e   :  { %7934 = dma.vmem_to_hbm [thread:$0]  %s7932_s4, 32, %s10774_s5, [#allocation7]  }
 0xb7f   :  { %10542 = dma.done.wait [#allocation7], 32  }
 0xb80   :  { %10543 = vsyncadd [#allocation7], 4294967264 }
 0xb81   :  { %7938 = vsyncpa [#allocation6], 1 }
 0xb82   :  { %7939 = vsyncpa [#allocation9], 1 }
 0xb83   :  { %7940 = vsyncpa [#allocation12], 1 }
 0xb84   :  { %7941 = vsyncpa [#allocation15], 1 }
 0xb85   :  { %7942 = vsyncpa [#allocation18], 1 }
 0xb86   :  { %7943 = vsyncpa [#allocation21], 1 }
 0xb87   :  { %7944 = vsyncpa [#allocation24], 1 }
 0xb88   :  { %7945 = vsyncpa [#allocation27], 1 }
 0xb89   :  { %7946 = vsyncpa [#allocation30], 1 }
 0xb8a   :  { %7947 = vsyncpa [#allocation7], 1 }

</bundles_post_ra>
